<compile_context>
chip_gen: v7x
topology: tpu7x:2x2x1
jax: 0.10.0
libtpu: 0.0.40
codegen_flags: <defaults>
</compile_context>

<pallas_src>
import numpy as np
import jax
import jax.numpy as jnp
from jax import lax
from jax.experimental import pallas as pl
from jax.experimental.pallas import tpu as pltpu

# ----- hyper-parameters (small shapes consistent with the module) -----------
IMG = 16          # img_dim
C1, K1 = 4, 3     # num_conv1, size_conv1
C2, K2 = 8, 3     # num_conv2, size_conv2
EMB = 8           # label_emb_dim
NCLS = 10         # n_classes
B = 2             # batch
CIN1 = 2          # image channel + label channel

H1 = IMG - K1 + 1          # 14  (conv1 output, square)
P1 = H1 // 2               # 7   (pool1 output)
H2 = P1 - K2 + 1           # 5   (conv2 output)
P2 = H2 // 2               # 2   (pool2 output)
FC_IN = P2 * P2 * C2       # 32  == conv2_out_w**2 * num_conv2

R1 = B * C1 * H1           # 112  stacked conv1 output rows
R2 = B * C2 * H2           # 80   stacked conv2 output rows
X1R = CIN1 * B * IMG       # 64   stacked conv1 input rows

SLOPE = 0.2
_HI = lax.Precision.HIGHEST

# MXU precision used inside the kernel; set once by _select_mxu_precision().
_MXU_PRECISION = lax.Precision.HIGHEST


def _dot(a, b):
    return jnp.dot(a, b, preferred_element_type=jnp.float32,
                   precision=_MXU_PRECISION)


def _lrelu(v):
    return jnp.where(v > 0, v, SLOPE * v)


# ----- fused kernel: whole batch, single grid step, 4 MXU dots total ---------
def _kernel(p_ref, wexp_ref, blab_ref, img_ref,
            a1b_ref, b1b_ref, csel_ref, a2b_ref, b2b_ref, wfc_ref, bfc_ref,
            out_ref):
    # --- label_fc: one dot directly yields the stacked [B*IMG, IMG] planes ---
    lab = _dot(p_ref[...], wexp_ref[...]) + blab_ref[...]                  # [32, 16]

    # --- conv1 input: image rows stacked over label rows -> [64, 16] ---
    x1 = jnp.concatenate([img_ref[...], lab], axis=0)

    # --- conv1 (+ row-shifted copy for pool1), ONE fused stacked dot ---
    xs1 = jnp.concatenate([x1[:, kw:kw + H1] for kw in range(K1)], axis=0)  # [192, 14]
    y1b = _lrelu(_dot(a1b_ref[...], xs1) + b1b_ref[...])                    # [224, 14]

    # --- pool1: row/col pair maxima on the VPU, even-column compaction = 1 dot,
    #     even-row compaction folded into a2b ---
    rmax1 = jnp.maximum(y1b[0:R1, :], y1b[R1:2 * R1, :])                    # [112, 14]
    cmax1 = jnp.maximum(rmax1[:, 0:H1 - 1], rmax1[:, 1:H1])                 # [112, 13]
    x2 = _dot(cmax1, csel_ref[...])                                         # [112, 7]

    # --- conv2 (+ row-shifted copy for pool2), ONE fused stacked dot ---
    xs2 = jnp.concatenate([x2[:, kw:kw + H2] for kw in range(K2)], axis=0)  # [336, 5]
    y2b = _lrelu(_dot(a2b_ref[...], xs2) + b2b_ref[...])                    # [160, 5]

    # --- pool2: maxima on the VPU; its compaction is folded into wfc ---
    rmax2 = jnp.maximum(y2b[0:R2, :], y2b[R2:2 * R2, :])                    # [80, 5]
    cmax2 = jnp.maximum(rmax2[:, 0:H2 - 1], rmax2[:, 1:H2])                 # [80, 4]

    # --- fc2: multiply + lane reduce + two per-sample block sums (no MXU) ---
    t = cmax2 * wfc_ref[...]                                                # [80, 4]
    rsum = jnp.sum(t, axis=1, keepdims=True)                                # [80, 1]
    s0 = jnp.sum(rsum[0:C2 * H2, :], axis=0, keepdims=True)                 # [1, 1]
    s1 = jnp.sum(rsum[C2 * H2:2 * C2 * H2, :], axis=0, keepdims=True)       # [1, 1]
    rid = lax.broadcasted_iota(jnp.int32, (B, 1), 0)
    out_ref[...] = jnp.where(rid == 0, s0, s1) + bfc_ref[...]               # [2, 1]


# ----- static weight re-layout helpers (run once, in plain XLA) --------------
def _shift_mats(k, n_out, n_in, stride):
    # m[kk, r, stride*(r+kk)] = 1  (conv row-shift / pool-row-compaction fold)
    m = np.zeros((k, n_out, n_in), np.float32)
    for kk in range(k):
        m[kk, np.arange(n_out), stride * (np.arange(n_out) + kk)] = 1.0
    return jnp.asarray(m)


def _shift_up_rows(m):
    # row i of the result = row i+1 of m (last row zero); exact, host-side XLA
    return jnp.concatenate([m[1:], jnp.zeros_like(m[:1])], axis=0)


def prepare_params(params):
    """One-time re-layout of the static weights into the kernel's packed
    layouts.  Call once and reuse across forward calls (review: do not rebuild
    the static re-layouts every forward)."""
    f32 = jnp.float32
    eye_b = jnp.eye(B, dtype=f32)

    # label_fc weight/bias in stacked-plane layout
    wexp = params["label_fc_w"].astype(f32).reshape(IMG, IMG, EMB) \
                               .transpose(2, 0, 1).reshape(EMB * IMG, IMG)   # [128, 16]
    blab = jnp.tile(params["label_fc_b"].astype(f32).reshape(IMG, IMG), (B, 1))

    # static block-diagonal mask used per call to expand the gathered embedding
    pmask = jnp.asarray(
        np.tile(np.tile(np.eye(IMG, dtype=np.float32), (1, EMB)), (B, 1)))   # [32, 128]

    # conv weights -> fused per-kw block-diagonal shifted matrices (exact 0/1
    # placement, HIGHEST); pool1's even-row compaction is folded into conv2 via
    # the stride-2 shift matrices.
    s1 = _shift_mats(K1, H1, IMG, 1)     # h == r + k
    s2 = _shift_mats(K2, H2, H1, 2)      # h == 2*(r + k)
    a1 = jnp.einsum('oikw,krh,bd->wboridh', params["conv1_w"].astype(f32), s1,
                    eye_b, precision=_HI).reshape(K1, R1, X1R)
    a1f = jnp.transpose(a1, (1, 0, 2)).reshape(R1, K1 * X1R)                 # [112, 192]
    a2 = jnp.einsum('oikw,krh,bd->wbordih', params["conv2_w"].astype(f32), s2,
                    eye_b, precision=_HI).reshape(K2, R2, R1)
    a2f = jnp.transpose(a2, (1, 0, 2)).reshape(R2, K2 * R1)                  # [80, 336]

    b1 = jnp.broadcast_to(params["conv1_b"].astype(f32)[None, :, None],
                          (B, C1, H1)).reshape(R1, 1)
    b2 = jnp.broadcast_to(params["conv2_b"].astype(f32)[None, :, None],
                          (B, C2, H2)).reshape(R2, 1)

    # stack [M ; shift_up_rows(M)] so each conv dot also emits the "next row"
    # copy needed for the pool row-pair max (no in-kernel sublane shifts).
    a1b = jnp.concatenate([a1f, _shift_up_rows(a1f)], axis=0)                # [224, 192]
    b1b = jnp.concatenate([b1, _shift_up_rows(b1)], axis=0)                  # [224, 1]
    a2b = jnp.concatenate([a2f, _shift_up_rows(a2f)], axis=0)                # [160, 336]
    b2b = jnp.concatenate([b2, _shift_up_rows(b2)], axis=0)                  # [160, 1]

    # pool1 even-column compaction selector
    cs = np.zeros((H1 - 1, P1), np.float32)
    cs[2 * np.arange(P1), np.arange(P1)] = 1.0
    csel1 = jnp.asarray(cs)                                                  # [13, 7]

    # fc2 weight scattered onto the un-compacted pool2 grid (rows/cols it never
    # reads are zero), tiled over batch; flatten order is (c2, ph, pw).
    wv = params["fc2_w"].astype(f32).reshape(C2, P2, P2)
    wfull = jnp.zeros((C2, H2, H2 - 1), f32).at[:, 0:2 * P2:2, 0:2 * P2:2].set(wv)
    wfc = jnp.tile(wfull.reshape(C2 * H2, H2 - 1), (B, 1))                   # [80, 4]
    bfc = jnp.broadcast_to(params["fc2_b"].astype(f32).reshape(1, 1), (B, 1))

    return dict(emb=params["emb"].astype(f32), pmask=pmask, wexp=wexp, blab=blab,
                a1b=a1b, b1b=b1b, csel1=csel1, a2b=a2b, b2b=b2b, wfc=wfc, bfc=bfc)


# ----- forward: per-call glue (embedding gather) + one fused pallas_call -----
@jax.jit
def cdc_discriminator_forward(packed, x, label):
    f32 = jnp.float32
    # label-dependent glue: embedding row gather + block-diagonal expansion so
    # one in-kernel dot yields the stacked [B*IMG, IMG] label planes.
    emb_sel = packed["emb"][label]                                           # [B, EMB]
    p_mat = (jnp.repeat(jnp.repeat(emb_sel.astype(f32), IMG, axis=0), IMG, axis=1)
             * packed["pmask"])                                              # [32, 128]
    img = x.astype(f32).reshape(B * IMG, IMG)                                # [32, 16]

    spec2 = lambda s: pl.BlockSpec(s, lambda i: (0, 0))
    out = pl.pallas_call(
        _kernel,
        out_shape=jax.ShapeDtypeStruct((B, 1), f32),
        grid=(1,),                                  # whole batch in one step
        in_specs=[
            spec2((B * IMG, EMB * IMG)),   # p_mat
            spec2((EMB * IMG, IMG)),       # wexp
            spec2((B * IMG, IMG)),         # blab
            spec2((B * IMG, IMG)),         # img
            spec2((2 * R1, K1 * X1R)),     # a1b
            spec2((2 * R1, 1)),            # b1b
            spec2((H1 - 1, P1)),           # csel1
            spec2((2 * R2, K2 * R1)),      # a2b
            spec2((2 * R2, 1)),            # b2b
            spec2((R2, H2 - 1)),           # wfc
            spec2((B, 1)),                 # bfc
        ],
        out_specs=spec2((B, 1)),
        compiler_params=pltpu.CompilerParams(dimension_semantics=("arbitrary",)),
    )(p_mat, packed["wexp"], packed["blab"], img,
      packed["a1b"], packed["b1b"], packed["csel1"],
      packed["a2b"], packed["b2b"], packed["wfc"], packed["bfc"])
    return out


# ----- one-time MXU precision selection (HIGH if supported & accurate) -------
def _probe_kernel_high(a_ref, b_ref, o_ref):
    o_ref[...] = jnp.dot(a_ref[...], b_ref[...],
                         preferred_element_type=jnp.float32,
                         precision=lax.Precision.HIGH)


def _select_mxu_precision():
    """Prefer HIGH (bf16_3x, half the MXU passes of HIGHEST).  Fall back to
    HIGHEST if the Mosaic lowering rejects HIGH or silently downgrades it."""
    global _MXU_PRECISION
    try:
        a = jax.random.normal(jax.random.PRNGKey(42), (8, 128), jnp.float32)
        b = jax.random.normal(jax.random.PRNGKey(43), (128, 128), jnp.float32)
        got = pl.pallas_call(
            _probe_kernel_high,
            out_shape=jax.ShapeDtypeStruct((8, 128), jnp.float32),
            grid=(1,),
            in_specs=[pl.BlockSpec((8, 128), lambda i: (0, 0)),
                      pl.BlockSpec((128, 128), lambda i: (0, 0))],
            out_specs=pl.BlockSpec((8, 128), lambda i: (0, 0)),
        )(a, b)
        got = jax.block_until_ready(got)
        ref = jnp.dot(a, b, precision=_HI)
        err = float(jnp.max(jnp.abs(got - ref)) / (jnp.max(jnp.abs(ref)) + 1e-30))
        _MXU_PRECISION = lax.Precision.HIGH if err < 3e-4 else _HI
    except Exception:
        _MXU_PRECISION = _HI


# ----- pure-JAX reference (for correctness check only) ------------------------
def reference_forward(params, x, label):
    lemb = params["emb"][label]
    lab = jnp.dot(lemb, params["label_fc_w"].T, precision=_HI) + params["label_fc_b"]
    lab = lab.reshape(B, 1, IMG, IMG)
    xin = jnp.concatenate([x, lab], axis=1)

    def conv(z, w, bias):
        y = lax.conv_general_dilated(z, w, (1, 1), "VALID",
                                     dimension_numbers=("NCHW", "OIHW", "NCHW"),
                                     precision=_HI)
        return y + bias[None, :, None, None]

    def pool(z):
        return lax.reduce_window(z, -jnp.inf, lax.max, (1, 1, 2, 2), (1, 1, 2, 2), "VALID")

    def lrelu(z):
        return jnp.where(z > 0, z, SLOPE * z)

    y = pool(lrelu(conv(xin, params["conv1_w"], params["conv1_b"])))
    y = pool(lrelu(conv(y, params["conv2_w"], params["conv2_b"])))
    y = y.reshape(B, FC_IN)
    return jnp.dot(y, params["fc2_w"].T, precision=_HI) + params["fc2_b"]


if __name__ == "__main__":
    _select_mxu_precision()

    key = jax.random.PRNGKey(0)
    ks = jax.random.split(key, 11)
    params = {
        "emb":        0.5 * jax.random.normal(ks[0], (NCLS, EMB), jnp.float32),
        "label_fc_w": 0.2 * jax.random.normal(ks[1], (IMG * IMG, EMB), jnp.float32),
        "label_fc_b": 0.1 * jax.random.normal(ks[2], (IMG * IMG,), jnp.float32),
        "conv1_w":    0.2 * jax.random.normal(ks[3], (C1, CIN1, K1, K1), jnp.float32),
        "conv1_b":    0.1 * jax.random.normal(ks[4], (C1,), jnp.float32),
        "conv2_w":    0.2 * jax.random.normal(ks[5], (C2, C1, K2, K2), jnp.float32),
        "conv2_b":    0.1 * jax.random.normal(ks[6], (C2,), jnp.float32),
        "fc2_w":      0.2 * jax.random.normal(ks[7], (1, FC_IN), jnp.float32),
        "fc2_b":      0.1 * jax.random.normal(ks[8], (1,), jnp.float32),
    }
    x = jax.random.normal(ks[9], (B, 1, IMG, IMG), jnp.float32)
    label = jax.random.randint(ks[10], (B,), 0, NCLS, jnp.int32)

    packed = prepare_params(params)            # static re-layouts, computed once
    out = cdc_discriminator_forward(packed, x, label)
    out = jax.block_until_ready(out)

    ref = reference_forward(params, x, label)
    np.testing.assert_allclose(np.asarray(out), np.asarray(ref), rtol=1e-3, atol=1e-3)
    print("KERNEL_OK")
</pallas_src>

<mosaic_0001>
module attributes {stable_mosaic.version = 11 : i64} {
  func.func @_kernel(%arg0: i32, %arg1: memref<32x128xf32, #tpu.memory_space<vmem>>, %arg2: memref<128x16xf32, #tpu.memory_space<vmem>>, %arg3: memref<32x16xf32, #tpu.memory_space<vmem>>, %arg4: memref<32x16xf32, #tpu.memory_space<vmem>>, %arg5: memref<224x192xf32, #tpu.memory_space<vmem>>, %arg6: memref<224x1xf32, #tpu.memory_space<vmem>>, %arg7: memref<13x7xf32, #tpu.memory_space<vmem>>, %arg8: memref<160x336xf32, #tpu.memory_space<vmem>>, %arg9: memref<160x1xf32, #tpu.memory_space<vmem>>, %arg10: memref<80x4xf32, #tpu.memory_space<vmem>>, %arg11: memref<2x1xf32, #tpu.memory_space<vmem>>, %arg12: memref<2x1xf32, #tpu.memory_space<vmem>>) attributes {dimension_semantics = [#tpu.dimension_semantics<arbitrary>], iteration_bounds = array<i64: 1>, scalar_prefetch = 0 : i64, scratch_operands = 0 : i64, tpu.core_type = #tpu.core_type<tc>, window_params = [{pipeline_mode = #tpu.pipeline_mode<synchronous>, transform_indices = @transform_0, window_bounds = array<i64: 32, 128>}, {pipeline_mode = #tpu.pipeline_mode<synchronous>, transform_indices = @transform_1, window_bounds = array<i64: 128, 16>}, {pipeline_mode = #tpu.pipeline_mode<synchronous>, transform_indices = @transform_2, window_bounds = array<i64: 32, 16>}, {pipeline_mode = #tpu.pipeline_mode<synchronous>, transform_indices = @transform_3, window_bounds = array<i64: 32, 16>}, {pipeline_mode = #tpu.pipeline_mode<synchronous>, transform_indices = @transform_4, window_bounds = array<i64: 224, 192>}, {pipeline_mode = #tpu.pipeline_mode<synchronous>, transform_indices = @transform_5, window_bounds = array<i64: 224, 1>}, {pipeline_mode = #tpu.pipeline_mode<synchronous>, transform_indices = @transform_6, window_bounds = array<i64: 13, 7>}, {pipeline_mode = #tpu.pipeline_mode<synchronous>, transform_indices = @transform_7, window_bounds = array<i64: 160, 336>}, {pipeline_mode = #tpu.pipeline_mode<synchronous>, transform_indices = @transform_8, window_bounds = array<i64: 160, 1>}, {pipeline_mode = #tpu.pipeline_mode<synchronous>, transform_indices = @transform_9, window_bounds = array<i64: 80, 4>}, {pipeline_mode = #tpu.pipeline_mode<synchronous>, transform_indices = @transform_10, window_bounds = array<i64: 2, 1>}, {pipeline_mode = #tpu.pipeline_mode<synchronous>, transform_indices = @transform_11, window_bounds = array<i64: 2, 1>}]} {
    %c0 = arith.constant 0 : index
    %c0_0 = arith.constant 0 : index
    %0 = vector.load %arg1[%c0, %c0_0] : memref<32x128xf32, #tpu.memory_space<vmem>>, vector<32x128xf32>
    %c0_1 = arith.constant 0 : index
    %c0_2 = arith.constant 0 : index
    %1 = vector.load %arg2[%c0_1, %c0_2] : memref<128x16xf32, #tpu.memory_space<vmem>>, vector<128x16xf32>
    %cst = arith.constant dense<0.000000e+00> : vector<32x16xf32>
    %2 = tpu.matmul %0, %1, %cst {dimension_numbers = #tpu.dot_dimension_numbers<[1], [0], [0], [1], [0, 0, 1, 1], [], []>, precision = #tpu.contract_precision<fp32>} : vector<32x128xf32>, vector<128x16xf32>, vector<32x16xf32> -> vector<32x16xf32>
    %c0_3 = arith.constant 0 : index
    %c0_4 = arith.constant 0 : index
    %3 = vector.load %arg3[%c0_3, %c0_4] : memref<32x16xf32, #tpu.memory_space<vmem>>, vector<32x16xf32>
    %4 = arith.addf %2, %3 : vector<32x16xf32>
    %c0_5 = arith.constant 0 : index
    %c0_6 = arith.constant 0 : index
    %5 = vector.load %arg4[%c0_5, %c0_6] : memref<32x16xf32, #tpu.memory_space<vmem>>, vector<32x16xf32>
    %6 = tpu.concatenate %5, %4 in 0 : vector<32x16xf32>, vector<32x16xf32> -> vector<64x16xf32>
    %7 = vector.extract_strided_slice %6 {offsets = [0, 0], sizes = [64, 14], strides = [1, 1]} : vector<64x16xf32> to vector<64x14xf32>
    %8 = vector.extract_strided_slice %6 {offsets = [0, 1], sizes = [64, 14], strides = [1, 1]} : vector<64x16xf32> to vector<64x14xf32>
    %9 = vector.extract_strided_slice %6 {offsets = [0, 2], sizes = [64, 14], strides = [1, 1]} : vector<64x16xf32> to vector<64x14xf32>
    %10 = tpu.concatenate %7, %8, %9 in 0 : vector<64x14xf32>, vector<64x14xf32>, vector<64x14xf32> -> vector<192x14xf32>
    %c0_7 = arith.constant 0 : index
    %c0_8 = arith.constant 0 : index
    %11 = vector.load %arg5[%c0_7, %c0_8] : memref<224x192xf32, #tpu.memory_space<vmem>>, vector<224x192xf32>
    %cst_9 = arith.constant dense<0.000000e+00> : vector<224x14xf32>
    %12 = tpu.matmul %11, %10, %cst_9 {dimension_numbers = #tpu.dot_dimension_numbers<[1], [0], [0], [1], [0, 0, 1, 1], [], []>, precision = #tpu.contract_precision<fp32>} : vector<224x192xf32>, vector<192x14xf32>, vector<224x14xf32> -> vector<224x14xf32>
    %c0_10 = arith.constant 0 : index
    %c0_11 = arith.constant 0 : index
    %13 = vector.load %arg6[%c0_10, %c0_11] : memref<224x1xf32, #tpu.memory_space<vmem>>, vector<224x1xf32>
    %14 = vector.broadcast %13 : vector<224x1xf32> to vector<224x14xf32>
    %15 = arith.addf %12, %14 : vector<224x14xf32>
    %cst_12 = arith.constant 0.000000e+00 : f32
    %16 = vector.broadcast %cst_12 : f32 to vector<224x14xf32>
    %17 = arith.cmpf ogt, %15, %16 : vector<224x14xf32>
    %cst_13 = arith.constant 2.000000e-01 : f32
    %18 = vector.broadcast %cst_13 : f32 to vector<224x14xf32>
    %19 = arith.mulf %18, %15 : vector<224x14xf32>
    %20 = arith.select %17, %15, %19 : vector<224x14xi1>, vector<224x14xf32>
    %21 = vector.extract_strided_slice %20 {offsets = [0, 0], sizes = [112, 14], strides = [1, 1]} : vector<224x14xf32> to vector<112x14xf32>
    %22 = vector.extract_strided_slice %20 {offsets = [112, 0], sizes = [112, 14], strides = [1, 1]} : vector<224x14xf32> to vector<112x14xf32>
    %23 = arith.maximumf %21, %22 : vector<112x14xf32>
    %24 = vector.extract_strided_slice %23 {offsets = [0, 0], sizes = [112, 13], strides = [1, 1]} : vector<112x14xf32> to vector<112x13xf32>
    %25 = vector.extract_strided_slice %23 {offsets = [0, 1], sizes = [112, 13], strides = [1, 1]} : vector<112x14xf32> to vector<112x13xf32>
    %26 = arith.maximumf %24, %25 : vector<112x13xf32>
    %c0_14 = arith.constant 0 : index
    %c0_15 = arith.constant 0 : index
    %27 = vector.load %arg7[%c0_14, %c0_15] : memref<13x7xf32, #tpu.memory_space<vmem>>, vector<13x7xf32>
    %cst_16 = arith.constant dense<0.000000e+00> : vector<112x7xf32>
    %28 = tpu.matmul %26, %27, %cst_16 {dimension_numbers = #tpu.dot_dimension_numbers<[1], [0], [0], [1], [0, 0, 1, 1], [], []>, precision = #tpu.contract_precision<fp32>} : vector<112x13xf32>, vector<13x7xf32>, vector<112x7xf32> -> vector<112x7xf32>
    %29 = vector.extract_strided_slice %28 {offsets = [0, 0], sizes = [112, 5], strides = [1, 1]} : vector<112x7xf32> to vector<112x5xf32>
    %30 = vector.extract_strided_slice %28 {offsets = [0, 1], sizes = [112, 5], strides = [1, 1]} : vector<112x7xf32> to vector<112x5xf32>
    %31 = vector.extract_strided_slice %28 {offsets = [0, 2], sizes = [112, 5], strides = [1, 1]} : vector<112x7xf32> to vector<112x5xf32>
    %32 = tpu.concatenate %29, %30, %31 in 0 : vector<112x5xf32>, vector<112x5xf32>, vector<112x5xf32> -> vector<336x5xf32>
    %c0_17 = arith.constant 0 : index
    %c0_18 = arith.constant 0 : index
    %33 = vector.load %arg8[%c0_17, %c0_18] : memref<160x336xf32, #tpu.memory_space<vmem>>, vector<160x336xf32>
    %cst_19 = arith.constant dense<0.000000e+00> : vector<160x5xf32>
    %34 = tpu.matmul %33, %32, %cst_19 {dimension_numbers = #tpu.dot_dimension_numbers<[1], [0], [0], [1], [0, 0, 1, 1], [], []>, precision = #tpu.contract_precision<fp32>} : vector<160x336xf32>, vector<336x5xf32>, vector<160x5xf32> -> vector<160x5xf32>
    %c0_20 = arith.constant 0 : index
    %c0_21 = arith.constant 0 : index
    %35 = vector.load %arg9[%c0_20, %c0_21] : memref<160x1xf32, #tpu.memory_space<vmem>>, vector<160x1xf32>
    %36 = vector.broadcast %35 : vector<160x1xf32> to vector<160x5xf32>
    %37 = arith.addf %34, %36 : vector<160x5xf32>
    %cst_22 = arith.constant 0.000000e+00 : f32
    %38 = vector.broadcast %cst_22 : f32 to vector<160x5xf32>
    %39 = arith.cmpf ogt, %37, %38 : vector<160x5xf32>
    %cst_23 = arith.constant 2.000000e-01 : f32
    %40 = vector.broadcast %cst_23 : f32 to vector<160x5xf32>
    %41 = arith.mulf %40, %37 : vector<160x5xf32>
    %42 = arith.select %39, %37, %41 : vector<160x5xi1>, vector<160x5xf32>
    %43 = vector.extract_strided_slice %42 {offsets = [0, 0], sizes = [80, 5], strides = [1, 1]} : vector<160x5xf32> to vector<80x5xf32>
    %44 = vector.extract_strided_slice %42 {offsets = [80, 0], sizes = [80, 5], strides = [1, 1]} : vector<160x5xf32> to vector<80x5xf32>
    %45 = arith.maximumf %43, %44 : vector<80x5xf32>
    %46 = vector.extract_strided_slice %45 {offsets = [0, 0], sizes = [80, 4], strides = [1, 1]} : vector<80x5xf32> to vector<80x4xf32>
    %47 = vector.extract_strided_slice %45 {offsets = [0, 1], sizes = [80, 4], strides = [1, 1]} : vector<80x5xf32> to vector<80x4xf32>
    %48 = arith.maximumf %46, %47 : vector<80x4xf32>
    %c0_24 = arith.constant 0 : index
    %c0_25 = arith.constant 0 : index
    %49 = vector.load %arg10[%c0_24, %c0_25] : memref<80x4xf32, #tpu.memory_space<vmem>>, vector<80x4xf32>
    %50 = arith.mulf %48, %49 : vector<80x4xf32>
    %cst_26 = arith.constant dense<0.000000e+00> : vector<80xf32>
    %51 = vector.multi_reduction <add>, %50, %cst_26 [1] : vector<80x4xf32> to vector<80xf32>
    %52 = vector.shape_cast %51 : vector<80xf32> to vector<80x1xf32>
    %53 = vector.extract_strided_slice %52 {offsets = [0, 0], sizes = [40, 1], strides = [1, 1]} : vector<80x1xf32> to vector<40x1xf32>
    %cst_27 = arith.constant dense<0.000000e+00> : vector<1xf32>
    %54 = vector.multi_reduction <add>, %53, %cst_27 [0] : vector<40x1xf32> to vector<1xf32>
    %55 = vector.shape_cast %54 : vector<1xf32> to vector<1x1xf32>
    %56 = vector.extract_strided_slice %52 {offsets = [40, 0], sizes = [40, 1], strides = [1, 1]} : vector<80x1xf32> to vector<40x1xf32>
    %cst_28 = arith.constant dense<0.000000e+00> : vector<1xf32>
    %57 = vector.multi_reduction <add>, %56, %cst_28 [0] : vector<40x1xf32> to vector<1xf32>
    %58 = vector.shape_cast %57 : vector<1xf32> to vector<1x1xf32>
    %59 = tpu.iota {dimensions = array<i32: 0>} : vector<2x1xi32>
    %c0_i32 = arith.constant 0 : i32
    %60 = vector.broadcast %c0_i32 : i32 to vector<2x1xi32>
    %61 = arith.cmpi eq, %59, %60 : vector<2x1xi32>
    %62 = vector.shape_cast %55 : vector<1x1xf32> to vector<1x1xf32>
    %63 = vector.broadcast %62 : vector<1x1xf32> to vector<2x1xf32>
    %64 = vector.shape_cast %58 : vector<1x1xf32> to vector<1x1xf32>
    %65 = vector.broadcast %64 : vector<1x1xf32> to vector<2x1xf32>
    %66 = arith.select %61, %63, %65 : vector<2x1xi1>, vector<2x1xf32>
    %c0_29 = arith.constant 0 : index
    %c0_30 = arith.constant 0 : index
    %67 = vector.load %arg11[%c0_29, %c0_30] : memref<2x1xf32, #tpu.memory_space<vmem>>, vector<2x1xf32>
    %68 = arith.addf %66, %67 : vector<2x1xf32>
    %c0_31 = arith.constant 0 : index
    %c0_32 = arith.constant 0 : index
    %69 = vector.load %arg12[%c0_31, %c0_32] : memref<2x1xf32, #tpu.memory_space<vmem>>, vector<2x1xf32>
    tpu.vector_store %arg12[%c0_31, %c0_32], %68 {strides = array<i32>} : memref<2x1xf32, #tpu.memory_space<vmem>>, vector<2x1xf32>,
    return
  }
  func.func @transform_0(%arg0: i32) -> (i32, i32) {
    %c0_i32 = arith.constant 0 : i32
    %c0_i32_0 = arith.constant 0 : i32
    %c0_i32_1 = arith.constant 0 : i32
    return %c0_i32, %c0_i32_0 : i32, i32
  }
  func.func @transform_1(%arg0: i32) -> (i32, i32) {
    %c0_i32 = arith.constant 0 : i32
    %c0_i32_0 = arith.constant 0 : i32
    %c0_i32_1 = arith.constant 0 : i32
    return %c0_i32, %c0_i32_0 : i32, i32
  }
  func.func @transform_2(%arg0: i32) -> (i32, i32) {
    %c0_i32 = arith.constant 0 : i32
    %c0_i32_0 = arith.constant 0 : i32
    %c0_i32_1 = arith.constant 0 : i32
    return %c0_i32, %c0_i32_0 : i32, i32
  }
  func.func @transform_3(%arg0: i32) -> (i32, i32) {
    %c0_i32 = arith.constant 0 : i32
    %c0_i32_0 = arith.constant 0 : i32
    %c0_i32_1 = arith.constant 0 : i32
    return %c0_i32, %c0_i32_0 : i32, i32
  }
  func.func @transform_4(%arg0: i32) -> (i32, i32) {
    %c0_i32 = arith.constant 0 : i32
    %c0_i32_0 = arith.constant 0 : i32
    %c0_i32_1 = arith.constant 0 : i32
    return %c0_i32, %c0_i32_0 : i32, i32
  }
  func.func @transform_5(%arg0: i32) -> (i32, i32) {
    %c0_i32 = arith.constant 0 : i32
    %c0_i32_0 = arith.constant 0 : i32
    %c0_i32_1 = arith.constant 0 : i32
    return %c0_i32, %c0_i32_0 : i32, i32
  }
  func.func @transform_6(%arg0: i32) -> (i32, i32) {
    %c0_i32 = arith.constant 0 : i32
    %c0_i32_0 = arith.constant 0 : i32
    %c0_i32_1 = arith.constant 0 : i32
    return %c0_i32, %c0_i32_0 : i32, i32
  }
  func.func @transform_7(%arg0: i32) -> (i32, i32) {
    %c0_i32 = arith.constant 0 : i32
    %c0_i32_0 = arith.constant 0 : i32
    %c0_i32_1 = arith.constant 0 : i32
    return %c0_i32, %c0_i32_0 : i32, i32
  }
  func.func @transform_8(%arg0: i32) -> (i32, i32) {
    %c0_i32 = arith.constant 0 : i32
    %c0_i32_0 = arith.constant 0 : i32
    %c0_i32_1 = arith.constant 0 : i32
    return %c0_i32, %c0_i32_0 : i32, i32
  }
  func.func @transform_9(%arg0: i32) -> (i32, i32) {
    %c0_i32 = arith.constant 0 : i32
    %c0_i32_0 = arith.constant 0 : i32
    %c0_i32_1 = arith.constant 0 : i32
    return %c0_i32, %c0_i32_0 : i32, i32
  }
  func.func @transform_10(%arg0: i32) -> (i32, i32) {
    %c0_i32 = arith.constant 0 : i32
    %c0_i32_0 = arith.constant 0 : i32
    %c0_i32_1 = arith.constant 0 : i32
    return %c0_i32, %c0_i32_0 : i32, i32
  }
  func.func @transform_11(%arg0: i32) -> (i32, i32) {
    %c0_i32 = arith.constant 0 : i32
    %c0_i32_0 = arith.constant 0 : i32
    %c0_i32_1 = arith.constant 0 : i32
    return %c0_i32, %c0_i32_0 : i32, i32
  }
}

</mosaic_0001>

<bundles_post_ra>
// kernel: mul.1
= control target key start
LH: loop header
LB: loop body
LE: loop exit
PB: predicated region body
PF: predicated region fallthrough
CT: control target
= control target key end

     0   :  { %s100_s0 = inlined_call_operand.vmem [shape: f32[32,128], index: 0, kind: input, shape index: {}]   ;;  %s101_s1 = inlined_call_operand.vmem [shape: f32[32,128], index: 1, kind: input, shape index: {}]   ;;  %s102_s2 = inlined_call_operand.vmem [shape: f32[32,128], index: 2, kind: output, shape index: {}]  }
   0x1   :  { %v3_v0 = vld [vmem:[%s100_s0] sm:$0xff]  ;;  %v40_v2 = vld [vmem:[%s100_s0 + $0x8] sm:$0xff]  ;;  %v43_v5 = vld [vmem:[%s100_s0 + $0x10] sm:$0xff] }
   0x2   :  { %v4_v1 = vld [vmem:[%s101_s1] sm:$0xff]  ;;  %v41_v4 = vld [vmem:[%s101_s1 + $0x8] sm:$0xff]  ;;  %v44_v6 = vld [vmem:[%s101_s1 + $0x10] sm:$0xff] }
   0x3   :  { %v7_v3 = vmul.f32 %v4_v1, %v3_v0  ;;  %v16_v7 = vmul.f32 %v41_v4, %v40_v2  ;;  %v26_v8 = vmul.f32 %v44_v6, %v43_v5  ;;  %v46_v9 = vld [vmem:[%s100_s0 + $0x18] sm:$0xff] }
   0x4   :  { %v47_v10 = vld [vmem:[%s101_s1 + $0x18] sm:$0xff] }
   0x5   :  { %9 = vst [vmem:[%s102_s2] sm:$0xff] %v7_v3  ;;  %v36_v11 = vmul.f32 %v47_v10, %v46_v9  ;;  %42 = vst [vmem:[%s102_s2 + $0x8] sm:$0xff] %v16_v7 }
   0x6   :  { %45 = vst [vmem:[%s102_s2 + $0x10] sm:$0xff] %v26_v8 }
   0x7   :  { %48 = vst [vmem:[%s102_s2 + $0x18] sm:$0xff] %v36_v11 }

// kernel: cdc_discriminator_forward.1
= control target key start
LH: loop header
LB: loop body
LE: loop exit
PB: predicated region body
PF: predicated region fallthrough
CT: control target
= control target key end

     0   :  { %s11096_s21 = smov 127   ;;  %vm1116_vm0 = vcmask 523264   ;;  %vm3684_vm7 = vcmask 1044480   ;;  %s16163_s1 = inlined_call_operand.vmem [shape: f32[128,16], index: 1, kind: input, shape index: {}]   ;;  %s16164_s0 = inlined_call_operand.vmem [shape: f32[32,128], index: 0, kind: input, shape index: {}]   ;;  %s16165_s3 = inlined_call_operand.vmem [shape: f32[32,16], index: 3, kind: input, shape index: {}]   ;;  %s16166_s2 = inlined_call_operand.vmem [shape: f32[32,16], index: 2, kind: input, shape index: {}]   ;;  %s16167_s4 = inlined_call_operand.vmem [shape: f32[224,192], index: 4, kind: input, shape index: {}]   ;;  %s16168_s5 = inlined_call_operand.vmem [shape: f32[224,1], index: 5, kind: input, shape index: {}]   ;;  %s16169_s6 = inlined_call_operand.vmem [shape: f32[13,7], index: 6, kind: input, shape index: {}]   ;;  %s16170_s7 = inlined_call_operand.vmem [shape: f32[160,336], index: 7, kind: input, shape index: {}]   ;;  %s16171_s8 = inlined_call_operand.vmem [shape: f32[160,1], index: 8, kind: input, shape index: {}]   ;;  %s16172_s9 = inlined_call_operand.vmem [shape: f32[80,4], index: 9, kind: input, shape index: {}]   ;;  %s16173_s10 = inlined_call_operand.vmem [shape: f32[2,1], index: 10, kind: input, shape index: {}]   ;;  %s16174_s11 = inlined_call_operand.vmem [shape: f32[2,1], index: 11, kind: output, shape index: {}]  }
   0x1   :  { %v42_v0 = vld [vmem:[%s16163_s1] sm:$0xff]  ;;  %v43_v1 = vld [vmem:[%s16163_s1 + $0x8] sm:$0xff]  ;;  %v44_v2 = vld [vmem:[%s16163_s1 + $0x10] sm:$0xff] }
   0x2   :  { %v63_v3 = vand.u32 4294901760, %v42_v0  ;;  %v66_v4 = vand.u32 4294901760, %v43_v1  ;;  %v45_v5 = vld [vmem:[%s16163_s1 + $0x18] sm:$0xff]  ;;  %v69_v6 = vand.u32 4294901760, %v44_v2  ;;  %v46_v7 = vld [vmem:[%s16163_s1 + $0x20] sm:$0xff]  ;;  %v47_v8 = vld [vmem:[%s16163_s1 + $0x28] sm:$0xff] }
   0x3   :  { %v72_v9 = vand.u32 4294901760, %v45_v5  ;;  %v75_v11 = vand.u32 4294901760, %v46_v7  ;;  %v78_v12 = vand.u32 4294901760, %v47_v8  ;;  %v11185_v14 = vld [vmem:[%s16163_s1 + $0x30] sm:$0xff]  ;;  %v11190_v15 = vld [vmem:[%s16163_s1 + $0x38] sm:$0xff]  ;;  %v38_v16 = vld [vmem:[%s16164_s0] sm:$0xff] }
   0x4   :  { %v11178_v10 = vpack.c.bf16 %v66_v4, %v63_v3  ;;  %v11197_v17 = vand.u32 4294901760, %v38_v16  ;;  %v81_v19 = vand.u32 4294901760, %v11185_v14  ;;  %v84_v20 = vand.u32 4294901760, %v11190_v15  ;;  %v11207_v21 = vld [vmem:[%s16163_s1 + $0x40] sm:$0xff]  ;;  %v11212_v22 = vld [vmem:[%s16163_s1 + $0x48] sm:$0xff]  ;;  %v52_v31 = vld [vmem:[%s16163_s1 + $0x50] sm:$0xff] }
   0x5   :  { %v11180_v13 = vpack.c.bf16 %v72_v9, %v69_v6  ;;  %v11200_v18 = vpack.c.bf16 %v78_v12, %v75_v11  ;;  %v39_v24 = vld [vmem:[%s16164_s0 + $0x8] sm:$0xff]  ;;  %v11222_v26 = vsub.f32 %v42_v0, %v63_v3  ;;  %v11224_v27 = vsub.f32 %v43_v1, %v66_v4  ;;  %v53_v32 = vld [vmem:[%s16163_s1 + $0x58] sm:$0xff]  ;;  %v54_v37 = vld [vmem:[%s16163_s1 + $0x60] sm:$0xff] }
   0x6   :  { %9629 = vmatprep.subr.bf16.mxu0 %v11178_v10  ;;  %v11215_v23 = vsub.f32 %v38_v16, %v11197_v17  ;;  %v11231_v28 = vpack.c.bf16 %v84_v20, %v81_v19  ;;  %v87_v29 = vand.u32 4294901760, %v11207_v21  ;;  %v90_v30 = vand.u32 4294901760, %v11212_v22  ;;  %v55_v43 = vld [vmem:[%s16163_s1 + $0x68] sm:$0xff]  ;;  %v56_v44 = vld [vmem:[%s16163_s1 + $0x70] sm:$0xff]  ;;  %v57_v47 = vld [vmem:[%s16163_s1 + $0x78] sm:$0xff] }
   0x7   :  { %9631 = vmatpush3.bf16.msra.mxu0 %v11178_v10  ;;  %v11244_v34 = vand.u32 4294901760, %v39_v24  ;;  %v11246_v35 = vsub.f32 %v44_v2, %v69_v6  ;;  %v93_v36 = vand.u32 4294901760, %v52_v31  ;;  %v186_v39 = vand.u32 4294901760, %v11222_v26  ;;  %v40_v63 = vld [vmem:[%s16164_s0 + $0x10] sm:$0xff] }
   0x8   :  { %9633 = vmatprep.subr.bf16.mxu0 %v11180_v13  ;;  %v16177_v25 = vand.u32 4294901760, %v11215_v23  ;;  %v193_v40 = vand.u32 4294901760, %v11224_v27  ;;  %v11255_v41 = vpack.c.bf16 %v90_v30, %v87_v29  ;;  %v96_v42 = vand.u32 4294901760, %v53_v32 }
   0x9   :  { %v11263_v45 = vsub.f32 %v45_v5, %v72_v9  ;;  %v11265_v46 = vsub.f32 %v46_v7, %v75_v11  ;;  %v11271_v48 = vsub.f32 %v39_v24, %v11244_v34  ;;  %v200_v49 = vand.u32 4294901760, %v11246_v35  ;;  %v41_v7 = vld [vmem:[%s16164_s0 + $0x18] sm:$0xff] }
   0xa   :  { %v146_v33 = vsub.f32 %v11215_v23, %v16177_v25  ;;  %v11274_v50 = vsub.f32 %v47_v8, %v78_v12  ;;  %v99_v51 = vand.u32 4294901760, %v54_v37  ;;  %v102_v52 = vand.u32 4294901760, %v55_v43 }
   0xb   :  { %9635 = vmatpush3.bf16.msra.mxu0 %v11180_v13  ;;  %v105_v53 = vand.u32 4294901760, %v56_v44  ;;  %v187_v54 = vsub.f32 %v11222_v26, %v186_v39  ;;  %v194_v55 = vsub.f32 %v11224_v27, %v193_v40  ;;  %v11284_v56 = vpack.c.bf16 %v96_v42, %v93_v36 }
   0xc   :  { %9637 = vmatprep.subr.bf16.mxu0 %v11200_v18  ;;  %v147_v38 = vand.u32 4294901760, %v146_v33  ;;  %v108_v57 = vand.u32 4294901760, %v57_v47  ;;  %v207_v58 = vand.u32 4294901760, %v11263_v45  ;;  %v214_v59 = vand.u32 4294901760, %v11265_v46 }
   0xd   :  { %v16176_v60 = vand.u32 4294901760, %v11271_v48  ;;  %v11292_v61 = vsub.f32 %v11246_v35, %v200_v49  ;;  %v221_v62 = vand.u32 4294901760, %v11274_v50  ;;  %v11299_v0 = vpack.c.bf16 %v102_v52, %v99_v51 }
   0xe   :  { %8982 = vmatprep.mubr.f32.mxu0 %v147_v38  ;;  %v188_v1 = vand.u32 4294901760, %v187_v54  ;;  %v195_v2 = vand.u32 4294901760, %v194_v55  ;;  %v11302_v3 = vpack.c.bf16 %v108_v57, %v105_v53  ;;  %v208_v4 = vsub.f32 %v11263_v45, %v207_v58 }
   0xf   :  { %9639 = vmatpush3.bf16.msra.mxu0 %v11200_v18  ;;  %v215_v5 = vsub.f32 %v11265_v46, %v214_v59  ;;  %v11306_v6 = vand.u32 4294901760, %v40_v63  ;;  %v156_v8 = vsub.f32 %v11271_v48, %v16176_v60  ;;  %v202_v9 = vand.u32 4294901760, %v11292_v61 }
  0x10   :  { %9641 = vmatprep.subr.bf16.mxu0 %v11231_v28  ;;  %v222_v11 = vsub.f32 %v11274_v50, %v221_v62  ;;  %v11319_v12 = vsub.f32 %v11185_v14, %v81_v19  ;;  %v11324_v16 = vsub.f32 %v11190_v15, %v84_v20  ;;  %v11327_v24 = vsub.f32 %v11207_v21, %v87_v29 }
  0x11   :  { %v11330_v33 = vsub.f32 %v11212_v22, %v90_v30  ;;  %v11333_v38 = vsub.f32 %v40_v63, %v11306_v6  ;;  %v9660_v54 = vpack.c.bf16 %v195_v2, %v188_v1  ;;  %v11336_v55 = vsub.f32 %v52_v31, %v93_v36 }
  0x12   :  { %v11338_v14 = vsub.f32 %v53_v32, %v96_v42  ;;  %v11340_v19 = vand.u32 4294901760, %v41_v7  ;;  %v11343_v15 = vsub.f32 %v54_v37, %v99_v51  ;;  %v11345_v20 = vsub.f32 %v55_v43, %v102_v52 }
  0x13   :  { %9643 = vmatpush3.bf16.msra.mxu0 %v11231_v28  ;;  %v16175_v21 = vand.u32 4294901760, %v11333_v38  ;;  %v11348_v22 = vsub.f32 %v56_v44, %v105_v53  ;;  %v157_v29 = vand.u32 4294901760, %v156_v8  ;;  %v209_v30 = vand.u32 4294901760, %v208_v4 }
  0x14   :  { %9645 = vmatprep.subr.bf16.mxu0 %v11255_v41  ;;  %v11350_v61 = vsub.f32 %v57_v47, %v108_v57  ;;  %v11353_v31 = vsub.f32 %v41_v7, %v11340_v19  ;;  %v228_v32 = vand.u32 4294901760, %v11319_v12  ;;  %v235_v36 = vand.u32 4294901760, %v11324_v16 }
  0x15   :  { %v242_v37 = vand.u32 4294901760, %v11327_v24  ;;  %v249_v42 = vand.u32 4294901760, %v11330_v33  ;;  %v256_v43 = vand.u32 4294901760, %v11336_v55  ;;  %v263_v44 = vand.u32 4294901760, %v11338_v14 }
  0x16   :  { %v166_v47 = vsub.f32 %v11333_v38, %v16175_v21  ;;  %v16179_v51 = vand.u32 4294901760, %v11353_v31  ;;  %v270_v52 = vand.u32 4294901760, %v11343_v15  ;;  %v277_v53 = vand.u32 4294901760, %v11345_v20 }
  0x17   :  { %9647 = vmatpush3.bf16.msra.mxu0 %v11255_v41  ;;  %v284_v57 = vand.u32 4294901760, %v11348_v22  ;;  %v11374_v63 = vpack.c.bf16 %v193_v40, %v186_v39  ;;  %v291_v1 = vand.u32 4294901760, %v11350_v61  ;;  %v11379_v2 = vpack.c.bf16 %v207_v58, %v200_v49 }
  0x18   :  { %9649 = vmatprep.subr.bf16.mxu0 %v11284_v56  ;;  %v11381_v4 = vpack.c.bf16 %v221_v62, %v214_v59  ;;  %v11383_v7 = vpack.c.bf16 %v235_v36, %v228_v32  ;;  %v176_v8 = vsub.f32 %v11353_v31, %v16179_v51  ;;  %v11388_v21 = vpack.c.bf16 %v249_v42, %v242_v37 }
  0x19   :  { %v11390_v60 = vpack.c.bf16 %v263_v44, %v256_v43  ;;  %v11392_v39 = vpack.c.bf16 %v277_v53, %v270_v52  ;;  %v216_v40 = vand.u32 4294901760, %v215_v5  ;;  %v223_v25 = vand.u32 4294901760, %v222_v11 }
  0x1a   :  { %16811 = vst [vmem:[#allocation2_spill] sm:$0xff] %v11383_v7  ;;  %16812 = vst [vmem:[#allocation3_spill] sm:$0xff] %v11388_v21  ;;  %v167_v49 = vand.u32 4294901760, %v166_v47  ;;  %v11395_v58 = vpack.c.bf16 %v291_v1, %v284_v57  ;;  %v9664_v59 = vpack.c.bf16 %v209_v30, %v202_v9  ;;  %v229_v62 = vsub.f32 %v11319_v12, %v228_v32 }
  0x1b   :  { %9651 = vmatpush3.bf16.msra.mxu0 %v11284_v56  ;;  %16813 = vst [vmem:[#allocation4_spill] sm:$0xff] %v11390_v60  ;;  %16814 = vst [vmem:[#allocation5_spill] sm:$0xff] %v11392_v39  ;;  %v236_v7 = vsub.f32 %v11324_v16, %v235_v36  ;;  %v177_v51 = vand.u32 4294901760, %v176_v8  ;;  %v9668_v21 = vpack.c.bf16 %v223_v25, %v216_v40 }
  0x1c   :  { %9653 = vmatprep.subr.bf16.mxu0 %v11299_v0  ;;  %v230_v39 = vand.u32 4294901760, %v229_v62  ;;  %v243_v5 = vsub.f32 %v11327_v24, %v242_v37  ;;  %v250_v11 = vsub.f32 %v11330_v33, %v249_v42  ;;  %v257_v9 = vsub.f32 %v11336_v55, %v256_v43 }
  0x1d   :  { %v237_v60 = vand.u32 4294901760, %v236_v7  ;;  %v264_v25 = vsub.f32 %v11338_v14, %v263_v44  ;;  %v278_v42 = vsub.f32 %v11345_v20, %v277_v53  ;;  %v292_v8 = vsub.f32 %v11350_v61, %v291_v1 }
  0x1e   :  { %v251_v32 = vand.u32 4294901760, %v250_v11  ;;  %v258_v37 = vand.u32 4294901760, %v257_v9  ;;  %v9692_v53 = vpack.c.bf16 %v11224_v27, %v11222_v26  ;;  %v9700_v1 = vpack.c.bf16 %v11274_v50, %v11265_v46  ;;  %v11421_v26 = vld [vmem:[%s16165_s3] sm:$0xff]  ;;  %v11426_v27 = vld [vmem:[%s16165_s3 + $0x10] sm:$0xff]  ;;  %v11443_v50 = vld [vmem:[%s16165_s3 + $0x18] sm:$0xff] }
  0x1f   :  { %9655 = vmatpush3.bf16.msra.mxu0 %v11299_v0  ;;  %v9672_v30 = vpack.c.bf16 %v237_v60, %v230_v39  ;;  %v265_v47 = vand.u32 4294901760, %v264_v25  ;;  %v279_v7 = vand.u32 4294901760, %v278_v42  ;;  %v285_v60 = vsub.f32 %v11348_v22, %v284_v57  ;;  %844 = vrot.lane.b32.xlu0 %v11421_v26, %s11096_s21  ;;  %v901_v42 = vld [vmem:[%s16167_s4 + $0x48] sm:$0xff] }
  0x20   :  { %9657 = vmatprep.subr.bf16.mxu0 %v11302_v3  ;;  %v9696_v57 = vpack.c.bf16 %v11263_v45, %v11246_v35  ;;  %v9704_v35 = vpack.c.bf16 %v11324_v16, %v11319_v12  ;;  %848 = vrot.lane.b32.xlu1 %v11426_v27, %s11096_s21  ;;  %v11437_v45 = vld [vmem:[%s16165_s3 + $0x8] sm:$0xff]  ;;  %v16197_v46 = vmov 0.0|0.0   ;;  %v9708_v12 = vpack.c.bf16 %v11330_v33, %v11327_v24 }
  0x21   :  { %v9680_v43 = vpack.c.bf16 %v265_v47, %v258_v37  ;;  %v286_v44 = vand.u32 4294901760, %v285_v60  ;;  %9820 = vmatprep.subr.bf16.mxu1 %v16197_v46  ;;  %v9712_v16 = vpack.c.bf16 %v11338_v14, %v11336_v55  ;;  %v9716_v40 = vpack.c.bf16 %v11345_v20, %v11343_v15 }
  0x22   :  { %v9720_v24 = vpack.c.bf16 %v11350_v61, %v11348_v22  ;;  %v16815_v33 = vand.u32 4294901760, %v11215_v23  ;;  %v16817_v55 = vand.u32 4294901760, %v11333_v38  ;;  %v16818_v14 = vand.u32 4294901760, %v11353_v31  ;;  %v16822_v20 = vld [vmem:[#allocation5_spill] sm:$0xff] }
  0x23   :  { %9659 = vmatpush3.bf16.msra.mxu0 %v11302_v3  ;;  %846 = vrot.lane.b32.xlu0 %v11437_v45, %s11096_s21  ;;  %v61_v61 = vld [vmem:[%s16166_s2 + $0x18] sm:$0xff] }
  0x24   :  { %9661 = vmatprep.subr.bf16.mxu0 %v9660_v54  ;;  %850 = vrot.lane.b32.xlu1 %v11443_v50, %s11096_s21 }
  0x26   :  { %8983 = vmatmul.mubr.f32.vlgmr.msra.gmra.mrb[0].mxu0 %v157_v29  ;;  %v244_v29 = vand.u32 4294901760, %v243_v5  ;;  %v893_v5 = vld [vmem:[%s16167_s4 + $0x8] sm:$0xff] }
  0x27   :  { %9663 = vmatpush3.bf16.msra.mxu0 %v9660_v54  ;;  %8985 = vmatprep.mubr.f32.mxu0 %v167_v49  ;;  %v271_v54 = vsub.f32 %v11343_v15, %v270_v52  ;;  %v293_v52 = vand.u32 4294901760, %v292_v8  ;;  %v16820_v15 = vld [vmem:[#allocation3_spill] sm:$0xff] }
  0x28   :  { %9665 = vmatprep.subr.bf16.mxu0 %v9664_v59  ;;  %v9676_v36 = vpack.c.bf16 %v251_v32, %v244_v29  ;;  %v1118_v29 = vsel %vm1116_vm0, %v893_v5, 0 }
  0x29   :  { %v9688_v39 = vpack.c.bf16 %v293_v52, %v286_v44 }
  0x2a   :  { %8986 = vmatmul.mubr.f32.gmra.mrb[2].mxu0 %v177_v51  ;;  %v272_v51 = vand.u32 4294901760, %v271_v54  ;;  %v11575_v54 = vand.u32 4294901760, %v1118_v29 }
  0x2b   :  { %9667 = vmatpush3.bf16.msra.mxu0 %v9664_v59  ;;  %9020 = vmatprep.mubr.f32.mxu0 %v11197_v17 }
  0x2c   :  { %9669 = vmatprep.subr.bf16.mxu0 %v9668_v21  ;;  %16826 = vst [vmem:[#allocation5_spill] sm:$0xff] %v11575_v54 }
  0x2f   :  { %9671 = vmatpush3.bf16.msra.mxu0 %v9668_v21  ;;  %v9684_v21 = vpack.c.bf16 %v279_v7, %v272_v51  ;;  %v11588_v7 = vsub.f32 %v1118_v29, %v11575_v54  ;;  %v899_v29 = vld [vmem:[%s16167_s4 + $0x38] sm:$0xff] }
  0x30   :  { %9673 = vmatprep.subr.bf16.mxu0 %v9672_v30 }
  0x31   :  { %16827 = vst [vmem:[#allocation6_spill] sm:$0xff] %v11588_v7 }
  0x33   :  { %9675 = vmatpush3.bf16.msra.mxu0 %v9672_v30 }
  0x34   :  { %9677 = vmatprep.subr.bf16.mxu0 %v9676_v36 }
  0x37   :  { %9679 = vmatpush3.bf16.msra.mxu0 %v9676_v36 }
  0x38   :  { %9681 = vmatprep.subr.bf16.mxu0 %v9680_v43 }
  0x3b   :  { %9683 = vmatpush3.bf16.msra.mxu0 %v9680_v43 }
  0x3c   :  { %9685 = vmatprep.subr.bf16.mxu0 %v9684_v21 }
  0x3f   :  { %9687 = vmatpush3.bf16.msra.mxu0 %v9684_v21 }
  0x40   :  { %9689 = vmatprep.subr.bf16.mxu0 %v9688_v39 }
  0x43   :  { %9691 = vmatpush3.bf16.msra.mxu0 %v9688_v39  ;;  %v16184_v39 = vand.u32 4294901760, %v11588_v7 }
  0x44   :  { %9693 = vmatprep.subr.bf16.mxu0 %v9692_v53 }
  0x46   :  { %9021 = vmatmul.mubr.f32.vlgmr.msra.gmra.mrb[0].mxu0 %v11244_v34 }
  0x47   :  { %9695 = vmatpush3.bf16.msra.mxu0 %v9692_v53  ;;  %9023 = vmatprep.mubr.f32.mxu0 %v11306_v6 }
  0x48   :  { %9697 = vmatprep.subr.bf16.mxu0 %v9696_v57 }
  0x4a   :  { %9024 = vmatmul.mubr.f32.gmra.mrb[2].mxu0 %v11340_v19 }
  0x4b   :  { %9699 = vmatpush3.bf16.msra.mxu0 %v9696_v57  ;;  %9058 = vmatprep.mubr.f32.mxu0 %v11215_v23  ;;  %v16816_v23 = vand.u32 4294901760, %v11271_v48 }
  0x4c   :  { %9701 = vmatprep.subr.bf16.mxu0 %v9700_v1 }
  0x4f   :  { %9703 = vmatpush3.bf16.msra.mxu0 %v9700_v1  ;;  %v1292_v1 = vsub.f32 %v11588_v7, %v16184_v39 }
  0x50   :  { %9705 = vmatprep.subr.bf16.mxu0 %v9704_v35 }
  0x53   :  { %9707 = vmatpush3.bf16.msra.mxu0 %v9704_v35 }
  0x54   :  { %9709 = vmatprep.subr.bf16.mxu0 %v9708_v12 }
  0x57   :  { %9711 = vmatpush3.bf16.msra.mxu0 %v9708_v12 }
  0x58   :  { %9713 = vmatprep.subr.bf16.mxu0 %v9712_v16 }
  0x5b   :  { %9715 = vmatpush3.bf16.msra.mxu0 %v9712_v16 }
  0x5c   :  { %9717 = vmatprep.subr.bf16.mxu0 %v9716_v40 }
  0x5f   :  { %9719 = vmatpush3.bf16.msra.mxu0 %v9716_v40 }
  0x60   :  { %9721 = vmatprep.subr.bf16.mxu0 %v9720_v24 }
  0x63   :  { %9723 = vmatpush3.bf16.msra.mxu0 %v9720_v24  ;;  %v1293_v24 = vand.u32 4294901760, %v1292_v1 }
  0x64   :  { %9725 = vmatprep.subr.bf16.mxu0 %v11178_v10 }
  0x65   :  { %1294 = vmatprep.mubr.f32.mxu1 %v1293_v24 }
  0x66   :  { %9059 = vmatmul.mubr.f32.vlgmr.msra.gmra.mrb[0].mxu0 %v11271_v48  ;;  %v16819_v48 = vld [vmem:[#allocation2_spill] sm:$0xff] }
  0x67   :  { %9727 = vmatpush3.bf16.msra.mxu0 %v11178_v10  ;;  %9061 = vmatprep.mubr.f32.mxu0 %v11333_v38  ;;  %v16821_v38 = vld [vmem:[#allocation4_spill] sm:$0xff] }
  0x68   :  { %9729 = vmatprep.subr.bf16.mxu0 %v11180_v13 }
  0x6a   :  { %9062 = vmatmul.mubr.f32.gmra.mrb[2].mxu0 %v11353_v31  ;;  %v60_v31 = vld [vmem:[%s16166_s2 + $0x10] sm:$0xff] }
  0x6b   :  { %9731 = vmatpush3.bf16.msra.mxu0 %v11180_v13  ;;  %9096 = vmatprep.mubr.f32.mxu0 %v16815_v33 }
  0x6c   :  { %9733 = vmatprep.subr.bf16.mxu0 %v11200_v18 }
  0x6f   :  { %9735 = vmatpush3.bf16.msra.mxu0 %v11200_v18 }
  0x70   :  { %9737 = vmatprep.subr.bf16.mxu0 %v11231_v28 }
  0x73   :  { %9739 = vmatpush3.bf16.msra.mxu0 %v11231_v28 }
  0x74   :  { %9741 = vmatprep.subr.bf16.mxu0 %v11255_v41 }
  0x77   :  { %9743 = vmatpush3.bf16.msra.mxu0 %v11255_v41 }
  0x78   :  { %9745 = vmatprep.subr.bf16.mxu0 %v11284_v56 }
  0x7b   :  { %9747 = vmatpush3.bf16.msra.mxu0 %v11284_v56 }
  0x7c   :  { %9749 = vmatprep.subr.bf16.mxu0 %v11299_v0 }
  0x7f   :  { %9751 = vmatpush3.bf16.msra.mxu0 %v11299_v0 }
  0x80   :  { %9753 = vmatprep.subr.bf16.mxu0 %v11302_v3 }
  0x83   :  { %9755 = vmatpush3.bf16.msra.mxu0 %v11302_v3 }
  0x84   :  { %9757 = vmatprep.subr.bf16.mxu0 %v11374_v63 }
  0x86   :  { %9097 = vmatmul.mubr.f32.vlgmr.msra.gmra.mrb[0].mxu0 %v16816_v23 }
  0x87   :  { %9759 = vmatpush3.bf16.msra.mxu0 %v11374_v63  ;;  %9099 = vmatprep.mubr.f32.mxu0 %v16817_v55 }
  0x88   :  { %9761 = vmatprep.subr.bf16.mxu0 %v11379_v2 }
  0x8a   :  { %9100 = vmatmul.mubr.f32.gmra.mrb[2].mxu0 %v16818_v14 }
  0x8b   :  { %9763 = vmatpush3.bf16.msra.mxu0 %v11379_v2  ;;  %9134 = vmatprep.mubr.f32.mxu0 %v11197_v17 }
  0x8c   :  { %9765 = vmatprep.subr.bf16.mxu0 %v11381_v4 }
  0x8f   :  { %9767 = vmatpush3.bf16.msra.mxu0 %v11381_v4 }
  0x90   :  { %9769 = vmatprep.subr.bf16.mxu0 %v16819_v48 }
  0x92   :  { %v11562_v62 = vpop.permute.xlu1 %848 }
  0x93   :  { %9771 = vmatpush3.bf16.msra.mxu0 %v16819_v48  ;;  %v16187_v35 = vand.u32 4294901760, %v11562_v62 }
  0x94   :  { %9773 = vmatprep.subr.bf16.mxu0 %v16820_v15 }
  0x96   :  { %v11598_v52 = vpop.permute.xlu1 %850 }
  0x97   :  { %9775 = vmatpush3.bf16.msra.mxu0 %v16820_v15  ;;  %v16186_v12 = vand.u32 4294901760, %v11598_v52 }
  0x98   :  { %9777 = vmatprep.subr.bf16.mxu0 %v16821_v38 }
  0x99   :  { %v11626_v33 = vpack.c.bf16 %v16186_v12, %v16187_v35 }
  0x9b   :  { %9779 = vmatpush3.bf16.msra.mxu0 %v16821_v38  ;;  %16831 = vst [vmem:[#allocation10_spill] sm:$0xff] %v11626_v33 }
  0x9c   :  { %9781 = vmatprep.subr.bf16.mxu0 %v16822_v20 }
  0x9f   :  { %9783 = vmatpush3.bf16.msra.mxu0 %v16822_v20 }
  0xa0   :  { %9785 = vmatprep.subr.bf16.mxu0 %v11395_v58 }
  0xa3   :  { %9787 = vmatpush3.bf16.msra.mxu0 %v11395_v58 }
  0xa4   :  { %9789 = vmatprep.subr.bf16.mxu0 %v11178_v10 }
  0xa6   :  { %9135 = vmatmul.mubr.f32.vlgmr.msra.gmra.mrb[0].mxu0 %v11244_v34 }
  0xa7   :  { %9791 = vmatpush3.bf16.msra.mxu0 %v11178_v10  ;;  %9137 = vmatprep.mubr.f32.mxu0 %v11306_v6  ;;  %v1202_v10 = vand.u32 4294901760, %v11421_v26 }
  0xa8   :  { %9793 = vmatprep.subr.bf16.mxu0 %v11180_v13 }
  0xaa   :  { %9138 = vmatmul.mubr.f32.gmra.mrb[2].mxu0 %v11340_v19 }
  0xab   :  { %9795 = vmatpush3.bf16.msra.mxu0 %v11180_v13  ;;  %9172 = vmatprep.mubr.f32.mxu0 %v11197_v17  ;;  %v1205_v13 = vand.u32 4294901760, %v11437_v45 }
  0xac   :  { %9797 = vmatprep.subr.bf16.mxu0 %v11200_v18 }
  0xad   :  { %v11530_v17 = vpack.c.bf16 %v1205_v13, %v1202_v10 }
  0xaf   :  { %9799 = vmatpush3.bf16.msra.mxu0 %v11200_v18  ;;  %16823 = vst [vmem:[#allocation2_spill] sm:$0xff] %v11530_v17  ;;  %9822 = vmatpush1.bf16.msra.mxu1 %v11530_v17  ;;  %v1208_v18 = vand.u32 4294901760, %v11426_v27 }
  0xb0   :  { %9801 = vmatprep.subr.bf16.mxu0 %v11231_v28  ;;  %9823 = vmatprep.subr.bf16.mxu1 %v16197_v46 }
  0xb3   :  { %9803 = vmatpush3.bf16.msra.mxu0 %v11231_v28  ;;  %v1211_v28 = vand.u32 4294901760, %v11443_v50 }
  0xb4   :  { %9805 = vmatprep.subr.bf16.mxu0 %v11255_v41 }
  0xb7   :  { %9807 = vmatpush3.bf16.msra.mxu0 %v11255_v41  ;;  %v59_v41 = vld [vmem:[%s16166_s2 + $0x8] sm:$0xff] }
  0xb8   :  { %9809 = vmatprep.subr.bf16.mxu0 %v11284_v56 }
  0xbb   :  { %9811 = vmatpush3.bf16.msra.mxu0 %v11284_v56  ;;  %v58_v56 = vld [vmem:[%s16166_s2] sm:$0xff]  ;;  %s11098_s2 = smov 126  }
  0xbc   :  { %9813 = vmatprep.subr.bf16.mxu0 %v11299_v0 }
  0xbf   :  { %9815 = vmatpush3.bf16.msra.mxu0 %v11299_v0 }
  0xc0   :  { %9817 = vmatprep.subr.bf16.mxu0 %v11302_v3 }
  0xc3   :  { %9819 = vmatpush3.bf16.msra.mxu0 %v11302_v3 }
  0xc6   :  { %9173 = vmatmul.mubr.f32.vlgmr.msra.gmra.mrb[0].mxu0 %v11244_v34  ;;  %v11540_v34 = vpack.c.bf16 %v1211_v28, %v1208_v18 }
  0xc7   :  { %9175 = vmatprep.mubr.f32.mxu0 %v11306_v6 }
  0xc8   :  { %16824 = vst [vmem:[#allocation3_spill] sm:$0xff] %v11540_v34  ;;  %9825 = vmatpush1.bf16.msra.mxu1 %v11540_v34 }
  0xc9   :  { %9826 = vmatprep.subr.bf16.mxu1 %v16197_v46 }
  0xca   :  { %9176 = vmatmul.mubr.f32.gmra.mrb[2].mxu0 %v11340_v19  ;;  %v11550_v19 = vpop.permute.xlu0 %844 }
  0xcb   :  { %v16195_v43 = vand.u32 4294901760, %v11550_v19 }
  0xce   :  { %v11573_v25 = vpop.permute.xlu0 %846 }
  0xcf   :  { %v16194_v21 = vand.u32 4294901760, %v11573_v25 }
  0xd1   :  { %v11608_v53 = vpack.c.bf16 %v16194_v21, %v16195_v43  ;;  %v1130_v43 = vsel %vm1116_vm0, %v901_v42, 0  ;;  %v16852_v42 = vand.u32 4294901760, %v11550_v19 }
  0xd3   :  { %16830 = vst [vmem:[#allocation9_spill] sm:$0xff] %v11608_v53 }
 0x199   :  { %v9174_v0 = vpop.f32.mrb[0].mxu0 }
 0x19a   :  { %v10468_v3 = vadd.f32 %v9174_v0, %v59_v41  ;;  %v810_v6 = vpop.f32.mrb[1].mxu0 }
 0x19b   :  { %v10469_v22 = vadd.f32 %v810_v6, %v58_v56  ;;  %v895_v6 = vld [vmem:[%s16167_s4 + $0x18] sm:$0xff] }
 0x19c   :  { %854 = vrot.lane.b32.xlu1 %v10468_v3, %s11096_s21  ;;  %v1217_v63 = vand.u32 4294901760, %v10468_v3 }
 0x19d   :  { %v9177_v2 = vpop.f32.mrb[2].mxu0  ;;  %852 = vrot.lane.b32.xlu0 %v10469_v22, %s11096_s21  ;;  %v1214_v4 = vand.u32 4294901760, %v10469_v22 }
 0x19e   :  { %v10470_v49 = vadd.f32 %v9177_v2, %v61_v61  ;;  %v822_v58 = vpop.f32.mrb[3].mxu0  ;;  %v11560_v59 = vsub.f32 %v10468_v3, %v1217_v63  ;;  %v897_v61 = vld [vmem:[%s16167_s4 + $0x28] sm:$0xff]  ;;  %v11665_v2 = vsub.f32 %v11421_v26, %v1202_v10  ;;  %v11690_v10 = vsub.f32 %v11443_v50, %v1211_v28 }
 0x19f   :  { %v10471_v11 = vadd.f32 %v822_v58, %v60_v31  ;;  %v11567_v9 = vpack.c.bf16 %v1217_v63, %v1214_v4  ;;  %v11569_v30 = vsub.f32 %v10469_v22, %v1214_v4  ;;  %v1121_v31 = vsel %vm1116_vm0, %v895_v6, 0  ;;  %v894_v63 = vld [vmem:[%s16167_s4 + $0x10] sm:$0xff] }
 0x1a0   :  { %858 = vrot.lane.b32.xlu1 %v10470_v49, %s11096_s21  ;;  %v1223_v32 = vand.u32 4294901760, %v10470_v49  ;;  %v1748_v36 = vand.u32 4294901760, %v11560_v59  ;;  %v11673_v58 = vsub.f32 %v11437_v45, %v1205_v13  ;;  %v11675_v5 = vand.u32 4294901760, %v1121_v31 }
 0x1a1   :  { %16825 = vst [vmem:[#allocation4_spill] sm:$0xff] %v11567_v9  ;;  %856 = vrot.lane.b32.xlu0 %v10471_v11, %s11096_s21  ;;  %9828 = vmatpush1.bf16.msra.mxu1 %v11567_v9  ;;  %v1220_v37 = vand.u32 4294901760, %v10471_v11  ;;  %v1741_v47 = vand.u32 4294901760, %v11569_v30  ;;  %v1127_v28 = vsel %vm1116_vm0, %v899_v29, 0  ;;  %v16192_v24 = vand.u32 4294901760, %v11690_v10 }
 0x1a2   :  { %9829 = vmatprep.subr.bf16.mxu1 %v16197_v46  ;;  %v11584_v51 = vsub.f32 %v10470_v49, %v1223_v32  ;;  %v1749_v44 = vsub.f32 %v11560_v59, %v1748_v36  ;;  %16835 = vst [vmem:[#allocation14_spill] sm:$0xff] %v11675_v5 }
 0x1a3   :  { %v11590_v60 = vpack.c.bf16 %v1223_v32, %v1220_v37  ;;  %v11592_v8 = vsub.f32 %v10471_v11, %v1220_v37  ;;  %v1742_v57 = vsub.f32 %v11569_v30, %v1741_v47  ;;  %v11641_v20 = vpack.c.bf16 %v1748_v36, %v1741_v47  ;;  %v896_v37 = vld [vmem:[%s16167_s4 + $0x20] sm:$0xff] }
 0x1a4   :  { %870 = vrot.lane.b32.xlu1 %v11437_v45, %s11098_s2  ;;  %v1750_v40 = vand.u32 4294901760, %v1749_v44  ;;  %v1762_v14 = vand.u32 4294901760, %v11584_v51  ;;  %v16185_v47 = vand.u32 4294901760, %v11673_v58  ;;  %v11710_v44 = vsub.f32 %v1121_v31, %v11675_v5 }
 0x1a5   :  { %16828 = vst [vmem:[#allocation7_spill] sm:$0xff] %v11590_v60  ;;  %16829 = vst [vmem:[#allocation8_spill] sm:$0xff] %v11592_v8  ;;  %868 = vrot.lane.b32.xlu0 %v11421_v26, %s11098_s2  ;;  %9831 = vmatpush1.bf16.msra.mxu1 %v11590_v60  ;;  %v1743_v16 = vand.u32 4294901760, %v1742_v57  ;;  %v1755_v55 = vand.u32 4294901760, %v11592_v8  ;;  %v11685_v26 = vsub.f32 %v11426_v27, %v1208_v18 }
 0x1a6   :  { %9832 = vmatprep.subr.bf16.mxu1 %v16197_v46  ;;  %v1763_v38 = vsub.f32 %v11584_v51, %v1762_v14  ;;  %16832 = vst [vmem:[#allocation11_spill] sm:$0xff] %v11641_v20  ;;  %16839 = vst [vmem:[#allocation18_spill] sm:$0xff] %v11710_v44  ;;  %v1721_v31 = vsub.f32 %v11673_v58, %v16185_v47  ;;  %v1735_v15 = vsub.f32 %v11690_v10, %v16192_v24 }
 0x1a7   :  { %v11629_v23 = vpack.c.bf16 %v1750_v40, %v1743_v16  ;;  %v1756_v48 = vsub.f32 %v11592_v8, %v1755_v55  ;;  %v11645_v0 = vpack.c.bf16 %v1762_v14, %v1755_v55  ;;  %v16191_v40 = vand.u32 4294901760, %v11685_v26 }
 0x1a8   :  { %874 = vrot.lane.b32.xlu1 %v11443_v50, %s11098_s2  ;;  %v1764_v56 = vand.u32 4294901760, %v1763_v38  ;;  %v16183_v50 = vand.u32 4294901760, %v11665_v2  ;;  %v11725_v55 = vand.u32 4294901760, %v896_v37 }
 0x1a9   :  { %872 = vrot.lane.b32.xlu0 %v11426_v27, %s11098_s2  ;;  %9834 = vmatpush1.bf16.msra.mxu1 %v11608_v53  ;;  %v1757_v41 = vand.u32 4294901760, %v1756_v48  ;;  %16833 = vst [vmem:[#allocation12_spill] sm:$0xff] %v11645_v0  ;;  %v1728_v39 = vsub.f32 %v11685_v26, %v16191_v40  ;;  %v16855_v53 = vmov 0.0|0.0  }
 0x1aa   :  { %9835 = vmatprep.subr.bf16.mxu1 %v16197_v46  ;;  %16842 = vst [vmem:[#allocation21_spill] sm:$0xff] %v11725_v55  ;;  %v11763_v47 = vsub.f32 %v896_v37, %v11725_v55 }
 0x1ac   :  { %878 = vrot.lane.b32.xlu1 %v10468_v3, %s11098_s2  ;;  %v11647_v3 = vpack.c.bf16 %v1764_v56, %v1757_v41  ;;  %v11733_v41 = vand.u32 4294901760, %v1127_v28  ;;  %16846 = vst [vmem:[#allocation25_spill] sm:$0xff] %v11763_v47 }
 0x1ad   :  { %876 = vrot.lane.b32.xlu0 %v10469_v22, %s11098_s2  ;;  %9837 = vmatpush1.bf16.msra.mxu1 %v11626_v33  ;;  %v892_v22 = vld [vmem:[%s16167_s4] sm:$0xff]  ;;  %v11807_v33 = vsub.f32 %v11550_v19, %v16852_v42 }
 0x1ae   :  { %9838 = vmatprep.subr.bf16.mxu1 %v16197_v46  ;;  %v11667_v4 = vand.u32 4294901760, %v892_v22  ;;  %16844 = vst [vmem:[#allocation23_spill] sm:$0xff] %v11733_v41  ;;  %v900_v19 = vld [vmem:[%s16167_s4 + $0x40] sm:$0xff] }
 0x1b0   :  { %882 = vrot.lane.b32.xlu1 %v10470_v49, %s11098_s2  ;;  %16834 = vst [vmem:[#allocation13_spill] sm:$0xff] %v11667_v4  ;;  %v1124_v49 = vsel %vm1116_vm0, %v897_v61, 0  ;;  %v11704_v18 = vsub.f32 %v892_v22, %v11667_v4  ;;  %v1714_v22 = vsub.f32 %v11665_v2, %v16183_v50  ;;  %v898_v61 = vld [vmem:[%s16167_s4 + $0x30] sm:$0xff] }
 0x1b1   :  { %880 = vrot.lane.b32.xlu0 %v10471_v11, %s11098_s2  ;;  %v11677_v11 = vand.u32 4294901760, %v894_v63  ;;  %v11697_v36 = vand.u32 4294901760, %v1124_v49 }
 0x1b2   :  { %16838 = vst [vmem:[#allocation17_spill] sm:$0xff] %v11704_v18  ;;  %v16196_v6 = vand.u32 4294901760, %v11704_v18  ;;  %v1715_v24 = vand.u32 4294901760, %v1714_v22  ;;  %v1736_v22 = vand.u32 4294901760, %v1735_v15  ;;  %v11810_v15 = vand.u32 4294901760, %v1130_v43 }
 0x1b3   :  { %16836 = vst [vmem:[#allocation15_spill] sm:$0xff] %v11677_v11  ;;  %16837 = vst [vmem:[#allocation16_spill] sm:$0xff] %v11697_v36  ;;  %v11713_v57 = vsub.f32 %v894_v63, %v11677_v11  ;;  %v11731_v38 = vsub.f32 %v1124_v49, %v11697_v36  ;;  %v16201_v63 = vand.u32 4294901760, %v11710_v44 }
 0x1b4   :  { %v11778_v37 = vsub.f32 %v11704_v18, %v16196_v6  ;;  %v1729_v6 = vand.u32 4294901760, %v1728_v39  ;;  %16853 = vst [vmem:[#allocation30_spill] sm:$0xff] %v11810_v15 }
 0x1b5   :  { %16840 = vst [vmem:[#allocation19_spill] sm:$0xff] %v11713_v57  ;;  %16843 = vst [vmem:[#allocation22_spill] sm:$0xff] %v11731_v38  ;;  %v16204_v49 = vand.u32 4294901760, %v11713_v57  ;;  %v11784_v21 = vsub.f32 %v11710_v44, %v16201_v63  ;;  %v11854_v44 = vand.u32 4294901760, %v900_v19 }
 0x1b7   :  { %16861 = vst [vmem:[#allocation33_spill] sm:$0xff] %v11854_v44 }
 0x20e   :  { %v11692_v45 = vpop.permute.xlu1 %854 }
 0x20f   :  { %v16193_v13 = vand.u32 4294901760, %v11692_v45  ;;  %v11695_v32 = vpop.permute.xlu0 %852 }
 0x210   :  { %v16190_v27 = vand.u32 4294901760, %v11695_v32 }
 0x212   :  { %v11715_v1 = vpop.permute.xlu1 %858  ;;  %v11721_v16 = vpack.c.bf16 %v16193_v13, %v16190_v27  ;;  %v11772_v27 = vand.u32 4294901760, %v898_v61  ;;  %v1722_v13 = vand.u32 4294901760, %v1721_v31 }
 0x213   :  { %v16189_v14 = vand.u32 4294901760, %v11715_v1  ;;  %v11728_v48 = vpop.permute.xlu0 %856 }
 0x214   :  { %16841 = vst [vmem:[#allocation20_spill] sm:$0xff] %v11721_v16  ;;  %v16188_v56 = vand.u32 4294901760, %v11728_v48  ;;  %9840 = vmatpush1.bf16.msra.mxu1 %v11721_v16  ;;  %16848 = vst [vmem:[#allocation27_spill] sm:$0xff] %v11772_v27  ;;  %v11819_v16 = vpack.c.bf16 %v1722_v13, %v1715_v24  ;;  %v903_v13 = vld [vmem:[%s16167_s4 + $0x58] sm:$0xff] }
 0x215   :  { %9841 = vmatprep.subr.bf16.mxu1 %v16197_v46 }
 0x216   :  { %v871_v29 = vpop.permute.xlu1 %870  ;;  %v11754_v50 = vpack.c.bf16 %v16189_v14, %v16188_v56  ;;  %v11770_v14 = vsub.f32 %v1127_v28, %v11733_v41  ;;  %v11789_v28 = vsub.f32 %v11713_v57, %v16204_v49  ;;  %v11802_v49 = vsub.f32 %v898_v61, %v11772_v27 }
 0x217   :  { %v1253_v12 = vand.u32 4294901760, %v871_v29  ;;  %v869_v35 = vpop.permute.xlu0 %868  ;;  %v16862_v61 = vand.u32 4294901760, %v11695_v32 }
 0x218   :  { %16845 = vst [vmem:[#allocation24_spill] sm:$0xff] %v11754_v50  ;;  %16847 = vst [vmem:[#allocation26_spill] sm:$0xff] %v11770_v14  ;;  %v1250_v40 = vand.u32 4294901760, %v869_v35  ;;  %9843 = vmatpush1.bf16.msra.mxu1 %v11754_v50  ;;  %v16850_v50 = vand.u32 4294901760, %v11731_v38  ;;  %v16858_v34 = vand.u32 4294901760, %v11770_v14 }
 0x219   :  { %9844 = vmatprep.subr.bf16.mxu1 %v16197_v46  ;;  %16851 = vst [vmem:[#allocation29_spill] sm:$0xff] %v11802_v49  ;;  %v16854_v46 = vand.u32 4294901760, %v11573_v25 }
 0x21a   :  { %v875_v56 = vpop.permute.xlu1 %874  ;;  %v11792_v0 = vpack.c.bf16 %v1253_v12, %v1250_v40  ;;  %v11798_v63 = vsub.f32 %v11731_v38, %v16850_v50  ;;  %v11828_v38 = vpack.c.bf16 %v1736_v22, %v1729_v6  ;;  %v11842_v57 = vsub.f32 %v11770_v14, %v16858_v34 }
 0x21b   :  { %v1259_v31 = vand.u32 4294901760, %v875_v56  ;;  %v873_v20 = vpop.permute.xlu0 %872  ;;  %v11815_v50 = vsub.f32 %v11573_v25, %v16854_v46  ;;  %v16857_v46 = vand.u32 4294901760, %v11763_v47  ;;  %v16859_v22 = vand.u32 4294901760, %v11692_v45 }
 0x21c   :  { %16849 = vst [vmem:[#allocation28_spill] sm:$0xff] %v11792_v0  ;;  %v1256_v39 = vand.u32 4294901760, %v873_v20  ;;  %9846 = vmatpush1.bf16.msra.mxu1 %v11792_v0  ;;  %v11859_v34 = vsub.f32 %v11695_v32, %v16862_v61  ;;  %v16863_v6 = vand.u32 4294901760, %v11715_v1  ;;  %v11876_v32 = vsub.f32 %v871_v29, %v1253_v12 }
 0x21d   :  { %9847 = vmatprep.subr.bf16.mxu1 %v16855_v53  ;;  %v11833_v25 = vsub.f32 %v11763_v47, %v16857_v46  ;;  %v11848_v46 = vsub.f32 %v11692_v45, %v16859_v22  ;;  %v11852_v47 = vsub.f32 %v1130_v43, %v11810_v15  ;;  %v16864_v45 = vand.u32 4294901760, %v11728_v48 }
 0x21e   :  { %v879_v42 = vpop.permute.xlu1 %878  ;;  %v11825_v0 = vpack.c.bf16 %v1259_v31, %v1256_v39  ;;  %v11864_v14 = vsub.f32 %v11715_v1, %v16863_v6  ;;  %v1133_v43 = vsel %vm1116_vm0, %v903_v13, 0  ;;  %v11878_v61 = vsub.f32 %v869_v35, %v1250_v40 }
 0x21f   :  { %v1265_v24 = vand.u32 4294901760, %v879_v42  ;;  %v877_v60 = vpop.permute.xlu0 %876  ;;  %16860 = vst [vmem:[#allocation32_spill] sm:$0xff] %v11852_v47  ;;  %v11869_v22 = vsub.f32 %v11728_v48, %v16864_v45  ;;  %v11880_v17 = vsub.f32 %v875_v56, %v1259_v31  ;;  %v11884_v18 = vsub.f32 %v873_v20, %v1256_v39 }
 0x220   :  { %16856 = vst [vmem:[#allocation31_spill] sm:$0xff] %v11825_v0  ;;  %v1262_v9 = vand.u32 4294901760, %v877_v60  ;;  %9849 = vmatpush1.bf16.msra.mxu1 %v11825_v0  ;;  %v905_v0 = vld [vmem:[%s16167_s4 + $0x68] sm:$0xff]  ;;  %v16241_v15 = vand.u32 4294901760, %v11848_v46  ;;  %v11892_v35 = vand.u32 4294901760, %v1133_v43  ;;  %v16240_v40 = vand.u32 4294901760, %v11859_v34 }
 0x221   :  { %9850 = vmatprep.subr.bf16.mxu1 %v16855_v53  ;;  %16865 = vst [vmem:[#allocation34_spill] sm:$0xff] %v11880_v17  ;;  %16867 = vst [vmem:[#allocation36_spill] sm:$0xff] %v11884_v18  ;;  %v11886_v48 = vsub.f32 %v879_v42, %v1265_v24  ;;  %v1136_v12 = vsel %vm1116_vm0, %v905_v0, 0  ;;  %v16244_v56 = vand.u32 4294901760, %v11869_v22  ;;  %v16873_v0 = vand.u32 4294901760, %v11778_v37 }
 0x222   :  { %v883_v1 = vpop.permute.xlu1 %882  ;;  %v11882_v6 = vpack.c.bf16 %v1265_v24, %v1262_v9  ;;  %v11888_v45 = vsub.f32 %v877_v60, %v1262_v9  ;;  %16868 = vst [vmem:[#allocation37_spill] sm:$0xff] %v11892_v35  ;;  %v11924_v24 = vsub.f32 %v900_v19, %v11854_v44  ;;  %v907_v9 = vld [vmem:[%s16167_s4 + $0x78] sm:$0xff]  ;;  %v11934_v20 = vsub.f32 %v1133_v43, %v11892_v35 }
 0x223   :  { %v1271_v13 = vand.u32 4294901760, %v883_v1  ;;  %v881_v7 = vpop.permute.xlu0 %880  ;;  %v11944_v42 = vand.u32 4294901760, %v1136_v12  ;;  %v11953_v43 = vpack.c.bf16 %v16241_v15, %v16240_v40  ;;  %v16878_v37 = vand.u32 4294901760, %v11878_v61 }
 0x224   :  { %16866 = vst [vmem:[#allocation35_spill] sm:$0xff] %v11882_v6  ;;  %v1268_v8 = vand.u32 4294901760, %v881_v7  ;;  %9852 = vmatpush1.bf16.msra.mxu1 %v11882_v6  ;;  %16870 = vst [vmem:[#allocation39_spill] sm:$0xff] %v11924_v24  ;;  %v1139_v40 = vsel %vm1116_vm0, %v907_v9, 0  ;;  %v16882_v15 = vand.u32 4294901760, %v11884_v18  ;;  %v16896_v9 = vand.u32 4294901760, %v11802_v49 }
 0x225   :  { %v11898_v29 = vsub.f32 %v883_v1, %v1271_v13  ;;  %9853 = vmatprep.subr.bf16.mxu1 %v16855_v53  ;;  %v902_v1 = vld [vmem:[%s16167_s4 + $0x50] sm:$0xff]  ;;  %16871 = vst [vmem:[#allocation40_spill] sm:$0xff] %v11934_v20  ;;  %16874 = vst [vmem:[#allocation42_spill] sm:$0xff] %v11944_v42 }
 0x226   :  { %v11903_v31 = vsub.f32 %v881_v7, %v1268_v8  ;;  %v11905_v39 = vpack.c.bf16 %v1271_v13, %v1268_v8  ;;  %v11936_v8 = vand.u32 4294901760, %v902_v1  ;;  %v904_v7 = vld [vmem:[%s16167_s4 + $0x60] sm:$0xff]  ;;  %16875 = vst [vmem:[#allocation43_spill] sm:$0xff] %v11953_v43  ;;  %v16876_v13 = vand.u32 4294901760, %v11864_v14 }
 0x227   :  { %v16883_v43 = vand.u32 4294901760, %v11880_v17 }
 0x228   :  { %16869 = vst [vmem:[#allocation38_spill] sm:$0xff] %v11905_v39  ;;  %9855 = vmatpush1.bf16.msra.mxu1 %v11905_v39  ;;  %16872 = vst [vmem:[#allocation41_spill] sm:$0xff] %v11936_v8  ;;  %v11959_v19 = vpack.c.bf16 %v16876_v13, %v16244_v56  ;;  %v16881_v39 = vand.u32 4294901760, %v11784_v21  ;;  %v16885_v13 = vand.u32 4294901760, %v11888_v45  ;;  %v16886_v56 = vand.u32 4294901760, %v11886_v48 }
 0x229   :  { %9856 = vmatprep.subr.bf16.mxu1 %v16855_v53  ;;  %v11975_v6 = vpack.c.bf16 %v16883_v43, %v16882_v15  ;;  %v16892_v43 = vand.u32 4294901760, %v11598_v52  ;;  %v12013_v15 = vand.u32 4294901760, %v904_v7 }
 0x22a   :  { %16877 = vst [vmem:[#allocation44_spill] sm:$0xff] %v11959_v19  ;;  %v11981_v19 = vpack.c.bf16 %v16886_v56, %v16885_v13  ;;  %v906_v13 = vld [vmem:[%s16167_s4 + $0x70] sm:$0xff] }
 0x22b   :  { %1300 = vmatmul.mubr.f32.vlgmr.msra.gmra.mrb[0].mxu1 %v16873_v0  ;;  %v16879_v0 = vand.u32 4294901760, %v11876_v32  ;;  %16884 = vst [vmem:[#allocation46_spill] sm:$0xff] %v11975_v6  ;;  %v11999_v56 = vsub.f32 %v11598_v52, %v16892_v43  ;;  %16894 = vst [vmem:[#allocation50_spill] sm:$0xff] %v12013_v15  ;;  %v16895_v52 = vand.u32 4294901760, %v11789_v28  ;;  %v1329_v43 = vand.u32 4294901760, %v11833_v25 }
 0x22c   :  { %9858 = vmatpush1.bf16.msra.mxu1 %v11819_v16  ;;  %1309 = vmatprep.mubr.f32.mxu1 %v16881_v39  ;;  %16887 = vst [vmem:[#allocation47_spill] sm:$0xff] %v11981_v19  ;;  %v16889_v16 = vand.u32 4294901760, %v11898_v29  ;;  %v16891_v39 = vand.u32 4294901760, %v11562_v62  ;;  %v12022_v19 = vsub.f32 %v1136_v12, %v11944_v42  ;;  %v16900_v28 = vand.u32 4294901760, %v11852_v47 }
 0x22d   :  { %v11965_v60 = vpack.c.bf16 %v16879_v0, %v16878_v37  ;;  %v16888_v37 = vand.u32 4294901760, %v11903_v31  ;;  %9859 = vmatprep.subr.bf16.mxu1 %v16855_v53  ;;  %v16902_v12 = vand.u32 4294901760, %v11807_v33 }
 0x22e   :  { %v11993_v0 = vsub.f32 %v11562_v62, %v16891_v39  ;;  %v12011_v39 = vsub.f32 %v902_v1, %v11936_v8  ;;  %16897 = vst [vmem:[#allocation51_spill] sm:$0xff] %v12022_v19  ;;  %v12024_v62 = vand.u32 4294901760, %v1139_v40  ;;  %v16899_v1 = vand.u32 4294901760, %v11798_v63 }
 0x22f   :  { %16880 = vst [vmem:[#allocation45_spill] sm:$0xff] %v11965_v60  ;;  %v11987_v21 = vpack.c.bf16 %v16889_v16, %v16888_v37  ;;  %v909_v37 = vld [vmem:[%s16167_s4 + $0x88] sm:$0xff]  ;;  %1315 = vmatmul.mubr.f32.gmra.mrb[2].mxu1 %v16895_v52  ;;  %v1338_v16 = vand.u32 4294901760, %v11842_v57  ;;  %v1352_v25 = vsub.f32 %v11852_v47, %v16900_v28  ;;  %v12033_v52 = vand.u32 4294901760, %v906_v13 }
 0x230   :  { %16893 = vst [vmem:[#allocation49_spill] sm:$0xff] %v12011_v39  ;;  %16898 = vst [vmem:[#allocation52_spill] sm:$0xff] %v12024_v62  ;;  %9861 = vmatpush1.bf16.msra.mxu1 %v11828_v38  ;;  %1324 = vmatprep.mubr.f32.mxu1 %v16899_v1  ;;  %v1770_v6 = vsub.f32 %v11807_v33, %v16902_v12  ;;  %v16903_v38 = vand.u32 4294901760, %v11815_v50  ;;  %v908_v1 = vld [vmem:[%s16167_s4 + $0x80] sm:$0xff]  ;;  %v16904_v28 = vand.u32 4294901760, %v11924_v24  ;;  %v16905_v60 = vand.u32 4294901760, %v11934_v20 }
 0x231   :  { %16890 = vst [vmem:[#allocation48_spill] sm:$0xff] %v11987_v21  ;;  %v1343_v21 = vsub.f32 %v11802_v49, %v16896_v9  ;;  %16901 = vst [vmem:[#allocation53_spill] sm:$0xff] %v12033_v52  ;;  %v1142_v9 = vsel %vm1116_vm0, %v909_v37, 0  ;;  %9862 = vmatprep.subr.bf16.mxu1 %v16855_v53  ;;  %v911_v37 = vld [vmem:[%s16167_s4 + $0x98] sm:$0xff]  ;;  %v12059_v47 = vsub.f32 %v904_v7, %v12013_v15  ;;  %v12071_v57 = vand.u32 4294901760, %v908_v1 }
 0x232   :  { %v1777_v63 = vsub.f32 %v11815_v50, %v16903_v38  ;;  %v1358_v12 = vsub.f32 %v11924_v24, %v16904_v28  ;;  %v1367_v38 = vsub.f32 %v11934_v20, %v16905_v60  ;;  %v12063_v8 = vsub.f32 %v1139_v40, %v12024_v62 }
 0x233   :  { %16906 = vst [vmem:[#allocation54_spill] sm:$0xff] %v12059_v47  ;;  %1330 = vmatmul.mubr.f32.gmra.mrb[4].mxu1 %v1329_v43  ;;  %v1344_v49 = vand.u32 4294901760, %v1343_v21  ;;  %v12065_v35 = vand.u32 4294901760, %v1142_v9  ;;  %v1353_v28 = vand.u32 4294901760, %v1352_v25  ;;  %v12069_v60 = vsub.f32 %v906_v13, %v12033_v52  ;;  %16910 = vst [vmem:[#allocation58_spill] sm:$0xff] %v12071_v57  ;;  %v913_v13 = vld [vmem:[%s16167_s4 + $0xa8] sm:$0xff] }
 0x234   :  { %16907 = vst [vmem:[#allocation55_spill] sm:$0xff] %v12063_v8  ;;  %9864 = vmatpush1.bf16.msra.mxu1 %v11629_v23  ;;  %1339 = vmatprep.mubr.f32.mxu1 %v1338_v16  ;;  %v1145_v7 = vsel %vm1116_vm0, %v911_v37, 0  ;;  %v1771_v43 = vand.u32 4294901760, %v1770_v6  ;;  %v16911_v21 = vand.u32 4294901760, %v11993_v0  ;;  %v1778_v40 = vand.u32 4294901760, %v1777_v63  ;;  %v910_v23 = vld [vmem:[%s16167_s4 + $0x90] sm:$0xff] }
 0x235   :  { %16908 = vst [vmem:[#allocation56_spill] sm:$0xff] %v12065_v35  ;;  %16909 = vst [vmem:[#allocation57_spill] sm:$0xff] %v12069_v60  ;;  %v16912_v20 = vand.u32 4294901760, %v11999_v56  ;;  %9865 = vmatprep.subr.bf16.mxu1 %v16855_v53  ;;  %v1359_v6 = vand.u32 4294901760, %v1358_v12  ;;  %v1368_v16 = vand.u32 4294901760, %v1367_v38  ;;  %v16913_v25 = vand.u32 4294901760, %v12011_v39 }
 0x236   :  { %v1784_v42 = vsub.f32 %v11993_v0, %v16911_v21  ;;  %v12096_v62 = vsub.f32 %v1142_v9, %v12065_v35  ;;  %v12098_v15 = vand.u32 4294901760, %v1145_v7  ;;  %v12103_v38 = vsub.f32 %v908_v1, %v12071_v57 }
 0x237   :  { %v1791_v24 = vsub.f32 %v11999_v56, %v16912_v20  ;;  %v1373_v63 = vsub.f32 %v12011_v39, %v16913_v25  ;;  %1345 = vmatmul.mubr.f32.gmra.mrb[6].mxu1 %v1344_v49  ;;  %v16914_v20 = vand.u32 4294901760, %v12022_v19  ;;  %v12105_v49 = vand.u32 4294901760, %v910_v23 }
 0x238   :  { %16915 = vst [vmem:[#allocation59_spill] sm:$0xff] %v12096_v62  ;;  %16916 = vst [vmem:[#allocation60_spill] sm:$0xff] %v12098_v15  ;;  %9867 = vmatpush1.bf16.msra.mxu1 %v11647_v3  ;;  %1354 = vmatprep.mubr.f32.mxu1 %v1353_v28  ;;  %v1148_v25 = vsel %vm1116_vm0, %v913_v13, 0  ;;  %v16919_v52 = vand.u32 4294901760, %v11848_v46  ;;  %v16920_v37 = vand.u32 4294901760, %v11859_v34  ;;  %v9869_v28 = vpack.c.bf16 %v1778_v40, %v1771_v43 }
 0x239   :  { %v1382_v21 = vsub.f32 %v12022_v19, %v16914_v20  ;;  %16917 = vst [vmem:[#allocation61_spill] sm:$0xff] %v12103_v38  ;;  %16918 = vst [vmem:[#allocation62_spill] sm:$0xff] %v12105_v49  ;;  %v1785_v20 = vand.u32 4294901760, %v1784_v42  ;;  %9868 = vmatprep.subr.bf16.mxu1 %v16855_v53  ;;  %v1792_v3 = vand.u32 4294901760, %v1791_v24  ;;  %v1374_v12 = vand.u32 4294901760, %v1373_v63  ;;  %v912_v42 = vld [vmem:[%s16167_s4 + $0xa0] sm:$0xff] }
 0x23a   :  { %v1805_v9 = vsub.f32 %v11848_v46, %v16919_v52  ;;  %v1798_v19 = vsub.f32 %v11859_v34, %v16920_v37  ;;  %v16921_v1 = vand.u32 4294901760, %v12059_v47  ;;  %v915_v52 = vld [vmem:[%s16167_s4 + $0xb8] sm:$0xff]  ;;  %v12126_v24 = vsub.f32 %v1145_v7, %v12098_v15 }
 0x23b   :  { %1360 = vmatmul.mubr.f32.gmra.mrb[8].mxu1 %v1359_v6  ;;  %v1383_v13 = vand.u32 4294901760, %v1382_v21  ;;  %v12128_v43 = vand.u32 4294901760, %v1148_v25  ;;  %v16924_v40 = vand.u32 4294901760, %v12063_v8  ;;  %v12138_v21 = vsub.f32 %v910_v23, %v12105_v49  ;;  %v917_v23 = vld [vmem:[%s16167_s4 + $0xc8] sm:$0xff] }
 0x23c   :  { %v1388_v39 = vsub.f32 %v12059_v47, %v16921_v1  ;;  %16922 = vst [vmem:[#allocation63_spill] sm:$0xff] %v12126_v24  ;;  %9870 = vmatpush1.bf16.msra.mxu1 %v9869_v28  ;;  %1369 = vmatprep.mubr.f32.mxu1 %v1368_v16  ;;  %v16925_v1 = vand.u32 4294901760, %v12069_v60  ;;  %v1806_v37 = vand.u32 4294901760, %v1805_v9  ;;  %v1799_v7 = vand.u32 4294901760, %v1798_v19 }
 0x23d   :  { %16923 = vst [vmem:[#allocation64_spill] sm:$0xff] %v12128_v43  ;;  %v1397_v63 = vsub.f32 %v12063_v8, %v16924_v40  ;;  %16926 = vst [vmem:[#allocation65_spill] sm:$0xff] %v12138_v21  ;;  %9871 = vmatprep.subr.bf16.mxu1 %v16855_v53  ;;  %v12141_v15 = vand.u32 4294901760, %v912_v42  ;;  %v1151_v16 = vsel %vm1116_vm0, %v915_v52, 0  ;;  %v16928_v28 = vand.u32 4294901760, %v11864_v14 }
 0x23e   :  { %v1403_v47 = vsub.f32 %v12069_v60, %v16925_v1  ;;  %v16929_v8 = vand.u32 4294901760, %v11869_v22  ;;  %v9872_v6 = vpack.c.bf16 %v1792_v3, %v1785_v20  ;;  %v1389_v19 = vand.u32 4294901760, %v1388_v39  ;;  %v914_v39 = vld [vmem:[%s16167_s4 + $0xb0] sm:$0xff] }
 0x23f   :  { %16927 = vst [vmem:[#allocation66_spill] sm:$0xff] %v12141_v15  ;;  %v1819_v40 = vsub.f32 %v11864_v14, %v16928_v28  ;;  %1375 = vmatmul.mubr.f32.gmra.mrb[10].mxu1 %v1374_v12  ;;  %v16930_v9 = vand.u32 4294901760, %v12096_v62  ;;  %v12158_v49 = vsub.f32 %v1148_v25, %v12128_v43  ;;  %v1398_v28 = vand.u32 4294901760, %v1397_v63  ;;  %v919_v63 = vld [vmem:[%s16167_s4 + $0xd8] sm:$0xff] }
 0x240   :  { %v1812_v1 = vsub.f32 %v11869_v22, %v16929_v8  ;;  %9873 = vmatpush1.bf16.msra.mxu1 %v9872_v6  ;;  %1384 = vmatprep.mubr.f32.mxu1 %v1383_v13  ;;  %v1404_v8 = vand.u32 4294901760, %v1403_v47  ;;  %v16932_v20 = vand.u32 4294901760, %v12103_v38  ;;  %v12163_v57 = vand.u32 4294901760, %v1151_v16  ;;  %v916_v13 = vld [vmem:[%s16167_s4 + $0xc0] sm:$0xff] }
 0x241   :  { %v1412_v60 = vsub.f32 %v12096_v62, %v16930_v9  ;;  %16931 = vst [vmem:[#allocation67_spill] sm:$0xff] %v12158_v49  ;;  %9874 = vmatprep.subr.bf16.mxu1 %v16855_v53  ;;  %v9875_v12 = vpack.c.bf16 %v1806_v37, %v1799_v7  ;;  %v12171_v6 = vsub.f32 %v912_v42, %v12141_v15  ;;  %v1154_v47 = vsel %vm1116_vm0, %v917_v23, 0 }
 0x242   :  { %v1418_v3 = vsub.f32 %v12103_v38, %v16932_v20  ;;  %16933 = vst [vmem:[#allocation68_spill] sm:$0xff] %v12163_v57  ;;  %v1820_v9 = vand.u32 4294901760, %v1819_v40  ;;  %v1813_v20 = vand.u32 4294901760, %v1812_v1  ;;  %v16935_v52 = vand.u32 4294901760, %v11876_v32 }
 0x243   :  { %16934 = vst [vmem:[#allocation69_spill] sm:$0xff] %v12171_v6  ;;  %v16936_v7 = vand.u32 4294901760, %v11878_v61  ;;  %1390 = vmatmul.mubr.f32.gmra.mrb[12].mxu1 %v1389_v19  ;;  %v1413_v23 = vand.u32 4294901760, %v1412_v60  ;;  %v16937_v25 = vand.u32 4294901760, %v12126_v24  ;;  %v12190_v15 = vand.u32 4294901760, %v914_v39 }
 0x244   :  { %v1833_v37 = vsub.f32 %v11876_v32, %v16935_v52  ;;  %9876 = vmatpush1.bf16.msra.mxu1 %v9875_v12  ;;  %1399 = vmatprep.mubr.f32.mxu1 %v1398_v28  ;;  %v12193_v40 = vsub.f32 %v1151_v16, %v12163_v57  ;;  %v12195_v1 = vand.u32 4294901760, %v1154_v47  ;;  %v12197_v52 = vand.u32 4294901760, %v916_v13 }
 0x245   :  { %v1826_v42 = vsub.f32 %v11878_v61, %v16936_v7  ;;  %v1427_v38 = vsub.f32 %v12126_v24, %v16937_v25  ;;  %16938 = vst [vmem:[#allocation70_spill] sm:$0xff] %v12190_v15  ;;  %v1157_v19 = vsel %vm1116_vm0, %v919_v63, 0  ;;  %v16942_v60 = vand.u32 4294901760, %v11880_v17  ;;  %9877 = vmatprep.subr.bf16.mxu1 %v16855_v53  ;;  %v921_v24 = vld [vmem:[%s16167_s4 + $0xe8] sm:$0xff] }
 0x246   :  { %16939 = vst [vmem:[#allocation71_spill] sm:$0xff] %v12193_v40  ;;  %16940 = vst [vmem:[#allocation72_spill] sm:$0xff] %v12195_v1  ;;  %v16943_v25 = vand.u32 4294901760, %v11884_v18  ;;  %v1419_v28 = vand.u32 4294901760, %v1418_v3  ;;  %v16944_v16 = vand.u32 4294901760, %v12138_v21  ;;  %v1834_v63 = vand.u32 4294901760, %v1833_v37 }
 0x247   :  { %16941 = vst [vmem:[#allocation73_spill] sm:$0xff] %v12197_v52  ;;  %v1847_v7 = vsub.f32 %v11880_v17, %v16942_v60  ;;  %v1827_v57 = vand.u32 4294901760, %v1826_v42  ;;  %v9878_v43 = vpack.c.bf16 %v1820_v9, %v1813_v20  ;;  %1405 = vmatmul.mubr.f32.gmra.mrb[14].mxu1 %v1404_v8  ;;  %v16945_v3 = vand.u32 4294901760, %v12158_v49 }
 0x248   :  { %v1840_v62 = vsub.f32 %v11884_v18, %v16943_v25  ;;  %v1433_v12 = vsub.f32 %v12138_v21, %v16944_v16  ;;  %v918_v25 = vld [vmem:[%s16167_s4 + $0xd0] sm:$0xff]  ;;  %v1428_v18 = vand.u32 4294901760, %v1427_v38  ;;  %v12221_v16 = vsub.f32 %v914_v39, %v12190_v15  ;;  %1414 = vmatprep.mubr.f32.mxu1 %v1413_v23 }
 0x249   :  { %v1442_v17 = vsub.f32 %v12158_v49, %v16945_v3  ;;  %v12223_v21 = vand.u32 4294901760, %v1157_v19  ;;  %9879 = vmatpush1.bf16.msra.mxu1 %v9878_v43  ;;  %v12227_v20 = vsub.f32 %v1154_v47, %v12195_v1  ;;  %v12230_v37 = vsub.f32 %v916_v13, %v12197_v52 }
 0x24a   :  { %16946 = vst [vmem:[#allocation74_spill] sm:$0xff] %v12221_v16  ;;  %v1160_v38 = vsel %vm1116_vm0, %v921_v24, 0  ;;  %v1848_v8 = vand.u32 4294901760, %v1847_v7  ;;  %v1841_v42 = vand.u32 4294901760, %v1840_v62  ;;  %9880 = vmatprep.subr.bf16.mxu1 %v16855_v53  ;;  %v12234_v39 = vand.u32 4294901760, %v918_v25  ;;  %v920_v24 = vld [vmem:[%s16167_s4 + $0xe0] sm:$0xff] }
 0x24b   :  { %16947 = vst [vmem:[#allocation75_spill] sm:$0xff] %v12223_v21  ;;  %16948 = vst [vmem:[#allocation76_spill] sm:$0xff] %v12227_v20  ;;  %v16951_v3 = vand.u32 4294901760, %v11886_v48  ;;  %v16952_v23 = vand.u32 4294901760, %v11888_v45  ;;  %v9881_v9 = vpack.c.bf16 %v1834_v63, %v1827_v57  ;;  %v1434_v60 = vand.u32 4294901760, %v1433_v12  ;;  %v923_v62 = vld [vmem:[%s16167_s4 + $0xf8] sm:$0xff]  ;;  %1420 = vmatmul.mubr.f32.gmra.mrb[16].mxu1 %v1419_v28 }
 0x24c   :  { %16949 = vst [vmem:[#allocation77_spill] sm:$0xff] %v12230_v37  ;;  %16950 = vst [vmem:[#allocation78_spill] sm:$0xff] %v12234_v39  ;;  %v16953_v13 = vand.u32 4294901760, %v12171_v6  ;;  %v12253_v49 = vsub.f32 %v1157_v19, %v12223_v21  ;;  %v12255_v57 = vand.u32 4294901760, %v1160_v38  ;;  %1429 = vmatprep.mubr.f32.mxu1 %v1428_v18  ;;  %v1443_v12 = vand.u32 4294901760, %v1442_v17 }
 0x24d   :  { %v1861_v43 = vsub.f32 %v11886_v48, %v16951_v3  ;;  %v1854_v47 = vsub.f32 %v11888_v45, %v16952_v23  ;;  %9882 = vmatpush1.bf16.msra.mxu1 %v9881_v9  ;;  %v16956_v63 = vand.u32 4294901760, %v12193_v40  ;;  %v12264_v3 = vsub.f32 %v918_v25, %v12234_v39 }
 0x24e   :  { %v1448_v7 = vsub.f32 %v12171_v6, %v16953_v13  ;;  %16954 = vst [vmem:[#allocation79_spill] sm:$0xff] %v12253_v49  ;;  %16955 = vst [vmem:[#allocation80_spill] sm:$0xff] %v12255_v57  ;;  %9883 = vmatprep.subr.bf16.mxu1 %v16855_v53  ;;  %v9884_v13 = vpack.c.bf16 %v1848_v8, %v1841_v42  ;;  %v12266_v19 = vand.u32 4294901760, %v920_v24  ;;  %v1163_v9 = vsel %vm1116_vm0, %v923_v62, 0  ;;  %v925_v8 = vld [vmem:[%s16167_s4 + $0x108] sm:$0xff] }
 0x24f   :  { %v1457_v23 = vsub.f32 %v12193_v40, %v16956_v63  ;;  %16957 = vst [vmem:[#allocation81_spill] sm:$0xff] %v12264_v3  ;;  %v1862_v18 = vand.u32 4294901760, %v1861_v43  ;;  %v1855_v17 = vand.u32 4294901760, %v1854_v47  ;;  %v16959_v6 = vand.u32 4294901760, %v11898_v29  ;;  %1435 = vmatmul.mubr.f32.gmra.mrb[18].mxu1 %v1434_v60  ;;  %v922_v60 = vld [vmem:[%s16167_s4 + $0xf0] sm:$0xff] }
 0x250   :  { %16958 = vst [vmem:[#allocation82_spill] sm:$0xff] %v12266_v19  ;;  %v16960_v28 = vand.u32 4294901760, %v11903_v31  ;;  %v1449_v25 = vand.u32 4294901760, %v1448_v7  ;;  %v16961_v42 = vand.u32 4294901760, %v12221_v16  ;;  %v12283_v47 = vsub.f32 %v1160_v38, %v12255_v57  ;;  %1444 = vmatprep.mubr.f32.mxu1 %v1443_v12 }
 0x251   :  { %v1875_v63 = vsub.f32 %v11898_v29, %v16959_v6  ;;  %9885 = vmatpush1.bf16.msra.mxu1 %v9884_v13  ;;  %v1458_v6 = vand.u32 4294901760, %v1457_v23  ;;  %v12288_v39 = vand.u32 4294901760, %v1163_v9  ;;  %v16965_v7 = vand.u32 4294901760, %v12230_v37 }
 0x252   :  { %v1868_v52 = vsub.f32 %v11903_v31, %v16960_v28  ;;  %v1463_v62 = vsub.f32 %v12221_v16, %v16961_v42  ;;  %16962 = vst [vmem:[#allocation83_spill] sm:$0xff] %v12283_v47  ;;  %v16963_v28 = vand.u32 4294901760, %v12227_v20  ;;  %9886 = vmatprep.subr.bf16.mxu1 %v16855_v53  ;;  %v1166_v12 = vsel %vm1116_vm0, %v925_v8, 0 }
 0x253   :  { %16964 = vst [vmem:[#allocation84_spill] sm:$0xff] %v12288_v39  ;;  %v1478_v38 = vsub.f32 %v12230_v37, %v16965_v7  ;;  %v1876_v23 = vand.u32 4294901760, %v1875_v63  ;;  %v9887_v43 = vpack.c.bf16 %v1862_v18, %v1855_v17  ;;  %1450 = vmatmul.mubr.f32.gmra.mrb[20].mxu1 %v1449_v25  ;;  %v16967_v57 = vand.u32 4294901760, %v12253_v49  ;;  %v924_v17 = vld [vmem:[%s16167_s4 + $0x100] sm:$0xff]  ;;  %v929_v63 = vld [vmem:[%s16167_s4 + $0x128] sm:$0xff] }
 0x254   :  { %v1472_v40 = vsub.f32 %v12227_v20, %v16963_v28  ;;  %v1869_v42 = vand.u32 4294901760, %v1868_v52  ;;  %v12300_v28 = vsub.f32 %v920_v24, %v12266_v19  ;;  %v927_v20 = vld [vmem:[%s16167_s4 + $0x118] sm:$0xff]  ;;  %v1464_v16 = vand.u32 4294901760, %v1463_v62  ;;  %1459 = vmatprep.mubr.f32.mxu1 %v1458_v6 }
 0x255   :  { %v1487_v7 = vsub.f32 %v12253_v49, %v16967_v57  ;;  %v16317_v13 = vand.u32 4294901760, %v12283_v47  ;;  %v12309_v37 = vand.u32 4294901760, %v922_v60  ;;  %9888 = vmatpush1.bf16.msra.mxu1 %v9887_v43  ;;  %v12312_v24 = vsub.f32 %v1163_v9, %v12288_v39 }
 0x256   :  { %16966 = vst [vmem:[#allocation85_spill] sm:$0xff] %v12300_v28  ;;  %v1473_v52 = vand.u32 4294901760, %v1472_v40  ;;  %v12314_v18 = vand.u32 4294901760, %v1166_v12  ;;  %9889 = vmatprep.subr.bf16.mxu1 %v16855_v53  ;;  %v1169_v57 = vsel %vm1116_vm0, %v927_v20, 0  ;;  %v9890_v8 = vpack.c.bf16 %v1876_v23, %v1869_v42 }
 0x257   :  { %16968 = vst [vmem:[#allocation86_spill] sm:$0xff] %v12309_v37  ;;  %16969 = vst [vmem:[#allocation87_spill] sm:$0xff] %v12312_v24  ;;  %v1479_v25 = vand.u32 4294901760, %v1478_v38  ;;  %v16971_v40 = vand.u32 4294901760, %v12264_v3  ;;  %v16320_v62 = vand.u32 4294901760, %v12300_v28  ;;  %1465 = vmatmul.mubr.f32.gmra.mrb[22].mxu1 %v1464_v16  ;;  %v1488_v43 = vand.u32 4294901760, %v1487_v7 }
 0x258   :  { %16970 = vst [vmem:[#allocation88_spill] sm:$0xff] %v12314_v18  ;;  %v1502_v6 = vsub.f32 %v12283_v47, %v16317_v13  ;;  %v12332_v20 = vsub.f32 %v922_v60, %v12309_v37  ;;  %v12334_v49 = vand.u32 4294901760, %v924_v17  ;;  %v926_v38 = vld [vmem:[%s16167_s4 + $0x110] sm:$0xff]  ;;  %1474 = vmatprep.mubr.f32.mxu1 %v1473_v52  ;;  %v12341_v16 = vsub.f32 %v1166_v12, %v12314_v18  ;;  %v931_v60 = vld [vmem:[%s16167_s4 + $0x138] sm:$0xff]  ;;  %v928_v47 = vld [vmem:[%s16167_s4 + $0x120] sm:$0xff] }
 0x259   :  { %v1493_v9 = vsub.f32 %v12264_v3, %v16971_v40  ;;  %9891 = vmatpush1.bf16.msra.mxu1 %v9890_v8  ;;  %v12343_v42 = vand.u32 4294901760, %v1169_v57  ;;  %v1172_v7 = vsel %vm1116_vm0, %v929_v63, 0  ;;  %v1508_v52 = vsub.f32 %v12300_v28, %v16320_v62 }
 0x25a   :  { %16972 = vst [vmem:[#allocation89_spill] sm:$0xff] %v12332_v20  ;;  %16973 = vst [vmem:[#allocation90_spill] sm:$0xff] %v12334_v49  ;;  %9892 = vmatprep.subr.bf16.mxu1 %v16855_v53  ;;  %v12353_v8 = vand.u32 4294901760, %v926_v38  ;;  %v1503_v12 = vand.u32 4294901760, %v1502_v6  ;;  %v12357_v23 = vsub.f32 %v924_v17, %v12334_v49  ;;  %v12359_v63 = vand.u32 4294901760, %v1172_v7 }
 0x25b   :  { %16974 = vst [vmem:[#allocation91_spill] sm:$0xff] %v12341_v16  ;;  %16975 = vst [vmem:[#allocation92_spill] sm:$0xff] %v12343_v42  ;;  %v1494_v40 = vand.u32 4294901760, %v1493_v9  ;;  %1480 = vmatmul.mubr.f32.gmra.mrb[24].mxu1 %v1479_v25  ;;  %v16979_v9 = vand.u32 4294901760, %v12312_v24  ;;  %v12369_v25 = vsub.f32 %v1169_v57, %v12343_v42  ;;  %v1175_v6 = vsel %vm1116_vm0, %v931_v60, 0 }
 0x25c   :  { %16976 = vst [vmem:[#allocation93_spill] sm:$0xff] %v12353_v8  ;;  %16977 = vst [vmem:[#allocation94_spill] sm:$0xff] %v12357_v23  ;;  %1489 = vmatprep.mubr.f32.mxu1 %v1488_v43  ;;  %v1509_v17 = vand.u32 4294901760, %v1508_v52  ;;  %v12373_v13 = vsub.f32 %v926_v38, %v12353_v8  ;;  %v12375_v3 = vand.u32 4294901760, %v928_v47  ;;  %v933_v43 = vld [vmem:[%s16167_s4 + $0x148] sm:$0xff]  ;;  %v12387_v60 = vand.u32 4294901760, %v1175_v6 }
 0x25d   :  { %16978 = vst [vmem:[#allocation95_spill] sm:$0xff] %v12359_v63  ;;  %v1517_v62 = vsub.f32 %v12312_v24, %v16979_v9  ;;  %16980 = vst [vmem:[#allocation96_spill] sm:$0xff] %v12369_v25  ;;  %v16983_v9 = vand.u32 4294901760, %v12332_v20  ;;  %v12385_v24 = vsub.f32 %v1172_v7, %v12359_v63  ;;  %v930_v38 = vld [vmem:[%s16167_s4 + $0x130] sm:$0xff]  ;;  %v16986_v8 = vand.u32 4294901760, %v12341_v16 }
 0x25e   :  { %16981 = vst [vmem:[#allocation97_spill] sm:$0xff] %v12373_v13  ;;  %16982 = vst [vmem:[#allocation98_spill] sm:$0xff] %v12375_v3  ;;  %v12399_v7 = vsub.f32 %v928_v47, %v12375_v3  ;;  %v16989_v63 = vand.u32 4294901760, %v12357_v23  ;;  %v16991_v57 = vand.u32 4294901760, %v12369_v25 }
 0x25f   :  { %1495 = vmatmul.mubr.f32.gmra.mrb[26].mxu1 %v1494_v40  ;;  %v1523_v28 = vsub.f32 %v12332_v20, %v16983_v9  ;;  %16984 = vst [vmem:[#allocation99_spill] sm:$0xff] %v12385_v24  ;;  %16985 = vst [vmem:[#allocation100_spill] sm:$0xff] %v12387_v60  ;;  %v1518_v52 = vand.u32 4294901760, %v1517_v62  ;;  %v1532_v40 = vsub.f32 %v12341_v16, %v16986_v8  ;;  %v1178_v9 = vsel %vm1116_vm0, %v933_v43, 0 }
 0x260   :  { %1504 = vmatprep.mubr.f32.mxu1 %v1503_v12  ;;  %16987 = vst [vmem:[#allocation101_spill] sm:$0xff] %v12399_v7  ;;  %v12401_v20 = vand.u32 4294901760, %v930_v38  ;;  %v935_v12 = vld [vmem:[%s16167_s4 + $0x158] sm:$0xff]  ;;  %v1538_v8 = vsub.f32 %v12357_v23, %v16989_v63  ;;  %v12411_v43 = vsub.f32 %v1175_v6, %v12387_v60  ;;  %v1547_v16 = vsub.f32 %v12369_v25, %v16991_v57  ;;  %v937_v57 = vld [vmem:[%s16167_s4 + $0x168] sm:$0xff] }
 0x261   :  { %v1524_v62 = vand.u32 4294901760, %v1523_v28  ;;  %v1533_v47 = vand.u32 4294901760, %v1532_v40  ;;  %v12416_v3 = vand.u32 4294901760, %v1178_v9  ;;  %v932_v28 = vld [vmem:[%s16167_s4 + $0x140] sm:$0xff]  ;;  %v16993_v63 = vand.u32 4294901760, %v12373_v13 }
 0x262   :  { %16988 = vst [vmem:[#allocation102_spill] sm:$0xff] %v12401_v20  ;;  %16990 = vst [vmem:[#allocation103_spill] sm:$0xff] %v12411_v43  ;;  %v1539_v40 = vand.u32 4294901760, %v1538_v8  ;;  %v16995_v25 = vand.u32 4294901760, %v12385_v24  ;;  %v12436_v60 = vand.u32 4294901760, %v932_v28  ;;  %v1184_v8 = vsel %vm1116_vm0, %v937_v57, 0 }
 0x263   :  { %1510 = vmatmul.mubr.f32.gmra.mrb[28].mxu1 %v1509_v17  ;;  %16992 = vst [vmem:[#allocation104_spill] sm:$0xff] %v12416_v3  ;;  %v1181_v17 = vsel %vm1116_vm0, %v935_v12, 0  ;;  %v1553_v42 = vsub.f32 %v12373_v13, %v16993_v63  ;;  %v1548_v63 = vand.u32 4294901760, %v1547_v16  ;;  %v12439_v6 = vsub.f32 %v1178_v9, %v12416_v3 }
 0x264   :  { %1519 = vmatprep.mubr.f32.mxu1 %v1518_v52  ;;  %v12427_v52 = vsub.f32 %v930_v38, %v12401_v20  ;;  %v1562_v23 = vsub.f32 %v12385_v24, %v16995_v25  ;;  %16996 = vst [vmem:[#allocation106_spill] sm:$0xff] %v12436_v60  ;;  %v12441_v38 = vand.u32 4294901760, %v1181_v17  ;;  %v939_v25 = vld [vmem:[%s16167_s4 + $0x178] sm:$0xff]  ;;  %v16999_v24 = vand.u32 4294901760, %v12399_v7 }
 0x265   :  { %16997 = vst [vmem:[#allocation107_spill] sm:$0xff] %v12439_v6  ;;  %v1554_v12 = vand.u32 4294901760, %v1553_v42  ;;  %v17000_v13 = vand.u32 4294901760, %v12411_v43  ;;  %v12458_v20 = vsub.f32 %v932_v28, %v12436_v60  ;;  %v936_v42 = vld [vmem:[%s16167_s4 + $0x160] sm:$0xff]  ;;  %v941_v28 = vld [vmem:[%s16167_s4 + $0x188] sm:$0xff]  ;;  %v17009_v60 = vand.u32 4294901760, %v12439_v6 }
 0x266   :  { %16994 = vst [vmem:[#allocation105_spill] sm:$0xff] %v12427_v52  ;;  %16998 = vst [vmem:[#allocation108_spill] sm:$0xff] %v12441_v38  ;;  %v1568_v16 = vsub.f32 %v12399_v7, %v16999_v24  ;;  %v12467_v9 = vsub.f32 %v1181_v17, %v12441_v38  ;;  %v17006_v7 = vand.u32 4294901760, %v12427_v52 }
 0x267   :  { %1525 = vmatmul.mubr.f32.gmra.mrb[30].mxu1 %v1524_v62  ;;  %v934_v62 = vld [vmem:[%s16167_s4 + $0x150] sm:$0xff]  ;;  %v1577_v3 = vsub.f32 %v12411_v43, %v17000_v13  ;;  %17001 = vst [vmem:[#allocation109_spill] sm:$0xff] %v12458_v20  ;;  %v12472_v43 = vand.u32 4294901760, %v936_v42 }
 0x268   :  { %1534 = vmatprep.mubr.f32.mxu1 %v1533_v47  ;;  %v1563_v47 = vand.u32 4294901760, %v1562_v23  ;;  %v12460_v57 = vand.u32 4294901760, %v934_v62  ;;  %17003 = vst [vmem:[#allocation111_spill] sm:$0xff] %v12467_v9  ;;  %v12469_v23 = vand.u32 4294901760, %v1184_v8  ;;  %v1569_v13 = vand.u32 4294901760, %v1568_v16 }
 0x269   :  { %17005 = vst [vmem:[#allocation113_spill] sm:$0xff] %v12472_v43  ;;  %v1578_v16 = vand.u32 4294901760, %v1577_v3  ;;  %v12498_v24 = vsub.f32 %v936_v42, %v12472_v43  ;;  %v943_v3 = vld [vmem:[%s16167_s4 + $0x198] sm:$0xff] }
 0x26a   :  { %17002 = vst [vmem:[#allocation110_spill] sm:$0xff] %v12460_v57  ;;  %17004 = vst [vmem:[#allocation112_spill] sm:$0xff] %v12469_v23  ;;  %v12482_v17 = vsub.f32 %v934_v62, %v12460_v57  ;;  %v1190_v62 = vsel %vm1116_vm0, %v941_v28, 0  ;;  %v17015_v28 = vand.u32 4294901760, %v12467_v9 }
 0x26b   :  { %1540 = vmatmul.mubr.f32.gmra.mrb[32].mxu1 %v1539_v40  ;;  %v1187_v40 = vsel %vm1116_vm0, %v939_v25, 0  ;;  %v938_v25 = vld [vmem:[%s16167_s4 + $0x170] sm:$0xff]  ;;  %17011 = vst [vmem:[#allocation117_spill] sm:$0xff] %v12498_v24  ;;  %v12516_v57 = vand.u32 4294901760, %v1190_v62 }
 0x26c   :  { %1549 = vmatprep.mubr.f32.mxu1 %v1548_v63  ;;  %v1583_v63 = vsub.f32 %v12427_v52, %v17006_v7  ;;  %17007 = vst [vmem:[#allocation114_spill] sm:$0xff] %v12482_v17  ;;  %v12484_v38 = vand.u32 4294901760, %v1187_v40  ;;  %v12494_v7 = vsub.f32 %v1184_v8, %v12469_v23  ;;  %v12500_v52 = vand.u32 4294901760, %v938_v25 }
 0x26d   :  { %v16379_v8 = vand.u32 4294901760, %v12482_v17  ;;  %v1607_v43 = vsub.f32 %v12467_v9, %v17015_v28  ;;  %17016 = vst [vmem:[#allocation120_spill] sm:$0xff] %v12516_v57 }
 0x26e   :  { %17008 = vst [vmem:[#allocation115_spill] sm:$0xff] %v12484_v38  ;;  %17010 = vst [vmem:[#allocation116_spill] sm:$0xff] %v12494_v7 }
 0x26f   :  { %1555 = vmatmul.mubr.f32.gmra.mrb[34].mxu1 %v1554_v12  ;;  %v1592_v12 = vsub.f32 %v12439_v6, %v17009_v60  ;;  %17012 = vst [vmem:[#allocation118_spill] sm:$0xff] %v12500_v52  ;;  %v17013_v60 = vand.u32 4294901760, %v12458_v20  ;;  %v12510_v6 = vsub.f32 %v1187_v40, %v12484_v38  ;;  %v12524_v40 = vsub.f32 %v938_v25, %v12500_v52 }
 0x270   :  { %1564 = vmatprep.mubr.f32.mxu1 %v1563_v47  ;;  %v1584_v47 = vand.u32 4294901760, %v1583_v63  ;;  %v1193_v63 = vsel %vm1116_vm0, %v943_v3, 0  ;;  %v1613_v28 = vsub.f32 %v12482_v17, %v16379_v8  ;;  %v1608_v3 = vand.u32 4294901760, %v1607_v43 }
 0x271   :  { %v1598_v49 = vsub.f32 %v12458_v20, %v17013_v60  ;;  %17014 = vst [vmem:[#allocation119_spill] sm:$0xff] %v12510_v6  ;;  %v1593_v42 = vand.u32 4294901760, %v1592_v12  ;;  %17017 = vst [vmem:[#allocation121_spill] sm:$0xff] %v12524_v40  ;;  %v16388_v23 = vand.u32 4294901760, %v12510_v6  ;;  %v17019_v60 = vand.u32 4294901760, %v12494_v7 }
 0x272   :  { %v12539_v20 = vsub.f32 %v1190_v62, %v12516_v57  ;;  %v12541_v52 = vand.u32 4294901760, %v1193_v63  ;;  %v17022_v8 = vand.u32 4294901760, %v12498_v24  ;;  %v1614_v62 = vand.u32 4294901760, %v1613_v28 }
 0x273   :  { %1570 = vmatmul.mubr.f32.gmra.mrb[36].mxu1 %v1569_v13  ;;  %v940_v13 = vld [vmem:[%s16167_s4 + $0x180] sm:$0xff]  ;;  %v1599_v12 = vand.u32 4294901760, %v1598_v49  ;;  %v1622_v25 = vsub.f32 %v12494_v7, %v17019_v60  ;;  %v942_v49 = vld [vmem:[%s16167_s4 + $0x190] sm:$0xff]  ;;  %v947_v60 = vld [vmem:[%s16167_s4 + $0x1b8] sm:$0xff]  ;;  %v1637_v7 = vsub.f32 %v12510_v6, %v16388_v23 }
 0x274   :  { %1579 = vmatprep.mubr.f32.mxu1 %v1578_v16  ;;  %v945_v16 = vld [vmem:[%s16167_s4 + $0x1a8] sm:$0xff]  ;;  %v12533_v9 = vand.u32 4294901760, %v940_v13  ;;  %17020 = vst [vmem:[#allocation123_spill] sm:$0xff] %v12539_v20  ;;  %17021 = vst [vmem:[#allocation124_spill] sm:$0xff] %v12541_v52  ;;  %v12564_v43 = vsub.f32 %v1193_v63, %v12541_v52  ;;  %v1199_v28 = vsel %vm1116_vm0, %v947_v60, 0  ;;  %v17030_v52 = vand.u32 4294901760, %v12539_v20 }
 0x275   :  { %v1623_v57 = vand.u32 4294901760, %v1622_v25 }
 0x276   :  { %17018 = vst [vmem:[#allocation122_spill] sm:$0xff] %v12533_v9  ;;  %v12558_v17 = vsub.f32 %v940_v13, %v12533_v9  ;;  %17025 = vst [vmem:[#allocation127_spill] sm:$0xff] %v12564_v43  ;;  %v17027_v13 = vand.u32 4294901760, %v12524_v40  ;;  %v1652_v9 = vsub.f32 %v12539_v20, %v17030_v52  ;;  %v17035_v20 = vand.u32 4294901760, %v12564_v43 }
 0x277   :  { %1585 = vmatmul.mubr.f32.gmra.mrb[38].mxu1 %v1584_v47  ;;  %v1196_v47 = vsel %vm1116_vm0, %v945_v16, 0  ;;  %v12560_v16 = vand.u32 4294901760, %v942_v49 }
 0x278   :  { %1594 = vmatprep.mubr.f32.mxu1 %v1593_v42  ;;  %v1628_v42 = vsub.f32 %v12498_v24, %v17022_v8  ;;  %17023 = vst [vmem:[#allocation125_spill] sm:$0xff] %v12558_v17  ;;  %v12566_v24 = vand.u32 4294901760, %v1196_v47  ;;  %v1643_v6 = vsub.f32 %v12524_v40, %v17027_v13  ;;  %v16399_v25 = vand.u32 4294901760, %v12558_v17 }
 0x279   :  { %17024 = vst [vmem:[#allocation126_spill] sm:$0xff] %v12560_v16  ;;  %v12577_v63 = vsub.f32 %v942_v49, %v12560_v16  ;;  %v12588_v13 = vand.u32 4294901760, %v1199_v28  ;;  %v1667_v40 = vsub.f32 %v12564_v43, %v17035_v20 }
 0x27a   :  { %17026 = vst [vmem:[#allocation128_spill] sm:$0xff] %v12566_v24  ;;  %v1629_v23 = vand.u32 4294901760, %v1628_v42  ;;  %v12586_v60 = vsub.f32 %v1196_v47, %v12566_v24  ;;  %v1644_v49 = vand.u32 4294901760, %v1643_v6  ;;  %v1653_v47 = vand.u32 4294901760, %v1652_v9 }
 0x27b   :  { %1600 = vmatmul.mubr.f32.gmra.mrb[40].mxu1 %v1599_v12  ;;  %v944_v12 = vld [vmem:[%s16167_s4 + $0x1a0] sm:$0xff]  ;;  %17028 = vst [vmem:[#allocation129_spill] sm:$0xff] %v12577_v63  ;;  %17032 = vst [vmem:[#allocation132_spill] sm:$0xff] %v12588_v13  ;;  %v1668_v9 = vand.u32 4294901760, %v1667_v40 }
 0x27c   :  { %1609 = vmatprep.mubr.f32.mxu1 %v1608_v3  ;;  %v1638_v3 = vand.u32 4294901760, %v1637_v7  ;;  %v12579_v8 = vand.u32 4294901760, %v944_v12  ;;  %17031 = vst [vmem:[#allocation131_spill] sm:$0xff] %v12586_v60  ;;  %v946_v7 = vld [vmem:[%s16167_s4 + $0x1b0] sm:$0xff]  ;;  %v16408_v6 = vand.u32 4294901760, %v12586_v60 }
 0x27d   :  { %v12600_v42 = vand.u32 4294901760, %v946_v7 }
 0x27e   :  { %17029 = vst [vmem:[#allocation130_spill] sm:$0xff] %v12579_v8  ;;  %v12598_v52 = vsub.f32 %v944_v12, %v12579_v8  ;;  %v1682_v20 = vsub.f32 %v12586_v60, %v16408_v6  ;;  %v17075_v6 = vld [vmem:[#allocation110_spill] sm:$0xff] }
 0x27f   :  { %1615 = vmatmul.mubr.f32.gmra.mrb[42].mxu1 %v1614_v62  ;;  %v16402_v62 = vand.u32 4294901760, %v12577_v63  ;;  %17034 = vst [vmem:[#allocation134_spill] sm:$0xff] %v12600_v42 }
 0x280   :  { %1624 = vmatprep.mubr.f32.mxu1 %v1623_v57  ;;  %v1658_v57 = vsub.f32 %v12558_v17, %v16399_v25  ;;  %17033 = vst [vmem:[#allocation133_spill] sm:$0xff] %v12598_v52  ;;  %v16407_v17 = vand.u32 4294901760, %v12598_v52 }
 0x281   :  { %v1673_v12 = vsub.f32 %v12577_v63, %v16402_v62  ;;  %v1683_v63 = vand.u32 4294901760, %v1682_v20  ;;  %v9896_v20 = vpack.c.bf16 %v11690_v10, %v11685_v26 }
 0x282   :  { %v1659_v25 = vand.u32 4294901760, %v1658_v57  ;;  %v1688_v57 = vsub.f32 %v12598_v52, %v16407_v17  ;;  %v17074_v17 = vld [vmem:[#allocation108_spill] sm:$0xff] }
 0x283   :  { %1630 = vmatmul.mubr.f32.gmra.mrb[44].mxu1 %v1629_v23  ;;  %v12607_v23 = vsub.f32 %v1199_v28, %v12588_v13 }
 0x284   :  { %1639 = vmatprep.mubr.f32.mxu1 %v1638_v3  ;;  %v12614_v3 = vsub.f32 %v946_v7, %v12600_v42  ;;  %v1689_v7 = vand.u32 4294901760, %v1688_v57 }
 0x285   :  { %17036 = vst [vmem:[#allocation135_spill] sm:$0xff] %v12607_v23  ;;  %v16406_v28 = vand.u32 4294901760, %v12607_v23 }
 0x286   :  { %17037 = vst [vmem:[#allocation136_spill] sm:$0xff] %v12614_v3  ;;  %v16405_v62 = vand.u32 4294901760, %v12614_v3 }
 0x287   :  { %1645 = vmatmul.mubr.f32.gmra.mrb[46].mxu1 %v1644_v49  ;;  %v1674_v49 = vand.u32 4294901760, %v1673_v12  ;;  %v1697_v40 = vsub.f32 %v12607_v23, %v16406_v28  ;;  %v17073_v28 = vld [vmem:[#allocation106_spill] sm:$0xff] }
 0x288   :  { %1654 = vmatprep.mubr.f32.mxu1 %v1653_v47  ;;  %v1703_v47 = vsub.f32 %v12614_v3, %v16405_v62  ;;  %v17072_v62 = vld [vmem:[#allocation104_spill] sm:$0xff] }
 0x28a   :  { %v1704_v12 = vand.u32 4294901760, %v1703_v47  ;;  %v17043_v47 = vld [vmem:[#allocation41_spill] sm:$0xff] }
 0x28b   :  { %1660 = vmatmul.mubr.f32.gmra.mrb[48].mxu1 %v1659_v25  ;;  %v1698_v25 = vand.u32 4294901760, %v1697_v40  ;;  %v17041_v40 = vld [vmem:[#allocation30_spill] sm:$0xff] }
 0x28c   :  { %1669 = vmatprep.mubr.f32.mxu1 %v1668_v9  ;;  %v9893_v9 = vpack.c.bf16 %v11673_v58, %v11665_v2 }
 0x28f   :  { %1675 = vmatmul.mubr.f32.gmra.mrb[50].mxu1 %v1674_v49  ;;  %v17039_v49 = vld [vmem:[#allocation8_spill] sm:$0xff] }
 0x290   :  { %1684 = vmatprep.mubr.f32.mxu1 %v1683_v63  ;;  %v17038_v63 = vpack.c.bf16 %v11560_v59, %v11569_v30  ;;  %v17040_v57 = vpack.c.bf16 %v11584_v51, %v17039_v49  ;;  %v17042_v59 = vld [vmem:[#allocation37_spill] sm:$0xff]  ;;  %v9908_v30 = vpack.c.bf16 %v11999_v56, %v11993_v0  ;;  %v17044_v51 = vld [vmem:[#allocation42_spill] sm:$0xff] }
 0x291   :  { %v17050_v49 = vld [vmem:[#allocation58_spill] sm:$0xff] }
 0x293   :  { %1690 = vmatmul.mubr.f32.gmra.mrb[52].mxu1 %v1689_v7  ;;  %v9905_v7 = vpack.c.bf16 %v11815_v50, %v11807_v33 }
 0x294   :  { %1699 = vmatprep.mubr.f32.mxu1 %v1698_v25  ;;  %v17045_v25 = vld [vmem:[#allocation50_spill] sm:$0xff] }
 0x297   :  { %1705 = vmatmul.mubr.f32.gmra.mrb[54].mxu1 %v1704_v12  ;;  %v17046_v12 = vpack.c.bf16 %v11848_v46, %v11859_v34  ;;  %v17051_v46 = vpack.c.bf16 %v11876_v32, %v11878_v61  ;;  %v17052_v34 = vld [vmem:[#allocation60_spill] sm:$0xff]  ;;  %v17059_v32 = vpack.c.bf16 %v11886_v48, %v11888_v45  ;;  %v17063_v48 = vld [vmem:[#allocation78_spill] sm:$0xff] }
 0x298   :  { %1895 = vmatprep.mubr.f32.mxu1 %v11575_v54  ;;  %v17060_v61 = vld [vmem:[#allocation68_spill] sm:$0xff]  ;;  %v17143_v54 = vld [vmem:[#allocation125_spill] sm:$0xff] }
 0x299   :  { %v17064_v45 = vld [vmem:[#allocation80_spill] sm:$0xff] }
 0x29b   :  { %1897 = vmatmul.mubr.f32.vlgmr.msra.gmra.mrb[0].mxu1 %v11667_v4  ;;  %v17142_v4 = vld [vmem:[#allocation123_spill] sm:$0xff] }
 0x29c   :  { %9894 = vmatpush1.bf16.msra.mxu1 %v9893_v9  ;;  %1902 = vmatprep.mubr.f32.mxu1 %v11675_v5  ;;  %v17047_v9 = vld [vmem:[#allocation52_spill] sm:$0xff]  ;;  %v17140_v5 = vld [vmem:[#allocation119_spill] sm:$0xff] }
 0x29d   :  { %9895 = vmatprep.subr.bf16.mxu1 %v16855_v53 }
 0x29f   :  { %1904 = vmatmul.mubr.f32.gmra.mrb[2].mxu1 %v11677_v11  ;;  %v17139_v11 = vld [vmem:[#allocation117_spill] sm:$0xff] }
 0x2a0   :  { %9897 = vmatpush1.bf16.msra.mxu1 %v9896_v20  ;;  %1909 = vmatprep.mubr.f32.mxu1 %v11697_v36  ;;  %v17048_v20 = vld [vmem:[#allocation53_spill] sm:$0xff]  ;;  %v17137_v36 = vld [vmem:[#allocation114_spill] sm:$0xff] }
 0x2a1   :  { %9898 = vmatprep.subr.bf16.mxu1 %v16855_v53 }
 0x2a3   :  { %1911 = vmatmul.mubr.f32.gmra.mrb[4].mxu1 %v11725_v55  ;;  %v17136_v55 = vld [vmem:[#allocation111_spill] sm:$0xff] }
 0x2a4   :  { %9900 = vmatpush1.bf16.msra.mxu1 %v17038_v63  ;;  %1916 = vmatprep.mubr.f32.mxu1 %v11733_v41  ;;  %v17049_v63 = vpack.c.bf16 %v11864_v14, %v11869_v22  ;;  %v17057_v22 = vld [vmem:[#allocation64_spill] sm:$0xff]  ;;  %v17134_v41 = vld [vmem:[#allocation107_spill] sm:$0xff] }
 0x2a5   :  { %9901 = vmatprep.subr.bf16.mxu1 %v16855_v53 }
 0x2a7   :  { %1918 = vmatmul.mubr.f32.gmra.mrb[6].mxu1 %v11772_v27  ;;  %v17133_v27 = vld [vmem:[#allocation105_spill] sm:$0xff] }
 0x2a8   :  { %9903 = vmatpush1.bf16.msra.mxu1 %v17040_v57  ;;  %1923 = vmatprep.mubr.f32.mxu1 %v17041_v40  ;;  %v17053_v57 = vld [vmem:[#allocation62_spill] sm:$0xff]  ;;  %v17131_v40 = vld [vmem:[#allocation101_spill] sm:$0xff] }
 0x2a9   :  { %9904 = vmatprep.subr.bf16.mxu1 %v16855_v53 }
 0x2ab   :  { %1925 = vmatmul.mubr.f32.gmra.mrb[8].mxu1 %v11854_v44  ;;  %v17130_v44 = vld [vmem:[#allocation99_spill] sm:$0xff] }
 0x2ac   :  { %9906 = vmatpush1.bf16.msra.mxu1 %v9905_v7  ;;  %1930 = vmatprep.mubr.f32.mxu1 %v17042_v59  ;;  %v17054_v7 = vld [vmem:[#allocation34_spill] sm:$0xff]  ;;  %v17128_v59 = vld [vmem:[#allocation96_spill] sm:$0xff] }
 0x2ad   :  { %9907 = vmatprep.subr.bf16.mxu1 %v16855_v53 }
 0x2af   :  { %1932 = vmatmul.mubr.f32.gmra.mrb[10].mxu1 %v17043_v47  ;;  %v17126_v47 = vld [vmem:[#allocation91_spill] sm:$0xff] }
 0x2b0   :  { %9909 = vmatpush1.bf16.msra.mxu1 %v9908_v30  ;;  %1937 = vmatprep.mubr.f32.mxu1 %v17044_v51  ;;  %v17055_v30 = vld [vmem:[#allocation36_spill] sm:$0xff]  ;;  %v17124_v51 = vld [vmem:[#allocation87_spill] sm:$0xff] }
 0x2b1   :  { %9910 = vmatprep.subr.bf16.mxu1 %v16855_v53  ;;  %v17056_v14 = vpack.c.bf16 %v17054_v7, %v17055_v30  ;;  %v17067_v7 = vld [vmem:[#allocation93_spill] sm:$0xff]  ;;  %v17068_v30 = vld [vmem:[#allocation95_spill] sm:$0xff] }
 0x2b3   :  { %1939 = vmatmul.mubr.f32.gmra.mrb[12].mxu1 %v17045_v25  ;;  %v17122_v25 = vld [vmem:[#allocation83_spill] sm:$0xff] }
 0x2b4   :  { %9912 = vmatpush1.bf16.msra.mxu1 %v17046_v12  ;;  %1944 = vmatprep.mubr.f32.mxu1 %v17047_v9  ;;  %v17058_v12 = vld [vmem:[#allocation66_spill] sm:$0xff]  ;;  %v17120_v9 = vld [vmem:[#allocation79_spill] sm:$0xff] }
 0x2b5   :  { %9913 = vmatprep.subr.bf16.mxu1 %v16855_v53 }
 0x2b7   :  { %1946 = vmatmul.mubr.f32.gmra.mrb[14].mxu1 %v17048_v20  ;;  %v17118_v20 = vld [vmem:[#allocation76_spill] sm:$0xff] }
 0x2b8   :  { %9915 = vmatpush1.bf16.msra.mxu1 %v17049_v63  ;;  %1951 = vmatprep.mubr.f32.mxu1 %v12065_v35  ;;  %v17061_v63 = vpack.c.bf16 %v11898_v29, %v11903_v31  ;;  %v17065_v29 = vld [vmem:[#allocation90_spill] sm:$0xff]  ;;  %v17066_v31 = vld [vmem:[#allocation92_spill] sm:$0xff]  ;;  %v17115_v35 = vld [vmem:[#allocation71_spill] sm:$0xff] }
 0x2b9   :  { %9916 = vmatprep.subr.bf16.mxu1 %v16855_v53 }
 0x2bb   :  { %1953 = vmatmul.mubr.f32.gmra.mrb[16].mxu1 %v17050_v49  ;;  %v17114_v49 = vld [vmem:[#allocation35_spill] sm:$0xff] }
 0x2bc   :  { %9918 = vmatpush1.bf16.msra.mxu1 %v17051_v46  ;;  %1958 = vmatprep.mubr.f32.mxu1 %v17052_v34  ;;  %v17062_v46 = vld [vmem:[#allocation73_spill] sm:$0xff] }
 0x2bd   :  { %9919 = vmatprep.subr.bf16.mxu1 %v16855_v53  ;;  %v17113_v34 = vld [vmem:[#allocation69_spill] sm:$0xff] }
 0x2bf   :  { %1960 = vmatmul.mubr.f32.gmra.mrb[18].mxu1 %v17053_v57  ;;  %v17112_v57 = vld [vmem:[#allocation67_spill] sm:$0xff] }
 0x2c0   :  { %9921 = vmatpush1.bf16.msra.mxu1 %v17056_v14  ;;  %1965 = vmatprep.mubr.f32.mxu1 %v17057_v22  ;;  %v17069_v14 = vld [vmem:[#allocation98_spill] sm:$0xff]  ;;  %v17111_v22 = vld [vmem:[#allocation31_spill] sm:$0xff] }
 0x2c1   :  { %9922 = vmatprep.subr.bf16.mxu1 %v16855_v53 }
 0x2c3   :  { %1967 = vmatmul.mubr.f32.gmra.mrb[20].mxu1 %v17058_v12  ;;  %v17110_v12 = vld [vmem:[#allocation65_spill] sm:$0xff] }
 0x2c4   :  { %9924 = vmatpush1.bf16.msra.mxu1 %v17059_v32  ;;  %1972 = vmatprep.mubr.f32.mxu1 %v17060_v61  ;;  %v17070_v32 = vld [vmem:[#allocation100_spill] sm:$0xff]  ;;  %v17109_v61 = vld [vmem:[#allocation63_spill] sm:$0xff] }
 0x2c5   :  { %9925 = vmatprep.subr.bf16.mxu1 %v16855_v53 }
 0x2c7   :  { %1974 = vmatmul.mubr.f32.gmra.mrb[22].mxu1 %v12190_v15  ;;  %v17108_v15 = vld [vmem:[#allocation28_spill] sm:$0xff] }
 0x2c8   :  { %9927 = vmatpush1.bf16.msra.mxu1 %v17061_v63  ;;  %1979 = vmatprep.mubr.f32.mxu1 %v12195_v1  ;;  %v17071_v63 = vld [vmem:[#allocation102_spill] sm:$0xff]  ;;  %v17107_v1 = vld [vmem:[#allocation61_spill] sm:$0xff] }
 0x2c9   :  { %9928 = vmatprep.subr.bf16.mxu1 %v16855_v53 }
 0x2cb   :  { %1981 = vmatmul.mubr.f32.gmra.mrb[24].mxu1 %v17062_v46  ;;  %v17106_v46 = vld [vmem:[#allocation59_spill] sm:$0xff] }
 0x2cc   :  { %1986 = vmatprep.mubr.f32.mxu1 %v12223_v21  ;;  %v17105_v21 = vld [vmem:[#allocation24_spill] sm:$0xff] }
 0x2cf   :  { %1988 = vmatmul.mubr.f32.gmra.mrb[26].mxu1 %v17063_v48  ;;  %v17104_v48 = vld [vmem:[#allocation57_spill] sm:$0xff] }
 0x2d0   :  { %1993 = vmatprep.mubr.f32.mxu1 %v17064_v45  ;;  %v17103_v45 = vld [vmem:[#allocation55_spill] sm:$0xff] }
 0x2d3   :  { %1995 = vmatmul.mubr.f32.gmra.mrb[28].mxu1 %v12266_v19  ;;  %v17102_v19 = vld [vmem:[#allocation20_spill] sm:$0xff] }
 0x2d4   :  { %2000 = vmatprep.mubr.f32.mxu1 %v12288_v39  ;;  %v17101_v39 = vld [vmem:[#allocation54_spill] sm:$0xff] }
 0x2d7   :  { %2002 = vmatmul.mubr.f32.gmra.mrb[30].mxu1 %v12309_v37  ;;  %v17100_v37 = vld [vmem:[#allocation51_spill] sm:$0xff] }
 0x2d8   :  { %2007 = vmatprep.mubr.f32.mxu1 %v12314_v18  ;;  %v17099_v18 = vld [vmem:[#allocation10_spill] sm:$0xff] }
 0x2db   :  { %2009 = vmatmul.mubr.f32.gmra.mrb[32].mxu1 %v17065_v29  ;;  %v17076_v29 = vld [vmem:[#allocation112_spill] sm:$0xff] }
 0x2dc   :  { %2014 = vmatprep.mubr.f32.mxu1 %v17066_v31  ;;  %v17077_v31 = vld [vmem:[#allocation113_spill] sm:$0xff] }
 0x2df   :  { %2016 = vmatmul.mubr.f32.gmra.mrb[34].mxu1 %v17067_v7  ;;  %v17098_v7 = vld [vmem:[#allocation49_spill] sm:$0xff] }
 0x2e0   :  { %2021 = vmatprep.mubr.f32.mxu1 %v17068_v30  ;;  %v17078_v30 = vld [vmem:[#allocation118_spill] sm:$0xff] }
 0x2e3   :  { %2023 = vmatmul.mubr.f32.gmra.mrb[36].mxu1 %v17069_v14  ;;  %v17079_v14 = vld [vmem:[#allocation120_spill] sm:$0xff] }
 0x2e4   :  { %2028 = vmatprep.mubr.f32.mxu1 %v17070_v32  ;;  %v17080_v32 = vld [vmem:[#allocation122_spill] sm:$0xff] }
 0x2e7   :  { %2030 = vmatmul.mubr.f32.gmra.mrb[38].mxu1 %v17071_v63  ;;  %v17081_v63 = vld [vmem:[#allocation124_spill] sm:$0xff] }
 0x2e8   :  { %2035 = vmatprep.mubr.f32.mxu1 %v17072_v62  ;;  %v17097_v62 = vld [vmem:[#allocation40_spill] sm:$0xff] }
 0x2eb   :  { %2037 = vmatmul.mubr.f32.gmra.mrb[40].mxu1 %v17073_v28  ;;  %v17096_v28 = vld [vmem:[#allocation9_spill] sm:$0xff] }
 0x2ec   :  { %2042 = vmatprep.mubr.f32.mxu1 %v17074_v17  ;;  %v17095_v17 = vld [vmem:[#allocation39_spill] sm:$0xff] }
 0x2ef   :  { %2044 = vmatmul.mubr.f32.gmra.mrb[42].mxu1 %v17075_v6  ;;  %v17094_v6 = vld [vmem:[#allocation32_spill] sm:$0xff] }
 0x2f0   :  { %2049 = vmatprep.mubr.f32.mxu1 %v17076_v29  ;;  %v17093_v29 = vld [vmem:[#allocation7_spill] sm:$0xff] }
 0x2f3   :  { %2051 = vmatmul.mubr.f32.gmra.mrb[44].mxu1 %v17077_v31  ;;  %v17082_v31 = vld [vmem:[#allocation6_spill] sm:$0xff] }
 0x2f4   :  { %2056 = vmatprep.mubr.f32.mxu1 %v12484_v38  ;;  %v17083_v38 = vld [vmem:[#allocation17_spill] sm:$0xff] }
 0x2f7   :  { %2058 = vmatmul.mubr.f32.gmra.mrb[46].mxu1 %v17078_v30  ;;  %v17084_v30 = vld [vmem:[#allocation2_spill] sm:$0xff] }
 0x2f8   :  { %2063 = vmatprep.mubr.f32.mxu1 %v17079_v14  ;;  %v17085_v14 = vld [vmem:[#allocation18_spill] sm:$0xff] }
 0x2fb   :  { %2065 = vmatmul.mubr.f32.gmra.mrb[48].mxu1 %v17080_v32  ;;  %v17092_v32 = vld [vmem:[#allocation29_spill] sm:$0xff] }
 0x2fc   :  { %2070 = vmatprep.mubr.f32.mxu1 %v17081_v63  ;;  %v17086_v63 = vld [vmem:[#allocation19_spill] sm:$0xff] }
 0x2ff   :  { %2072 = vmatmul.mubr.f32.gmra.mrb[50].mxu1 %v12560_v16  ;;  %v17087_v16 = vld [vmem:[#allocation3_spill] sm:$0xff] }
 0x300   :  { %2077 = vmatprep.mubr.f32.mxu1 %v12566_v24  ;;  %v17088_v24 = vld [vmem:[#allocation22_spill] sm:$0xff] }
 0x303   :  { %2079 = vmatmul.mubr.f32.gmra.mrb[52].mxu1 %v12579_v8  ;;  %v17091_v8 = vld [vmem:[#allocation26_spill] sm:$0xff] }
 0x304   :  { %2084 = vmatprep.mubr.f32.mxu1 %v12588_v13  ;;  %v17089_v13 = vld [vmem:[#allocation25_spill] sm:$0xff] }
 0x307   :  { %2086 = vmatmul.mubr.f32.gmra.mrb[54].mxu1 %v12600_v42  ;;  %v17090_v42 = vld [vmem:[#allocation4_spill] sm:$0xff] }
 0x308   :  { %2205 = vmatprep.mubr.f32.mxu1 %v17082_v31 }
 0x30b   :  { %2208 = vmatmul.mubr.f32.vlgmr.msra.gmra.mrb[0].mxu1 %v17083_v38 }
 0x30c   :  { %9930 = vmatpush1.bf16.msra.mxu1 %v17084_v30  ;;  %2214 = vmatprep.mubr.f32.mxu1 %v17085_v14  ;;  %v17141_v30 = vld [vmem:[#allocation121_spill] sm:$0xff] }
 0x30d   :  { %9931 = vmatprep.subr.bf16.mxu1 %v16855_v53 }
 0x30f   :  { %2217 = vmatmul.mubr.f32.gmra.mrb[2].mxu1 %v17086_v63 }
 0x310   :  { %9933 = vmatpush1.bf16.msra.mxu1 %v17087_v16  ;;  %2223 = vmatprep.mubr.f32.mxu1 %v17088_v24  ;;  %v17138_v16 = vld [vmem:[#allocation116_spill] sm:$0xff] }
 0x311   :  { %9934 = vmatprep.subr.bf16.mxu1 %v16855_v53 }
 0x313   :  { %2226 = vmatmul.mubr.f32.gmra.mrb[4].mxu1 %v17089_v13 }
 0x314   :  { %9936 = vmatpush1.bf16.msra.mxu1 %v17090_v42  ;;  %2232 = vmatprep.mubr.f32.mxu1 %v17091_v8  ;;  %v17135_v42 = vld [vmem:[#allocation109_spill] sm:$0xff] }
 0x315   :  { %9937 = vmatprep.subr.bf16.mxu1 %v16855_v53 }
 0x317   :  { %2235 = vmatmul.mubr.f32.gmra.mrb[6].mxu1 %v17092_v32 }
 0x318   :  { %9939 = vmatpush1.bf16.msra.mxu1 %v17093_v29  ;;  %2241 = vmatprep.mubr.f32.mxu1 %v17094_v6  ;;  %v17132_v29 = vld [vmem:[#allocation103_spill] sm:$0xff] }
 0x319   :  { %9940 = vmatprep.subr.bf16.mxu1 %v16855_v53 }
 0x31b   :  { %2244 = vmatmul.mubr.f32.gmra.mrb[8].mxu1 %v17095_v17 }
 0x31c   :  { %9942 = vmatpush1.bf16.msra.mxu1 %v17096_v28  ;;  %2250 = vmatprep.mubr.f32.mxu1 %v17097_v62  ;;  %v17129_v28 = vld [vmem:[#allocation97_spill] sm:$0xff] }
 0x31d   :  { %9943 = vmatprep.subr.bf16.mxu1 %v16855_v53 }
 0x31f   :  { %2253 = vmatmul.mubr.f32.gmra.mrb[10].mxu1 %v17098_v7 }
 0x320   :  { %9945 = vmatpush1.bf16.msra.mxu1 %v17099_v18  ;;  %2259 = vmatprep.mubr.f32.mxu1 %v17100_v37  ;;  %v17125_v18 = vld [vmem:[#allocation89_spill] sm:$0xff] }
 0x321   :  { %9946 = vmatprep.subr.bf16.mxu1 %v16855_v53 }
 0x323   :  { %2262 = vmatmul.mubr.f32.gmra.mrb[12].mxu1 %v17101_v39 }
 0x324   :  { %9948 = vmatpush1.bf16.msra.mxu1 %v17102_v19  ;;  %2268 = vmatprep.mubr.f32.mxu1 %v17103_v45  ;;  %v17121_v19 = vld [vmem:[#allocation81_spill] sm:$0xff] }
 0x325   :  { %9949 = vmatprep.subr.bf16.mxu1 %v16855_v53 }
 0x327   :  { %2271 = vmatmul.mubr.f32.gmra.mrb[14].mxu1 %v17104_v48 }
 0x328   :  { %9951 = vmatpush1.bf16.msra.mxu1 %v17105_v21  ;;  %2277 = vmatprep.mubr.f32.mxu1 %v17106_v46  ;;  %v17117_v21 = vld [vmem:[#allocation38_spill] sm:$0xff] }
 0x329   :  { %9952 = vmatprep.subr.bf16.mxu1 %v16855_v53 }
 0x32b   :  { %2280 = vmatmul.mubr.f32.gmra.mrb[16].mxu1 %v17107_v1 }
 0x32c   :  { %9954 = vmatpush1.bf16.msra.mxu1 %v17108_v15  ;;  %2286 = vmatprep.mubr.f32.mxu1 %v17109_v61  ;;  %v17116_v15 = vld [vmem:[#allocation74_spill] sm:$0xff] }
 0x32d   :  { %9955 = vmatprep.subr.bf16.mxu1 %v16855_v53 }
 0x32f   :  { %2289 = vmatmul.mubr.f32.gmra.mrb[18].mxu1 %v17110_v12 }
 0x330   :  { %9957 = vmatpush1.bf16.msra.mxu1 %v17111_v22  ;;  %2295 = vmatprep.mubr.f32.mxu1 %v17112_v57  ;;  %v17119_v22 = vld [vmem:[#allocation77_spill] sm:$0xff] }
 0x331   :  { %9958 = vmatprep.subr.bf16.mxu1 %v16855_v53 }
 0x333   :  { %2298 = vmatmul.mubr.f32.gmra.mrb[20].mxu1 %v17113_v34 }
 0x334   :  { %9960 = vmatpush1.bf16.msra.mxu1 %v17114_v49  ;;  %2304 = vmatprep.mubr.f32.mxu1 %v17115_v35  ;;  %v17123_v49 = vld [vmem:[#allocation85_spill] sm:$0xff] }
 0x335   :  { %9961 = vmatprep.subr.bf16.mxu1 %v16855_v53 }
 0x337   :  { %2307 = vmatmul.mubr.f32.gmra.mrb[22].mxu1 %v17116_v15 }
 0x338   :  { %9963 = vmatpush1.bf16.msra.mxu1 %v17117_v21  ;;  %2313 = vmatprep.mubr.f32.mxu1 %v17118_v20  ;;  %v17127_v21 = vld [vmem:[#allocation94_spill] sm:$0xff] }
 0x339   :  { %9964 = vmatprep.subr.bf16.mxu1 %v16855_v53 }
 0x33b   :  { %2316 = vmatmul.mubr.f32.gmra.mrb[24].mxu1 %v17119_v22 }
 0x33c   :  { %2322 = vmatprep.mubr.f32.mxu1 %v17120_v9 }
 0x33f   :  { %2325 = vmatmul.mubr.f32.gmra.mrb[26].mxu1 %v17121_v19 }
 0x340   :  { %2331 = vmatprep.mubr.f32.mxu1 %v17122_v25 }
 0x343   :  { %2334 = vmatmul.mubr.f32.gmra.mrb[28].mxu1 %v17123_v49 }
 0x344   :  { %2340 = vmatprep.mubr.f32.mxu1 %v17124_v51 }
 0x347   :  { %2343 = vmatmul.mubr.f32.gmra.mrb[30].mxu1 %v17125_v18 }
 0x348   :  { %2349 = vmatprep.mubr.f32.mxu1 %v17126_v47 }
 0x34b   :  { %2352 = vmatmul.mubr.f32.gmra.mrb[32].mxu1 %v17127_v21 }
 0x34c   :  { %2358 = vmatprep.mubr.f32.mxu1 %v17128_v59 }
 0x34f   :  { %2361 = vmatmul.mubr.f32.gmra.mrb[34].mxu1 %v17129_v28 }
 0x350   :  { %2367 = vmatprep.mubr.f32.mxu1 %v17130_v44 }
 0x353   :  { %2370 = vmatmul.mubr.f32.gmra.mrb[36].mxu1 %v17131_v40 }
 0x354   :  { %2376 = vmatprep.mubr.f32.mxu1 %v17132_v29 }
 0x357   :  { %2379 = vmatmul.mubr.f32.gmra.mrb[38].mxu1 %v17133_v27 }
 0x358   :  { %2385 = vmatprep.mubr.f32.mxu1 %v17134_v41  ;;  %v17144_v41 = vld [vmem:[#allocation129_spill] sm:$0xff] }
 0x35b   :  { %2388 = vmatmul.mubr.f32.gmra.mrb[40].mxu1 %v17135_v42 }
 0x35c   :  { %2394 = vmatprep.mubr.f32.mxu1 %v17136_v55 }
 0x35f   :  { %2397 = vmatmul.mubr.f32.gmra.mrb[42].mxu1 %v17137_v36 }
 0x360   :  { %2403 = vmatprep.mubr.f32.mxu1 %v17138_v16 }
 0x363   :  { %2406 = vmatmul.mubr.f32.gmra.mrb[44].mxu1 %v17139_v11 }
 0x364   :  { %2412 = vmatprep.mubr.f32.mxu1 %v17140_v5  ;;  %v17145_v5 = vand.u32 4294901760, %v17082_v31  ;;  %v17175_v31 = vld [vmem:[#allocation45_spill] sm:$0xff] }
 0x367   :  { %2415 = vmatmul.mubr.f32.gmra.mrb[46].mxu1 %v17141_v30  ;;  %v17146_v30 = vand.u32 4294901760, %v11665_v2  ;;  %v17153_v2 = vand.u32 4294901760, %v17088_v24  ;;  %v17160_v24 = vand.u32 4294901760, %v11807_v33  ;;  %v17167_v33 = vand.u32 4294901760, %v17100_v37 }
 0x368   :  { %2421 = vmatprep.mubr.f32.mxu1 %v17142_v4  ;;  %v17147_v4 = vand.u32 4294901760, %v11673_v58  ;;  %v17156_v58 = vand.u32 4294901760, %v17091_v8  ;;  %v17162_v8 = vand.u32 4294901760, %v17095_v17  ;;  %v17169_v17 = vld [vmem:[#allocation43_spill] sm:$0xff]  ;;  %v17173_v37 = vand.u32 4294901760, %v17106_v46 }
 0x369   :  { %v17179_v46 = vand.u32 4294901760, %v17112_v57  ;;  %v17185_v57 = vand.u32 4294901760, %v17118_v20  ;;  %v17191_v20 = vand.u32 4294901760, %v17124_v51  ;;  %v17198_v51 = vand.u32 4294901760, %v17131_v40 }
 0x36a   :  { %v17206_v40 = vand.u32 4294901760, %v17138_v16  ;;  %v17218_v16 = vand.u32 4294901760, %v17144_v41 }
 0x36b   :  { %2424 = vmatmul.mubr.f32.gmra.mrb[48].mxu1 %v17143_v54  ;;  %v9965_v54 = vpack.c.bf16 %v17147_v4, %v17146_v30  ;;  %v17155_v4 = vld [vmem:[#allocation11_spill] sm:$0xff] }
 0x36c   :  { %2430 = vmatprep.mubr.f32.mxu1 %v12564_v43  ;;  %v17148_v43 = vand.u32 4294901760, %v17083_v38  ;;  %v17159_v38 = vand.u32 4294901760, %v17094_v6  ;;  %v17165_v6 = vand.u32 4294901760, %v11999_v56  ;;  %v17172_v56 = vld [vmem:[#allocation44_spill] sm:$0xff]  ;;  %v17181_v30 = vld [vmem:[#allocation47_spill] sm:$0xff] }
 0x36f   :  { %2433 = vmatmul.mubr.f32.gmra.mrb[50].mxu1 %v17144_v41  ;;  %v17230_v41 = vld [vmem:[#allocation14_spill] sm:$0xff] }
 0x370   :  { %2439 = vmatprep.mubr.f32.mxu1 %v12586_v60  ;;  %v17149_v60 = vand.u32 4294901760, %v17085_v14  ;;  %v17184_v14 = vld [vmem:[#allocation48_spill] sm:$0xff] }
 0x373   :  { %2442 = vmatmul.mubr.f32.gmra.mrb[52].mxu1 %v12598_v52  ;;  %v17150_v52 = vand.u32 4294901760, %v11685_v26  ;;  %v17157_v26 = vand.u32 4294901760, %v17092_v32  ;;  %v17187_v32 = vand.u32 4294901760, %v17120_v9  ;;  %v17194_v9 = vand.u32 4294901760, %v17127_v21  ;;  %v17201_v21 = vld [vmem:[#allocation107_spill] sm:$0xff] }
 0x374   :  { %2448 = vmatprep.mubr.f32.mxu1 %v12607_v23  ;;  %v17151_v23 = vand.u32 4294901760, %v11690_v10  ;;  %v17158_v10 = vld [vmem:[#allocation12_spill] sm:$0xff] }
 0x377   :  { %2451 = vmatmul.mubr.f32.gmra.mrb[54].mxu1 %v12614_v3  ;;  %v9968_v3 = vpack.c.bf16 %v17151_v23, %v17150_v52  ;;  %v17164_v52 = vand.u32 4294901760, %v11993_v0  ;;  %v17171_v0 = vand.u32 4294901760, %v17104_v48  ;;  %v17177_v48 = vand.u32 4294901760, %v17110_v12 }
 0x378   :  { %2547 = vmatprep.mubr.f32.mxu1 %v17145_v5  ;;  %v17152_v5 = vand.u32 4294901760, %v17086_v63  ;;  %v17183_v12 = vand.u32 4294901760, %v17116_v15  ;;  %v17189_v63 = vand.u32 4294901760, %v17122_v25  ;;  %v17190_v15 = vand.u32 4294901760, %v17123_v49 }
 0x379   :  { %v9980_v23 = vpack.c.bf16 %v17165_v6, %v17164_v52  ;;  %v17196_v25 = vand.u32 4294901760, %v17129_v28  ;;  %v17197_v49 = vand.u32 4294901760, %v17130_v44  ;;  %v17204_v28 = vand.u32 4294901760, %v17136_v55  ;;  %v17214_v55 = vld [vmem:[#allocation125_spill] sm:$0xff]  ;;  %v17225_v52 = vld [vmem:[#allocation136_spill] sm:$0xff] }
 0x37a   :  { %v17205_v44 = vand.u32 4294901760, %v17137_v36  ;;  %v17216_v36 = vld [vmem:[#allocation127_spill] sm:$0xff]  ;;  %v17226_v6 = vand.u32 4294901760, %v17225_v52  ;;  %v17280_v52 = vld [vmem:[#allocation106_spill] sm:$0xff] }
 0x37b   :  { %2551 = vmatmul.mubr.f32.vlgmr.msra.gmra.mrb[0].mxu1 %v17148_v43  ;;  %v17161_v43 = vand.u32 4294901760, %v11815_v50  ;;  %v17168_v50 = vand.u32 4294901760, %v17101_v39  ;;  %v17174_v39 = vand.u32 4294901760, %v17107_v1  ;;  %v17180_v1 = vand.u32 4294901760, %v17113_v34 }
 0x37c   :  { %9966 = vmatpush1.bf16.msra.mxu1 %v9965_v54  ;;  %2558 = vmatprep.mubr.f32.mxu1 %v17149_v60  ;;  %v17154_v54 = vand.u32 4294901760, %v17089_v13  ;;  %v17163_v13 = vand.u32 4294901760, %v17097_v62  ;;  %v17170_v62 = vand.u32 4294901760, %v17103_v45  ;;  %v17176_v45 = vand.u32 4294901760, %v17109_v61 }
 0x37d   :  { %9967 = vmatprep.subr.bf16.mxu1 %v16855_v53  ;;  %v9977_v60 = vpack.c.bf16 %v17161_v43, %v17160_v24  ;;  %v17182_v61 = vand.u32 4294901760, %v17115_v35  ;;  %v17186_v34 = vand.u32 4294901760, %v17119_v22  ;;  %v17188_v35 = vand.u32 4294901760, %v17121_v19  ;;  %v17221_v43 = vld [vmem:[#allocation133_spill] sm:$0xff] }
 0x37e   :  { %v17193_v22 = vand.u32 4294901760, %v17126_v47  ;;  %v17195_v19 = vand.u32 4294901760, %v17128_v59  ;;  %v17200_v47 = vand.u32 4294901760, %v17133_v27  ;;  %v17203_v59 = vand.u32 4294901760, %v17135_v42  ;;  %v17208_v27 = vld [vmem:[#allocation119_spill] sm:$0xff] }
 0x37f   :  { %2562 = vmatmul.mubr.f32.gmra.mrb[2].mxu1 %v17152_v5  ;;  %v17192_v5 = vand.u32 4294901760, %v17125_v18  ;;  %v17199_v18 = vand.u32 4294901760, %v17132_v29  ;;  %v17207_v29 = vand.u32 4294901760, %v17139_v11  ;;  %v17212_v42 = vld [vmem:[#allocation123_spill] sm:$0xff] }
 0x380   :  { %9969 = vmatpush1.bf16.msra.mxu1 %v9968_v3  ;;  %2569 = vmatprep.mubr.f32.mxu1 %v17153_v2  ;;  %v17166_v3 = vand.u32 4294901760, %v17098_v7  ;;  %v17178_v7 = vld [vmem:[#allocation46_spill] sm:$0xff]  ;;  %v17202_v2 = vand.u32 4294901760, %v17201_v21  ;;  %v17219_v11 = vld [vmem:[#allocation131_spill] sm:$0xff]  ;;  %v17264_v21 = vld [vmem:[#allocation73_spill] sm:$0xff] }
 0x381   :  { %9970 = vmatprep.subr.bf16.mxu1 %v16855_v53  ;;  %v17220_v24 = vand.u32 4294901760, %v17219_v11  ;;  %v950_v11 = vld [vmem:[%s16168_s5 + $0x10] sm:$0xff] }
 0x383   :  { %2573 = vmatmul.mubr.f32.gmra.mrb[4].mxu1 %v17154_v54  ;;  %v17209_v54 = vand.u32 4294901760, %v17208_v27  ;;  %v17271_v27 = vld [vmem:[#allocation88_spill] sm:$0xff] }
 0x384   :  { %9972 = vmatpush1.bf16.msra.mxu1 %v17155_v4  ;;  %2580 = vmatprep.mubr.f32.mxu1 %v17156_v58  ;;  %v17210_v4 = vld [vmem:[#allocation121_spill] sm:$0xff] }
 0x385   :  { %9973 = vmatprep.subr.bf16.mxu1 %v16855_v53  ;;  %v17211_v58 = vand.u32 4294901760, %v17210_v4  ;;  %v17273_v4 = vld [vmem:[#allocation92_spill] sm:$0xff] }
 0x387   :  { %2584 = vmatmul.mubr.f32.gmra.mrb[6].mxu1 %v17157_v26  ;;  %v17213_v26 = vand.u32 4294901760, %v17212_v42  ;;  %v962_v42 = vld [vmem:[%s16168_s5 + $0x70] sm:$0xff] }
 0x388   :  { %9975 = vmatpush1.bf16.msra.mxu1 %v17158_v10  ;;  %2591 = vmatprep.mubr.f32.mxu1 %v17159_v38  ;;  %v17215_v10 = vand.u32 4294901760, %v17214_v55  ;;  %v17217_v38 = vand.u32 4294901760, %v17216_v36  ;;  %v17274_v55 = vld [vmem:[#allocation93_spill] sm:$0xff]  ;;  %v949_v36 = vld [vmem:[%s16168_s5 + $0x8] sm:$0xff] }
 0x389   :  { %9976 = vmatprep.subr.bf16.mxu1 %v16855_v53 }
 0x38b   :  { %2595 = vmatmul.mubr.f32.gmra.mrb[8].mxu1 %v17162_v8  ;;  %v17223_v8 = vld [vmem:[#allocation135_spill] sm:$0xff] }
 0x38c   :  { %9978 = vmatpush1.bf16.msra.mxu1 %v9977_v60  ;;  %2602 = vmatprep.mubr.f32.mxu1 %v17163_v13  ;;  %v17222_v60 = vand.u32 4294901760, %v17221_v43  ;;  %v17224_v13 = vand.u32 4294901760, %v17223_v8  ;;  %v17278_v43 = vld [vmem:[#allocation102_spill] sm:$0xff]  ;;  %v951_v8 = vld [vmem:[%s16168_s5 + $0x18] sm:$0xff] }
 0x38d   :  { %9979 = vmatprep.subr.bf16.mxu1 %v16855_v53 }
 0x38f   :  { %2606 = vmatmul.mubr.f32.gmra.mrb[10].mxu1 %v17166_v3  ;;  %v17228_v3 = vld [vmem:[#allocation13_spill] sm:$0xff] }
 0x390   :  { %9981 = vmatpush1.bf16.msra.mxu1 %v9980_v23  ;;  %2613 = vmatprep.mubr.f32.mxu1 %v17167_v33  ;;  %v17227_v23 = vld [vmem:[#allocation5_spill] sm:$0xff]  ;;  %v17229_v33 = vld [vmem:[#allocation2_spill] sm:$0xff] }
 0x391   :  { %9982 = vmatprep.subr.bf16.mxu1 %v16855_v53 }
 0x393   :  { %2617 = vmatmul.mubr.f32.gmra.mrb[12].mxu1 %v17168_v50  ;;  %v17231_v50 = vld [vmem:[#allocation15_spill] sm:$0xff] }
 0x394   :  { %9984 = vmatpush1.bf16.msra.mxu1 %v17169_v17  ;;  %2624 = vmatprep.mubr.f32.mxu1 %v17170_v62  ;;  %v17232_v17 = vld [vmem:[#allocation3_spill] sm:$0xff]  ;;  %v17233_v62 = vld [vmem:[#allocation16_spill] sm:$0xff] }
 0x395   :  { %9985 = vmatprep.subr.bf16.mxu1 %v16855_v53 }
 0x397   :  { %2628 = vmatmul.mubr.f32.gmra.mrb[14].mxu1 %v17171_v0  ;;  %v17234_v0 = vld [vmem:[#allocation21_spill] sm:$0xff] }
 0x398   :  { %9987 = vmatpush1.bf16.msra.mxu1 %v17172_v56  ;;  %2635 = vmatprep.mubr.f32.mxu1 %v17173_v37  ;;  %v17235_v56 = vld [vmem:[#allocation4_spill] sm:$0xff]  ;;  %v17236_v37 = vld [vmem:[#allocation23_spill] sm:$0xff] }
 0x399   :  { %9988 = vmatprep.subr.bf16.mxu1 %v16855_v53 }
 0x39b   :  { %2639 = vmatmul.mubr.f32.gmra.mrb[16].mxu1 %v17174_v39  ;;  %v17237_v39 = vld [vmem:[#allocation27_spill] sm:$0xff] }
 0x39c   :  { %9990 = vmatpush1.bf16.msra.mxu1 %v17175_v31  ;;  %2646 = vmatprep.mubr.f32.mxu1 %v17176_v45  ;;  %v17238_v31 = vld [vmem:[#allocation7_spill] sm:$0xff]  ;;  %v17239_v45 = vld [vmem:[#allocation30_spill] sm:$0xff] }
 0x39d   :  { %9991 = vmatprep.subr.bf16.mxu1 %v16855_v53 }
 0x39f   :  { %2650 = vmatmul.mubr.f32.gmra.mrb[18].mxu1 %v17177_v48  ;;  %v17240_v48 = vld [vmem:[#allocation33_spill] sm:$0xff] }
 0x3a0   :  { %9993 = vmatpush1.bf16.msra.mxu1 %v17178_v7  ;;  %2657 = vmatprep.mubr.f32.mxu1 %v17179_v46  ;;  %v17241_v7 = vld [vmem:[#allocation9_spill] sm:$0xff] }
 0x3a1   :  { %9994 = vmatprep.subr.bf16.mxu1 %v16855_v53  ;;  %v17242_v46 = vld [vmem:[#allocation37_spill] sm:$0xff] }
 0x3a3   :  { %2661 = vmatmul.mubr.f32.gmra.mrb[20].mxu1 %v17180_v1  ;;  %v17243_v1 = vld [vmem:[#allocation41_spill] sm:$0xff] }
 0x3a4   :  { %9996 = vmatpush1.bf16.msra.mxu1 %v17181_v30  ;;  %2668 = vmatprep.mubr.f32.mxu1 %v17182_v61  ;;  %v17244_v30 = vld [vmem:[#allocation10_spill] sm:$0xff] }
 0x3a5   :  { %9997 = vmatprep.subr.bf16.mxu1 %v16855_v53  ;;  %v17245_v61 = vld [vmem:[#allocation42_spill] sm:$0xff] }
 0x3a7   :  { %2672 = vmatmul.mubr.f32.gmra.mrb[22].mxu1 %v17183_v12  ;;  %v17246_v12 = vld [vmem:[#allocation50_spill] sm:$0xff] }
 0x3a8   :  { %9999 = vmatpush1.bf16.msra.mxu1 %v17184_v14  ;;  %2679 = vmatprep.mubr.f32.mxu1 %v17185_v57  ;;  %v17247_v14 = vld [vmem:[#allocation20_spill] sm:$0xff] }
 0x3a9   :  { %10000 = vmatprep.subr.bf16.mxu1 %v16855_v53  ;;  %v17248_v57 = vld [vmem:[#allocation52_spill] sm:$0xff] }
 0x3ab   :  { %2683 = vmatmul.mubr.f32.gmra.mrb[24].mxu1 %v17186_v34  ;;  %v17249_v34 = vld [vmem:[#allocation53_spill] sm:$0xff] }
 0x3ac   :  { %2690 = vmatprep.mubr.f32.mxu1 %v17187_v32  ;;  %v17250_v32 = vld [vmem:[#allocation24_spill] sm:$0xff] }
 0x3af   :  { %2694 = vmatmul.mubr.f32.gmra.mrb[26].mxu1 %v17188_v35  ;;  %v17251_v35 = vld [vmem:[#allocation56_spill] sm:$0xff] }
 0x3b0   :  { %2701 = vmatprep.mubr.f32.mxu1 %v17189_v63  ;;  %v17252_v63 = vld [vmem:[#allocation58_spill] sm:$0xff] }
 0x3b3   :  { %2705 = vmatmul.mubr.f32.gmra.mrb[28].mxu1 %v17190_v15  ;;  %v17253_v15 = vld [vmem:[#allocation28_spill] sm:$0xff] }
 0x3b4   :  { %2712 = vmatprep.mubr.f32.mxu1 %v17191_v20  ;;  %v17254_v20 = vld [vmem:[#allocation60_spill] sm:$0xff] }
 0x3b7   :  { %2716 = vmatmul.mubr.f32.gmra.mrb[30].mxu1 %v17192_v5  ;;  %v17255_v5 = vld [vmem:[#allocation62_spill] sm:$0xff] }
 0x3b8   :  { %2723 = vmatprep.mubr.f32.mxu1 %v17193_v22  ;;  %v17256_v22 = vld [vmem:[#allocation31_spill] sm:$0xff] }
 0x3bb   :  { %2727 = vmatmul.mubr.f32.gmra.mrb[32].mxu1 %v17194_v9  ;;  %v17257_v9 = vld [vmem:[#allocation64_spill] sm:$0xff] }
 0x3bc   :  { %2734 = vmatprep.mubr.f32.mxu1 %v17195_v19  ;;  %v17258_v19 = vld [vmem:[#allocation66_spill] sm:$0xff] }
 0x3bf   :  { %2738 = vmatmul.mubr.f32.gmra.mrb[34].mxu1 %v17196_v25  ;;  %v17259_v25 = vld [vmem:[#allocation35_spill] sm:$0xff] }
 0x3c0   :  { %2745 = vmatprep.mubr.f32.mxu1 %v17197_v49  ;;  %v17260_v49 = vld [vmem:[#allocation68_spill] sm:$0xff] }
 0x3c3   :  { %2749 = vmatmul.mubr.f32.gmra.mrb[36].mxu1 %v17198_v51  ;;  %v17261_v51 = vld [vmem:[#allocation70_spill] sm:$0xff] }
 0x3c4   :  { %2756 = vmatprep.mubr.f32.mxu1 %v17199_v18  ;;  %v17262_v18 = vld [vmem:[#allocation38_spill] sm:$0xff] }
 0x3c7   :  { %2760 = vmatmul.mubr.f32.gmra.mrb[38].mxu1 %v17200_v47  ;;  %v17263_v47 = vld [vmem:[#allocation72_spill] sm:$0xff] }
 0x3c8   :  { %2767 = vmatprep.mubr.f32.mxu1 %v17202_v2  ;;  %v17265_v2 = vld [vmem:[#allocation75_spill] sm:$0xff] }
 0x3cb   :  { %2771 = vmatmul.mubr.f32.gmra.mrb[40].mxu1 %v17203_v59  ;;  %v17266_v59 = vld [vmem:[#allocation78_spill] sm:$0xff] }
 0x3cc   :  { %2778 = vmatprep.mubr.f32.mxu1 %v17204_v28  ;;  %v17267_v28 = vld [vmem:[#allocation80_spill] sm:$0xff] }
 0x3cf   :  { %2782 = vmatmul.mubr.f32.gmra.mrb[42].mxu1 %v17205_v44  ;;  %v17268_v44 = vld [vmem:[#allocation82_spill] sm:$0xff] }
 0x3d0   :  { %2789 = vmatprep.mubr.f32.mxu1 %v17206_v40  ;;  %v17269_v40 = vld [vmem:[#allocation84_spill] sm:$0xff] }
 0x3d3   :  { %2793 = vmatmul.mubr.f32.gmra.mrb[44].mxu1 %v17207_v29  ;;  %v17270_v29 = vld [vmem:[#allocation86_spill] sm:$0xff] }
 0x3d4   :  { %2800 = vmatprep.mubr.f32.mxu1 %v17209_v54  ;;  %v17272_v54 = vld [vmem:[#allocation90_spill] sm:$0xff] }
 0x3d7   :  { %2804 = vmatmul.mubr.f32.gmra.mrb[46].mxu1 %v17211_v58  ;;  %v11099_v58 = vmov 0  }
 0x3d8   :  { %2811 = vmatprep.mubr.f32.mxu1 %v17213_v26  ;;  %11095 = vset.pattern.permute.xlu1 %v11099_v58  ;;  %v948_v26 = vld [vmem:[%s16168_s5] sm:$0xff] }
 0x3d9   :  { %11094 = vset.pattern.permute.xlu0 %v11099_v58  ;;  %1048 = vperm.xlu1 %11095, %v962_v42   ;;  %v968_v58 = vld [vmem:[%s16168_s5 + $0xa0] sm:$0xff]  ;;  %v17287_v42 = vld [vmem:[#allocation120_spill] sm:$0xff] }
 0x3da   :  { %978 = vperm.xlu0 %11094, %v948_v26   ;;  %v969_v26 = vld [vmem:[%s16168_s5 + $0xa8] sm:$0xff] }
 0x3db   :  { %2815 = vmatmul.mubr.f32.gmra.mrb[48].mxu1 %v17215_v10  ;;  %v17275_v10 = vld [vmem:[#allocation95_spill] sm:$0xff] }
 0x3dc   :  { %2822 = vmatprep.mubr.f32.mxu1 %v17217_v38  ;;  %v17276_v38 = vld [vmem:[#allocation98_spill] sm:$0xff] }
 0x3dd   :  { %983 = vperm.xlu1 %11095, %v949_v36   ;;  %v17288_v36 = vld [vmem:[#allocation122_spill] sm:$0xff] }
 0x3df   :  { %2826 = vmatmul.mubr.f32.gmra.mrb[50].mxu1 %v17218_v16  ;;  %v17277_v16 = vld [vmem:[#allocation100_spill] sm:$0xff] }
 0x3e0   :  { %2833 = vmatprep.mubr.f32.mxu1 %v17220_v24  ;;  %v963_v24 = vld [vmem:[%s16168_s5 + $0x78] sm:$0xff] }
 0x3e1   :  { %1053 = vperm.xlu0 %11094, %v963_v24   ;;  %988 = vperm.xlu1 %11095, %v950_v11   ;;  %v956_v11 = vld [vmem:[%s16168_s5 + $0x40] sm:$0xff]  ;;  %v17289_v24 = vld [vmem:[#allocation124_spill] sm:$0xff] }
 0x3e3   :  { %2837 = vmatmul.mubr.f32.gmra.mrb[52].mxu1 %v17222_v60  ;;  %v17279_v60 = vld [vmem:[#allocation104_spill] sm:$0xff] }
 0x3e4   :  { %2844 = vmatprep.mubr.f32.mxu1 %v17224_v13  ;;  %v964_v13 = vld [vmem:[%s16168_s5 + $0x80] sm:$0xff] }
 0x3e5   :  { %1058 = vperm.xlu0 %11094, %v964_v13   ;;  %993 = vperm.xlu1 %11095, %v951_v8   ;;  %v970_v8 = vld [vmem:[%s16168_s5 + $0xb0] sm:$0xff]  ;;  %v17290_v13 = vld [vmem:[#allocation126_spill] sm:$0xff] }
 0x3e7   :  { %2848 = vmatmul.mubr.f32.gmra.mrb[54].mxu1 %v17226_v6  ;;  %v17281_v6 = vld [vmem:[#allocation108_spill] sm:$0xff] }
 0x3e8   :  { %2990 = vmatprep.mubr.f32.mxu1 %v17227_v23 }
 0x3eb   :  { %2992 = vmatmul.mubr.f32.vlgmr.msra.gmra.mrb[0].mxu1 %v17228_v3 }
 0x3ec   :  { %10002 = vmatpush1.bf16.msra.mxu1 %v17229_v33  ;;  %2997 = vmatprep.mubr.f32.mxu1 %v17230_v41  ;;  %v952_v33 = vld [vmem:[%s16168_s5 + $0x20] sm:$0xff] }
 0x3ed   :  { %10003 = vmatprep.subr.bf16.mxu1 %v16855_v53  ;;  %998 = vperm.xlu1 %11095, %v952_v33   ;;  %v957_v33 = vld [vmem:[%s16168_s5 + $0x48] sm:$0xff] }
 0x3ef   :  { %2999 = vmatmul.mubr.f32.gmra.mrb[2].mxu1 %v17231_v50 }
 0x3f0   :  { %10005 = vmatpush1.bf16.msra.mxu1 %v17232_v17  ;;  %3004 = vmatprep.mubr.f32.mxu1 %v17233_v62  ;;  %v965_v17 = vld [vmem:[%s16168_s5 + $0x88] sm:$0xff] }
 0x3f1   :  { %10006 = vmatprep.subr.bf16.mxu1 %v16855_v53  ;;  %1063 = vperm.xlu0 %11094, %v965_v17   ;;  %v17291_v17 = vld [vmem:[#allocation128_spill] sm:$0xff] }
 0x3f3   :  { %3006 = vmatmul.mubr.f32.gmra.mrb[4].mxu1 %v17234_v0 }
 0x3f4   :  { %10008 = vmatpush1.bf16.msra.mxu1 %v17235_v56  ;;  %3011 = vmatprep.mubr.f32.mxu1 %v17236_v37  ;;  %v17282_v56 = vld [vmem:[#allocation110_spill] sm:$0xff] }
 0x3f5   :  { %10009 = vmatprep.subr.bf16.mxu1 %v16855_v53 }
 0x3f7   :  { %3013 = vmatmul.mubr.f32.gmra.mrb[6].mxu1 %v17237_v39 }
 0x3f8   :  { %10011 = vmatpush1.bf16.msra.mxu1 %v17238_v31  ;;  %3018 = vmatprep.mubr.f32.mxu1 %v17239_v45  ;;  %v17283_v31 = vld [vmem:[#allocation112_spill] sm:$0xff] }
 0x3f9   :  { %10012 = vmatprep.subr.bf16.mxu1 %v16855_v53 }
 0x3fb   :  { %3020 = vmatmul.mubr.f32.gmra.mrb[8].mxu1 %v17240_v48 }
 0x3fc   :  { %10014 = vmatpush1.bf16.msra.mxu1 %v17241_v7  ;;  %3025 = vmatprep.mubr.f32.mxu1 %v17242_v46  ;;  %v953_v7 = vld [vmem:[%s16168_s5 + $0x28] sm:$0xff] }
 0x3fd   :  { %10015 = vmatprep.subr.bf16.mxu1 %v16855_v53  ;;  %1003 = vperm.xlu1 %11095, %v953_v7   ;;  %v971_v7 = vld [vmem:[%s16168_s5 + $0xb8] sm:$0xff] }
 0x3ff   :  { %3027 = vmatmul.mubr.f32.gmra.mrb[10].mxu1 %v17243_v1 }
 0x400   :  { %10017 = vmatpush1.bf16.msra.mxu1 %v17244_v30  ;;  %3032 = vmatprep.mubr.f32.mxu1 %v17245_v61  ;;  %v966_v30 = vld [vmem:[%s16168_s5 + $0x90] sm:$0xff] }
 0x401   :  { %10018 = vmatprep.subr.bf16.mxu1 %v16855_v53  ;;  %1068 = vperm.xlu0 %11094, %v966_v30   ;;  %v17292_v30 = vld [vmem:[#allocation130_spill] sm:$0xff] }
 0x403   :  { %3034 = vmatmul.mubr.f32.gmra.mrb[12].mxu1 %v17246_v12 }
 0x404   :  { %10020 = vmatpush1.bf16.msra.mxu1 %v17247_v14  ;;  %3039 = vmatprep.mubr.f32.mxu1 %v17248_v57  ;;  %v17284_v14 = vld [vmem:[#allocation113_spill] sm:$0xff] }
 0x405   :  { %10021 = vmatprep.subr.bf16.mxu1 %v16855_v53 }
 0x407   :  { %3041 = vmatmul.mubr.f32.gmra.mrb[14].mxu1 %v17249_v34 }
 0x408   :  { %10023 = vmatpush1.bf16.msra.mxu1 %v17250_v32  ;;  %3046 = vmatprep.mubr.f32.mxu1 %v17251_v35  ;;  %v17285_v32 = vld [vmem:[#allocation115_spill] sm:$0xff] }
 0x409   :  { %10024 = vmatprep.subr.bf16.mxu1 %v16855_v53 }
 0x40b   :  { %3048 = vmatmul.mubr.f32.gmra.mrb[16].mxu1 %v17252_v63 }
 0x40c   :  { %10026 = vmatpush1.bf16.msra.mxu1 %v17253_v15  ;;  %3053 = vmatprep.mubr.f32.mxu1 %v17254_v20  ;;  %v954_v15 = vld [vmem:[%s16168_s5 + $0x30] sm:$0xff] }
 0x40d   :  { %10027 = vmatprep.subr.bf16.mxu1 %v16855_v53  ;;  %1008 = vperm.xlu1 %11095, %v954_v15   ;;  %v958_v15 = vld [vmem:[%s16168_s5 + $0x50] sm:$0xff] }
 0x40f   :  { %3055 = vmatmul.mubr.f32.gmra.mrb[18].mxu1 %v17255_v5 }
 0x410   :  { %10029 = vmatpush1.bf16.msra.mxu1 %v17256_v22  ;;  %3060 = vmatprep.mubr.f32.mxu1 %v17257_v9  ;;  %v967_v22 = vld [vmem:[%s16168_s5 + $0x98] sm:$0xff] }
 0x411   :  { %10030 = vmatprep.subr.bf16.mxu1 %v16855_v53  ;;  %1073 = vperm.xlu0 %11094, %v967_v22   ;;  %v17293_v22 = vld [vmem:[#allocation132_spill] sm:$0xff] }
 0x413   :  { %3062 = vmatmul.mubr.f32.gmra.mrb[20].mxu1 %v17258_v19 }
 0x414   :  { %10032 = vmatpush1.bf16.msra.mxu1 %v17259_v25  ;;  %3067 = vmatprep.mubr.f32.mxu1 %v17260_v49  ;;  %v17286_v25 = vld [vmem:[#allocation118_spill] sm:$0xff] }
 0x415   :  { %10033 = vmatprep.subr.bf16.mxu1 %v16855_v53  ;;  %1078 = vperm.xlu0 %11094, %v968_v58   ;;  %v17294_v58 = vld [vmem:[#allocation134_spill] sm:$0xff] }
 0x417   :  { %3069 = vmatmul.mubr.f32.gmra.mrb[22].mxu1 %v17261_v51 }
 0x418   :  { %10035 = vmatpush1.bf16.msra.mxu1 %v17262_v18  ;;  %3074 = vmatprep.mubr.f32.mxu1 %v17263_v47  ;;  %v955_v18 = vld [vmem:[%s16168_s5 + $0x38] sm:$0xff] }
 0x419   :  { %1013 = vperm.xlu1 %11095, %v955_v18   ;;  %1083 = vperm.xlu0 %11094, %v969_v26   ;;  %v972_v18 = vld [vmem:[%s16168_s5 + $0xc0] sm:$0xff]  ;;  %v959_v26 = vld [vmem:[%s16168_s5 + $0x58] sm:$0xff] }
 0x41b   :  { %3076 = vmatmul.mubr.f32.gmra.mrb[24].mxu1 %v17264_v21 }
 0x41c   :  { %3081 = vmatprep.mubr.f32.mxu1 %v17265_v2 }
 0x41d   :  { %1018 = vperm.xlu1 %11095, %v956_v11   ;;  %1088 = vperm.xlu0 %11094, %v970_v8   ;;  %v973_v11 = vld [vmem:[%s16168_s5 + $0xc8] sm:$0xff]  ;;  %v960_v8 = vld [vmem:[%s16168_s5 + $0x60] sm:$0xff] }
 0x41f   :  { %3083 = vmatmul.mubr.f32.gmra.mrb[26].mxu1 %v17266_v59 }
 0x420   :  { %3088 = vmatprep.mubr.f32.mxu1 %v17267_v28 }
 0x421   :  { %1023 = vperm.xlu1 %11095, %v957_v33   ;;  %1093 = vperm.xlu0 %11094, %v971_v7   ;;  %v961_v33 = vld [vmem:[%s16168_s5 + $0x68] sm:$0xff] }
 0x423   :  { %3090 = vmatmul.mubr.f32.gmra.mrb[28].mxu1 %v17268_v44 }
 0x424   :  { %3095 = vmatprep.mubr.f32.mxu1 %v17269_v40 }
 0x425   :  { %1028 = vperm.xlu1 %11095, %v958_v15   ;;  %1098 = vperm.xlu0 %11094, %v972_v18  }
 0x427   :  { %3097 = vmatmul.mubr.f32.gmra.mrb[30].mxu1 %v17270_v29 }
 0x428   :  { %3102 = vmatprep.mubr.f32.mxu1 %v17271_v27 }
 0x429   :  { %1033 = vperm.xlu1 %11095, %v959_v26   ;;  %1103 = vperm.xlu0 %11094, %v973_v11  }
 0x42b   :  { %3104 = vmatmul.mubr.f32.gmra.mrb[32].mxu1 %v17272_v54 }
 0x42c   :  { %3109 = vmatprep.mubr.f32.mxu1 %v17273_v4 }
 0x42d   :  { %1038 = vperm.xlu1 %11095, %v960_v8  }
 0x42f   :  { %3111 = vmatmul.mubr.f32.gmra.mrb[34].mxu1 %v17274_v55 }
 0x430   :  { %3116 = vmatprep.mubr.f32.mxu1 %v17275_v10 }
 0x431   :  { %1043 = vperm.xlu1 %11095, %v961_v33  }
 0x433   :  { %3118 = vmatmul.mubr.f32.gmra.mrb[36].mxu1 %v17276_v38 }
 0x434   :  { %3123 = vmatprep.mubr.f32.mxu1 %v17277_v16 }
 0x437   :  { %3125 = vmatmul.mubr.f32.gmra.mrb[38].mxu1 %v17278_v43 }
 0x438   :  { %3130 = vmatprep.mubr.f32.mxu1 %v17279_v60 }
 0x43b   :  { %3132 = vmatmul.mubr.f32.gmra.mrb[40].mxu1 %v17280_v52 }
 0x43c   :  { %3137 = vmatprep.mubr.f32.mxu1 %v17281_v6 }
 0x43f   :  { %3139 = vmatmul.mubr.f32.gmra.mrb[42].mxu1 %v17282_v56 }
 0x440   :  { %3144 = vmatprep.mubr.f32.mxu1 %v17283_v31 }
 0x443   :  { %3146 = vmatmul.mubr.f32.gmra.mrb[44].mxu1 %v17284_v14 }
 0x444   :  { %3151 = vmatprep.mubr.f32.mxu1 %v17285_v32 }
 0x447   :  { %3153 = vmatmul.mubr.f32.gmra.mrb[46].mxu1 %v17286_v25 }
 0x448   :  { %3158 = vmatprep.mubr.f32.mxu1 %v17287_v42 }
 0x44b   :  { %3160 = vmatmul.mubr.f32.gmra.mrb[48].mxu1 %v17288_v36 }
 0x44c   :  { %3165 = vmatprep.mubr.f32.mxu1 %v17289_v24 }
 0x44f   :  { %3167 = vmatmul.mubr.f32.gmra.mrb[50].mxu1 %v17290_v13 }
 0x450   :  { %3172 = vmatprep.mubr.f32.mxu1 %v17291_v17 }
 0x453   :  { %3174 = vmatmul.mubr.f32.gmra.mrb[52].mxu1 %v17292_v30 }
 0x454   :  { %3179 = vmatprep.mubr.f32.mxu1 %v17293_v22 }
 0x457   :  { %3181 = vmatmul.mubr.f32.gmra.mrb[54].mxu1 %v17294_v58 }
 0x458   :  { %3275 = vmatprep.mubr.f32.mxu1 %v17227_v23  ;;  %v974_v23 = vld [vmem:[%s16168_s5 + $0xd0] sm:$0xff] }
 0x459   :  { %1108 = vperm.xlu0 %11094, %v974_v23  }
 0x45b   :  { %3277 = vmatmul.mubr.f32.vlgmr.msra.gmra.mrb[0].mxu1 %v17228_v3  ;;  %v975_v3 = vld [vmem:[%s16168_s5 + $0xd8] sm:$0xff] }
 0x45c   :  { %3282 = vmatprep.mubr.f32.mxu1 %v17230_v41 }
 0x45d   :  { %1113 = vperm.xlu0 %11094, %v975_v3  }
 0x45f   :  { %3284 = vmatmul.mubr.f32.gmra.mrb[2].mxu1 %v17231_v50 }
 0x460   :  { %3289 = vmatprep.mubr.f32.mxu1 %v17233_v62 }
 0x463   :  { %3291 = vmatmul.mubr.f32.gmra.mrb[4].mxu1 %v17234_v0 }
 0x464   :  { %3296 = vmatprep.mubr.f32.mxu1 %v17236_v37 }
 0x467   :  { %3298 = vmatmul.mubr.f32.gmra.mrb[6].mxu1 %v17237_v39 }
 0x468   :  { %3303 = vmatprep.mubr.f32.mxu1 %v17239_v45 }
 0x46b   :  { %3305 = vmatmul.mubr.f32.gmra.mrb[8].mxu1 %v17240_v48 }
 0x46c   :  { %3310 = vmatprep.mubr.f32.mxu1 %v17242_v46 }
 0x46f   :  { %3312 = vmatmul.mubr.f32.gmra.mrb[10].mxu1 %v17243_v1 }
 0x470   :  { %3317 = vmatprep.mubr.f32.mxu1 %v17245_v61 }
 0x473   :  { %3319 = vmatmul.mubr.f32.gmra.mrb[12].mxu1 %v17246_v12 }
 0x474   :  { %3324 = vmatprep.mubr.f32.mxu1 %v17248_v57  ;;  %v1049_v57 = vpop.permute.xlu1 %1048 }
 0x477   :  { %3326 = vmatmul.mubr.f32.gmra.mrb[14].mxu1 %v17249_v34 }
 0x478   :  { %3331 = vmatprep.mubr.f32.mxu1 %v17251_v35 }
 0x47b   :  { %3333 = vmatmul.mubr.f32.gmra.mrb[16].mxu1 %v17252_v63 }
 0x47c   :  { %3338 = vmatprep.mubr.f32.mxu1 %v17254_v20  ;;  %v984_v20 = vpop.permute.xlu1 %983 }
 0x47f   :  { %3340 = vmatmul.mubr.f32.gmra.mrb[18].mxu1 %v17255_v5 }
 0x480   :  { %3345 = vmatprep.mubr.f32.mxu1 %v17257_v9  ;;  %v979_v9 = vpop.permute.xlu0 %978 }
 0x483   :  { %3347 = vmatmul.mubr.f32.gmra.mrb[20].mxu1 %v17258_v19 }
 0x484   :  { %3352 = vmatprep.mubr.f32.mxu1 %v17260_v49 }
 0x487   :  { %3354 = vmatmul.mubr.f32.gmra.mrb[22].mxu1 %v17261_v51  ;;  %v989_v51 = vpop.permute.xlu1 %988 }
 0x488   :  { %3359 = vmatprep.mubr.f32.mxu1 %v17263_v47  ;;  %v1054_v47 = vpop.permute.xlu0 %1053 }
 0x48b   :  { %3361 = vmatmul.mubr.f32.gmra.mrb[24].mxu1 %v17264_v21 }
 0x48c   :  { %3366 = vmatprep.mubr.f32.mxu1 %v17265_v2 }
 0x48f   :  { %3368 = vmatmul.mubr.f32.gmra.mrb[26].mxu1 %v17266_v59 }
 0x490   :  { %3373 = vmatprep.mubr.f32.mxu1 %v17267_v28  ;;  %v994_v28 = vpop.permute.xlu1 %993 }
 0x493   :  { %3375 = vmatmul.mubr.f32.gmra.mrb[28].mxu1 %v17268_v44 }
 0x494   :  { %3380 = vmatprep.mubr.f32.mxu1 %v17269_v40  ;;  %v1059_v40 = vpop.permute.xlu0 %1058 }
 0x497   :  { %3382 = vmatmul.mubr.f32.gmra.mrb[30].mxu1 %v17270_v29 }
 0x498   :  { %3387 = vmatprep.mubr.f32.mxu1 %v17271_v27 }
 0x49b   :  { %3389 = vmatmul.mubr.f32.gmra.mrb[32].mxu1 %v17272_v54  ;;  %v999_v54 = vpop.permute.xlu1 %998 }
 0x49c   :  { %3394 = vmatprep.mubr.f32.mxu1 %v17273_v4  ;;  %v1064_v4 = vpop.permute.xlu0 %1063 }
 0x49f   :  { %3396 = vmatmul.mubr.f32.gmra.mrb[34].mxu1 %v17274_v55 }
 0x4a0   :  { %3401 = vmatprep.mubr.f32.mxu1 %v17275_v10 }
 0x4a3   :  { %3403 = vmatmul.mubr.f32.gmra.mrb[36].mxu1 %v17276_v38 }
 0x4a4   :  { %3408 = vmatprep.mubr.f32.mxu1 %v17277_v16 }
 0x4a7   :  { %3410 = vmatmul.mubr.f32.gmra.mrb[38].mxu1 %v17278_v43  ;;  %v13197_v43 = vpop.permute.xlu1 %1003 }
 0x4a8   :  { %3415 = vmatprep.mubr.f32.mxu1 %v17279_v60 }
 0x4ab   :  { %3417 = vmatmul.mubr.f32.gmra.mrb[40].mxu1 %v17280_v52  ;;  %v1069_v52 = vpop.permute.xlu0 %1068 }
 0x4ac   :  { %3422 = vmatprep.mubr.f32.mxu1 %v17281_v6 }
 0x4af   :  { %3424 = vmatmul.mubr.f32.gmra.mrb[42].mxu1 %v17282_v56 }
 0x4b0   :  { %3429 = vmatprep.mubr.f32.mxu1 %v17283_v31 }
 0x4b3   :  { %3431 = vmatmul.mubr.f32.gmra.mrb[44].mxu1 %v17284_v14 }
 0x4b4   :  { %3436 = vmatprep.mubr.f32.mxu1 %v17285_v32 }
 0x4b7   :  { %3438 = vmatmul.mubr.f32.gmra.mrb[46].mxu1 %v17286_v25  ;;  %v13199_v25 = vpop.permute.xlu1 %1008 }
 0x4b8   :  { %3443 = vmatprep.mubr.f32.mxu1 %v17287_v42 }
 0x4bb   :  { %3445 = vmatmul.mubr.f32.gmra.mrb[48].mxu1 %v17288_v36  ;;  %v13201_v36 = vpop.permute.xlu0 %1073  ;;  %v1014_v23 = vpop.permute.xlu1 %1013 }
 0x4bc   :  { %3450 = vmatprep.mubr.f32.mxu1 %v17289_v24 }
 0x4bf   :  { %3452 = vmatmul.mubr.f32.gmra.mrb[50].mxu1 %v17290_v13 }
 0x4c0   :  { %3457 = vmatprep.mubr.f32.mxu1 %v17291_v17 }
 0x4c3   :  { %3459 = vmatmul.mubr.f32.gmra.mrb[52].mxu1 %v17292_v30 }
 0x4c4   :  { %3464 = vmatprep.mubr.f32.mxu1 %v17293_v22 }
 0x4c7   :  { %3466 = vmatmul.mubr.f32.gmra.mrb[54].mxu1 %v17294_v58 }
 0x52e   :  { %v3278_v41 = vpop.f32.mrb[0].mxu1 }
 0x52f   :  { %v3280_v50 = vpop.f32.mrb[1].mxu1  ;;  %v10472_v38 = vadd.f32 %v3278_v41, %v979_v9 }
 0x531   :  { %v3499_v6 = vmul.f32 0.2, %v10472_v38  ;;  %vm3471_vm1 = vcmp.gt.f32.partialorder %v10472_v38, 0.0 }
 0x532   :  { %v3285_v62 = vpop.f32.mrb[2].mxu1 }
 0x533   :  { %v3287_v0 = vpop.f32.mrb[3].mxu1  ;;  %v10473_v31 = vadd.f32 %v3285_v62, %v984_v20  ;;  %v3527_v13 = vsel %vm3471_vm1, %v10472_v38, %v3499_v6  ;;  %v1079_v62 = vpop.permute.xlu0 %1078  ;;  %v13215_v20 = vld [vmem:[%s16169_s6] sm:$0xff] }
 0x535   :  { %v3500_v17 = vmul.f32 0.2, %v10473_v31  ;;  %vm3472_vm3 = vcmp.gt.f32.partialorder %v10473_v31, 0.0 }
 0x536   :  { %v3292_v37 = vpop.f32.mrb[4].mxu1 }
 0x537   :  { %v3294_v39 = vpop.f32.mrb[5].mxu1  ;;  %v10474_v7 = vadd.f32 %v3292_v37, %v989_v51  ;;  %v3528_v41 = vsel %vm3472_vm3, %v10473_v31, %v3500_v17  ;;  %v1019_v51 = vpop.permute.xlu1 %1018 }
 0x539   :  { %v3501_v8 = vmul.f32 0.2, %v10474_v7  ;;  %vm3473_vm5 = vcmp.gt.f32.partialorder %v10474_v7, 0.0 }
 0x53a   :  { %v3299_v45 = vpop.f32.mrb[6].mxu1 }
 0x53b   :  { %v3301_v48 = vpop.f32.mrb[7].mxu1  ;;  %v10475_v26 = vadd.f32 %v3299_v45, %v994_v28 }
 0x53d   :  { %v3502_v39 = vmul.f32 0.2, %v10475_v26  ;;  %vm3474_vm8 = vcmp.gt.f32.partialorder %v10475_v26, 0.0 }
 0x53e   :  { %v13177_v46 = vpop.f32.mrb[8].mxu1 }
 0x53f   :  { %v3308_v1 = vpop.f32.mrb[9].mxu1  ;;  %v10476_v48 = vadd.f32 %v13177_v46, %v999_v54 }
 0x541   :  { %v3503_v28 = vmul.f32 0.2, %v10476_v48  ;;  %vm3475_vm10 = vcmp.gt.f32.partialorder %v10476_v48, 0.0 }
 0x542   :  { %v13179_v61 = vpop.f32.mrb[10].mxu1 }
 0x543   :  { %v3315_v12 = vpop.f32.mrb[11].mxu1  ;;  %v10477_v54 = vadd.f32 %v13179_v61, %v13197_v43 }
 0x545   :  { %v3504_v43 = vmul.f32 0.2, %v10477_v54  ;;  %vm3476_vm12 = vcmp.gt.f32.partialorder %v10477_v54, 0.0 }
 0x546   :  { %v13181_v34 = vpop.f32.mrb[12].mxu1 }
 0x547   :  { %v3322_v35 = vpop.f32.mrb[13].mxu1  ;;  %v10478_v31 = vadd.f32 %v13181_v34, %v13199_v25 }
 0x549   :  { %v3505_v34 = vmul.f32 0.2, %v10478_v31  ;;  %vm3477_vm14 = vcmp.gt.f32.partialorder %v10478_v31, 0.0 }
 0x54a   :  { %v13183_v63 = vpop.f32.mrb[14].mxu1 }
 0x54b   :  { %v3329_v5 = vpop.f32.mrb[15].mxu1  ;;  %v10479_v25 = vadd.f32 %v13183_v63, %v1014_v23  ;;  %v3533_v63 = vsel %vm3477_vm14, %v10478_v31, %v3505_v34  ;;  %vm3641_vm14 = vcmask 105472  }
 0x54c   :  { %v3640_v5 = vld [vmem:[%s16169_s6 + $0x8] sm:$0x1f] }
 0x54d   :  { %v13222_v9 = vsel %vm3684_vm7, %v3640_v5, 0  ;;  %vm3478_vm0 = vcmp.gt.f32.partialorder %v10479_v25, 0.0 }
 0x54e   :  { %v13185_v19 = vpop.f32.mrb[16].mxu1 }
 0x54f   :  { %v3336_v49 = vpop.f32.mrb[17].mxu1  ;;  %v10480_v23 = vadd.f32 %v13185_v19, %v1019_v51 }
 0x550   :  { %v3689_v49 = vand.u32 4294901760, %v13215_v20 }
 0x552   :  { %v13187_v21 = vpop.f32.mrb[18].mxu1 }
 0x553   :  { %v3343_v2 = vpop.f32.mrb[19].mxu1 }
 0x554   :  { %v3692_v2 = vand.u32 4294901760, %v13222_v9 }
 0x556   :  { %v13189_v59 = vpop.f32.mrb[20].mxu1 }
 0x557   :  { %v3350_v44 = vpop.f32.mrb[21].mxu1 }
 0x558   :  { %v1084_v44 = vpop.permute.xlu0 %1083 }
 0x55a   :  { %v13191_v29 = vpop.f32.mrb[22].mxu1 }
 0x55b   :  { %v3357_v27 = vpop.f32.mrb[23].mxu1 }
 0x55c   :  { %v3530_v27 = vsel %vm3474_vm8, %v10475_v26, %v3502_v39 }
 0x55e   :  { %v13193_v55 = vpop.f32.mrb[24].mxu1 }
 0x55f   :  { %v3364_v10 = vpop.f32.mrb[25].mxu1 }
 0x562   :  { %v13195_v16 = vpop.f32.mrb[26].mxu1 }
 0x563   :  { %v3371_v60 = vpop.f32.mrb[27].mxu1 }
 0x564   :  { %v13235_v60 = vpack.c.bf16 %v3692_v2, %v3689_v49 }
 0x566   :  { %v3376_v56 = vpop.f32.mrb[28].mxu1  ;;  %10037 = vmatprep.subr.bf16.mxu0 %v13235_v60 }
 0x567   :  { %v10486_v14 = vadd.f32 %v3376_v56, %v1049_v57  ;;  %v3378_v32 = vpop.f32.mrb[29].mxu1  ;;  %v3529_v57 = vsel %vm3473_vm5, %v10474_v7, %v3501_v8  ;;  %10039 = vmatpush3.bf16.msra.mxu0 %v13235_v60 }
 0x569   :  { %vm3485_vm2 = vcmp.gt.f32.partialorder %v10486_v14, 0.0  ;;  %v3513_v42 = vmul.f32 0.2, %v10486_v14 }
 0x56a   :  { %v3383_v24 = vpop.f32.mrb[30].mxu1 }
 0x56b   :  { %v10487_v30 = vadd.f32 %v3383_v24, %v1054_v47  ;;  %v3385_v15 = vpop.f32.mrb[31].mxu1  ;;  %v3541_v22 = vsel %vm3485_vm2, %v10486_v14, %v3513_v42  ;;  %v3531_v42 = vsel %vm3475_vm10, %v10476_v48, %v3503_v28  ;;  %vm3479_vm2 = vcmp.gt.f32.partialorder %v10480_v23, 0.0 }
 0x56c   :  { %v13203_v18 = vmax.f32 %v3527_v13, %v3541_v22  ;;  %v1089_v13 = vpop.permute.xlu0 %1088 }
 0x56d   :  { %vm3486_vm4 = vcmp.gt.f32.partialorder %v10487_v30, 0.0  ;;  %v3514_v58 = vmul.f32 0.2, %v10487_v30 }
 0x56e   :  { %v3390_v11 = vpop.f32.mrb[32].mxu1  ;;  %3583 = vrot.lane.b32.xlu1 %v13203_v18, %s11096_s21 }
 0x56f   :  { %v10488_v33 = vadd.f32 %v3390_v11, %v1059_v40  ;;  %v3392_v3 = vpop.f32.mrb[33].mxu1  ;;  %v3542_v50 = vsel %vm3486_vm4, %v10487_v30, %v3514_v58 }
 0x570   :  { %v13207_v0 = vmax.f32 %v3528_v41, %v3542_v50  ;;  %v1094_v3 = vpop.permute.xlu0 %1093 }
 0x571   :  { %vm3487_vm6 = vcmp.gt.f32.partialorder %v10488_v33, 0.0  ;;  %v3515_v37 = vmul.f32 0.2, %v10488_v33 }
 0x572   :  { %v3397_v45 = vpop.f32.mrb[34].mxu1  ;;  %3585 = vrot.lane.b32.xlu0 %v13207_v0, %s11096_s21 }
 0x573   :  { %v10489_v1 = vadd.f32 %v3397_v45, %v1064_v4  ;;  %v3399_v12 = vpop.f32.mrb[35].mxu1  ;;  %v3543_v35 = vsel %vm3487_vm6, %v10488_v33, %v3515_v37  ;;  %v3506_v33 = vmul.f32 0.2, %v10479_v25 }
 0x574   :  { %v13220_v46 = vmax.f32 %v3529_v57, %v3543_v35  ;;  %v3507_v12 = vmul.f32 0.2, %v10480_v23  ;;  %v1099_v19 = vpop.permute.xlu0 %1098 }
 0x575   :  { %vm3488_vm9 = vcmp.gt.f32.partialorder %v10489_v1, 0.0  ;;  %v3516_v47 = vmul.f32 0.2, %v10489_v1 }
 0x576   :  { %v3404_v40 = vpop.f32.mrb[36].mxu1  ;;  %3587 = vrot.lane.b32.xlu1 %v13220_v46, %s11096_s21 }
 0x577   :  { %v10490_v4 = vadd.f32 %v3404_v40, %v1069_v52  ;;  %v3406_v10 = vpop.f32.mrb[37].mxu1  ;;  %v3544_v38 = vsel %vm3488_vm9, %v10489_v1, %v3516_v47  ;;  %v1024_v52 = vpop.permute.xlu1 %1023  ;;  %v3534_v1 = vsel %vm3478_vm0, %v10479_v25, %v3506_v33 }
 0x578   :  { %v13237_v6 = vmax.f32 %v3530_v27, %v3544_v38  ;;  %v10481_v57 = vadd.f32 %v13187_v21, %v1024_v52  ;;  %v3535_v21 = vsel %vm3479_vm2, %v10480_v23, %v3507_v12 }
 0x579   :  { %vm3489_vm11 = vcmp.gt.f32.partialorder %v10490_v4, 0.0  ;;  %v3517_v56 = vmul.f32 0.2, %v10490_v4 }
 0x57a   :  { %v3411_v61 = vpop.f32.mrb[38].mxu1  ;;  %3589 = vrot.lane.b32.xlu0 %v13237_v6, %s11096_s21  ;;  %vm3480_vm4 = vcmp.gt.f32.partialorder %v10481_v57, 0.0 }
 0x57b   :  { %v10491_v14 = vadd.f32 %v3411_v61, %v13201_v36  ;;  %v3413_v32 = vpop.f32.mrb[39].mxu1  ;;  %v3545_v24 = vsel %vm3489_vm11, %v10490_v4, %v3517_v56  ;;  %v3532_v36 = vsel %vm3476_vm12, %v10477_v54, %v3504_v43  ;;  %v1029_v11 = vpop.permute.xlu1 %1028  ;;  %v3508_v54 = vmul.f32 0.2, %v10481_v57 }
 0x57c   :  { %v13246_v17 = vmax.f32 %v3531_v42, %v3545_v24  ;;  %v10482_v40 = vadd.f32 %v13189_v59, %v1029_v11  ;;  %v13274_v32 = vsub.f32 %v13215_v20, %v3689_v49  ;;  %v13279_v42 = vsub.f32 %v13222_v9, %v3692_v2 }
 0x57d   :  { %vm3490_vm13 = vcmp.gt.f32.partialorder %v10491_v14, 0.0  ;;  %v3518_v7 = vmul.f32 0.2, %v10491_v14 }
 0x57e   :  { %v3418_v30 = vpop.f32.mrb[40].mxu1  ;;  %3591 = vrot.lane.b32.xlu1 %v13246_v17, %s11096_s21  ;;  %v3509_v43 = vmul.f32 0.2, %v10482_v40  ;;  %vm3481_vm6 = vcmp.gt.f32.partialorder %v10482_v40, 0.0  ;;  %v3898_v25 = vand.u32 4294901760, %v13274_v32 }
 0x57f   :  { %v10492_v15 = vadd.f32 %v3418_v30, %v1079_v62  ;;  %v3420_v22 = vpop.f32.mrb[41].mxu1  ;;  %v3546_v58 = vsel %vm3490_vm13, %v10491_v14, %v3518_v7  ;;  %v1034_v35 = vpop.permute.xlu1 %1033  ;;  %v3536_v7 = vsel %vm3480_vm4, %v10481_v57, %v3508_v54  ;;  %v3905_v30 = vand.u32 4294901760, %v13279_v42 }
 0x580   :  { %v13251_v26 = vmax.f32 %v3532_v36, %v3546_v58  ;;  %v10483_v52 = vadd.f32 %v13191_v29, %v1034_v35  ;;  %v1104_v14 = vpop.permute.xlu0 %1103  ;;  %v3537_v9 = vsel %vm3481_vm6, %v10482_v40, %v3509_v43  ;;  %v3899_v2 = vsub.f32 %v13274_v32, %v3898_v25 }
 0x581   :  { %vm3491_vm15 = vcmp.gt.f32.partialorder %v10492_v15, 0.0  ;;  %v3519_v8 = vmul.f32 0.2, %v10492_v15  ;;  %v3906_v22 = vsub.f32 %v13279_v42, %v3905_v30 }
 0x582   :  { %v3425_v41 = vpop.f32.mrb[42].mxu1  ;;  %3593 = vrot.lane.b32.xlu0 %v13251_v26, %s11096_s21  ;;  %v3510_v20 = vmul.f32 0.2, %v10483_v52  ;;  %vm3482_vm8 = vcmp.gt.f32.partialorder %v10483_v52, 0.0 }
 0x583   :  { %v10493_v50 = vadd.f32 %v3425_v41, %v1084_v44  ;;  %v3427_v62 = vpop.f32.mrb[43].mxu1  ;;  %v3547_v37 = vsel %vm3491_vm15, %v10492_v15, %v3519_v8  ;;  %v1039_v31 = vpop.permute.xlu1 %1038  ;;  %v3907_v23 = vand.u32 4294901760, %v3906_v22  ;;  %vm4984_vm15 = vcmask 654336  }
 0x584   :  { %v13256_v39 = vmax.f32 %v3533_v63, %v3547_v37  ;;  %v10484_v36 = vadd.f32 %v13193_v55, %v1039_v31  ;;  %v3900_v63 = vand.u32 4294901760, %v3899_v2  ;;  %v3538_v37 = vsel %vm3482_vm8, %v10483_v52, %v3510_v20 }
 0x585   :  { %vm3492_vm1 = vcmp.gt.f32.partialorder %v10493_v50, 0.0  ;;  %v3520_v48 = vmul.f32 0.2, %v10493_v50  ;;  %v13316_v31 = vpack.c.bf16 %v13279_v42, %v13274_v32 }
 0x586   :  { %v3432_v45 = vpop.f32.mrb[44].mxu1  ;;  %3595 = vrot.lane.b32.xlu1 %v13256_v39, %s11096_s21  ;;  %vm3483_vm10 = vcmp.gt.f32.partialorder %v10484_v36, 0.0 }
 0x587   :  { %v10494_v5 = vadd.f32 %v3432_v45, %v1089_v13  ;;  %v3434_v47 = vpop.f32.mrb[45].mxu1  ;;  %v3548_v28 = vsel %vm3492_vm1, %v10493_v50, %v3520_v48  ;;  %v1044_v33 = vpop.permute.xlu1 %1043  ;;  %v13298_v48 = vpack.c.bf16 %v3907_v23, %v3900_v63  ;;  %v3511_v45 = vmul.f32 0.2, %v10484_v36 }
 0x588   :  { %v13261_v51 = vmax.f32 %v3534_v1, %v3548_v28  ;;  %v10485_v55 = vadd.f32 %v13195_v16, %v1044_v33 }
 0x589   :  { %vm3493_vm3 = vcmp.gt.f32.partialorder %v10494_v5, 0.0  ;;  %v3521_v44 = vmul.f32 0.2, %v10494_v5  ;;  %10041 = vmatprep.subr.bf16.mxu0 %v13298_v48 }
 0x58a   :  { %v3439_v27 = vpop.f32.mrb[46].mxu1  ;;  %3597 = vrot.lane.b32.xlu0 %v13261_v51, %s11096_s21  ;;  %vm3484_vm12 = vcmp.gt.f32.partialorder %v10485_v55, 0.0 }
 0x58b   :  { %v10495_v4 = vadd.f32 %v3439_v27, %v1094_v3  ;;  %v3441_v10 = vpop.f32.mrb[47].mxu1  ;;  %v3549_v38 = vsel %vm3493_vm3, %v10494_v5, %v3521_v44  ;;  %v1109_v3 = vpop.permute.xlu0 %1108  ;;  %v3539_v27 = vsel %vm3483_vm10, %v10484_v36, %v3511_v45 }
 0x58c   :  { %v13266_v56 = vmax.f32 %v3535_v21, %v3549_v38 }
 0x58d   :  { %vm3494_vm5 = vcmp.gt.f32.partialorder %v10495_v4, 0.0  ;;  %v3522_v61 = vmul.f32 0.2, %v10495_v4 }
 0x58e   :  { %v3446_v59 = vpop.f32.mrb[48].mxu1  ;;  %3599 = vrot.lane.b32.xlu1 %v13266_v56, %s11096_s21 }
 0x58f   :  { %v10496_v24 = vadd.f32 %v3446_v59, %v1099_v19  ;;  %v3448_v13 = vpop.f32.mrb[49].mxu1  ;;  %v3550_v29 = vsel %vm3494_vm5, %v10495_v4, %v3522_v61  ;;  %v1114_v47 = vpop.permute.xlu0 %1113  ;;  %v3512_v19 = vmul.f32 0.2, %v10485_v55 }
 0x590   :  { %v13281_v34 = vmax.f32 %v3536_v7, %v3550_v29 }
 0x591   :  { %vm3495_vm7 = vcmp.gt.f32.partialorder %v10496_v24, 0.0  ;;  %v3523_v15 = vmul.f32 0.2, %v10496_v24  ;;  %v3540_v10 = vsel %vm3484_vm12, %v10485_v55, %v3512_v19 }
 0x592   :  { %v3453_v49 = vpop.f32.mrb[50].mxu1  ;;  %3601 = vrot.lane.b32.xlu0 %v13281_v34, %s11096_s21 }
 0x593   :  { %v10497_v58 = vadd.f32 %v3453_v49, %v1104_v14  ;;  %v3455_v11 = vpop.f32.mrb[51].mxu1  ;;  %v3551_v8 = vsel %vm3495_vm7, %v10496_v24, %v3523_v15 }
 0x594   :  { %v13294_v41 = vmax.f32 %v3537_v9, %v3551_v8 }
 0x595   :  { %vm3496_vm9 = vcmp.gt.f32.partialorder %v10497_v58, 0.0  ;;  %v3524_v50 = vmul.f32 0.2, %v10497_v58 }
 0x596   :  { %v3460_v62 = vpop.f32.mrb[52].mxu1  ;;  %3603 = vrot.lane.b32.xlu1 %v13294_v41, %s11096_s21 }
 0x597   :  { %v10498_v1 = vadd.f32 %v3460_v62, %v1109_v3  ;;  %v3462_v12 = vpop.f32.mrb[53].mxu1  ;;  %v3552_v57 = vsel %vm3496_vm9, %v10497_v58, %v3524_v50 }
 0x598   :  { %v13301_v35 = vmax.f32 %v3538_v37, %v3552_v57 }
 0x599   :  { %vm3497_vm11 = vcmp.gt.f32.partialorder %v10498_v1, 0.0  ;;  %v3525_v5 = vmul.f32 0.2, %v10498_v1 }
 0x59a   :  { %v3467_v28 = vpop.f32.mrb[54].mxu1  ;;  %3605 = vrot.lane.b32.xlu0 %v13301_v35, %s11096_s21 }
 0x59b   :  { %v10499_v44 = vadd.f32 %v3467_v28, %v1114_v47  ;;  %v3469_v40 = vpop.f32.mrb[55].mxu1  ;;  %v3553_v16 = vsel %vm3497_vm11, %v10498_v1, %v3525_v5 }
 0x59c   :  { %v13306_v54 = vmax.f32 %v3539_v27, %v3553_v16 }
 0x59d   :  { %vm3498_vm13 = vcmp.gt.f32.partialorder %v10499_v44, 0.0  ;;  %v3526_v4 = vmul.f32 0.2, %v10499_v44 }
 0x59e   :  { %3607 = vrot.lane.b32.xlu1 %v13306_v54, %s11096_s21 }
 0x59f   :  { %v3554_v21 = vsel %vm3498_vm13, %v10499_v44, %v3526_v4 }
 0x5a0   :  { %v13310_v38 = vmax.f32 %v3540_v10, %v3554_v21 }
 0x5a2   :  { %3609 = vrot.lane.b32.xlu0 %v13310_v38, %s11096_s21 }
 0x5e0   :  { %v3584_v61 = vpop.permute.xlu1 %3583 }
 0x5e1   :  { %v3625_v43 = vmax.f32 %v13203_v18, %v3584_v61 }
 0x5e3   :  { %v3643_v52 = vsel %vm3641_vm14, %v3625_v43, 0 }
 0x5e4   :  { %v13320_v14 = vand.u32 4294901760, %v3643_v52  ;;  %v3586_v59 = vpop.permute.xlu0 %3585 }
 0x5e5   :  { %v3626_v24 = vmax.f32 %v13207_v0, %v3586_v59 }
 0x5e6   :  { %v13324_v13 = vsub.f32 %v3643_v52, %v13320_v14 }
 0x5e7   :  { %v3646_v7 = vsel %vm3641_vm14, %v3626_v24, 0 }
 0x5e8   :  { %v13327_v29 = vand.u32 4294901760, %v3646_v7  ;;  %v3588_v15 = vpop.permute.xlu1 %3587  ;;  %v3757_v20 = vand.u32 4294901760, %v13324_v13 }
 0x5e9   :  { %v3627_v49 = vmax.f32 %v13220_v46, %v3588_v15 }
 0x5ea   :  { %v13332_v18 = vsub.f32 %v3646_v7, %v13327_v29  ;;  %v3758_v9 = vsub.f32 %v13324_v13, %v3757_v20 }
 0x5eb   :  { %v3649_v0 = vsel %vm3641_vm14, %v3627_v49, 0 }
 0x5ec   :  { %v3767_v2 = vand.u32 4294901760, %v13332_v18  ;;  %v13339_v22 = vand.u32 4294901760, %v3649_v0  ;;  %v3590_v36 = vpop.permute.xlu0 %3589  ;;  %v3759_v58 = vand.u32 4294901760, %v3758_v9 }
 0x5ed   :  { %v3628_v11 = vmax.f32 %v13237_v6, %v3590_v36 }
 0x5ee   :  { %v3768_v46 = vsub.f32 %v13332_v18, %v3767_v2  ;;  %v13346_v8 = vsub.f32 %v3649_v0, %v13339_v22  ;;  %9182 = vmatprep.mubr.f32.mxu0 %v3759_v58 }
 0x5ef   :  { %v3652_v33 = vsel %vm3641_vm14, %v3628_v11, 0 }
 0x5f0   :  { %v3769_v3 = vand.u32 4294901760, %v3768_v46  ;;  %v13349_v63 = vand.u32 4294901760, %v3652_v33  ;;  %v3592_v23 = vpop.permute.xlu1 %3591  ;;  %v3777_v50 = vand.u32 4294901760, %v13346_v8 }
 0x5f1   :  { %v3629_v62 = vmax.f32 %v13246_v17, %v3592_v23 }
 0x5f2   :  { %v13354_v6 = vsub.f32 %v3652_v33, %v13349_v63  ;;  %9183 = vmatmul.mubr.f32.vlgmr.msra.gmra.mrb[4].mxu0 %v3769_v3  ;;  %v3778_v37 = vsub.f32 %v13346_v8, %v3777_v50 }
 0x5f3   :  { %v3655_v45 = vsel %vm3641_vm14, %v3629_v62, 0  ;;  %10043 = vmatpush3.bf16.msra.mxu0 %v13298_v48 }
 0x5f4   :  { %v13361_v55 = vand.u32 4294901760, %v3655_v45  ;;  %v3594_v1 = vpop.permute.xlu0 %3593  ;;  %v3779_v12 = vand.u32 4294901760, %v3778_v37  ;;  %v3787_v57 = vand.u32 4294901760, %v13354_v6  ;;  %10045 = vmatprep.subr.bf16.mxu0 %v13316_v31 }
 0x5f5   :  { %v3630_v17 = vmax.f32 %v13251_v26, %v3594_v1 }
 0x5f6   :  { %v13367_v5 = vsub.f32 %v3655_v45, %v13361_v55  ;;  %9185 = vmatprep.mubr.f32.mxu0 %v3779_v12  ;;  %v3788_v47 = vsub.f32 %v13354_v6, %v3787_v57 }
 0x5f7   :  { %v3658_v48 = vsel %vm3641_vm14, %v3630_v17, 0 }
 0x5f8   :  { %v13373_v28 = vand.u32 4294901760, %v3658_v48  ;;  %v3596_v19 = vpop.permute.xlu1 %3595  ;;  %v3789_v44 = vand.u32 4294901760, %v3788_v47  ;;  %v3797_v40 = vand.u32 4294901760, %v13367_v5 }
 0x5f9   :  { %v3631_v27 = vmax.f32 %v13256_v39, %v3596_v19 }
 0x5fa   :  { %v13378_v26 = vsub.f32 %v3658_v48, %v13373_v28  ;;  %9186 = vmatmul.mubr.f32.gmra.mrb[6].mxu0 %v3789_v44  ;;  %v3798_v16 = vsub.f32 %v13367_v5, %v3797_v40 }
 0x5fb   :  { %v3661_v4 = vsel %vm3641_vm14, %v3631_v27, 0 }
 0x5fc   :  { %v13384_v10 = vand.u32 4294901760, %v3661_v4  ;;  %v3598_v21 = vpop.permute.xlu0 %3597  ;;  %v3799_v61 = vand.u32 4294901760, %v3798_v16  ;;  %v3807_v43 = vand.u32 4294901760, %v13378_v26 }
 0x5fd   :  { %v3632_v52 = vmax.f32 %v13261_v51, %v3598_v21 }
 0x5fe   :  { %v13389_v39 = vsub.f32 %v3661_v4, %v13384_v10  ;;  %9188 = vmatprep.mubr.f32.mxu0 %v3799_v61  ;;  %v3808_v59 = vsub.f32 %v13378_v26, %v3807_v43 }
 0x5ff   :  { %v3664_v24 = vsel %vm3641_vm14, %v3632_v52, 0 }
 0x600   :  { %v13395_v7 = vand.u32 4294901760, %v3664_v24  ;;  %v3600_v15 = vpop.permute.xlu1 %3599  ;;  %v3809_v49 = vand.u32 4294901760, %v3808_v59  ;;  %v3817_v9 = vand.u32 4294901760, %v13389_v39 }
 0x601   :  { %v3633_v0 = vmax.f32 %v13266_v56, %v3600_v15 }
 0x602   :  { %v13400_v51 = vsub.f32 %v3664_v24, %v13395_v7  ;;  %9189 = vmatmul.mubr.f32.gmra.mrb[8].mxu0 %v3809_v49  ;;  %v3818_v36 = vsub.f32 %v13389_v39, %v3817_v9 }
 0x603   :  { %v3667_v58 = vsel %vm3641_vm14, %v3633_v0, 0 }
 0x604   :  { %v13406_v11 = vand.u32 4294901760, %v3667_v58  ;;  %v3602_v46 = vpop.permute.xlu0 %3601  ;;  %v3819_v33 = vand.u32 4294901760, %v3818_v36  ;;  %v3827_v3 = vand.u32 4294901760, %v13400_v51 }
 0x605   :  { %v3634_v23 = vmax.f32 %v13281_v34, %v3602_v46 }
 0x606   :  { %v13411_v56 = vsub.f32 %v3667_v58, %v13406_v11  ;;  %9191 = vmatprep.mubr.f32.mxu0 %v3819_v33  ;;  %v3828_v62 = vsub.f32 %v13400_v51, %v3827_v3 }
 0x607   :  { %v3670_v37 = vsel %vm3641_vm14, %v3634_v23, 0 }
 0x608   :  { %v13417_v45 = vand.u32 4294901760, %v3670_v37  ;;  %v3604_v1 = vpop.permute.xlu1 %3603  ;;  %v3829_v12 = vand.u32 4294901760, %v3828_v62  ;;  %v3837_v17 = vand.u32 4294901760, %v13411_v56 }
 0x609   :  { %v3635_v47 = vmax.f32 %v13294_v41, %v3604_v1 }
 0x60a   :  { %v13422_v34 = vsub.f32 %v3670_v37, %v13417_v45  ;;  %9192 = vmatmul.mubr.f32.gmra.mrb[10].mxu0 %v3829_v12  ;;  %v3838_v48 = vsub.f32 %v13411_v56, %v3837_v17 }
 0x60b   :  { %v3673_v19 = vsel %vm3641_vm14, %v3635_v47, 0 }
 0x60c   :  { %v13428_v44 = vand.u32 4294901760, %v3673_v19  ;;  %v3606_v27 = vpop.permute.xlu0 %3605  ;;  %v3839_v16 = vand.u32 4294901760, %v3838_v48  ;;  %v3847_v4 = vand.u32 4294901760, %v13422_v34 }
 0x60d   :  { %v3636_v21 = vmax.f32 %v13301_v35, %v3606_v27 }
 0x60e   :  { %v13433_v41 = vsub.f32 %v3673_v19, %v13428_v44  ;;  %9194 = vmatprep.mubr.f32.mxu0 %v3839_v16  ;;  %v3848_v61 = vsub.f32 %v13422_v34, %v3847_v4 }
 0x60f   :  { %v3676_v52 = vsel %vm3641_vm14, %v3636_v21, 0 }
 0x610   :  { %v13439_v59 = vand.u32 4294901760, %v3676_v52  ;;  %v3608_v24 = vpop.permute.xlu1 %3607  ;;  %v3849_v15 = vand.u32 4294901760, %v3848_v61  ;;  %v3857_v49 = vand.u32 4294901760, %v13433_v41 }
 0x611   :  { %v3637_v0 = vmax.f32 %v13306_v54, %v3608_v24 }
 0x612   :  { %v13444_v35 = vsub.f32 %v3676_v52, %v13439_v59  ;;  %9195 = vmatmul.mubr.f32.gmra.mrb[12].mxu0 %v3849_v15  ;;  %v3858_v36 = vsub.f32 %v13433_v41, %v3857_v49 }
 0x613   :  { %v3679_v58 = vsel %vm3641_vm14, %v3637_v0, 0 }
 0x614   :  { %v13450_v46 = vand.u32 4294901760, %v3679_v58  ;;  %v3610_v33 = vpop.permute.xlu0 %3609  ;;  %v3859_v23 = vand.u32 4294901760, %v3858_v36  ;;  %v3867_v62 = vand.u32 4294901760, %v13444_v35 }
 0x615   :  { %v3638_v37 = vmax.f32 %v13310_v38, %v3610_v33 }
 0x616   :  { %v13455_v54 = vsub.f32 %v3679_v58, %v13450_v46  ;;  %9197 = vmatprep.mubr.f32.mxu0 %v3859_v23  ;;  %v3868_v1 = vsub.f32 %v13444_v35, %v3867_v62  ;;  %v4820_v58 = vld [vmem:[%s16170_s7 + $0x80] sm:$0xff] }
 0x617   :  { %v3682_v12 = vsel %vm3641_vm14, %v3638_v37, 0 }
 0x618   :  { %v13461_v47 = vand.u32 4294901760, %v3682_v12  ;;  %v3869_v48 = vand.u32 4294901760, %v3868_v1  ;;  %v3877_v19 = vand.u32 4294901760, %v13455_v54 }
 0x61a   :  { %v3886_v27 = vsub.f32 %v3682_v12, %v13461_v47  ;;  %9198 = vmatmul.mubr.f32.gmra.mrb[14].mxu0 %v3869_v48  ;;  %v3878_v38 = vsub.f32 %v13455_v54, %v3877_v19 }
 0x61c   :  { %v3879_v16 = vand.u32 4294901760, %v3878_v38  ;;  %v3887_v21 = vand.u32 4294901760, %v3886_v27 }
 0x61e   :  { %9200 = vmatprep.mubr.f32.mxu0 %v3879_v16  ;;  %v3888_v61 = vsub.f32 %v3886_v27, %v3887_v21 }
 0x620   :  { %v3889_v52 = vand.u32 4294901760, %v3888_v61 }
 0x622   :  { %9201 = vmatmul.mubr.f32.gmra.mrb[16].mxu0 %v3889_v52 }
 0x623   :  { %9207 = vmatprep.mubr.f32.mxu0 %v13320_v14 }
 0x626   :  { %9208 = vmatmul.mubr.f32.vlgmr.msra.gmra.mrb[4].mxu0 %v13327_v29 }
 0x627   :  { %9210 = vmatprep.mubr.f32.mxu0 %v13339_v22  ;;  %10047 = vmatpush3.bf16.msra.mxu0 %v13316_v31  ;;  %v10052_v31 = vpack.c.bf16 %v3905_v30, %v3898_v25 }
 0x628   :  { %10049 = vmatprep.subr.bf16.mxu0 %v13235_v60 }
 0x62a   :  { %9211 = vmatmul.mubr.f32.gmra.mrb[6].mxu0 %v13349_v63 }
 0x62b   :  { %9213 = vmatprep.mubr.f32.mxu0 %v13361_v55 }
 0x62e   :  { %9214 = vmatmul.mubr.f32.gmra.mrb[8].mxu0 %v13373_v28 }
 0x62f   :  { %9216 = vmatprep.mubr.f32.mxu0 %v13384_v10 }
 0x632   :  { %9217 = vmatmul.mubr.f32.gmra.mrb[10].mxu0 %v13395_v7 }
 0x633   :  { %9219 = vmatprep.mubr.f32.mxu0 %v13406_v11 }
 0x636   :  { %9220 = vmatmul.mubr.f32.gmra.mrb[12].mxu0 %v13417_v45 }
 0x637   :  { %9222 = vmatprep.mubr.f32.mxu0 %v13428_v44 }
 0x63a   :  { %9223 = vmatmul.mubr.f32.gmra.mrb[14].mxu0 %v13439_v59 }
 0x63b   :  { %9225 = vmatprep.mubr.f32.mxu0 %v13450_v46 }
 0x63e   :  { %9226 = vmatmul.mubr.f32.gmra.mrb[16].mxu0 %v13461_v47 }
 0x63f   :  { %9232 = vmatprep.mubr.f32.mxu0 %v13324_v13 }
 0x642   :  { %9233 = vmatmul.mubr.f32.vlgmr.msra.gmra.mrb[4].mxu0 %v13332_v18 }
 0x643   :  { %9235 = vmatprep.mubr.f32.mxu0 %v13346_v8  ;;  %10051 = vmatpush3.bf16.msra.mxu0 %v13235_v60 }
 0x644   :  { %10053 = vmatprep.subr.bf16.mxu0 %v10052_v31 }
 0x646   :  { %9236 = vmatmul.mubr.f32.gmra.mrb[6].mxu0 %v13354_v6 }
 0x647   :  { %9238 = vmatprep.mubr.f32.mxu0 %v13367_v5 }
 0x64a   :  { %9239 = vmatmul.mubr.f32.gmra.mrb[8].mxu0 %v13378_v26 }
 0x64b   :  { %9241 = vmatprep.mubr.f32.mxu0 %v13389_v39 }
 0x64e   :  { %9242 = vmatmul.mubr.f32.gmra.mrb[10].mxu0 %v13400_v51 }
 0x64f   :  { %9244 = vmatprep.mubr.f32.mxu0 %v13411_v56 }
 0x652   :  { %9245 = vmatmul.mubr.f32.gmra.mrb[12].mxu0 %v13422_v34 }
 0x653   :  { %9247 = vmatprep.mubr.f32.mxu0 %v13433_v41 }
 0x656   :  { %9248 = vmatmul.mubr.f32.gmra.mrb[14].mxu0 %v13444_v35 }
 0x657   :  { %9250 = vmatprep.mubr.f32.mxu0 %v13455_v54 }
 0x65a   :  { %9251 = vmatmul.mubr.f32.gmra.mrb[16].mxu0 %v3886_v27 }
 0x65b   :  { %9257 = vmatprep.mubr.f32.mxu0 %v3757_v20 }
 0x65e   :  { %9258 = vmatmul.mubr.f32.vlgmr.msra.gmra.mrb[4].mxu0 %v3767_v2 }
 0x65f   :  { %9260 = vmatprep.mubr.f32.mxu0 %v3777_v50  ;;  %10055 = vmatpush3.bf16.msra.mxu0 %v10052_v31 }
 0x660   :  { %10057 = vmatprep.subr.bf16.mxu0 %v13235_v60 }
 0x662   :  { %9261 = vmatmul.mubr.f32.gmra.mrb[6].mxu0 %v3787_v57 }
 0x663   :  { %9263 = vmatprep.mubr.f32.mxu0 %v3797_v40 }
 0x666   :  { %9264 = vmatmul.mubr.f32.gmra.mrb[8].mxu0 %v3807_v43 }
 0x667   :  { %9266 = vmatprep.mubr.f32.mxu0 %v3817_v9 }
 0x66a   :  { %9267 = vmatmul.mubr.f32.gmra.mrb[10].mxu0 %v3827_v3 }
 0x66b   :  { %9269 = vmatprep.mubr.f32.mxu0 %v3837_v17 }
 0x66e   :  { %9270 = vmatmul.mubr.f32.gmra.mrb[12].mxu0 %v3847_v4 }
 0x66f   :  { %9272 = vmatprep.mubr.f32.mxu0 %v3857_v49 }
 0x672   :  { %9273 = vmatmul.mubr.f32.gmra.mrb[14].mxu0 %v3867_v62 }
 0x673   :  { %9275 = vmatprep.mubr.f32.mxu0 %v3877_v19 }
 0x676   :  { %9276 = vmatmul.mubr.f32.gmra.mrb[16].mxu0 %v3887_v21 }
 0x677   :  { %9282 = vmatprep.mubr.f32.mxu0 %v13320_v14 }
 0x67a   :  { %9283 = vmatmul.mubr.f32.vlgmr.msra.gmra.mrb[4].mxu0 %v13327_v29 }
 0x67b   :  { %9285 = vmatprep.mubr.f32.mxu0 %v13339_v22  ;;  %10059 = vmatpush3.bf16.msra.mxu0 %v13235_v60 }
 0x67c   :  { %10060 = vmatprep.subr.bf16.mxu0 %v16855_v53 }
 0x67e   :  { %9286 = vmatmul.mubr.f32.gmra.mrb[6].mxu0 %v13349_v63 }
 0x67f   :  { %9288 = vmatprep.mubr.f32.mxu0 %v13361_v55 }
 0x682   :  { %9289 = vmatmul.mubr.f32.gmra.mrb[8].mxu0 %v13373_v28 }
 0x683   :  { %9291 = vmatprep.mubr.f32.mxu0 %v13384_v10 }
 0x686   :  { %9292 = vmatmul.mubr.f32.gmra.mrb[10].mxu0 %v13395_v7 }
 0x687   :  { %9294 = vmatprep.mubr.f32.mxu0 %v13406_v11 }
 0x68a   :  { %9295 = vmatmul.mubr.f32.gmra.mrb[12].mxu0 %v13417_v45 }
 0x68b   :  { %9297 = vmatprep.mubr.f32.mxu0 %v13428_v44 }
 0x68e   :  { %9298 = vmatmul.mubr.f32.gmra.mrb[14].mxu0 %v13439_v59 }
 0x68f   :  { %9300 = vmatprep.mubr.f32.mxu0 %v13450_v46 }
 0x692   :  { %9301 = vmatmul.mubr.f32.gmra.mrb[16].mxu0 %v13461_v47 }
 0x693   :  { %9307 = vmatprep.mubr.f32.mxu0 %v13320_v14 }
 0x696   :  { %9308 = vmatmul.mubr.f32.vlgmr.msra.gmra.mrb[4].mxu0 %v13327_v29 }
 0x697   :  { %9310 = vmatprep.mubr.f32.mxu0 %v13339_v22 }
 0x69a   :  { %9311 = vmatmul.mubr.f32.gmra.mrb[6].mxu0 %v13349_v63 }
 0x69b   :  { %9313 = vmatprep.mubr.f32.mxu0 %v13361_v55 }
 0x69e   :  { %9314 = vmatmul.mubr.f32.gmra.mrb[8].mxu0 %v13373_v28 }
 0x69f   :  { %9316 = vmatprep.mubr.f32.mxu0 %v13384_v10 }
 0x6a2   :  { %9317 = vmatmul.mubr.f32.gmra.mrb[10].mxu0 %v13395_v7 }
 0x6a3   :  { %9319 = vmatprep.mubr.f32.mxu0 %v13406_v11  ;;  %v13954_v11 = vand.u32 4294901760, %v4820_v58 }
 0x6a5   :  { %17341 = vst [vmem:[#allocation116_spill] sm:$0xff] %v13954_v11 }
 0x6a6   :  { %9320 = vmatmul.mubr.f32.gmra.mrb[12].mxu0 %v13417_v45 }
 0x6a7   :  { %9322 = vmatprep.mubr.f32.mxu0 %v13428_v44 }
 0x6aa   :  { %9323 = vmatmul.mubr.f32.gmra.mrb[14].mxu0 %v13439_v59 }
 0x6ab   :  { %9325 = vmatprep.mubr.f32.mxu0 %v13450_v46 }
 0x6ae   :  { %9326 = vmatmul.mubr.f32.gmra.mrb[16].mxu0 %v13461_v47 }
 0x769   :  { %v13555_v60 = vpop.f32.mrb[4].mxu0 }
 0x76a   :  { %v5049_v32 = vand.u32 4294901760, %v13555_v60  ;;  %4722 = vrot.lane.b32.xlu0 %v13555_v60, %s11096_s21  ;;  %v13560_v42 = vpop.f32.mrb[5].mxu0 }
 0x76b   :  { %v5046_v25 = vand.u32 4294901760, %v13560_v42  ;;  %4720 = vrot.lane.b32.xlu1 %v13560_v42, %s11096_s21 }
 0x76c   :  { %v13566_v30 = vsub.f32 %v13555_v60, %v5049_v32 }
 0x76d   :  { %v13569_v14 = vsub.f32 %v13560_v42, %v5046_v25  ;;  %v13571_v13 = vpop.f32.mrb[6].mxu0  ;;  %v13573_v29 = vpack.c.bf16 %v5049_v32, %v5046_v25 }
 0x76e   :  { %17295 = vst [vmem:[#allocation8_spill] sm:$0xff] %v13566_v30  ;;  %v5452_v20 = vand.u32 4294901760, %v13566_v30  ;;  %v5055_v18 = vand.u32 4294901760, %v13571_v13  ;;  %4726 = vrot.lane.b32.xlu0 %v13571_v13, %s11096_s21  ;;  %v13579_v2 = vpop.f32.mrb[7].mxu0 }
 0x76f   :  { %17296 = vst [vmem:[#allocation34_spill] sm:$0xff] %v13569_v14  ;;  %17297 = vst [vmem:[#allocation36_spill] sm:$0xff] %v13573_v29  ;;  %v5445_v22 = vand.u32 4294901760, %v13569_v14  ;;  %v5052_v8 = vand.u32 4294901760, %v13579_v2  ;;  %10062 = vmatpush1.bf16.msra.mxu0 %v13573_v29  ;;  %4724 = vrot.lane.b32.xlu1 %v13579_v2, %s11096_s21 }
 0x770   :  { %v13589_v50 = vsub.f32 %v13571_v13, %v5055_v18  ;;  %10063 = vmatprep.subr.bf16.mxu0 %v16855_v53  ;;  %v5453_v6 = vsub.f32 %v13566_v30, %v5452_v20 }
 0x771   :  { %v13594_v55 = vsub.f32 %v13579_v2, %v5052_v8  ;;  %v13596_v57 = vpop.f32.mrb[8].mxu0  ;;  %v13598_v5 = vpack.c.bf16 %v5055_v18, %v5052_v8  ;;  %v5446_v28 = vsub.f32 %v13569_v14, %v5445_v22  ;;  %v13601_v40 = vpack.c.bf16 %v5452_v20, %v5445_v22 }
 0x772   :  { %17298 = vst [vmem:[#allocation6_spill] sm:$0xff] %v13589_v50  ;;  %v5466_v26 = vand.u32 4294901760, %v13589_v50  ;;  %v5061_v10 = vand.u32 4294901760, %v13596_v57  ;;  %4730 = vrot.lane.b32.xlu0 %v13596_v57, %s11096_s21  ;;  %v13607_v43 = vpop.f32.mrb[9].mxu0  ;;  %v5454_v39 = vand.u32 4294901760, %v5453_v6 }
 0x773   :  { %17299 = vst [vmem:[#allocation17_spill] sm:$0xff] %v13594_v55  ;;  %17300 = vst [vmem:[#allocation18_spill] sm:$0xff] %v13598_v5  ;;  %v5459_v7 = vand.u32 4294901760, %v13594_v55  ;;  %v5058_v9 = vand.u32 4294901760, %v13607_v43  ;;  %10065 = vmatpush1.bf16.msra.mxu0 %v13598_v5  ;;  %4728 = vrot.lane.b32.xlu1 %v13607_v43, %s11096_s21  ;;  %v5447_v51 = vand.u32 4294901760, %v5446_v28 }
 0x774   :  { %17301 = vst [vmem:[#allocation19_spill] sm:$0xff] %v13601_v40  ;;  %v13617_v3 = vsub.f32 %v13596_v57, %v5061_v10  ;;  %10066 = vmatprep.subr.bf16.mxu0 %v16855_v53  ;;  %v5467_v56 = vsub.f32 %v13589_v50, %v5466_v26 }
 0x775   :  { %v13622_v45 = vsub.f32 %v13607_v43, %v5058_v9  ;;  %v13624_v17 = vpop.f32.mrb[10].mxu0  ;;  %v13626_v34 = vpack.c.bf16 %v5061_v10, %v5058_v9  ;;  %v13628_v44 = vpack.c.bf16 %v5454_v39, %v5447_v51  ;;  %v5460_v4 = vsub.f32 %v13594_v55, %v5459_v7 }
 0x776   :  { %17302 = vst [vmem:[#allocation22_spill] sm:$0xff] %v13617_v3  ;;  %v5480_v41 = vand.u32 4294901760, %v13617_v3  ;;  %v5067_v59 = vand.u32 4294901760, %v13624_v17  ;;  %4734 = vrot.lane.b32.xlu0 %v13624_v17, %s11096_s21  ;;  %v13635_v24 = vpop.f32.mrb[11].mxu0  ;;  %v5468_v15 = vand.u32 4294901760, %v5467_v56  ;;  %v13637_v49 = vpack.c.bf16 %v5466_v26, %v5459_v7 }
 0x777   :  { %17303 = vst [vmem:[#allocation25_spill] sm:$0xff] %v13622_v45  ;;  %17304 = vst [vmem:[#allocation26_spill] sm:$0xff] %v13626_v34  ;;  %v5473_v0 = vand.u32 4294901760, %v13622_v45  ;;  %v5064_v35 = vand.u32 4294901760, %v13635_v24  ;;  %10068 = vmatpush1.bf16.msra.mxu0 %v13626_v34  ;;  %4732 = vrot.lane.b32.xlu1 %v13635_v24, %s11096_s21  ;;  %v5461_v36 = vand.u32 4294901760, %v5460_v4 }
 0x778   :  { %17305 = vst [vmem:[#allocation29_spill] sm:$0xff] %v13637_v49  ;;  %v13647_v46 = vsub.f32 %v13624_v17, %v5067_v59  ;;  %10069 = vmatprep.subr.bf16.mxu0 %v16855_v53  ;;  %v5481_v33 = vsub.f32 %v13617_v3, %v5480_v41 }
 0x779   :  { %v13652_v23 = vsub.f32 %v13635_v24, %v5064_v35  ;;  %v13654_v62 = vpop.f32.mrb[12].mxu0  ;;  %v13656_v37 = vpack.c.bf16 %v5067_v59, %v5064_v35  ;;  %v13658_v54 = vpack.c.bf16 %v5468_v15, %v5461_v36  ;;  %v5474_v1 = vsub.f32 %v13622_v45, %v5473_v0 }
 0x77a   :  { %17306 = vst [vmem:[#allocation32_spill] sm:$0xff] %v13647_v46  ;;  %v5494_v12 = vand.u32 4294901760, %v13647_v46  ;;  %v5073_v47 = vand.u32 4294901760, %v13654_v62  ;;  %4738 = vrot.lane.b32.xlu0 %v13654_v62, %s11096_s21  ;;  %v13665_v48 = vpop.f32.mrb[13].mxu0  ;;  %v5482_v19 = vand.u32 4294901760, %v5481_v33  ;;  %v13667_v27 = vpack.c.bf16 %v5480_v41, %v5473_v0 }
 0x77b   :  { %17307 = vst [vmem:[#allocation39_spill] sm:$0xff] %v13652_v23  ;;  %17308 = vst [vmem:[#allocation40_spill] sm:$0xff] %v13656_v37  ;;  %v5487_v38 = vand.u32 4294901760, %v13652_v23  ;;  %v5070_v16 = vand.u32 4294901760, %v13665_v48  ;;  %10071 = vmatpush1.bf16.msra.mxu0 %v13656_v37  ;;  %4736 = vrot.lane.b32.xlu1 %v13665_v48, %s11096_s21  ;;  %v5475_v21 = vand.u32 4294901760, %v5474_v1 }
 0x77c   :  { %17309 = vst [vmem:[#allocation49_spill] sm:$0xff] %v13667_v27  ;;  %v13677_v52 = vsub.f32 %v13654_v62, %v5073_v47  ;;  %10072 = vmatprep.subr.bf16.mxu0 %v16855_v53  ;;  %v5495_v31 = vsub.f32 %v13647_v46, %v5494_v12 }
 0x77d   :  { %v13682_v32 = vsub.f32 %v13665_v48, %v5070_v16  ;;  %v13684_v25 = vpop.f32.mrb[14].mxu0  ;;  %v13686_v20 = vpack.c.bf16 %v5073_v47, %v5070_v16  ;;  %v13688_v18 = vpack.c.bf16 %v5482_v19, %v5475_v21  ;;  %v5488_v22 = vsub.f32 %v13652_v23, %v5487_v38 }
 0x77e   :  { %17310 = vst [vmem:[#allocation51_spill] sm:$0xff] %v13677_v52  ;;  %v5508_v8 = vand.u32 4294901760, %v13677_v52  ;;  %v5079_v6 = vand.u32 4294901760, %v13684_v25  ;;  %4742 = vrot.lane.b32.xlu0 %v13684_v25, %s11096_s21  ;;  %v13695_v28 = vpop.f32.mrb[15].mxu0  ;;  %v5496_v26 = vand.u32 4294901760, %v5495_v31  ;;  %v13697_v10 = vpack.c.bf16 %v5494_v12, %v5487_v38 }
 0x77f   :  { %17311 = vst [vmem:[#allocation54_spill] sm:$0xff] %v13682_v32  ;;  %17312 = vst [vmem:[#allocation55_spill] sm:$0xff] %v13686_v20  ;;  %v5501_v39 = vand.u32 4294901760, %v13682_v32  ;;  %v5076_v7 = vand.u32 4294901760, %v13695_v28  ;;  %10074 = vmatpush1.bf16.msra.mxu0 %v13686_v20  ;;  %4740 = vrot.lane.b32.xlu1 %v13695_v28, %s11096_s21  ;;  %v5489_v9 = vand.u32 4294901760, %v5488_v22 }
 0x780   :  { %17313 = vst [vmem:[#allocation57_spill] sm:$0xff] %v13697_v10  ;;  %v13707_v56 = vsub.f32 %v13684_v25, %v5079_v6  ;;  %10075 = vmatprep.subr.bf16.mxu0 %v16855_v53  ;;  %v5509_v4 = vsub.f32 %v13677_v52, %v5508_v8  ;;  %v4832_v52 = vld [vmem:[%s16170_s7 + $0xe0] sm:$0xff] }
 0x781   :  { %v13712_v41 = vsub.f32 %v13695_v28, %v5076_v7  ;;  %v9327_v59 = vpop.f32.mrb[16].mxu0  ;;  %v13714_v15 = vpack.c.bf16 %v5079_v6, %v5076_v7  ;;  %v13716_v0 = vpack.c.bf16 %v5496_v26, %v5489_v9  ;;  %v5502_v35 = vsub.f32 %v13682_v32, %v5501_v39 }
 0x782   :  { %17314 = vst [vmem:[#allocation59_spill] sm:$0xff] %v13707_v56  ;;  %v5522_v36 = vand.u32 4294901760, %v13707_v56  ;;  %v5085_v33 = vand.u32 4294901760, %v9327_v59  ;;  %4746 = vrot.lane.b32.xlu0 %v9327_v59, %s11096_s21  ;;  %v4696_v1 = vpop.f32.mrb[17].mxu0  ;;  %v5510_v12 = vand.u32 4294901760, %v5509_v4  ;;  %v13721_v47 = vpack.c.bf16 %v5508_v8, %v5501_v39 }
 0x783   :  { %17315 = vst [vmem:[#allocation61_spill] sm:$0xff] %v13712_v41  ;;  %17316 = vst [vmem:[#allocation63_spill] sm:$0xff] %v13714_v15  ;;  %v5515_v19 = vand.u32 4294901760, %v13712_v41  ;;  %v5082_v38 = vand.u32 4294901760, %v4696_v1  ;;  %10077 = vmatpush1.bf16.msra.mxu0 %v13714_v15  ;;  %4744 = vrot.lane.b32.xlu1 %v4696_v1, %s11096_s21  ;;  %v5503_v16 = vand.u32 4294901760, %v5502_v35 }
 0x784   :  { %17317 = vst [vmem:[#allocation65_spill] sm:$0xff] %v13721_v47  ;;  %v13728_v31 = vsub.f32 %v9327_v59, %v5085_v33  ;;  %10078 = vmatprep.subr.bf16.mxu0 %v16855_v53  ;;  %v5523_v22 = vsub.f32 %v13707_v56, %v5522_v36  ;;  %v4815_v47 = vld [vmem:[%s16170_s7 + $0x58] sm:$0xff] }
 0x785   :  { %v13732_v6 = vsub.f32 %v4696_v1, %v5082_v38  ;;  %v13734_v8 = vpack.c.bf16 %v5085_v33, %v5082_v38  ;;  %v13736_v26 = vpack.c.bf16 %v5510_v12, %v5503_v16  ;;  %v5516_v39 = vsub.f32 %v13712_v41, %v5515_v19 }
 0x786   :  { %17318 = vst [vmem:[#allocation67_spill] sm:$0xff] %v13728_v31  ;;  %v5536_v7 = vand.u32 4294901760, %v13728_v31  ;;  %4764 = vrot.lane.b32.xlu0 %v13555_v60, %s11098_s2  ;;  %v5524_v9 = vand.u32 4294901760, %v5523_v22  ;;  %v13742_v4 = vpack.c.bf16 %v5522_v36, %v5515_v19  ;;  %v4805_v60 = vld [vmem:[%s16170_s7 + $0x8] sm:$0xff]  ;;  %v4995_v5 = vsel %vm4984_vm15, %v4815_v47, 0 }
 0x787   :  { %17319 = vst [vmem:[#allocation69_spill] sm:$0xff] %v13732_v6  ;;  %17320 = vst [vmem:[#allocation71_spill] sm:$0xff] %v13734_v8  ;;  %v5529_v35 = vand.u32 4294901760, %v13732_v6  ;;  %4762 = vrot.lane.b32.xlu1 %v13560_v42, %s11098_s2  ;;  %10080 = vmatpush1.bf16.msra.mxu0 %v13734_v8  ;;  %v5517_v33 = vand.u32 4294901760, %v5516_v39  ;;  %v13762_v42 = vand.u32 4294901760, %v4805_v60  ;;  %v13999_v47 = vsub.f32 %v4820_v58, %v13954_v11 }
 0x788   :  { %17321 = vst [vmem:[#allocation74_spill] sm:$0xff] %v13742_v4  ;;  %10081 = vmatprep.subr.bf16.mxu0 %v16855_v53  ;;  %v5537_v38 = vsub.f32 %v13728_v31, %v5536_v7  ;;  %v4812_v4 = vld [vmem:[%s16170_s7 + $0x40] sm:$0xff] }
 0x789   :  { %v13755_v36 = vpack.c.bf16 %v5524_v9, %v5517_v33  ;;  %v5530_v19 = vsub.f32 %v13732_v6, %v5529_v35  ;;  %v13758_v16 = vpack.c.bf16 %v5536_v7, %v5529_v35  ;;  %17323 = vst [vmem:[#allocation77_spill] sm:$0xff] %v13762_v42  ;;  %v13767_v12 = vsub.f32 %v4805_v60, %v13762_v42  ;;  %v4875_v9 = vld [vmem:[%s16171_s8 + $0x58] sm:$0xff]  ;;  %v4874_v35 = vld [vmem:[%s16171_s8 + $0x50] sm:$0xff] }
 0x78a   :  { %4768 = vrot.lane.b32.xlu0 %v13571_v13, %s11098_s2  ;;  %v5538_v22 = vand.u32 4294901760, %v5537_v38  ;;  %v4880_v38 = vld [vmem:[%s16171_s8 + $0x80] sm:$0xff]  ;;  %v4879_v60 = vld [vmem:[%s16171_s8 + $0x78] sm:$0xff]  ;;  %v4992_v34 = vsel %vm4984_vm15, %v4812_v4, 0  ;;  %17353 = vst [vmem:[#allocation47_spill] sm:$0xff] %v13999_v47 }
 0x78b   :  { %17322 = vst [vmem:[#allocation76_spill] sm:$0xff] %v13758_v16  ;;  %4766 = vrot.lane.b32.xlu1 %v13579_v2, %s11098_s2  ;;  %v5531_v39 = vand.u32 4294901760, %v5530_v19  ;;  %17324 = vst [vmem:[#allocation79_spill] sm:$0xff] %v13767_v12  ;;  %v16460_v7 = vand.u32 4294901760, %v13767_v12  ;;  %v4871_v19 = vld [vmem:[%s16171_s8 + $0x38] sm:$0xff] }
 0x78c   :  { %v4823_v16 = vld [vmem:[%s16170_s7 + $0x98] sm:$0xff] }
 0x78d   :  { %v13769_v21 = vpack.c.bf16 %v5538_v22, %v5531_v39  ;;  %v5144_v13 = vsub.f32 %v13767_v12, %v16460_v7  ;;  %v4866_v22 = vld [vmem:[%s16171_s8 + $0x10] sm:$0xff]  ;;  %v4881_v39 = vld [vmem:[%s16171_s8 + $0x88] sm:$0xff]  ;;  %v13975_v37 = vand.u32 4294901760, %v4823_v16  ;;  %v14009_v12 = vand.u32 4294901760, %v4992_v34 }
 0x78e   :  { %4772 = vrot.lane.b32.xlu0 %v13596_v57, %s11098_s2  ;;  %v4806_v57 = vld [vmem:[%s16170_s7 + $0x10] sm:$0xff]  ;;  %v4817_v7 = vld [vmem:[%s16170_s7 + $0x68] sm:$0xff] }
 0x78f   :  { %4770 = vrot.lane.b32.xlu1 %v13607_v43, %s11098_s2  ;;  %v5145_v2 = vand.u32 4294901760, %v5144_v13  ;;  %v4865_v43 = vld [vmem:[%s16171_s8 + $0x8] sm:$0xff]  ;;  %v4876_v13 = vld [vmem:[%s16171_s8 + $0x60] sm:$0xff]  ;;  %v13939_v63 = vand.u32 4294901760, %v4817_v7  ;;  %17347 = vst [vmem:[#allocation43_spill] sm:$0xff] %v13975_v37  ;;  %17355 = vst [vmem:[#allocation107_spill] sm:$0xff] %v14009_v12  ;;  %v14023_v6 = vsub.f32 %v4823_v16, %v13975_v37 }
 0x790   :  { %v4818_v37 = vld [vmem:[%s16170_s7 + $0x70] sm:$0xff] }
 0x791   :  { %5146 = vmatprep.mubr.f32.mxu0 %v5145_v2  ;;  %v4872_v2 = vld [vmem:[%s16171_s8 + $0x40] sm:$0xff]  ;;  %17339 = vst [vmem:[#allocation111_spill] sm:$0xff] %v13939_v63  ;;  %17359 = vst [vmem:[#allocation123_spill] sm:$0xff] %v14023_v6  ;;  %v4998_v16 = vsel %vm4984_vm15, %v4818_v37, 0 }
 0x792   :  { %4776 = vrot.lane.b32.xlu0 %v13624_v17, %s11098_s2  ;;  %v4986_v17 = vsel %vm4984_vm15, %v4806_v57, 0  ;;  %v4867_v57 = vld [vmem:[%s16171_s8 + $0x18] sm:$0xff] }
 0x793   :  { %4774 = vrot.lane.b32.xlu1 %v13635_v24, %s11098_s2  ;;  %v4864_v24 = vld [vmem:[%s16171_s8] sm:$0xff] }
 0x796   :  { %4780 = vrot.lane.b32.xlu0 %v13654_v62, %s11098_s2  ;;  %v13803_v62 = vand.u32 4294901760, %v4986_v17 }
 0x797   :  { %4778 = vrot.lane.b32.xlu1 %v13665_v48, %s11098_s2 }
 0x798   :  { %17325 = vst [vmem:[#allocation81_spill] sm:$0xff] %v13803_v62  ;;  %v13806_v48 = vsub.f32 %v4986_v17, %v13803_v62  ;;  %v4882_v17 = vld [vmem:[%s16171_s8 + $0x90] sm:$0xff] }
 0x79a   :  { %4784 = vrot.lane.b32.xlu0 %v13684_v25, %s11098_s2  ;;  %17326 = vst [vmem:[#allocation83_spill] sm:$0xff] %v13806_v48  ;;  %v4870_v25 = vld [vmem:[%s16171_s8 + $0x30] sm:$0xff] }
 0x79b   :  { %4782 = vrot.lane.b32.xlu1 %v13695_v28, %s11098_s2  ;;  %v4869_v28 = vld [vmem:[%s16171_s8 + $0x28] sm:$0xff] }
 0x79e   :  { %4788 = vrot.lane.b32.xlu0 %v9327_v59, %s11098_s2  ;;  %v16461_v59 = vand.u32 4294901760, %v13806_v48 }
 0x79f   :  { %4786 = vrot.lane.b32.xlu1 %v4696_v1, %s11098_s2 }
 0x7a0   :  { %v7049_v1 = vsub.f32 %v13806_v48, %v16461_v59  ;;  %v4809_v59 = vld [vmem:[%s16170_s7 + $0x28] sm:$0xff] }
 0x7a1   :  { %v4989_v51 = vsel %vm4984_vm15, %v4809_v59, 0  ;;  %v4822_v59 = vld [vmem:[%s16170_s7 + $0x90] sm:$0xff] }
 0x7a2   :  { %4891 = vperm.xlu0 %11094, %v4865_v43   ;;  %v7050_v33 = vand.u32 4294901760, %v7049_v1  ;;  %v4804_v43 = vld [vmem:[%s16170_s7] sm:$0xff]  ;;  %v4807_v1 = vld [vmem:[%s16170_s7 + $0x18] sm:$0xff]  ;;  %v13973_v20 = vand.u32 4294901760, %v4989_v51 }
 0x7a3   :  { %4886 = vperm.xlu1 %11095, %v4864_v24   ;;  %v4877_v24 = vld [vmem:[%s16171_s8 + $0x68] sm:$0xff] }
 0x7a4   :  { %9348 = vmatprep.mubr.f32.mxu1 %v7050_v33  ;;  %v4811_v33 = vld [vmem:[%s16170_s7 + $0x38] sm:$0xff]  ;;  %17346 = vst [vmem:[#allocation12_spill] sm:$0xff] %v13973_v20 }
 0x7a6   :  { %4916 = vperm.xlu0 %11094, %v4870_v25   ;;  %v4808_v25 = vld [vmem:[%s16170_s7 + $0x20] sm:$0xff] }
 0x7a7   :  { %4911 = vperm.xlu1 %11095, %v4869_v28   ;;  %v13860_v28 = vand.u32 4294901760, %v4804_v43 }
 0x7a9   :  { %17327 = vst [vmem:[#allocation85_spill] sm:$0xff] %v13860_v28 }
 0x7aa   :  { %4941 = vperm.xlu0 %11094, %v4875_v9   ;;  %v4873_v9 = vld [vmem:[%s16171_s8 + $0x48] sm:$0xff] }
 0x7ab   :  { %4936 = vperm.xlu1 %11095, %v4874_v35   ;;  %v13868_v35 = vand.u32 4294901760, %v4808_v25 }
 0x7ad   :  { %17328 = vst [vmem:[#allocation87_spill] sm:$0xff] %v13868_v35 }
 0x7ae   :  { %4966 = vperm.xlu0 %11094, %v4880_v38   ;;  %v4868_v38 = vld [vmem:[%s16171_s8 + $0x20] sm:$0xff] }
 0x7af   :  { %4961 = vperm.xlu1 %11095, %v4879_v60   ;;  %v4810_v60 = vld [vmem:[%s16170_s7 + $0x30] sm:$0xff] }
 0x7b2   :  { %4921 = vperm.xlu0 %11094, %v4871_v19   ;;  %v13880_v19 = vsub.f32 %v4804_v43, %v13860_v28  ;;  %v4878_v43 = vld [vmem:[%s16171_s8 + $0x70] sm:$0xff] }
 0x7b3   :  { %4896 = vperm.xlu1 %11095, %v4866_v22   ;;  %v13882_v22 = vand.u32 4294901760, %v4807_v1 }
 0x7b4   :  { %17329 = vst [vmem:[#allocation89_spill] sm:$0xff] %v13880_v19 }
 0x7b5   :  { %17330 = vst [vmem:[#allocation91_spill] sm:$0xff] %v13882_v22 }
 0x7b6   :  { %4971 = vperm.xlu0 %11094, %v4881_v39   ;;  %v13884_v39 = vand.u32 4294901760, %v4811_v33 }
 0x7b7   :  { %4946 = vperm.xlu1 %11095, %v4876_v13   ;;  %v4883_v13 = vld [vmem:[%s16171_s8 + $0x98] sm:$0xff] }
 0x7b8   :  { %17331 = vst [vmem:[#allocation94_spill] sm:$0xff] %v13884_v39 }
 0x7ba   :  { %4926 = vperm.xlu0 %11094, %v4872_v2   ;;  %v13890_v2 = vsub.f32 %v4808_v25, %v13868_v35  ;;  %v13908_v25 = vsub.f32 %v4811_v33, %v13884_v39  ;;  %v4816_v33 = vld [vmem:[%s16170_s7 + $0x60] sm:$0xff] }
 0x7bb   :  { %4901 = vperm.xlu1 %11095, %v4867_v57   ;;  %v13892_v57 = vand.u32 4294901760, %v4810_v60  ;;  %v13952_v10 = vand.u32 4294901760, %v4816_v33 }
 0x7bc   :  { %17332 = vst [vmem:[#allocation96_spill] sm:$0xff] %v13890_v2  ;;  %17335 = vst [vmem:[#allocation101_spill] sm:$0xff] %v13908_v25  ;;  %v17343_v49 = vand.u32 4294901760, %v13890_v2 }
 0x7bd   :  { %17333 = vst [vmem:[#allocation97_spill] sm:$0xff] %v13892_v57  ;;  %v13918_v61 = vsub.f32 %v4810_v60, %v13892_v57  ;;  %17340 = vst [vmem:[#allocation114_spill] sm:$0xff] %v13952_v10  ;;  %v13996_v4 = vsub.f32 %v4816_v33, %v13952_v10 }
 0x7be   :  { %4976 = vperm.xlu0 %11094, %v4882_v17   ;;  %v4814_v17 = vld [vmem:[%s16170_s7 + $0x50] sm:$0xff]  ;;  %v13964_v40 = vsub.f32 %v13890_v2, %v17343_v49  ;;  %v17351_v2 = vand.u32 4294901760, %v13908_v25 }
 0x7bf   :  { %4951 = vperm.xlu1 %11095, %v4877_v24   ;;  %v4813_v24 = vld [vmem:[%s16170_s7 + $0x48] sm:$0xff]  ;;  %17336 = vst [vmem:[#allocation103_spill] sm:$0xff] %v13918_v61  ;;  %17352 = vst [vmem:[#allocation46_spill] sm:$0xff] %v13996_v4  ;;  %v17357_v33 = vand.u32 4294901760, %v13918_v61  ;;  %v17369_v11 = vand.u32 4294901760, %v13996_v4 }
 0x7c1   :  { %v14016_v58 = vsub.f32 %v13918_v61, %v17357_v33  ;;  %v4821_v61 = vld [vmem:[%s16170_s7 + $0x88] sm:$0xff] }
 0x7c2   :  { %4931 = vperm.xlu0 %11094, %v4873_v9   ;;  %v16462_v9 = vand.u32 4294901760, %v13880_v19 }
 0x7c3   :  { %4906 = vperm.xlu1 %11095, %v4868_v38   ;;  %v13905_v38 = vsub.f32 %v4807_v1, %v13882_v22  ;;  %v13920_v1 = vand.u32 4294901760, %v4814_v17 }
 0x7c4   :  { %v13936_v60 = vsub.f32 %v13880_v19, %v16462_v9  ;;  %v13993_v19 = vsub.f32 %v13908_v25, %v17351_v2  ;;  %v14011_v2 = vand.u32 4294901760, %v4995_v5  ;;  %v14020_v25 = vsub.f32 %v4989_v51, %v13973_v20  ;;  %v4834_v20 = vld [vmem:[%s16170_s7 + $0xf0] sm:$0xff] }
 0x7c5   :  { %17334 = vst [vmem:[#allocation99_spill] sm:$0xff] %v13905_v38  ;;  %17337 = vst [vmem:[#allocation105_spill] sm:$0xff] %v13920_v1  ;;  %v13968_v15 = vsub.f32 %v4814_v17, %v13920_v1  ;;  %v17348_v49 = vand.u32 4294901760, %v13905_v38  ;;  %v13986_v17 = vsub.f32 %v4817_v7, %v13939_v63  ;;  %v4826_v7 = vld [vmem:[%s16170_s7 + $0xb0] sm:$0xff] }
 0x7c6   :  { %4981 = vperm.xlu0 %11094, %v4883_v13   ;;  %v13922_v13 = vand.u32 4294901760, %v4813_v24  ;;  %17356 = vst [vmem:[#allocation119_spill] sm:$0xff] %v14011_v2  ;;  %17358 = vst [vmem:[#allocation121_spill] sm:$0xff] %v14020_v25  ;;  %v14033_v33 = vand.u32 4294901760, %v4826_v7 }
 0x7c7   :  { %4956 = vperm.xlu1 %11095, %v4878_v43   ;;  %v4819_v43 = vld [vmem:[%s16170_s7 + $0x78] sm:$0xff]  ;;  %17344 = vst [vmem:[#allocation129_spill] sm:$0xff] %v13968_v15  ;;  %v13983_v8 = vsub.f32 %v13905_v38, %v17348_v49  ;;  %17349 = vst [vmem:[#allocation44_spill] sm:$0xff] %v13986_v17  ;;  %v4825_v49 = vld [vmem:[%s16170_s7 + $0xa8] sm:$0xff]  ;;  %v17362_v38 = vand.u32 4294901760, %v13968_v15 }
 0x7c8   :  { %17338 = vst [vmem:[#allocation109_spill] sm:$0xff] %v13922_v13  ;;  %v13956_v27 = vand.u32 4294901760, %v4819_v43  ;;  %v13971_v9 = vsub.f32 %v4813_v24, %v13922_v13  ;;  %v13988_v24 = vand.u32 4294901760, %v4822_v59  ;;  %17361 = vst [vmem:[#allocation127_spill] sm:$0xff] %v14033_v33  ;;  %v14053_v51 = vand.u32 4294901760, %v4825_v49 }
 0x7c9   :  { %v14045_v31 = vsub.f32 %v13968_v15, %v17362_v38  ;;  %v14073_v48 = vsub.f32 %v4826_v7, %v14033_v33  ;;  %v17370_v38 = vand.u32 4294901760, %v13999_v47  ;;  %v5001_v7 = vsel %vm4984_vm15, %v4821_v61, 0 }
 0x7ca   :  { %17342 = vst [vmem:[#allocation117_spill] sm:$0xff] %v13956_v27  ;;  %17345 = vst [vmem:[#allocation11_spill] sm:$0xff] %v13971_v9  ;;  %v14002_v29 = vsub.f32 %v4819_v43, %v13956_v27  ;;  %v14031_v41 = vsub.f32 %v4822_v59, %v13988_v24  ;;  %v14048_v59 = vsub.f32 %v4992_v34, %v14009_v12  ;;  %v17374_v61 = vand.u32 4294901760, %v14023_v6 }
 0x7cb   :  { %17350 = vst [vmem:[#allocation45_spill] sm:$0xff] %v13988_v24  ;;  %v14051_v43 = vsub.f32 %v4995_v5, %v14011_v2  ;;  %17365 = vst [vmem:[#allocation135_spill] sm:$0xff] %v14053_v51  ;;  %v17366_v24 = vand.u32 4294901760, %v13971_v9  ;;  %v17367_v5 = vand.u32 4294901760, %v13986_v17  ;;  %v14084_v34 = vsub.f32 %v13999_v47, %v17370_v38  ;;  %v4829_v38 = vld [vmem:[%s16170_s7 + $0xc8] sm:$0xff] }
 0x7cc   :  { %17354 = vst [vmem:[#allocation48_spill] sm:$0xff] %v14002_v29  ;;  %17360 = vst [vmem:[#allocation125_spill] sm:$0xff] %v14031_v41  ;;  %v14110_v27 = vsub.f32 %v14023_v6, %v17374_v61  ;;  %v17376_v47 = vand.u32 4294901760, %v14031_v41  ;;  %v4828_v61 = vld [vmem:[%s16170_s7 + $0xc0] sm:$0xff]  ;;  %v14132_v37 = vand.u32 4294901760, %v4829_v38  ;;  %v17379_v32 = vand.u32 4294901760, %v14048_v59 }
 0x7cd   :  { %17363 = vst [vmem:[#allocation131_spill] sm:$0xff] %v14048_v59  ;;  %17364 = vst [vmem:[#allocation133_spill] sm:$0xff] %v14051_v43  ;;  %v14062_v56 = vsub.f32 %v13971_v9, %v17366_v24  ;;  %v14069_v15 = vsub.f32 %v13986_v17, %v17367_v5  ;;  %v14079_v24 = vsub.f32 %v13996_v4, %v17369_v11  ;;  %v17371_v5 = vand.u32 4294901760, %v14002_v29 }
 0x7ce   :  { %17368 = vst [vmem:[#allocation136_spill] sm:$0xff] %v14073_v48  ;;  %v14096_v11 = vsub.f32 %v4825_v49, %v14053_v51  ;;  %v14112_v9 = vand.u32 4294901760, %v4998_v16  ;;  %v4824_v49 = vld [vmem:[%s16170_s7 + $0xa0] sm:$0xff]  ;;  %v14121_v4 = vsub.f32 %v14031_v41, %v17376_v47  ;;  %v14124_v51 = vand.u32 4294901760, %v5001_v7  ;;  %17378 = vst [vmem:[#allocation14_spill] sm:$0xff] %v14132_v37 }
 0x7cf   :  { %v14089_v17 = vsub.f32 %v14002_v29, %v17371_v5  ;;  %v17373_v5 = vand.u32 4294901760, %v14020_v25  ;;  %v14137_v47 = vsub.f32 %v14048_v59, %v17379_v32  ;;  %v5004_v6 = vsel %vm4984_vm15, %v4824_v49, 0 }
 0x7d0   :  { %17372 = vst [vmem:[#allocation5_spill] sm:$0xff] %v14096_v11  ;;  %17375 = vst [vmem:[#allocation13_spill] sm:$0xff] %v14112_v9  ;;  %v14152_v32 = vsub.f32 %v4998_v16, %v14112_v9  ;;  %v14154_v59 = vand.u32 4294901760, %v4828_v61  ;;  %v17383_v49 = vand.u32 4294901760, %v14073_v48  ;;  %v14163_v46 = vsub.f32 %v5001_v7, %v14124_v51 }
 0x7d1   :  { %v14105_v29 = vsub.f32 %v14020_v25, %v17373_v5  ;;  %17377 = vst [vmem:[#allocation2_spill] sm:$0xff] %v14124_v51  ;;  %v17380_v5 = vand.u32 4294901760, %v14051_v43  ;;  %v4827_v25 = vld [vmem:[%s16170_s7 + $0xb8] sm:$0xff]  ;;  %v14166_v63 = vsub.f32 %v4829_v38, %v14132_v37  ;;  %v14168_v16 = vand.u32 4294901760, %v5004_v6 }
 0x7d2   :  { %17381 = vst [vmem:[#allocation15_spill] sm:$0xff] %v14152_v32  ;;  %17382 = vst [vmem:[#allocation3_spill] sm:$0xff] %v14154_v59  ;;  %v14160_v23 = vsub.f32 %v14073_v48, %v17383_v49  ;;  %v5007_v13 = vsel %vm4984_vm15, %v4827_v25, 0  ;;  %v17387_v7 = vand.u32 4294901760, %v14096_v11  ;;  %v14189_v57 = vsub.f32 %v4828_v61, %v14154_v59 }
 0x7d3   :  { %v14142_v41 = vsub.f32 %v14051_v43, %v17380_v5  ;;  %17384 = vst [vmem:[#allocation16_spill] sm:$0xff] %v14163_v46  ;;  %17385 = vst [vmem:[#allocation21_spill] sm:$0xff] %v14166_v63  ;;  %v14204_v3 = vsub.f32 %v5004_v6, %v14168_v16  ;;  %v17395_v61 = vand.u32 4294901760, %v14152_v32  ;;  %v17396_v39 = vand.u32 4294901760, %v14163_v46 }
 0x7d4   :  { %17386 = vst [vmem:[#allocation4_spill] sm:$0xff] %v14168_v16  ;;  %v14181_v45 = vsub.f32 %v14096_v11, %v17387_v7  ;;  %17389 = vst [vmem:[#allocation27_spill] sm:$0xff] %v14189_v57  ;;  %v14195_v7 = vand.u32 4294901760, %v5007_v13 }
 0x7d5   :  { %17392 = vst [vmem:[#allocation33_spill] sm:$0xff] %v14204_v3  ;;  %v14220_v6 = vsub.f32 %v14152_v32, %v17395_v61  ;;  %v14226_v59 = vsub.f32 %v14163_v46, %v17396_v39  ;;  %v17403_v39 = vand.u32 4294901760, %v14189_v57 }
 0x7d6   :  { %17390 = vst [vmem:[#allocation7_spill] sm:$0xff] %v14195_v7 }
 0x7d7   :  { %v14259_v46 = vsub.f32 %v14189_v57, %v17403_v39 }
 0x7d9   :  { %17404 = vst [vmem:[#allocation52_spill] sm:$0xff] %v14259_v46 }
 0x7dc   :  { %v4723_v33 = vpop.permute.xlu0 %4722 }
 0x7dd   :  { %v5091_v5 = vand.u32 4294901760, %v4723_v33  ;;  %v4721_v43 = vpop.permute.xlu1 %4720 }
 0x7de   :  { %v5088_v10 = vand.u32 4294901760, %v4721_v43 }
 0x7df   :  { %v14174_v1 = vsub.f32 %v4723_v33, %v5091_v5  ;;  %v4831_v33 = vld [vmem:[%s16170_s7 + $0xd8] sm:$0xff] }
 0x7e0   :  { %v14183_v38 = vpack.c.bf16 %v5091_v5, %v5088_v10  ;;  %v14185_v37 = vsub.f32 %v4721_v43, %v5088_v10  ;;  %v4727_v25 = vpop.permute.xlu0 %4726  ;;  %v14197_v5 = vand.u32 4294901760, %v4832_v52  ;;  %v14211_v55 = vand.u32 4294901760, %v4831_v33 }
 0x7e1   :  { %v5097_v48 = vand.u32 4294901760, %v4727_v25  ;;  %v4725_v49 = vpop.permute.xlu1 %4724 }
 0x7e2   :  { %17388 = vst [vmem:[#allocation23_spill] sm:$0xff] %v14183_v38  ;;  %17391 = vst [vmem:[#allocation30_spill] sm:$0xff] %v14197_v5  ;;  %v5094_v43 = vand.u32 4294901760, %v4725_v49  ;;  %10083 = vmatpush1.bf16.msra.mxu0 %v14183_v38 }
 0x7e3   :  { %v14206_v11 = vsub.f32 %v4727_v25, %v5097_v48  ;;  %10084 = vmatprep.subr.bf16.mxu0 %v16855_v53  ;;  %17393 = vst [vmem:[#allocation9_spill] sm:$0xff] %v14211_v55  ;;  %v17399_v25 = vand.u32 4294901760, %v14166_v63 }
 0x7e4   :  { %v14213_v50 = vpack.c.bf16 %v5097_v48, %v5094_v43  ;;  %v14215_v10 = vsub.f32 %v4725_v49, %v5094_v43  ;;  %v4731_v38 = vpop.permute.xlu0 %4730  ;;  %v14229_v48 = vsub.f32 %v5007_v13, %v14195_v7  ;;  %v14232_v49 = vsub.f32 %v4832_v52, %v14197_v5 }
 0x7e5   :  { %v5103_v22 = vand.u32 4294901760, %v4731_v38  ;;  %v4729_v35 = vpop.permute.xlu1 %4728  ;;  %v14240_v32 = vsub.f32 %v14166_v63, %v17399_v25  ;;  %v14249_v52 = vsub.f32 %v4831_v33, %v14211_v55  ;;  %v17405_v25 = vand.u32 4294901760, %v14204_v3 }
 0x7e6   :  { %17394 = vst [vmem:[#allocation37_spill] sm:$0xff] %v14213_v50  ;;  %17397 = vst [vmem:[#allocation41_spill] sm:$0xff] %v14229_v48  ;;  %v5100_v61 = vand.u32 4294901760, %v4729_v35  ;;  %10086 = vmatpush1.bf16.msra.mxu0 %v14213_v50  ;;  %v17407_v33 = vand.u32 4294901760, %v14185_v37  ;;  %v17411_v16 = vand.u32 4294901760, %v14229_v48 }
 0x7e7   :  { %17398 = vst [vmem:[#allocation10_spill] sm:$0xff] %v14232_v49  ;;  %17400 = vst [vmem:[#allocation42_spill] sm:$0xff] %v14240_v32  ;;  %v14245_v14 = vsub.f32 %v4731_v38, %v5103_v22  ;;  %10087 = vmatprep.subr.bf16.mxu0 %v16855_v53  ;;  %v14271_v39 = vsub.f32 %v14204_v3, %v17405_v25 }
 0x7e8   :  { %17401 = vst [vmem:[#allocation50_spill] sm:$0xff] %v14249_v52  ;;  %v14251_v43 = vpack.c.bf16 %v5103_v22, %v5100_v61  ;;  %v14253_v50 = vsub.f32 %v4729_v35, %v5100_v61  ;;  %v4735_v5 = vpop.permute.xlu0 %4734  ;;  %v4830_v35 = vld [vmem:[%s16170_s7 + $0xd0] sm:$0xff]  ;;  %v17408_v61 = vand.u32 4294901760, %v14174_v1 }
 0x7e9   :  { %v5109_v13 = vand.u32 4294901760, %v4735_v5  ;;  %v4733_v38 = vpop.permute.xlu1 %4732  ;;  %17406 = vst [vmem:[#allocation53_spill] sm:$0xff] %v14271_v39  ;;  %v5010_v63 = vsel %vm4984_vm15, %v4830_v35, 0 }
 0x7ea   :  { %17402 = vst [vmem:[#allocation20_spill] sm:$0xff] %v14251_v43  ;;  %v5106_v22 = vand.u32 4294901760, %v4733_v38  ;;  %10089 = vmatpush1.bf16.msra.mxu0 %v14251_v43  ;;  %v14285_v43 = vpack.c.bf16 %v17408_v61, %v17407_v33  ;;  %v14298_v33 = vsub.f32 %v14229_v48, %v17411_v16  ;;  %v17413_v61 = vand.u32 4294901760, %v14232_v49 }
 0x7eb   :  { %v14275_v30 = vsub.f32 %v4735_v5, %v5109_v13  ;;  %10090 = vmatprep.subr.bf16.mxu0 %v16855_v53  ;;  %v14330_v9 = vand.u32 4294901760, %v5010_v63 }
 0x7ec   :  { %17409 = vst [vmem:[#allocation24_spill] sm:$0xff] %v14285_v43  ;;  %v14287_v25 = vpack.c.bf16 %v5109_v13, %v5106_v22  ;;  %v14289_v55 = vsub.f32 %v4733_v38, %v5106_v22  ;;  %v4739_v57 = vpop.permute.xlu0 %4738  ;;  %17412 = vst [vmem:[#allocation58_spill] sm:$0xff] %v14298_v33  ;;  %v4833_v13 = vld [vmem:[%s16170_s7 + $0xe8] sm:$0xff]  ;;  %v14309_v5 = vsub.f32 %v14232_v49, %v17413_v61  ;;  %v17416_v38 = vand.u32 4294901760, %v14215_v10 }
 0x7ed   :  { %v5115_v42 = vand.u32 4294901760, %v4739_v57  ;;  %v4737_v7 = vpop.permute.xlu1 %4736  ;;  %v17417_v43 = vand.u32 4294901760, %v14206_v11  ;;  %v5013_v16 = vsel %vm4984_vm15, %v4833_v13, 0  ;;  %17421 = vst [vmem:[#allocation66_spill] sm:$0xff] %v14330_v9  ;;  %v4836_v13 = vld [vmem:[%s16170_s7 + $0x100] sm:$0xff] }
 0x7ee   :  { %17410 = vst [vmem:[#allocation56_spill] sm:$0xff] %v14287_v25  ;;  %v5112_v22 = vand.u32 4294901760, %v4737_v7  ;;  %10092 = vmatpush1.bf16.msra.mxu0 %v14287_v25  ;;  %17414 = vst [vmem:[#allocation28_spill] sm:$0xff] %v14309_v5 }
 0x7ef   :  { %v14314_v28 = vsub.f32 %v4739_v57, %v5115_v42  ;;  %10093 = vmatprep.subr.bf16.mxu0 %v16855_v53  ;;  %v14321_v25 = vpack.c.bf16 %v17417_v43, %v17416_v38  ;;  %v4835_v43 = vld [vmem:[%s16170_s7 + $0xf8] sm:$0xff]  ;;  %v17425_v57 = vand.u32 4294901760, %v14249_v52 }
 0x7f0   :  { %v14323_v48 = vpack.c.bf16 %v5115_v42, %v5112_v22  ;;  %v14325_v61 = vsub.f32 %v4737_v7, %v5112_v22  ;;  %v4743_v49 = vpop.permute.xlu0 %4742  ;;  %v17422_v42 = vand.u32 4294901760, %v14253_v50  ;;  %v17423_v7 = vand.u32 4294901760, %v14245_v14 }
 0x7f1   :  { %17415 = vst [vmem:[#allocation60_spill] sm:$0xff] %v14314_v28  ;;  %17418 = vst [vmem:[#allocation62_spill] sm:$0xff] %v14321_v25  ;;  %v5121_v3 = vand.u32 4294901760, %v4743_v49  ;;  %v4741_v51 = vpop.permute.xlu1 %4740  ;;  %v14348_v25 = vsub.f32 %v14249_v52, %v17425_v57  ;;  %v17429_v22 = vand.u32 4294901760, %v14289_v55 }
 0x7f2   :  { %17419 = vst [vmem:[#allocation31_spill] sm:$0xff] %v14323_v48  ;;  %17420 = vst [vmem:[#allocation64_spill] sm:$0xff] %v14325_v61  ;;  %v14339_v38 = vpack.c.bf16 %v17423_v7, %v17422_v42  ;;  %v5118_v35 = vand.u32 4294901760, %v4741_v51  ;;  %10095 = vmatpush1.bf16.msra.mxu0 %v14323_v48  ;;  %v14354_v7 = vand.u32 4294901760, %v5013_v16  ;;  %v14370_v42 = vand.u32 4294901760, %v4835_v43 }
 0x7f3   :  { %17426 = vst [vmem:[#allocation68_spill] sm:$0xff] %v14348_v25  ;;  %v14350_v2 = vsub.f32 %v4743_v49, %v5121_v3  ;;  %10096 = vmatprep.subr.bf16.mxu0 %v16855_v53 }
 0x7f4   :  { %17424 = vst [vmem:[#allocation35_spill] sm:$0xff] %v14339_v38  ;;  %17428 = vst [vmem:[#allocation38_spill] sm:$0xff] %v14354_v7  ;;  %v17430_v38 = vand.u32 4294901760, %v14275_v30  ;;  %v14365_v57 = vpack.c.bf16 %v5121_v3, %v5118_v35  ;;  %v14367_v49 = vsub.f32 %v4741_v51, %v5118_v35  ;;  %v4747_v52 = vpop.permute.xlu0 %4746  ;;  %v4839_v3 = vld [vmem:[%s16170_s7 + $0x118] sm:$0xff]  ;;  %v17436_v51 = vand.u32 4294901760, %v14325_v61 }
 0x7f5   :  { %17427 = vst [vmem:[#allocation70_spill] sm:$0xff] %v14350_v2  ;;  %17434 = vst [vmem:[#allocation78_spill] sm:$0xff] %v14370_v42  ;;  %v5127_v33 = vand.u32 4294901760, %v4747_v52  ;;  %v4745_v39 = vpop.permute.xlu1 %4744  ;;  %v17437_v35 = vand.u32 4294901760, %v14314_v28  ;;  %v14398_v28 = vsub.f32 %v5013_v16, %v14354_v7 }
 0x7f6   :  { %v14363_v48 = vpack.c.bf16 %v17430_v38, %v17429_v22  ;;  %17432 = vst [vmem:[#allocation73_spill] sm:$0xff] %v14365_v57  ;;  %17433 = vst [vmem:[#allocation75_spill] sm:$0xff] %v14367_v49  ;;  %v14377_v38 = vsub.f32 %v5010_v63, %v14330_v9  ;;  %10098 = vmatpush1.bf16.msra.mxu0 %v14365_v57  ;;  %v5016_v63 = vsel %vm4984_vm15, %v4836_v13, 0  ;;  %v4838_v13 = vld [vmem:[%s16170_s7 + $0x110] sm:$0xff] }
 0x7f7   :  { %v14386_v22 = vpack.c.bf16 %v17437_v35, %v17436_v51  ;;  %v14393_v9 = vsub.f32 %v4747_v52, %v5127_v33  ;;  %10099 = vmatprep.subr.bf16.mxu0 %v16855_v53  ;;  %17440 = vst [vmem:[#allocation86_spill] sm:$0xff] %v14398_v28  ;;  %v14400_v51 = vand.u32 4294901760, %v4834_v20  ;;  %v5019_v52 = vsel %vm4984_vm15, %v4839_v3, 0 }
 0x7f8   :  { %17431 = vst [vmem:[#allocation72_spill] sm:$0xff] %v14363_v48  ;;  %17435 = vst [vmem:[#allocation80_spill] sm:$0xff] %v14377_v38  ;;  %v5124_v48 = vand.u32 4294901760, %v4745_v39  ;;  %v4765_v62 = vpop.permute.xlu0 %4764  ;;  %v14414_v7 = vand.u32 4294901760, %v5016_v63 }
 0x7f9   :  { %17438 = vst [vmem:[#allocation82_spill] sm:$0xff] %v14386_v22  ;;  %17439 = vst [vmem:[#allocation84_spill] sm:$0xff] %v14393_v9  ;;  %v14407_v22 = vsub.f32 %v4835_v43, %v14370_v42  ;;  %v5133_v16 = vand.u32 4294901760, %v4765_v62  ;;  %v4763_v57 = vpop.permute.xlu1 %4762  ;;  %v17457_v32 = vand.u32 4294901760, %v14393_v9 }
 0x7fa   :  { %17441 = vst [vmem:[#allocation88_spill] sm:$0xff] %v14400_v51  ;;  %v14402_v35 = vpack.c.bf16 %v5127_v33, %v5124_v48  ;;  %v14404_v12 = vsub.f32 %v4745_v39, %v5124_v48  ;;  %17445 = vst [vmem:[#allocation95_spill] sm:$0xff] %v14414_v7  ;;  %v17446_v33 = vand.u32 4294901760, %v14367_v49  ;;  %v17447_v48 = vand.u32 4294901760, %v14350_v2 }
 0x7fb   :  { %17444 = vst [vmem:[#allocation93_spill] sm:$0xff] %v14407_v22  ;;  %v5130_v42 = vand.u32 4294901760, %v4763_v57  ;;  %v14427_v25 = vsub.f32 %v4765_v62, %v5133_v16  ;;  %v14431_v49 = vsub.f32 %v4834_v20, %v14400_v51  ;;  %v14433_v2 = vand.u32 4294901760, %v5019_v52 }
 0x7fc   :  { %17442 = vst [vmem:[#allocation90_spill] sm:$0xff] %v14402_v35  ;;  %17443 = vst [vmem:[#allocation92_spill] sm:$0xff] %v14404_v12  ;;  %v14420_v39 = vpack.c.bf16 %v17447_v48, %v17446_v33  ;;  %10101 = vmatpush1.bf16.msra.mxu0 %v14402_v35  ;;  %v14435_v33 = vand.u32 4294901760, %v4838_v13  ;;  %v4837_v48 = vld [vmem:[%s16170_s7 + $0x108] sm:$0xff]  ;;  %v4769_v61 = vpop.permute.xlu0 %4768  ;;  %v14448_v5 = vsub.f32 %v5016_v63, %v14414_v7  ;;  %v17456_v46 = vand.u32 4294901760, %v14404_v12 }
 0x7fd   :  { %17449 = vst [vmem:[#allocation100_spill] sm:$0xff] %v14427_v25  ;;  %10102 = vmatprep.subr.bf16.mxu0 %v16855_v53  ;;  %17450 = vst [vmem:[#allocation102_spill] sm:$0xff] %v14431_v49  ;;  %v14440_v3 = vpack.c.bf16 %v5133_v16, %v5130_v42  ;;  %v14442_v43 = vsub.f32 %v4763_v57, %v5130_v42  ;;  %v5139_v35 = vand.u32 4294901760, %v4769_v61  ;;  %v4767_v51 = vpop.permute.xlu1 %4766  ;;  %v14460_v20 = vand.u32 4294901760, %v4837_v48 }
 0x7fe   :  { %17448 = vst [vmem:[#allocation98_spill] sm:$0xff] %v14420_v39  ;;  %17451 = vst [vmem:[#allocation104_spill] sm:$0xff] %v14433_v2  ;;  %v14454_v16 = vpack.c.bf16 %v17457_v32, %v17456_v46  ;;  %v5136_v62 = vand.u32 4294901760, %v4767_v51  ;;  %v17461_v63 = vand.u32 4294901760, %v14377_v38  ;;  %v14472_v32 = vsub.f32 %v5019_v52, %v14433_v2 }
 0x7ff   :  { %17452 = vst [vmem:[#allocation106_spill] sm:$0xff] %v14435_v33  ;;  %17453 = vst [vmem:[#allocation108_spill] sm:$0xff] %v14440_v3  ;;  %v14462_v39 = vsub.f32 %v4769_v61, %v5139_v35  ;;  %v17465_v61 = vand.u32 4294901760, %v14398_v28  ;;  %v14484_v12 = vsub.f32 %v4838_v13, %v14435_v33  ;;  %v17467_v52 = vand.u32 4294901760, %v14407_v22 }
 0x800   :  { %17454 = vst [vmem:[#allocation110_spill] sm:$0xff] %v14442_v43  ;;  %17455 = vst [vmem:[#allocation112_spill] sm:$0xff] %v14448_v5  ;;  %10104 = vmatpush1.bf16.msra.mxu0 %v14440_v3  ;;  %v14468_v7 = vsub.f32 %v14377_v38, %v17461_v63  ;;  %v14474_v57 = vpack.c.bf16 %v5139_v35, %v5136_v62  ;;  %v14476_v42 = vsub.f32 %v4767_v51, %v5136_v62 }
 0x801   :  { %17458 = vst [vmem:[#allocation113_spill] sm:$0xff] %v14454_v16  ;;  %17459 = vst [vmem:[#allocation115_spill] sm:$0xff] %v14460_v20  ;;  %10105 = vmatprep.subr.bf16.mxu0 %v16855_v53  ;;  %v4773_v16 = vpop.permute.xlu0 %4772  ;;  %v14481_v3 = vsub.f32 %v14398_v28, %v17465_v61  ;;  %v4771_v46 = vpop.permute.xlu1 %4770  ;;  %v14490_v35 = vsub.f32 %v14407_v22, %v17467_v52  ;;  %v17469_v51 = vand.u32 4294901760, %v14442_v43  ;;  %v17470_v62 = vand.u32 4294901760, %v14427_v25  ;;  %v4842_v52 = vld [vmem:[%s16170_s7 + $0x130] sm:$0xff] }
 0x802   :  { %17460 = vst [vmem:[#allocation118_spill] sm:$0xff] %v14462_v39  ;;  %17462 = vst [vmem:[#allocation120_spill] sm:$0xff] %v14472_v32  ;;  %v6975_v38 = vand.u32 4294901760, %v4773_v16  ;;  %v6972_v33 = vand.u32 4294901760, %v4771_v46 }
 0x803   :  { %17463 = vst [vmem:[#allocation122_spill] sm:$0xff] %v14474_v57  ;;  %17464 = vst [vmem:[#allocation124_spill] sm:$0xff] %v14476_v42  ;;  %v14496_v2 = vpack.c.bf16 %v17470_v62, %v17469_v51  ;;  %v14509_v51 = vsub.f32 %v4837_v48, %v14460_v20 }
 0x804   :  { %17466 = vst [vmem:[#allocation126_spill] sm:$0xff] %v14484_v12  ;;  %17468 = vst [vmem:[#allocation128_spill] sm:$0xff] %v14490_v35  ;;  %10107 = vmatpush1.bf16.msra.mxu0 %v14474_v57  ;;  %v14503_v28 = vsub.f32 %v4773_v16, %v6975_v38  ;;  %v14511_v62 = vpack.c.bf16 %v6975_v38, %v6972_v33  ;;  %v14513_v61 = vsub.f32 %v4771_v46, %v6972_v33 }
 0x805   :  { %17471 = vst [vmem:[#allocation130_spill] sm:$0xff] %v14496_v2  ;;  %10108 = vmatprep.subr.bf16.mxu0 %v16855_v53  ;;  %17473 = vst [vmem:[#allocation134_spill] sm:$0xff] %v14509_v51  ;;  %v4777_v13 = vpop.permute.xlu0 %4776  ;;  %v17476_v2 = vand.u32 4294901760, %v14431_v49  ;;  %v4775_v57 = vpop.permute.xlu1 %4774  ;;  %v17478_v38 = vand.u32 4294901760, %v13936_v60  ;;  %v17479_v46 = vand.u32 4294901760, %v14476_v42  ;;  %v17480_v16 = vand.u32 4294901760, %v14462_v39 }
 0x806   :  { %17472 = vst [vmem:[#allocation132_spill] sm:$0xff] %v14503_v28  ;;  %17474 = vst [vmem:[#allocation137_spill] sm:$0xff] %v14511_v62  ;;  %v7256_v22 = vand.u32 4294901760, %v14503_v28  ;;  %v6981_v48 = vand.u32 4294901760, %v4777_v13  ;;  %v7249_v20 = vand.u32 4294901760, %v14513_v61  ;;  %v6978_v43 = vand.u32 4294901760, %v4775_v57  ;;  %10349 = vmatprep.subr.bf16.mxu1 %v14511_v62 }
 0x807   :  { %17475 = vst [vmem:[#allocation138_spill] sm:$0xff] %v14513_v61  ;;  %v14518_v63 = vsub.f32 %v14431_v49, %v17476_v2  ;;  %5152 = vmatmul.mubr.f32.vlgmr.msra.gmra.mrb[18].mxu0 %v17478_v38  ;;  %v4845_v2 = vld [vmem:[%s16170_s7 + $0x148] sm:$0xff]  ;;  %v14535_v49 = vpack.c.bf16 %v17480_v16, %v17479_v46  ;;  %v17482_v38 = vand.u32 4294901760, %v14448_v5  ;;  %10351 = vmatpush3.bf16.msra.mxu1 %v14511_v62  ;;  %v17484_v16 = vand.u32 4294901760, %v13964_v40 }
 0x808   :  { %10110 = vmatpush1.bf16.msra.mxu0 %v13628_v44  ;;  %v14546_v25 = vsub.f32 %v4777_v13, %v6981_v48  ;;  %v17485_v46 = vand.u32 4294901760, %v14472_v32  ;;  %v5022_v60 = vsel %vm4984_vm15, %v4842_v52, 0  ;;  %v14558_v42 = vpack.c.bf16 %v6981_v48, %v6978_v43 }
 0x809   :  { %17477 = vst [vmem:[#allocation139_spill] sm:$0xff] %v14518_v63  ;;  %17481 = vst [vmem:[#allocation140_spill] sm:$0xff] %v14535_v49  ;;  %v14544_v33 = vsub.f32 %v14448_v5, %v17482_v38  ;;  %5161 = vmatprep.mubr.f32.mxu0 %v17484_v16  ;;  %v14560_v38 = vsub.f32 %v4775_v57, %v6978_v43  ;;  %v4781_v13 = vpop.permute.xlu0 %4780  ;;  %10111 = vmatprep.subr.bf16.mxu0 %v16855_v53  ;;  %v17488_v5 = vand.u32 4294901760, %v14484_v12  ;;  %v4779_v49 = vpop.permute.xlu1 %4778 }
 0x80a   :  { %v14554_v44 = vsub.f32 %v14472_v32, %v17485_v46  ;;  %17487 = vst [vmem:[#allocation143_spill] sm:$0xff] %v14558_v42  ;;  %v5025_v16 = vsel %vm4984_vm15, %v4845_v2, 0  ;;  %v7270_v46 = vand.u32 4294901760, %v14546_v25  ;;  %v6987_v32 = vand.u32 4294901760, %v4781_v13  ;;  %10353 = vmatprep.subr.bf16.mxu1 %v14558_v42 }
 0x80b   :  { %17483 = vst [vmem:[#allocation141_spill] sm:$0xff] %v14544_v33  ;;  %v14566_v40 = vsub.f32 %v14484_v12, %v17488_v5  ;;  %v17490_v52 = vand.u32 4294901760, %v13983_v8  ;;  %v14573_v57 = vpack.c.bf16 %v7256_v22, %v7249_v20  ;;  %v7263_v48 = vand.u32 4294901760, %v14560_v38  ;;  %10355 = vmatpush3.bf16.msra.mxu1 %v14558_v42  ;;  %v4841_v5 = vld [vmem:[%s16170_s7 + $0x128] sm:$0xff] }
 0x80c   :  { %17486 = vst [vmem:[#allocation142_spill] sm:$0xff] %v14554_v44  ;;  %v6984_v62 = vand.u32 4294901760, %v4779_v49  ;;  %10113 = vmatpush1.bf16.msra.mxu0 %v13658_v54  ;;  %v14579_v2 = vand.u32 4294901760, %v5022_v60  ;;  %v14581_v12 = vsub.f32 %v4781_v13, %v6987_v32  ;;  %v17493_v8 = vand.u32 4294901760, %v13993_v19 }
 0x80d   :  { %17489 = vst [vmem:[#allocation144_spill] sm:$0xff] %v14566_v40  ;;  %5167 = vmatmul.mubr.f32.gmra.mrb[20].mxu0 %v17490_v52  ;;  %17491 = vst [vmem:[#allocation145_spill] sm:$0xff] %v14573_v57  ;;  %v17494_v43 = vand.u32 4294901760, %v14509_v51  ;;  %v14592_v54 = vand.u32 4294901760, %v5025_v16  ;;  %v14598_v13 = vsub.f32 %v14503_v28, %v7256_v22  ;;  %10114 = vmatprep.subr.bf16.mxu0 %v16855_v53  ;;  %v4851_v52 = vld [vmem:[%s16170_s7 + $0x178] sm:$0xff]  ;;  %v14627_v33 = vand.u32 4294901760, %v4841_v5 }
 0x80e   :  { %17492 = vst [vmem:[#allocation146_spill] sm:$0xff] %v14579_v2  ;;  %5176 = vmatprep.mubr.f32.mxu0 %v17493_v8  ;;  %v14600_v42 = vpack.c.bf16 %v6987_v32, %v6984_v62  ;;  %v14602_v19 = vsub.f32 %v4779_v49, %v6984_v62  ;;  %v4785_v8 = vpop.permute.xlu0 %4784  ;;  %v7250_v22 = vsub.f32 %v14513_v61, %v7249_v20  ;;  %v7284_v32 = vand.u32 4294901760, %v14581_v12  ;;  %v4783_v49 = vpop.permute.xlu1 %4782 }
 0x80f   :  { %v14590_v57 = vsub.f32 %v14509_v51, %v17494_v43  ;;  %17495 = vst [vmem:[#allocation147_spill] sm:$0xff] %v14592_v54  ;;  %v4840_v43 = vld [vmem:[%s16170_s7 + $0x120] sm:$0xff]  ;;  %v6993_v39 = vand.u32 4294901760, %v4785_v8  ;;  %v17497_v62 = vand.u32 4294901760, %v14016_v58  ;;  %v14619_v40 = vpack.c.bf16 %v7270_v46, %v7263_v48  ;;  %17499 = vst [vmem:[#allocation150_spill] sm:$0xff] %v14627_v33 }
 0x810   :  { %17496 = vst [vmem:[#allocation148_spill] sm:$0xff] %v14600_v42  ;;  %v4848_v51 = vld [vmem:[%s16170_s7 + $0x160] sm:$0xff]  ;;  %v7277_v9 = vand.u32 4294901760, %v14602_v19  ;;  %v6990_v44 = vand.u32 4294901760, %v4783_v49  ;;  %10116 = vmatpush1.bf16.msra.mxu0 %v13688_v18  ;;  %10357 = vmatprep.subr.bf16.mxu1 %v14600_v42  ;;  %v14625_v20 = vsub.f32 %v5022_v60, %v14579_v2  ;;  %v14637_v63 = vand.u32 4294901760, %v4840_v43 }
 0x811   :  { %5182 = vmatmul.mubr.f32.gmra.mrb[22].mxu0 %v17497_v62  ;;  %17498 = vst [vmem:[#allocation149_spill] sm:$0xff] %v14619_v40  ;;  %v14629_v58 = vsub.f32 %v4785_v8, %v6993_v39  ;;  %10359 = vmatpush3.bf16.msra.mxu1 %v14600_v42  ;;  %v17500_v62 = vand.u32 4294901760, %v14045_v31  ;;  %v14635_v40 = vsub.f32 %v5025_v16, %v14592_v54  ;;  %v5028_v18 = vsel %vm4984_vm15, %v4848_v51, 0 }
 0x812   :  { %17502 = vst [vmem:[#allocation152_spill] sm:$0xff] %v14637_v63  ;;  %v14640_v35 = vpack.c.bf16 %v6993_v39, %v6990_v44  ;;  %v14642_v60 = vsub.f32 %v4783_v49, %v6990_v44  ;;  %v4789_v2 = vpop.permute.xlu0 %4788  ;;  %10117 = vmatprep.subr.bf16.mxu0 %v16855_v53  ;;  %v7258_v8 = vand.u32 4294901760, %v14598_v13  ;;  %v5031_v42 = vsel %vm4984_vm15, %v4851_v52, 0  ;;  %v4787_v16 = vpop.permute.xlu1 %4786 }
 0x813   :  { %5191 = vmatprep.mubr.f32.mxu0 %v17500_v62  ;;  %17501 = vst [vmem:[#allocation151_spill] sm:$0xff] %v14635_v40  ;;  %v7298_v31 = vand.u32 4294901760, %v14629_v58  ;;  %v6999_v62 = vand.u32 4294901760, %v4789_v2  ;;  %v17504_v54 = vand.u32 4294901760, %v14062_v56  ;;  %v7251_v28 = vand.u32 4294901760, %v7250_v22 }
 0x814   :  { %17503 = vst [vmem:[#allocation153_spill] sm:$0xff] %v14640_v35  ;;  %v14650_v51 = vpack.c.bf16 %v7284_v32, %v7277_v9  ;;  %v7271_v39 = vsub.f32 %v14546_v25, %v7270_v46  ;;  %v7264_v44 = vsub.f32 %v14560_v38, %v7263_v48  ;;  %v7291_v49 = vand.u32 4294901760, %v14642_v60  ;;  %10119 = vmatpush1.bf16.msra.mxu0 %v13716_v0 }
 0x815   :  { %5197 = vmatmul.mubr.f32.gmra.mrb[24].mxu0 %v17504_v54  ;;  %v6996_v61 = vand.u32 4294901760, %v4787_v16  ;;  %10361 = vmatprep.subr.bf16.mxu1 %v14640_v35  ;;  %v14657_v52 = vsub.f32 %v4789_v2, %v6999_v62  ;;  %v17506_v56 = vand.u32 4294901760, %v14069_v15  ;;  %v14664_v46 = vsub.f32 %v4841_v5, %v14627_v33  ;;  %v4844_v15 = vld [vmem:[%s16170_s7 + $0x140] sm:$0xff] }
 0x816   :  { %17505 = vst [vmem:[#allocation154_spill] sm:$0xff] %v14650_v51  ;;  %10363 = vmatpush3.bf16.msra.mxu1 %v14640_v35  ;;  %v14666_v48 = vand.u32 4294901760, %v5028_v18  ;;  %10120 = vmatprep.subr.bf16.mxu0 %v16855_v53  ;;  %v14674_v0 = vsub.f32 %v4840_v43, %v14637_v63  ;;  %v14676_v2 = vand.u32 4294901760, %v5031_v42  ;;  %v7285_v5 = vsub.f32 %v14581_v12, %v7284_v32  ;;  %v4843_v43 = vld [vmem:[%s16170_s7 + $0x138] sm:$0xff] }
 0x817   :  { %5206 = vmatprep.mubr.f32.mxu0 %v17506_v56  ;;  %17507 = vst [vmem:[#allocation155_spill] sm:$0xff] %v14664_v46  ;;  %v14668_v13 = vpack.c.bf16 %v6999_v62, %v6996_v61  ;;  %v14670_v22 = vsub.f32 %v4787_v16, %v6996_v61  ;;  %v7278_v56 = vsub.f32 %v14602_v19, %v7277_v9  ;;  %v7312_v62 = vand.u32 4294901760, %v14657_v52 }
 0x818   :  { %17508 = vst [vmem:[#allocation156_spill] sm:$0xff] %v14666_v48  ;;  %17510 = vst [vmem:[#allocation158_spill] sm:$0xff] %v14674_v0  ;;  %v17512_v61 = vand.u32 4294901760, %v14079_v24  ;;  %v14689_v16 = vpack.c.bf16 %v7298_v31, %v7291_v49  ;;  %10122 = vmatpush1.bf16.msra.mxu0 %v13736_v26  ;;  %v10368_v32 = vpack.c.bf16 %v7258_v8, %v7251_v28  ;;  %v7265_v51 = vand.u32 4294901760, %v7264_v44 }
 0x819   :  { %17509 = vst [vmem:[#allocation157_spill] sm:$0xff] %v14668_v13  ;;  %17511 = vst [vmem:[#allocation159_spill] sm:$0xff] %v14676_v2  ;;  %v7305_v54 = vand.u32 4294901760, %v14670_v22  ;;  %10365 = vmatprep.subr.bf16.mxu1 %v14668_v13  ;;  %v7272_v9 = vand.u32 4294901760, %v7271_v39  ;;  %v17514_v63 = vand.u32 4294901760, %v14174_v1  ;;  %v14704_v35 = vand.u32 4294901760, %v4844_v15  ;;  %10123 = vmatprep.subr.bf16.mxu0 %v16855_v53 }
 0x81a   :  { %5212 = vmatmul.mubr.f32.gmra.mrb[26].mxu0 %v17512_v61  ;;  %17513 = vst [vmem:[#allocation160_spill] sm:$0xff] %v14689_v16  ;;  %v17515_v61 = vand.u32 4294901760, %v14185_v37  ;;  %10367 = vmatpush3.bf16.msra.mxu1 %v14668_v13  ;;  %v17516_v16 = vand.u32 4294901760, %v14084_v34  ;;  %v14711_v8 = vand.u32 4294901760, %v4843_v43  ;;  %v17521_v44 = vand.u32 4294901760, %v14089_v17 }
 0x81b   :  { %v5551_v24 = vsub.f32 %v14174_v1, %v17514_v63  ;;  %17517 = vst [vmem:[#allocation161_spill] sm:$0xff] %v14704_v35  ;;  %10369 = vmatprep.subr.bf16.mxu1 %v10368_v32  ;;  %v14709_v63 = vsub.f32 %v5028_v18, %v14666_v48  ;;  %v14713_v39 = vpack.c.bf16 %v7312_v62, %v7305_v54  ;;  %v7279_v34 = vand.u32 4294901760, %v7278_v56  ;;  %v4854_v56 = vld [vmem:[%s16170_s7 + $0x190] sm:$0xff] }
 0x81c   :  { %v5544_v33 = vsub.f32 %v14185_v37, %v17515_v61  ;;  %5221 = vmatprep.mubr.f32.mxu0 %v17516_v16  ;;  %17519 = vst [vmem:[#allocation163_spill] sm:$0xff] %v14711_v8  ;;  %v7286_v16 = vand.u32 4294901760, %v7285_v5  ;;  %v17522_v61 = vand.u32 4294901760, %v14625_v20  ;;  %v14723_v13 = vsub.f32 %v5031_v42, %v14676_v2  ;;  %10125 = vmatpush1.bf16.msra.mxu0 %v13755_v36 }
 0x81d   :  { %17518 = vst [vmem:[#allocation162_spill] sm:$0xff] %v14709_v63  ;;  %17520 = vst [vmem:[#allocation164_spill] sm:$0xff] %v14713_v39  ;;  %v7299_v18 = vsub.f32 %v14629_v58, %v7298_v31  ;;  %v7292_v28 = vsub.f32 %v14642_v60, %v7291_v49  ;;  %v17524_v39 = vand.u32 4294901760, %v14105_v29  ;;  %v10372_v17 = vpack.c.bf16 %v7272_v9, %v7265_v51 }
 0x81e   :  { %5227 = vmatmul.mubr.f32.gmra.mrb[28].mxu0 %v17521_v44  ;;  %v14720_v26 = vsub.f32 %v14625_v20, %v17522_v61  ;;  %17523 = vst [vmem:[#allocation165_spill] sm:$0xff] %v14723_v13  ;;  %v5552_v44 = vand.u32 4294901760, %v5551_v24  ;;  %v5545_v61 = vand.u32 4294901760, %v5544_v33  ;;  %v17525_v42 = vand.u32 4294901760, %v14110_v27  ;;  %10126 = vmatprep.subr.bf16.mxu0 %v16855_v53 }
 0x81f   :  { %9349 = vmatmul.mubr.f32.vlgmr.msra.gmra.mrb[56].mxu1 %v17524_v39  ;;  %v17526_v31 = vand.u32 4294901760, %v14635_v40  ;;  %v14742_v29 = vsub.f32 %v4844_v15, %v14704_v35  ;;  %v17528_v51 = vand.u32 4294901760, %v14206_v11  ;;  %v17529_v9 = vand.u32 4294901760, %v14215_v10 }
 0x820   :  { %10371 = vmatpush3.bf16.msra.mxu1 %v10368_v32  ;;  %5236 = vmatprep.mubr.f32.mxu0 %v17525_v42  ;;  %v17530_v32 = vand.u32 4294901760, %v14664_v46  ;;  %v17531_v15 = vand.u32 4294901760, %v14121_v4  ;;  %v17532_v39 = vand.u32 4294901760, %v14137_v47  ;;  %v10376_v42 = vpack.c.bf16 %v7286_v16, %v7279_v34 }
 0x821   :  { %v14739_v36 = vsub.f32 %v14635_v40, %v17526_v31  ;;  %17527 = vst [vmem:[#allocation166_spill] sm:$0xff] %v14742_v29  ;;  %v5565_v49 = vsub.f32 %v14206_v11, %v17528_v51  ;;  %v5558_v33 = vsub.f32 %v14215_v10, %v17529_v9  ;;  %10373 = vmatprep.subr.bf16.mxu1 %v10372_v17  ;;  %v16709_v31 = vand.u32 4294901760, %v14709_v63 }
 0x822   :  { %v14755_v24 = vsub.f32 %v14664_v46, %v17530_v32  ;;  %5242 = vmatmul.mubr.f32.gmra.mrb[30].mxu0 %v17531_v15  ;;  %9351 = vmatprep.mubr.f32.mxu1 %v17532_v39  ;;  %v14763_v51 = vsub.f32 %v4843_v43, %v14711_v8  ;;  %v5034_v9 = vsel %vm4984_vm15, %v4854_v56, 0  ;;  %v7313_v27 = vsub.f32 %v14657_v52, %v7312_v62 }
 0x823   :  { %v7306_v5 = vsub.f32 %v14670_v22, %v7305_v54  ;;  %10128 = vmatpush1.bf16.msra.mxu0 %v13769_v21  ;;  %v17534_v4 = vand.u32 4294901760, %v14142_v41  ;;  %v7293_v32 = vand.u32 4294901760, %v7292_v28  ;;  %v7300_v47 = vand.u32 4294901760, %v7299_v18  ;;  %v4857_v41 = vld [vmem:[%s16170_s7 + $0x1a8] sm:$0xff] }
 0x824   :  { %17533 = vst [vmem:[#allocation167_spill] sm:$0xff] %v14763_v51  ;;  %10375 = vmatpush3.bf16.msra.mxu1 %v10372_v17  ;;  %v17535_v34 = vand.u32 4294901760, %v14160_v23  ;;  %v10130_v16 = vpack.c.bf16 %v5552_v44, %v5545_v61  ;;  %v17536_v56 = vand.u32 4294901760, %v14674_v0  ;;  %v16712_v54 = vand.u32 4294901760, %v14723_v13  ;;  %10129 = vmatprep.subr.bf16.mxu0 %v16855_v53  ;;  %v4860_v61 = vld [vmem:[%s16170_s7 + $0x1c0] sm:$0xff] }
 0x825   :  { %9352 = vmatmul.mubr.f32.gmra.mrb[58].mxu1 %v17534_v4  ;;  %v5566_v21 = vand.u32 4294901760, %v5565_v49  ;;  %v5559_v28 = vand.u32 4294901760, %v5558_v33  ;;  %v17537_v18 = vand.u32 4294901760, %v14245_v14  ;;  %v17538_v17 = vand.u32 4294901760, %v14253_v50  ;;  %10377 = vmatprep.subr.bf16.mxu1 %v10376_v42 }
 0x826   :  { %5251 = vmatprep.mubr.f32.mxu0 %v17535_v34  ;;  %v14777_v62 = vsub.f32 %v14674_v0, %v17536_v56  ;;  %v17539_v15 = vand.u32 4294901760, %v14181_v45  ;;  %v17540_v49 = vand.u32 4294901760, %v14220_v6  ;;  %v14800_v34 = vand.u32 4294901760, %v5034_v9  ;;  %v4847_v6 = vld [vmem:[%s16170_s7 + $0x158] sm:$0xff]  ;;  %v17558_v0 = vld [vmem:[#allocation28_spill] sm:$0xff] }
 0x827   :  { %v5579_v23 = vsub.f32 %v14245_v14, %v17537_v18  ;;  %v5572_v44 = vsub.f32 %v14253_v50, %v17538_v17  ;;  %v17542_v56 = vand.u32 4294901760, %v14226_v59  ;;  %10131 = vmatpush1.bf16.msra.mxu0 %v10130_v16  ;;  %v10380_v18 = vpack.c.bf16 %v7300_v47, %v7293_v32  ;;  %v17545_v59 = vld [vmem:[#allocation42_spill] sm:$0xff] }
 0x828   :  { %5257 = vmatmul.mubr.f32.gmra.mrb[32].mxu0 %v17539_v15  ;;  %9354 = vmatprep.mubr.f32.mxu1 %v17540_v49  ;;  %17541 = vst [vmem:[#allocation168_spill] sm:$0xff] %v14800_v34  ;;  %v7307_v17 = vand.u32 4294901760, %v7306_v5  ;;  %v7314_v43 = vand.u32 4294901760, %v7313_v27  ;;  %v5037_v45 = vsel %vm4984_vm15, %v4857_v41, 0  ;;  %v17543_v15 = vand.u32 4294901760, %v14275_v30 }
 0x829   :  { %9355 = vmatmul.mubr.f32.gmra.mrb[60].mxu1 %v17542_v56  ;;  %v17544_v39 = vand.u32 4294901760, %v14289_v55  ;;  %v17546_v16 = vand.u32 4294901760, %v17545_v59  ;;  %v14819_v5 = vsub.f32 %v14709_v63, %v16709_v31  ;;  %v5040_v27 = vsel %vm4984_vm15, %v4860_v61, 0  ;;  %10132 = vmatprep.subr.bf16.mxu0 %v16855_v53  ;;  %v17549_v61 = vld [vmem:[#allocation53_spill] sm:$0xff]  ;;  %v17554_v31 = vld [vmem:[#allocation58_spill] sm:$0xff]  ;;  %v17583_v63 = vld [vmem:[#allocation75_spill] sm:$0xff] }
 0x82a   :  { %v5593_v49 = vsub.f32 %v14275_v30, %v17543_v15  ;;  %10379 = vmatpush3.bf16.msra.mxu1 %v10376_v42  ;;  %v5580_v32 = vand.u32 4294901760, %v5579_v23  ;;  %v5573_v47 = vand.u32 4294901760, %v5572_v44  ;;  %v10133_v41 = vpack.c.bf16 %v5566_v21, %v5559_v28  ;;  %v4846_v42 = vld [vmem:[%s16170_s7 + $0x150] sm:$0xff] }
 0x82b   :  { %v5586_v33 = vsub.f32 %v14289_v55, %v17544_v39  ;;  %5266 = vmatprep.mubr.f32.mxu0 %v17546_v16  ;;  %10381 = vmatprep.subr.bf16.mxu1 %v10380_v18  ;;  %v4863_v39 = vld [vmem:[%s16170_s7 + $0x1d8] sm:$0xff]  ;;  %v17547_v15 = vld [vmem:[#allocation52_spill] sm:$0xff]  ;;  %v17550_v23 = vand.u32 4294901760, %v17549_v61  ;;  %v14836_v21 = vsub.f32 %v5034_v9, %v14800_v34  ;;  %v14838_v28 = vand.u32 4294901760, %v5037_v45 }
 0x82c   :  { %v17548_v59 = vand.u32 4294901760, %v17547_v15  ;;  %v14840_v16 = vand.u32 4294901760, %v4847_v6  ;;  %v17555_v56 = vand.u32 4294901760, %v17554_v31  ;;  %10134 = vmatpush1.bf16.msra.mxu0 %v10133_v41  ;;  %v10384_v4 = vpack.c.bf16 %v7314_v43, %v7307_v17  ;;  %v4850_v17 = vld [vmem:[%s16170_s7 + $0x170] sm:$0xff] }
 0x82d   :  { %9357 = vmatprep.mubr.f32.mxu1 %v17550_v23  ;;  %17551 = vst [vmem:[#allocation42_spill] sm:$0xff] %v14836_v21  ;;  %17552 = vst [vmem:[#allocation52_spill] sm:$0xff] %v14838_v28  ;;  %v14847_v15 = vsub.f32 %v14723_v13, %v16712_v54  ;;  %v14854_v9 = vand.u32 4294901760, %v5040_v27  ;;  %v5594_v23 = vand.u32 4294901760, %v5593_v49  ;;  %v5587_v44 = vand.u32 4294901760, %v5586_v33  ;;  %10135 = vmatprep.subr.bf16.mxu0 %v16855_v53  ;;  %v4849_v49 = vld [vmem:[%s16170_s7 + $0x168] sm:$0xff] }
 0x82e   :  { %5272 = vmatmul.mubr.f32.gmra.mrb[34].mxu0 %v17548_v59  ;;  %17553 = vst [vmem:[#allocation53_spill] sm:$0xff] %v14840_v16  ;;  %9358 = vmatmul.mubr.f32.gmra.mrb[62].mxu1 %v17555_v56  ;;  %v17556_v59 = vand.u32 4294901760, %v14742_v29  ;;  %v17559_v31 = vand.u32 4294901760, %v17558_v0  ;;  %v14858_v41 = vand.u32 4294901760, %v4846_v42  ;;  %v5043_v43 = vsel %vm4984_vm15, %v4863_v39, 0  ;;  %v17561_v56 = vld [vmem:[#allocation60_spill] sm:$0xff] }
 0x82f   :  { %17557 = vst [vmem:[#allocation58_spill] sm:$0xff] %v14854_v9  ;;  %10383 = vmatpush3.bf16.msra.mxu1 %v10380_v18  ;;  %v17562_v54 = vand.u32 4294901760, %v17561_v56  ;;  %v10136_v0 = vpack.c.bf16 %v5580_v32, %v5573_v47  ;;  %v17565_v39 = vld [vmem:[#allocation68_spill] sm:$0xff]  ;;  %v17567_v8 = vand.u32 4294901760, %v14468_v7  ;;  %v14886_v32 = vsub.f32 %v5037_v45, %v14838_v28 }
 0x830   :  { %v14852_v61 = vsub.f32 %v14742_v29, %v17556_v59  ;;  %5281 = vmatprep.mubr.f32.mxu0 %v17559_v31  ;;  %17560 = vst [vmem:[#allocation28_spill] sm:$0xff] %v14858_v41  ;;  %v17563_v29 = vld [vmem:[#allocation64_spill] sm:$0xff]  ;;  %10385 = vmatprep.subr.bf16.mxu1 %v10384_v4  ;;  %v17566_v31 = vand.u32 4294901760, %v17565_v39  ;;  %v14889_v47 = vsub.f32 %v4847_v6, %v14840_v16  ;;  %v17571_v18 = vand.u32 4294901760, %v14481_v3  ;;  %v17572_v39 = vld [vmem:[#allocation138_spill] sm:$0xff] }
 0x831   :  { %v5607_v59 = vsub.f32 %v17561_v56, %v17562_v54  ;;  %v17564_v46 = vand.u32 4294901760, %v17563_v29  ;;  %9360 = vmatprep.mubr.f32.mxu1 %v17567_v8  ;;  %v17568_v54 = vand.u32 4294901760, %v14763_v51  ;;  %17569 = vst [vmem:[#allocation60_spill] sm:$0xff] %v14886_v32  ;;  %10137 = vmatpush1.bf16.msra.mxu0 %v10136_v0  ;;  %v17573_v7 = vld [vmem:[#allocation132_spill] sm:$0xff]  ;;  %v14902_v35 = vand.u32 4294901760, %v4850_v17 }
 0x832   :  { %5287 = vmatmul.mubr.f32.gmra.mrb[36].mxu0 %v17566_v31  ;;  %17570 = vst [vmem:[#allocation68_spill] sm:$0xff] %v14889_v47  ;;  %9361 = vmatmul.mubr.f32.gmra.mrb[64].mxu1 %v17571_v18  ;;  %v14895_v8 = vpack.c.bf16 %v17573_v7, %v17572_v39  ;;  %v14898_v31 = vsub.f32 %v5040_v27, %v14854_v9  ;;  %v17577_v45 = vld [vmem:[#allocation128_spill] sm:$0xff]  ;;  %v14910_v18 = vand.u32 4294901760, %v4849_v49  ;;  %v17581_v27 = vld [vmem:[#allocation70_spill] sm:$0xff]  ;;  %v17584_v40 = vand.u32 4294901760, %v17583_v63 }
 0x833   :  { %v5600_v33 = vsub.f32 %v17563_v29, %v17564_v46  ;;  %v14882_v46 = vsub.f32 %v14763_v51, %v17568_v54  ;;  %v14900_v54 = vand.u32 4294901760, %v5043_v43  ;;  %17576 = vst [vmem:[#allocation169_spill] sm:$0xff] %v14902_v35  ;;  %10387 = vmatpush3.bf16.msra.mxu1 %v10384_v4  ;;  %v17578_v51 = vand.u32 4294901760, %v17577_v45  ;;  %10138 = vmatprep.subr.bf16.mxu0 %v16855_v53  ;;  %v17597_v45 = vld [vmem:[#allocation144_spill] sm:$0xff] }
 0x834   :  { %17574 = vst [vmem:[#allocation138_spill] sm:$0xff] %v14898_v31  ;;  %v10139_v6 = vpack.c.bf16 %v5594_v23, %v5587_v44  ;;  %v14908_v0 = vsub.f32 %v4846_v42, %v14858_v41  ;;  %17580 = vst [vmem:[#allocation170_spill] sm:$0xff] %v14910_v18  ;;  %v5608_v39 = vand.u32 4294901760, %v5607_v59  ;;  %v17582_v16 = vand.u32 4294901760, %v17581_v27  ;;  %10389 = vmatprep.subr.bf16.mxu1 %v14895_v8  ;;  %v17585_v42 = vld [vmem:[#allocation139_spill] sm:$0xff]  ;;  %v17587_v23 = vld [vmem:[#allocation141_spill] sm:$0xff] }
 0x835   :  { %17575 = vst [vmem:[#allocation132_spill] sm:$0xff] %v14900_v54  ;;  %5296 = vmatprep.mubr.f32.mxu0 %v17578_v51  ;;  %v5601_v7 = vand.u32 4294901760, %v5600_v33  ;;  %v5614_v4 = vsub.f32 %v17583_v63, %v17584_v40  ;;  %v4853_v51 = vld [vmem:[%s16170_s7 + $0x188] sm:$0xff]  ;;  %v17586_v44 = vand.u32 4294901760, %v17585_v42  ;;  %v17588_v59 = vand.u32 4294901760, %v17587_v23  ;;  %v17590_v41 = vld [vmem:[#allocation142_spill] sm:$0xff] }
 0x836   :  { %17579 = vst [vmem:[#allocation128_spill] sm:$0xff] %v14908_v0  ;;  %v5621_v13 = vsub.f32 %v17581_v27, %v17582_v16  ;;  %v5340_v16 = vand.u32 4294901760, %v14852_v61  ;;  %v17589_v33 = vand.u32 4294901760, %v14836_v21  ;;  %v17591_v63 = vand.u32 4294901760, %v17590_v41  ;;  %10140 = vmatpush1.bf16.msra.mxu0 %v10139_v6 }
 0x837   :  { %5302 = vmatmul.mubr.f32.gmra.mrb[38].mxu0 %v17586_v44  ;;  %9363 = vmatprep.mubr.f32.mxu1 %v17588_v59  ;;  %v14940_v23 = vsub.f32 %v5043_v43, %v14900_v54  ;;  %v14943_v61 = vsub.f32 %v4850_v17, %v14902_v35  ;;  %v4852_v59 = vld [vmem:[%s16170_s7 + $0x180] sm:$0xff]  ;;  %v17598_v44 = vand.u32 4294901760, %v17597_v45  ;;  %v14958_v43 = vsub.f32 %v4849_v49, %v14910_v18 }
 0x838   :  { %v14931_v40 = vsub.f32 %v14836_v21, %v17589_v33  ;;  %9364 = vmatmul.mubr.f32.gmra.mrb[66].mxu1 %v17591_v63  ;;  %v17593_v33 = vld [vmem:[#allocation84_spill] sm:$0xff]  ;;  %10141 = vmatprep.subr.bf16.mxu0 %v16855_v53  ;;  %v14960_v17 = vand.u32 4294901760, %v4853_v51  ;;  %v4856_v35 = vld [vmem:[%s16170_s7 + $0x1a0] sm:$0xff]  ;;  %v5622_v21 = vand.u32 4294901760, %v5621_v13  ;;  %v17603_v18 = vand.u32 4294901760, %v14886_v32 }
 0x839   :  { %17592 = vst [vmem:[#allocation139_spill] sm:$0xff] %v14943_v61  ;;  %v17594_v3 = vand.u32 4294901760, %v17593_v33  ;;  %v17595_v63 = vld [vmem:[#allocation92_spill] sm:$0xff]  ;;  %5311 = vmatprep.mubr.f32.mxu0 %v17598_v44  ;;  %17599 = vst [vmem:[#allocation141_spill] sm:$0xff] %v14958_v43  ;;  %v17602_v44 = vand.u32 4294901760, %v14590_v57  ;;  %v17604_v27 = vand.u32 4294901760, %v14889_v47 }
 0x83a   :  { %v17596_v6 = vand.u32 4294901760, %v17595_v63  ;;  %17600 = vst [vmem:[#allocation142_spill] sm:$0xff] %v14960_v17  ;;  %v7210_v49 = vand.u32 4294901760, %v14931_v40  ;;  %v17610_v40 = vld [vmem:[#allocation100_spill] sm:$0xff] }
 0x83b   :  { %v5635_v41 = vsub.f32 %v17593_v33, %v17594_v3  ;;  %v5615_v3 = vand.u32 4294901760, %v5614_v4  ;;  %v17601_v33 = vand.u32 4294901760, %v14720_v26  ;;  %5317 = vmatmul.mubr.f32.gmra.mrb[40].mxu0 %v17602_v44  ;;  %v5354_v13 = vsub.f32 %v14889_v47, %v17604_v27 }
 0x83c   :  { %v5628_v42 = vsub.f32 %v17595_v63, %v17596_v6  ;;  %v10142_v6 = vpack.c.bf16 %v5608_v39, %v5601_v7  ;;  %v7219_v63 = vsub.f32 %v14886_v32, %v17603_v18  ;;  %v14977_v4 = vand.u32 4294901760, %v4852_v59  ;;  %v4855_v18 = vld [vmem:[%s16170_s7 + $0x198] sm:$0xff] }
 0x83d   :  { %9366 = vmatprep.mubr.f32.mxu1 %v17601_v33  ;;  %v17606_v26 = vand.u32 4294901760, %v14739_v36  ;;  %v17607_v39 = vand.u32 4294901760, %v14898_v31  ;;  %v14986_v33 = vand.u32 4294901760, %v4856_v35  ;;  %v5636_v27 = vand.u32 4294901760, %v5635_v41  ;;  %v17612_v41 = vld [vmem:[#allocation110_spill] sm:$0xff] }
 0x83e   :  { %17605 = vst [vmem:[#allocation144_spill] sm:$0xff] %v14977_v4  ;;  %10143 = vmatpush1.bf16.msra.mxu0 %v10142_v6  ;;  %v5629_v44 = vand.u32 4294901760, %v5628_v42  ;;  %v17609_v36 = vand.u32 4294901760, %v14755_v24  ;;  %v17611_v7 = vand.u32 4294901760, %v17610_v40  ;;  %v17613_v42 = vand.u32 4294901760, %v17612_v41 }
 0x83f   :  { %9367 = vmatmul.mubr.f32.gmra.mrb[68].mxu1 %v17606_v26  ;;  %v7229_v57 = vsub.f32 %v14898_v31, %v17607_v39  ;;  %17608 = vst [vmem:[#allocation171_spill] sm:$0xff] %v14986_v33  ;;  %10144 = vmatprep.subr.bf16.mxu0 %v16855_v53  ;;  %v14996_v26 = vsub.f32 %v4853_v51, %v14960_v17  ;;  %v4859_v39 = vld [vmem:[%s16170_s7 + $0x1b8] sm:$0xff]  ;;  %v17615_v6 = vand.u32 4294901760, %v14908_v0  ;;  %v17616_v17 = vand.u32 4294901760, %v14777_v62 }
 0x840   :  { %5326 = vmatprep.mubr.f32.mxu0 %v17609_v36  ;;  %v5649_v45 = vsub.f32 %v17610_v40, %v17611_v7  ;;  %v5642_v24 = vsub.f32 %v17612_v41, %v17613_v42  ;;  %v17614_v36 = vand.u32 4294901760, %v14819_v5  ;;  %v10145_v47 = vpack.c.bf16 %v5622_v21, %v5615_v3 }
 0x841   :  { %v5360_v51 = vsub.f32 %v14908_v0, %v17615_v6  ;;  %5332 = vmatmul.mubr.f32.gmra.mrb[42].mxu0 %v17616_v17  ;;  %v7220_v31 = vand.u32 4294901760, %v7219_v63  ;;  %v5355_v32 = vand.u32 4294901760, %v5354_v13  ;;  %v15015_v29 = vsub.f32 %v4852_v59, %v14977_v4  ;;  %v4858_v59 = vld [vmem:[%s16170_s7 + $0x1b0] sm:$0xff] }
 0x842   :  { %9369 = vmatprep.mubr.f32.mxu1 %v17614_v36  ;;  %v15017_v7 = vand.u32 4294901760, %v4855_v18  ;;  %v17618_v42 = vand.u32 4294901760, %v14847_v15  ;;  %10146 = vmatpush1.bf16.msra.mxu0 %v10145_v47  ;;  %v17619_v5 = vand.u32 4294901760, %v14940_v23  ;;  %v17620_v3 = vand.u32 4294901760, %v14943_v61  ;;  %v17625_v0 = vld [vmem:[#allocation124_spill] sm:$0xff] }
 0x843   :  { %v15028_v63 = vsub.f32 %v4856_v35, %v14986_v33  ;;  %v15030_v17 = vand.u32 4294901760, %v4859_v39  ;;  %5341 = vmatprep.mubr.f32.mxu0 %v5340_v16  ;;  %10147 = vmatprep.subr.bf16.mxu0 %v16855_v53  ;;  %v10148_v15 = vpack.c.bf16 %v5636_v27, %v5629_v44  ;;  %v7230_v47 = vand.u32 4294901760, %v7229_v57  ;;  %v4862_v35 = vld [vmem:[%s16170_s7 + $0x1d0] sm:$0xff] }
 0x844   :  { %17617 = vst [vmem:[#allocation100_spill] sm:$0xff] %v15017_v7  ;;  %9370 = vmatmul.mubr.f32.gmra.mrb[70].mxu1 %v17618_v42  ;;  %v7239_v21 = vsub.f32 %v14940_v23, %v17619_v5  ;;  %v5369_v62 = vsub.f32 %v14943_v61, %v17620_v3  ;;  %v17622_v13 = vand.u32 4294901760, %v14958_v43  ;;  %v5650_v42 = vand.u32 4294901760, %v5649_v45  ;;  %v17623_v3 = vld [vmem:[#allocation118_spill] sm:$0xff] }
 0x845   :  { %17621 = vst [vmem:[#allocation110_spill] sm:$0xff] %v15030_v17  ;;  %v5643_v5 = vand.u32 4294901760, %v5642_v24  ;;  %v17624_v61 = vand.u32 4294901760, %v17623_v3  ;;  %v17626_v33 = vand.u32 4294901760, %v17625_v0  ;;  %9372 = vmatprep.mubr.f32.mxu1 %v7210_v49  ;;  %v17627_v27 = vand.u32 4294901760, %v14882_v46  ;;  %v4861_v46 = vld [vmem:[%s16170_s7 + $0x1c8] sm:$0xff] }
 0x846   :  { %v5375_v6 = vsub.f32 %v14958_v43, %v17622_v13  ;;  %v5361_v44 = vand.u32 4294901760, %v5360_v51  ;;  %v16765_v13 = vand.u32 4294901760, %v15015_v29  ;;  %v15053_v36 = vsub.f32 %v4855_v18, %v15017_v7  ;;  %10149 = vmatpush1.bf16.msra.mxu0 %v10148_v15 }
 0x847   :  { %v5663_v16 = vsub.f32 %v17623_v3, %v17624_v61  ;;  %v5656_v57 = vsub.f32 %v17625_v0, %v17626_v33  ;;  %5347 = vmatmul.mubr.f32.gmra.mrb[44].mxu0 %v17627_v27  ;;  %v15055_v45 = vand.u32 4294901760, %v4858_v59  ;;  %v7240_v24 = vand.u32 4294901760, %v7239_v21  ;;  %10150 = vmatprep.subr.bf16.mxu0 %v16855_v53 }
 0x848   :  { %9373 = vmatmul.mubr.f32.gmra.mrb[72].mxu1 %v7220_v31  ;;  %v15059_v43 = vsub.f32 %v4859_v39, %v15030_v17  ;;  %v15061_v49 = vand.u32 4294901760, %v4862_v35  ;;  %5356 = vmatprep.mubr.f32.mxu0 %v5355_v32  ;;  %v5370_v33 = vand.u32 4294901760, %v5369_v62  ;;  %v17631_v18 = vand.u32 4294901760, %v14996_v26 }
 0x849   :  { %17628 = vst [vmem:[#allocation118_spill] sm:$0xff] %v15055_v45  ;;  %v5664_v51 = vand.u32 4294901760, %v5663_v16  ;;  %v5657_v21 = vand.u32 4294901760, %v5656_v57  ;;  %9375 = vmatprep.mubr.f32.mxu1 %v7230_v47  ;;  %v10151_v15 = vpack.c.bf16 %v5650_v42, %v5643_v5  ;;  %v5376_v39 = vand.u32 4294901760, %v5375_v6  ;;  %v17636_v57 = vld [vmem:[#allocation81_spill] sm:$0xff] }
 0x84a   :  { %17629 = vst [vmem:[#allocation124_spill] sm:$0xff] %v15059_v43  ;;  %17630 = vst [vmem:[#allocation172_spill] sm:$0xff] %v15061_v49  ;;  %v5384_v31 = vsub.f32 %v14996_v26, %v17631_v18  ;;  %v5390_v27 = vsub.f32 %v15015_v29, %v16765_v13  ;;  %v16764_v61 = vand.u32 4294901760, %v15053_v36  ;;  %v15075_v32 = vsub.f32 %v4858_v59, %v15055_v45  ;;  %v17667_v13 = vld [vmem:[#allocation105_spill] sm:$0xff] }
 0x84b   :  { %5362 = vmatmul.mubr.f32.gmra.mrb[46].mxu0 %v5361_v44  ;;  %v15077_v62 = vand.u32 4294901760, %v4861_v46  ;;  %v17634_v16 = vand.u32 4294901760, %v15028_v63  ;;  %v16763_v6 = vand.u32 4294901760, %v15059_v43  ;;  %v15084_v42 = vsub.f32 %v4862_v35, %v15061_v49  ;;  %v17638_v35 = vld [vmem:[#allocation12_spill] sm:$0xff] }
 0x84c   :  { %17632 = vst [vmem:[#allocation173_spill] sm:$0xff] %v15075_v32  ;;  %9376 = vmatmul.mubr.f32.gmra.mrb[74].mxu1 %v7240_v24  ;;  %10152 = vmatpush1.bf16.msra.mxu0 %v10151_v15  ;;  %v5385_v5 = vand.u32 4294901760, %v5384_v31  ;;  %v10154_v59 = vpack.c.bf16 %v5664_v51, %v5657_v21  ;;  %v5391_v44 = vand.u32 4294901760, %v5390_v27  ;;  %v5405_v24 = vsub.f32 %v15053_v36, %v16764_v61 }
 0x84d   :  { %17633 = vst [vmem:[#allocation174_spill] sm:$0xff] %v15077_v62  ;;  %v5399_v47 = vsub.f32 %v15028_v63, %v17634_v16  ;;  %17635 = vst [vmem:[#allocation175_spill] sm:$0xff] %v15084_v42  ;;  %5371 = vmatprep.mubr.f32.mxu0 %v5370_v33  ;;  %10153 = vmatprep.subr.bf16.mxu0 %v16855_v53  ;;  %v16762_v18 = vand.u32 4294901760, %v15075_v32  ;;  %v15093_v15 = vsub.f32 %v4861_v46, %v15077_v62 }
 0x84e   :  { %9398 = vmatprep.mubr.f32.mxu1 %v17636_v57  ;;  %v10392_v33 = vpack.c.bf16 %v14546_v25, %v14560_v38  ;;  %v5414_v51 = vsub.f32 %v15059_v43, %v16763_v6  ;;  %v16761_v21 = vand.u32 4294901760, %v15084_v42  ;;  %v5406_v46 = vand.u32 4294901760, %v5405_v24  ;;  %v17640_v38 = vld [vmem:[#allocation119_spill] sm:$0xff]  ;;  %v17642_v24 = vld [vmem:[#allocation2_spill] sm:$0xff]  ;;  %v17734_v43 = vld [vmem:[#allocation60_spill] sm:$0xff] }
 0x84f   :  { %5377 = vmatmul.mubr.f32.gmra.mrb[48].mxu0 %v5376_v39  ;;  %17637 = vst [vmem:[#allocation176_spill] sm:$0xff] %v15093_v15  ;;  %v5400_v31 = vand.u32 4294901760, %v5399_v47  ;;  %v17639_v39 = vld [vmem:[#allocation107_spill] sm:$0xff]  ;;  %v5420_v27 = vsub.f32 %v15075_v32, %v16762_v18  ;;  %v16760_v25 = vand.u32 4294901760, %v15093_v15  ;;  %v10396_v16 = vpack.c.bf16 %v14581_v12, %v14602_v19  ;;  %v17662_v6 = vld [vmem:[#allocation94_spill] sm:$0xff] }
 0x850   :  { %9399 = vmatmul.mubr.f32.vlgmr.msra.gmra.mrb[76].mxu1 %v17638_v35  ;;  %10155 = vmatpush1.bf16.msra.mxu0 %v10154_v59  ;;  %v5429_v47 = vsub.f32 %v15084_v42, %v16761_v21  ;;  %v10400_v12 = vpack.c.bf16 %v14629_v58, %v14642_v60  ;;  %v17646_v58 = vld [vmem:[#allocation38_spill] sm:$0xff]  ;;  %v17647_v60 = vld [vmem:[#allocation77_spill] sm:$0xff]  ;;  %v17661_v18 = vld [vmem:[#allocation147_spill] sm:$0xff] }
 0x851   :  { %10391 = vmatpush3.bf16.msra.mxu1 %v14895_v8  ;;  %5386 = vmatprep.mubr.f32.mxu0 %v5385_v5  ;;  %v5415_v8 = vand.u32 4294901760, %v5414_v51  ;;  %v17641_v5 = vld [vmem:[#allocation13_spill] sm:$0xff]  ;;  %v5421_v59 = vand.u32 4294901760, %v5420_v27  ;;  %v17644_v51 = vld [vmem:[#allocation7_spill] sm:$0xff]  ;;  %v17645_v27 = vld [vmem:[#allocation66_spill] sm:$0xff] }
 0x852   :  { %10393 = vmatprep.subr.bf16.mxu1 %v10392_v33  ;;  %9401 = vmatprep.mubr.f32.mxu1 %v17639_v39  ;;  %v5430_v19 = vand.u32 4294901760, %v5429_v47  ;;  %v17650_v47 = vld [vmem:[#allocation85_spill] sm:$0xff] }
 0x853   :  { %5392 = vmatmul.mubr.f32.gmra.mrb[50].mxu0 %v5391_v44  ;;  %10156 = vmatprep.subr.bf16.mxu0 %v16855_v53  ;;  %v5435_v44 = vsub.f32 %v15093_v15, %v16760_v25  ;;  %v17659_v25 = vld [vmem:[#allocation17_spill] sm:$0xff] }
 0x854   :  { %9402 = vmatmul.mubr.f32.gmra.mrb[78].mxu1 %v17640_v38  ;;  %5401 = vmatprep.mubr.f32.mxu0 %v5400_v31  ;;  %v17643_v31 = vld [vmem:[#allocation4_spill] sm:$0xff]  ;;  %v17727_v42 = vld [vmem:[#allocation165_spill] sm:$0xff] }
 0x855   :  { %10395 = vmatpush3.bf16.msra.mxu1 %v10392_v33  ;;  %9404 = vmatprep.mubr.f32.mxu1 %v17641_v5  ;;  %v5436_v33 = vand.u32 4294901760, %v5435_v44  ;;  %v17652_v44 = vld [vmem:[#allocation34_spill] sm:$0xff] }
 0x856   :  { %10397 = vmatprep.subr.bf16.mxu1 %v10396_v16 }
 0x857   :  { %5407 = vmatmul.mubr.f32.gmra.mrb[52].mxu0 %v5406_v46  ;;  %v10404_v46 = vpack.c.bf16 %v14657_v52, %v14670_v22  ;;  %v17654_v22 = vld [vmem:[#allocation104_spill] sm:$0xff] }
 0x858   :  { %9405 = vmatmul.mubr.f32.gmra.mrb[80].mxu1 %v17642_v24  ;;  %5416 = vmatprep.mubr.f32.mxu0 %v5415_v8  ;;  %v17649_v8 = vld [vmem:[#allocation137_spill] sm:$0xff] }
 0x859   :  { %10399 = vmatpush3.bf16.msra.mxu1 %v10396_v16  ;;  %9407 = vmatprep.mubr.f32.mxu1 %v17643_v31  ;;  %v17648_v16 = vld [vmem:[#allocation95_spill] sm:$0xff] }
 0x85a   :  { %10401 = vmatprep.subr.bf16.mxu1 %v10400_v12 }
 0x85b   :  { %5422 = vmatmul.mubr.f32.gmra.mrb[54].mxu0 %v5421_v59  ;;  %v17651_v59 = vld [vmem:[#allocation8_spill] sm:$0xff] }
 0x85c   :  { %9408 = vmatmul.mubr.f32.gmra.mrb[82].mxu1 %v17644_v51  ;;  %5431 = vmatprep.mubr.f32.mxu0 %v5430_v19  ;;  %v17653_v52 = vpack.c.bf16 %v17651_v59, %v17652_v44  ;;  %v17656_v19 = vld [vmem:[#allocation146_spill] sm:$0xff]  ;;  %v17663_v59 = vld [vmem:[#allocation97_spill] sm:$0xff] }
 0x85d   :  { %10403 = vmatpush3.bf16.msra.mxu1 %v10400_v12  ;;  %9410 = vmatprep.mubr.f32.mxu1 %v17645_v27  ;;  %v17655_v12 = vld [vmem:[#allocation87_spill] sm:$0xff]  ;;  %v17664_v44 = vld [vmem:[#allocation22_spill] sm:$0xff] }
 0x85e   :  { %10405 = vmatprep.subr.bf16.mxu1 %v10404_v46 }
 0x85f   :  { %5437 = vmatmul.mubr.f32.gmra.mrb[56].mxu0 %v5436_v33  ;;  %v17657_v33 = vld [vmem:[#allocation91_spill] sm:$0xff] }
 0x860   :  { %9411 = vmatmul.mubr.f32.gmra.mrb[84].mxu1 %v17646_v58  ;;  %5667 = vmatprep.mubr.f32.mxu0 %v17647_v60  ;;  %v17721_v60 = vld [vmem:[#allocation150_spill] sm:$0xff] }
 0x861   :  { %10407 = vmatpush3.bf16.msra.mxu1 %v10404_v46  ;;  %9413 = vmatprep.mubr.f32.mxu1 %v17648_v16  ;;  %v17658_v46 = vld [vmem:[#allocation6_spill] sm:$0xff] }
 0x862   :  { %10409 = vmatprep.subr.bf16.mxu1 %v17649_v8  ;;  %v17660_v21 = vpack.c.bf16 %v17658_v46, %v17659_v25  ;;  %v17669_v25 = vld [vmem:[#allocation32_spill] sm:$0xff]  ;;  %v17670_v46 = vld [vmem:[#allocation39_spill] sm:$0xff] }
 0x863   :  { %5669 = vmatmul.mubr.f32.vlgmr.msra.gmra.mrb[18].mxu0 %v17650_v47 }
 0x864   :  { %10158 = vmatpush1.bf16.msra.mxu0 %v17653_v52  ;;  %9414 = vmatmul.mubr.f32.gmra.mrb[86].mxu1 %v17654_v22  ;;  %v17665_v52 = vld [vmem:[#allocation25_spill] sm:$0xff] }
 0x865   :  { %5674 = vmatprep.mubr.f32.mxu0 %v17655_v12  ;;  %10159 = vmatprep.subr.bf16.mxu0 %v16855_v53  ;;  %v17666_v61 = vpack.c.bf16 %v17664_v44, %v17665_v52  ;;  %v17674_v44 = vld [vmem:[#allocation51_spill] sm:$0xff]  ;;  %v17675_v52 = vld [vmem:[#allocation54_spill] sm:$0xff]  ;;  %v17683_v12 = vld [vmem:[#allocation121_spill] sm:$0xff] }
 0x866   :  { %9416 = vmatprep.mubr.f32.mxu1 %v17656_v19 }
 0x867   :  { %5676 = vmatmul.mubr.f32.gmra.mrb[20].mxu0 %v17657_v33 }
 0x868   :  { %10161 = vmatpush1.bf16.msra.mxu0 %v17660_v21  ;;  %9417 = vmatmul.mubr.f32.gmra.mrb[88].mxu1 %v17661_v18  ;;  %v17668_v21 = vld [vmem:[#allocation109_spill] sm:$0xff] }
 0x869   :  { %5681 = vmatprep.mubr.f32.mxu0 %v17662_v6  ;;  %10162 = vmatprep.subr.bf16.mxu0 %v16855_v53  ;;  %v17671_v6 = vpack.c.bf16 %v17669_v25, %v17670_v46  ;;  %v17679_v25 = vld [vmem:[#allocation117_spill] sm:$0xff]  ;;  %v17680_v46 = vld [vmem:[#allocation59_spill] sm:$0xff] }
 0x86a   :  { %9419 = vmatprep.mubr.f32.mxu1 %v14666_v48 }
 0x86b   :  { %5683 = vmatmul.mubr.f32.gmra.mrb[22].mxu0 %v17663_v59  ;;  %v17672_v59 = vld [vmem:[#allocation111_spill] sm:$0xff] }
 0x86c   :  { %10164 = vmatpush1.bf16.msra.mxu0 %v17666_v61  ;;  %9420 = vmatmul.mubr.f32.gmra.mrb[90].mxu1 %v14676_v2  ;;  %v17673_v61 = vld [vmem:[#allocation114_spill] sm:$0xff] }
 0x86d   :  { %5688 = vmatprep.mubr.f32.mxu0 %v17667_v13  ;;  %10165 = vmatprep.subr.bf16.mxu0 %v16855_v53  ;;  %v17676_v13 = vpack.c.bf16 %v17674_v44, %v17675_v52  ;;  %v17684_v44 = vld [vmem:[#allocation43_spill] sm:$0xff]  ;;  %v17686_v52 = vld [vmem:[#allocation45_spill] sm:$0xff] }
 0x86e   :  { %9422 = vmatprep.mubr.f32.mxu1 %v14800_v34 }
 0x86f   :  { %5690 = vmatmul.mubr.f32.gmra.mrb[24].mxu0 %v17668_v21  ;;  %v17677_v21 = vld [vmem:[#allocation116_spill] sm:$0xff] }
 0x870   :  { %10167 = vmatpush1.bf16.msra.mxu0 %v17671_v6  ;;  %9423 = vmatmul.mubr.f32.gmra.mrb[92].mxu1 %v14838_v28  ;;  %v17678_v6 = vld [vmem:[#allocation83_spill] sm:$0xff] }
 0x871   :  { %5695 = vmatprep.mubr.f32.mxu0 %v17672_v59  ;;  %10168 = vmatprep.subr.bf16.mxu0 %v16855_v53  ;;  %v17681_v59 = vld [vmem:[#allocation61_spill] sm:$0xff] }
 0x872   :  { %9425 = vmatprep.mubr.f32.mxu1 %v14854_v9  ;;  %v17682_v33 = vpack.c.bf16 %v17680_v46, %v17681_v59  ;;  %v17691_v59 = vld [vmem:[#allocation133_spill] sm:$0xff]  ;;  %v17693_v46 = vld [vmem:[#allocation148_spill] sm:$0xff] }
 0x873   :  { %5697 = vmatmul.mubr.f32.gmra.mrb[26].mxu0 %v17673_v61  ;;  %v17688_v61 = vld [vmem:[#allocation67_spill] sm:$0xff] }
 0x874   :  { %10170 = vmatpush1.bf16.msra.mxu0 %v17676_v13  ;;  %9426 = vmatmul.mubr.f32.gmra.mrb[94].mxu1 %v14900_v54  ;;  %v17685_v13 = vld [vmem:[#allocation143_spill] sm:$0xff] }
 0x875   :  { %5702 = vmatprep.mubr.f32.mxu0 %v17677_v21  ;;  %10171 = vmatprep.subr.bf16.mxu0 %v16855_v53  ;;  %v17687_v21 = vld [vmem:[#allocation131_spill] sm:$0xff] }
 0x876   :  { %9448 = vmatprep.mubr.f32.mxu1 %v17678_v6 }
 0x877   :  { %5704 = vmatmul.mubr.f32.gmra.mrb[28].mxu0 %v17679_v25  ;;  %v17689_v25 = vld [vmem:[#allocation69_spill] sm:$0xff] }
 0x878   :  { %10173 = vmatpush1.bf16.msra.mxu0 %v17682_v33  ;;  %9449 = vmatmul.mubr.f32.vlgmr.msra.gmra.mrb[96].mxu1 %v17683_v12  ;;  %v17690_v47 = vpack.c.bf16 %v17688_v61, %v17689_v25  ;;  %v17692_v33 = vld [vmem:[#allocation127_spill] sm:$0xff]  ;;  %v17697_v61 = vld [vmem:[#allocation16_spill] sm:$0xff]  ;;  %v17699_v25 = vld [vmem:[#allocation153_spill] sm:$0xff] }
 0x879   :  { %10411 = vmatpush3.bf16.msra.mxu1 %v17649_v8  ;;  %5709 = vmatprep.mubr.f32.mxu0 %v17684_v44  ;;  %v17694_v8 = vld [vmem:[#allocation135_spill] sm:$0xff] }
 0x87a   :  { %10413 = vmatprep.subr.bf16.mxu1 %v17685_v13  ;;  %10174 = vmatprep.subr.bf16.mxu0 %v16855_v53  ;;  %v17695_v44 = vld [vmem:[#allocation15_spill] sm:$0xff] }
 0x87b   :  { %5711 = vmatmul.mubr.f32.gmra.mrb[30].mxu0 %v17686_v52  ;;  %9451 = vmatprep.mubr.f32.mxu1 %v17687_v21  ;;  %v17696_v52 = vpack.c.bf16 %v14174_v1, %v14185_v37  ;;  %v17703_v1 = vld [vmem:[#allocation41_spill] sm:$0xff]  ;;  %v17704_v37 = vld [vmem:[#allocation30_spill] sm:$0xff] }
 0x87c   :  { %10176 = vmatpush1.bf16.msra.mxu0 %v17690_v47  ;;  %9452 = vmatmul.mubr.f32.gmra.mrb[98].mxu1 %v17691_v59  ;;  %v17698_v47 = vld [vmem:[#allocation14_spill] sm:$0xff] }
 0x87d   :  { %10415 = vmatpush3.bf16.msra.mxu1 %v17685_v13  ;;  %5716 = vmatprep.mubr.f32.mxu0 %v17692_v33  ;;  %v17700_v13 = vld [vmem:[#allocation3_spill] sm:$0xff]  ;;  %v17701_v33 = vld [vmem:[#allocation33_spill] sm:$0xff] }
 0x87e   :  { %10417 = vmatprep.subr.bf16.mxu1 %v17693_v46  ;;  %10177 = vmatprep.subr.bf16.mxu0 %v16855_v53 }
 0x87f   :  { %5718 = vmatmul.mubr.f32.gmra.mrb[32].mxu0 %v17694_v8  ;;  %9454 = vmatprep.mubr.f32.mxu1 %v17695_v44  ;;  %v17702_v8 = vpack.c.bf16 %v14206_v11, %v14215_v10  ;;  %v17709_v11 = vld [vmem:[#allocation86_spill] sm:$0xff] }
 0x880   :  { %10179 = vmatpush1.bf16.msra.mxu0 %v17696_v52  ;;  %9455 = vmatmul.mubr.f32.gmra.mrb[100].mxu1 %v17697_v61  ;;  %v17705_v52 = vld [vmem:[#allocation157_spill] sm:$0xff]  ;;  %v17710_v10 = vld [vmem:[#allocation78_spill] sm:$0xff] }
 0x881   :  { %10419 = vmatpush3.bf16.msra.mxu1 %v17693_v46  ;;  %5723 = vmatprep.mubr.f32.mxu0 %v17698_v47  ;;  %v17706_v46 = vld [vmem:[#allocation9_spill] sm:$0xff]  ;;  %v17707_v47 = vld [vmem:[#allocation80_spill] sm:$0xff] }
 0x882   :  { %10421 = vmatprep.subr.bf16.mxu1 %v17699_v25  ;;  %10180 = vmatprep.subr.bf16.mxu0 %v16855_v53 }
 0x883   :  { %5725 = vmatmul.mubr.f32.gmra.mrb[34].mxu0 %v17700_v13  ;;  %9457 = vmatprep.mubr.f32.mxu1 %v17701_v33  ;;  %v17708_v13 = vpack.c.bf16 %v14245_v14, %v14253_v50  ;;  %v17715_v14 = vld [vmem:[#allocation120_spill] sm:$0xff]  ;;  %v17716_v50 = vld [vmem:[#allocation106_spill] sm:$0xff] }
 0x884   :  { %10182 = vmatpush1.bf16.msra.mxu0 %v17702_v8  ;;  %9458 = vmatmul.mubr.f32.gmra.mrb[102].mxu1 %v17703_v1  ;;  %v17711_v8 = vld [vmem:[#allocation145_spill] sm:$0xff] }
 0x885   :  { %10423 = vmatpush3.bf16.msra.mxu1 %v17699_v25  ;;  %5730 = vmatprep.mubr.f32.mxu0 %v17704_v37  ;;  %v17712_v25 = vld [vmem:[#allocation88_spill] sm:$0xff] }
 0x886   :  { %10425 = vmatprep.subr.bf16.mxu1 %v17705_v52  ;;  %10183 = vmatprep.subr.bf16.mxu0 %v16855_v53  ;;  %v17713_v37 = vld [vmem:[#allocation112_spill] sm:$0xff] }
 0x887   :  { %5732 = vmatmul.mubr.f32.gmra.mrb[36].mxu0 %v17706_v46  ;;  %9460 = vmatprep.mubr.f32.mxu1 %v17707_v47  ;;  %v17714_v46 = vpack.c.bf16 %v14275_v30, %v14289_v55  ;;  %v17722_v30 = vld [vmem:[#allocation162_spill] sm:$0xff]  ;;  %v17723_v55 = vld [vmem:[#allocation152_spill] sm:$0xff] }
 0x888   :  { %10185 = vmatpush1.bf16.msra.mxu0 %v17708_v13  ;;  %9461 = vmatmul.mubr.f32.gmra.mrb[104].mxu1 %v17709_v11  ;;  %v17717_v13 = vld [vmem:[#allocation115_spill] sm:$0xff] }
 0x889   :  { %10427 = vmatpush3.bf16.msra.mxu1 %v17705_v52  ;;  %5737 = vmatprep.mubr.f32.mxu0 %v17710_v10  ;;  %v17718_v52 = vld [vmem:[#allocation64_spill] sm:$0xff] }
 0x88a   :  { %10429 = vmatprep.subr.bf16.mxu1 %v17711_v8  ;;  %10186 = vmatprep.subr.bf16.mxu0 %v16855_v53  ;;  %v17719_v10 = vpack.c.bf16 %v17561_v56, %v17718_v52  ;;  %v17729_v56 = vld [vmem:[#allocation42_spill] sm:$0xff]  ;;  %v17730_v52 = vld [vmem:[#allocation163_spill] sm:$0xff] }
 0x88b   :  { %5739 = vmatmul.mubr.f32.gmra.mrb[38].mxu0 %v17712_v25  ;;  %9463 = vmatprep.mubr.f32.mxu1 %v17713_v37  ;;  %v17720_v25 = vld [vmem:[#allocation151_spill] sm:$0xff] }
 0x88c   :  { %10188 = vmatpush1.bf16.msra.mxu0 %v17714_v46  ;;  %9464 = vmatmul.mubr.f32.gmra.mrb[106].mxu1 %v17715_v14  ;;  %v17724_v46 = vld [vmem:[#allocation70_spill] sm:$0xff] }
 0x88d   :  { %5744 = vmatprep.mubr.f32.mxu0 %v17716_v50  ;;  %10189 = vmatprep.subr.bf16.mxu0 %v16855_v53  ;;  %v17725_v50 = vld [vmem:[#allocation75_spill] sm:$0xff] }
 0x88e   :  { %9466 = vmatprep.mubr.f32.mxu1 %v14625_v20  ;;  %v17726_v15 = vpack.c.bf16 %v17724_v46, %v17725_v50  ;;  %v17737_v50 = vld [vmem:[#allocation28_spill] sm:$0xff]  ;;  %v17738_v46 = vpack.c.bf16 %v17610_v40, %v17612_v41  ;;  %v17744_v40 = vld [vmem:[#allocation142_spill] sm:$0xff]  ;;  %v17745_v41 = vld [vmem:[#allocation149_spill] sm:$0xff] }
 0x88f   :  { %5746 = vmatmul.mubr.f32.gmra.mrb[40].mxu0 %v17717_v13  ;;  %v17728_v13 = vld [vmem:[#allocation161_spill] sm:$0xff] }
 0x890   :  { %10191 = vmatpush1.bf16.msra.mxu0 %v17719_v10  ;;  %9467 = vmatmul.mubr.f32.gmra.mrb[108].mxu1 %v17720_v25  ;;  %v17731_v10 = vld [vmem:[#allocation84_spill] sm:$0xff] }
 0x891   :  { %5751 = vmatprep.mubr.f32.mxu0 %v17721_v60  ;;  %10192 = vmatprep.subr.bf16.mxu0 %v16855_v53  ;;  %v17732_v60 = vld [vmem:[#allocation92_spill] sm:$0xff] }
 0x892   :  { %9469 = vmatprep.mubr.f32.mxu1 %v17722_v30  ;;  %v17733_v32 = vpack.c.bf16 %v17731_v10, %v17732_v60  ;;  %v17741_v60 = vld [vmem:[#allocation170_spill] sm:$0xff]  ;;  %v17742_v10 = vpack.c.bf16 %v17623_v3, %v17625_v0  ;;  %v17748_v0 = vand.u32 4294901760, %v17691_v59  ;;  %v17749_v3 = vand.u32 4294901760, %v17695_v44  ;;  %v17753_v59 = vld [vmem:[#allocation160_spill] sm:$0xff] }
 0x893   :  { %5753 = vmatmul.mubr.f32.gmra.mrb[42].mxu0 %v17723_v55  ;;  %v17735_v55 = vld [vmem:[#allocation53_spill] sm:$0xff]  ;;  %v17754_v44 = vand.u32 4294901760, %v17703_v1 }
 0x894   :  { %10194 = vmatpush1.bf16.msra.mxu0 %v17726_v15  ;;  %9470 = vmatmul.mubr.f32.gmra.mrb[110].mxu1 %v17727_v42  ;;  %v17736_v15 = vld [vmem:[#allocation138_spill] sm:$0xff]  ;;  %v17760_v1 = vld [vmem:[#allocation89_spill] sm:$0xff] }
 0x895   :  { %5758 = vmatprep.mubr.f32.mxu0 %v17728_v13  ;;  %10195 = vmatprep.subr.bf16.mxu0 %v16855_v53 }
 0x896   :  { %9472 = vmatprep.mubr.f32.mxu1 %v17729_v56 }
 0x897   :  { %5760 = vmatmul.mubr.f32.gmra.mrb[44].mxu0 %v17730_v52  ;;  %v17739_v52 = vld [vmem:[#allocation169_spill] sm:$0xff] }
 0x898   :  { %10197 = vmatpush1.bf16.msra.mxu0 %v17733_v32  ;;  %9473 = vmatmul.mubr.f32.gmra.mrb[112].mxu1 %v17734_v43  ;;  %v17740_v32 = vand.u32 4294901760, %v17678_v6  ;;  %v17746_v6 = vand.u32 4294901760, %v17687_v21  ;;  %v17752_v21 = vand.u32 4294901760, %v17701_v33  ;;  %v17757_v33 = vld [vmem:[#allocation79_spill] sm:$0xff] }
 0x899   :  { %5765 = vmatprep.mubr.f32.mxu0 %v17735_v55  ;;  %10198 = vmatprep.subr.bf16.mxu0 %v16855_v53 }
 0x89a   :  { %9475 = vmatprep.mubr.f32.mxu1 %v17736_v15 }
 0x89b   :  { %5767 = vmatmul.mubr.f32.gmra.mrb[46].mxu0 %v17737_v50  ;;  %v17743_v50 = vand.u32 4294901760, %v17683_v12  ;;  %v17750_v12 = vld [vmem:[#allocation154_spill] sm:$0xff] }
 0x89c   :  { %10200 = vmatpush1.bf16.msra.mxu0 %v17738_v46  ;;  %9476 = vmatmul.mubr.f32.gmra.mrb[114].mxu1 %v14940_v23  ;;  %v17747_v46 = vld [vmem:[#allocation171_spill] sm:$0xff] }
 0x89d   :  { %5772 = vmatprep.mubr.f32.mxu0 %v17739_v52  ;;  %10201 = vmatprep.subr.bf16.mxu0 %v16855_v53  ;;  %v17825_v52 = vld [vmem:[#allocation29_spill] sm:$0xff] }
 0x89e   :  { %9498 = vmatprep.mubr.f32.mxu1 %v17740_v32  ;;  %v17758_v32 = vand.u32 4294901760, %v17709_v11  ;;  %v17765_v11 = vld [vmem:[#allocation99_spill] sm:$0xff] }
 0x89f   :  { %5774 = vmatmul.mubr.f32.gmra.mrb[48].mxu0 %v17741_v60  ;;  %v17824_v60 = vand.u32 4294901760, %v17765_v11 }
 0x8a0   :  { %10203 = vmatpush1.bf16.msra.mxu0 %v17742_v10  ;;  %9499 = vmatmul.mubr.f32.vlgmr.msra.gmra.mrb[116].mxu1 %v17743_v50  ;;  %v17755_v50 = vand.u32 4294901760, %v17707_v47  ;;  %v17759_v10 = vand.u32 4294901760, %v17713_v37  ;;  %v17762_v47 = vld [vmem:[#allocation96_spill] sm:$0xff]  ;;  %v17767_v37 = vld [vmem:[#allocation101_spill] sm:$0xff] }
 0x8a1   :  { %10431 = vmatpush3.bf16.msra.mxu1 %v17711_v8  ;;  %5779 = vmatprep.mubr.f32.mxu0 %v17744_v40  ;;  %v17751_v8 = vand.u32 4294901760, %v17697_v61  ;;  %v17756_v61 = vld [vmem:[#allocation164_spill] sm:$0xff]  ;;  %v17822_v40 = vld [vmem:[#allocation19_spill] sm:$0xff] }
 0x8a2   :  { %10433 = vmatprep.subr.bf16.mxu1 %v17745_v41  ;;  %10204 = vmatprep.subr.bf16.mxu0 %v16855_v53 }
 0x8a3   :  { %5781 = vmatmul.mubr.f32.gmra.mrb[50].mxu0 %v14977_v4  ;;  %9501 = vmatprep.mubr.f32.mxu1 %v17746_v6  ;;  %v17763_v6 = vand.u32 4294901760, %v17715_v14  ;;  %v17771_v14 = vld [vmem:[#allocation26_spill] sm:$0xff]  ;;  %v17821_v4 = vand.u32 4294901760, %v17760_v1 }
 0x8a4   :  { %5786 = vmatprep.mubr.f32.mxu0 %v17747_v46  ;;  %9502 = vmatmul.mubr.f32.gmra.mrb[118].mxu1 %v17748_v0  ;;  %v17764_v0 = vand.u32 4294901760, %v14625_v20  ;;  %v17772_v20 = vld [vmem:[#allocation129_spill] sm:$0xff]  ;;  %v17820_v46 = vand.u32 4294901760, %v17757_v33 }
 0x8a5   :  { %10435 = vmatpush3.bf16.msra.mxu1 %v17745_v41  ;;  %9504 = vmatprep.mubr.f32.mxu1 %v17749_v3  ;;  %v17761_v41 = vld [vmem:[#allocation36_spill] sm:$0xff]  ;;  %v17766_v3 = vld [vmem:[#allocation18_spill] sm:$0xff] }
 0x8a6   :  { %10437 = vmatprep.subr.bf16.mxu1 %v17750_v12 }
 0x8a7   :  { %5788 = vmatmul.mubr.f32.gmra.mrb[52].mxu0 %v15017_v7  ;;  %v17818_v7 = vld [vmem:[#allocation175_spill] sm:$0xff] }
 0x8a8   :  { %5793 = vmatprep.mubr.f32.mxu0 %v15030_v17  ;;  %9505 = vmatmul.mubr.f32.gmra.mrb[120].mxu1 %v17751_v8  ;;  %v17769_v8 = vand.u32 4294901760, %v17722_v30  ;;  %v17777_v30 = vld [vmem:[#allocation44_spill] sm:$0xff]  ;;  %v17813_v17 = vld [vmem:[#allocation139_spill] sm:$0xff] }
 0x8a9   :  { %10439 = vmatpush3.bf16.msra.mxu1 %v17750_v12  ;;  %9507 = vmatprep.mubr.f32.mxu1 %v17752_v21  ;;  %v17768_v12 = vand.u32 4294901760, %v17720_v25  ;;  %v17770_v21 = vld [vmem:[#allocation103_spill] sm:$0xff]  ;;  %v17776_v25 = vld [vmem:[#allocation40_spill] sm:$0xff] }
 0x8aa   :  { %10441 = vmatprep.subr.bf16.mxu1 %v17753_v59 }
 0x8ab   :  { %5795 = vmatmul.mubr.f32.gmra.mrb[54].mxu0 %v15055_v45  ;;  %v17810_v45 = vld [vmem:[#allocation68_spill] sm:$0xff] }
 0x8ac   :  { %5800 = vmatprep.mubr.f32.mxu0 %v15061_v49  ;;  %9508 = vmatmul.mubr.f32.gmra.mrb[122].mxu1 %v17754_v44  ;;  %v17774_v44 = vand.u32 4294901760, %v17729_v56  ;;  %v17782_v56 = vld [vmem:[#allocation47_spill] sm:$0xff]  ;;  %v17807_v49 = vld [vmem:[#allocation166_spill] sm:$0xff] }
 0x8ad   :  { %10443 = vmatpush3.bf16.msra.mxu1 %v17753_v59  ;;  %9510 = vmatprep.mubr.f32.mxu1 %v17755_v50  ;;  %v17773_v59 = vand.u32 4294901760, %v17727_v42  ;;  %v17775_v50 = vld [vmem:[#allocation11_spill] sm:$0xff] }
 0x8ae   :  { %10445 = vmatprep.subr.bf16.mxu1 %v17756_v61  ;;  %v17781_v42 = vld [vmem:[#allocation55_spill] sm:$0xff] }
 0x8af   :  { %5802 = vmatmul.mubr.f32.gmra.mrb[56].mxu0 %v15077_v62  ;;  %v17804_v62 = vld [vmem:[#allocation155_spill] sm:$0xff] }
 0x8b0   :  { %5937 = vmatprep.mubr.f32.mxu0 %v17757_v33  ;;  %9511 = vmatmul.mubr.f32.gmra.mrb[124].mxu1 %v17758_v32  ;;  %v17779_v32 = vand.u32 4294901760, %v17736_v15  ;;  %v17787_v15 = vld [vmem:[#allocation125_spill] sm:$0xff] }
 0x8b1   :  { %10447 = vmatpush3.bf16.msra.mxu1 %v17756_v61  ;;  %9513 = vmatprep.mubr.f32.mxu1 %v17759_v10  ;;  %v17778_v61 = vand.u32 4294901760, %v17734_v43  ;;  %v17780_v10 = vld [vmem:[#allocation46_spill] sm:$0xff]  ;;  %v17785_v43 = vld [vmem:[#allocation63_spill] sm:$0xff]  ;;  %v17834_v33 = vld [vmem:[#allocation65_spill] sm:$0xff] }
 0x8b3   :  { %5940 = vmatmul.mubr.f32.vlgmr.msra.gmra.mrb[18].mxu0 %v17760_v1  ;;  %v17835_v1 = vand.u32 4294901760, %v17782_v56 }
 0x8b4   :  { %10206 = vmatpush1.bf16.msra.mxu0 %v17761_v41  ;;  %5946 = vmatprep.mubr.f32.mxu0 %v17762_v47 }
 0x8b5   :  { %10207 = vmatprep.subr.bf16.mxu0 %v16855_v53  ;;  %9514 = vmatmul.mubr.f32.gmra.mrb[126].mxu1 %v17763_v6  ;;  %v17783_v6 = vand.u32 4294901760, %v14940_v23  ;;  %v17789_v23 = vld [vmem:[#allocation136_spill] sm:$0xff] }
 0x8b6   :  { %9516 = vmatprep.mubr.f32.mxu1 %v17764_v0  ;;  %v17784_v0 = vld [vmem:[#allocation48_spill] sm:$0xff] }
 0x8b7   :  { %5949 = vmatmul.mubr.f32.gmra.mrb[20].mxu0 %v17765_v11  ;;  %v17837_v11 = vld [vmem:[#allocation74_spill] sm:$0xff] }
 0x8b8   :  { %10209 = vmatpush1.bf16.msra.mxu0 %v17766_v3  ;;  %5955 = vmatprep.mubr.f32.mxu0 %v17767_v37 }
 0x8b9   :  { %10210 = vmatprep.subr.bf16.mxu0 %v16855_v53  ;;  %9517 = vmatmul.mubr.f32.gmra.mrb[128].mxu1 %v17768_v12  ;;  %v17786_v12 = vld [vmem:[#allocation123_spill] sm:$0xff] }
 0x8ba   :  { %9519 = vmatprep.mubr.f32.mxu1 %v17769_v8  ;;  %v17788_v8 = vld [vmem:[#allocation71_spill] sm:$0xff] }
 0x8bb   :  { %5958 = vmatmul.mubr.f32.gmra.mrb[22].mxu0 %v17770_v21 }
 0x8bc   :  { %10212 = vmatpush1.bf16.msra.mxu0 %v17771_v14  ;;  %5964 = vmatprep.mubr.f32.mxu0 %v17772_v20 }
 0x8bd   :  { %10213 = vmatprep.subr.bf16.mxu0 %v16855_v53  ;;  %9520 = vmatmul.mubr.f32.gmra.mrb[130].mxu1 %v17773_v59  ;;  %v17790_v59 = vld [vmem:[#allocation5_spill] sm:$0xff] }
 0x8be   :  { %9522 = vmatprep.mubr.f32.mxu1 %v17774_v44  ;;  %v17791_v44 = vld [vmem:[#allocation23_spill] sm:$0xff] }
 0x8bf   :  { %5967 = vmatmul.mubr.f32.gmra.mrb[24].mxu0 %v17775_v50 }
 0x8c0   :  { %10215 = vmatpush1.bf16.msra.mxu0 %v17776_v25  ;;  %5973 = vmatprep.mubr.f32.mxu0 %v17777_v30 }
 0x8c1   :  { %10216 = vmatprep.subr.bf16.mxu0 %v16855_v53  ;;  %9523 = vmatmul.mubr.f32.gmra.mrb[132].mxu1 %v17778_v61  ;;  %v17792_v61 = vld [vmem:[#allocation21_spill] sm:$0xff] }
 0x8c2   :  { %9525 = vmatprep.mubr.f32.mxu1 %v17779_v32  ;;  %v17793_v32 = vld [vmem:[#allocation27_spill] sm:$0xff] }
 0x8c3   :  { %5976 = vmatmul.mubr.f32.gmra.mrb[26].mxu0 %v17780_v10 }
 0x8c4   :  { %10218 = vmatpush1.bf16.msra.mxu0 %v17781_v42  ;;  %5982 = vmatprep.mubr.f32.mxu0 %v17782_v56  ;;  %v17844_v56 = vand.u32 4294901760, %v17792_v61 }
 0x8c5   :  { %10219 = vmatprep.subr.bf16.mxu0 %v16855_v53  ;;  %9526 = vmatmul.mubr.f32.gmra.mrb[134].mxu1 %v17783_v6  ;;  %v17794_v6 = vld [vmem:[#allocation37_spill] sm:$0xff] }
 0x8c6   :  { %9548 = vmatprep.mubr.f32.mxu1 %v17636_v57  ;;  %v17801_v57 = vld [vmem:[#allocation126_spill] sm:$0xff] }
 0x8c7   :  { %5985 = vmatmul.mubr.f32.gmra.mrb[28].mxu0 %v17784_v0 }
 0x8c8   :  { %10221 = vmatpush1.bf16.msra.mxu0 %v17785_v43  ;;  %5991 = vmatprep.mubr.f32.mxu0 %v17786_v12 }
 0x8c9   :  { %10222 = vmatprep.subr.bf16.mxu0 %v16855_v53  ;;  %9549 = vmatmul.mubr.f32.vlgmr.msra.gmra.mrb[136].mxu1 %v17638_v35  ;;  %v17798_v35 = vld [vmem:[#allocation93_spill] sm:$0xff] }
 0x8ca   :  { %9551 = vmatprep.mubr.f32.mxu1 %v17639_v39  ;;  %v17795_v39 = vld [vmem:[#allocation10_spill] sm:$0xff] }
 0x8cb   :  { %5994 = vmatmul.mubr.f32.gmra.mrb[30].mxu0 %v17787_v15 }
 0x8cc   :  { %10224 = vmatpush1.bf16.msra.mxu0 %v17788_v8  ;;  %6000 = vmatprep.mubr.f32.mxu0 %v17789_v23 }
 0x8cd   :  { %10225 = vmatprep.subr.bf16.mxu0 %v16855_v53  ;;  %9552 = vmatmul.mubr.f32.gmra.mrb[138].mxu1 %v17640_v38  ;;  %v17797_v38 = vld [vmem:[#allocation20_spill] sm:$0xff] }
 0x8ce   :  { %9554 = vmatprep.mubr.f32.mxu1 %v17641_v5  ;;  %v17796_v5 = vld [vmem:[#allocation50_spill] sm:$0xff] }
 0x8cf   :  { %6003 = vmatmul.mubr.f32.gmra.mrb[32].mxu0 %v17790_v59 }
 0x8d0   :  { %10227 = vmatpush1.bf16.msra.mxu0 %v17791_v44  ;;  %6009 = vmatprep.mubr.f32.mxu0 %v17792_v61  ;;  %v17850_v61 = vand.u32 4294901760, %v17798_v35 }
 0x8d1   :  { %10228 = vmatprep.subr.bf16.mxu0 %v16855_v53  ;;  %9555 = vmatmul.mubr.f32.gmra.mrb[140].mxu1 %v17642_v24  ;;  %v17800_v24 = vld [vmem:[#allocation56_spill] sm:$0xff] }
 0x8d2   :  { %9557 = vmatprep.mubr.f32.mxu1 %v17643_v31  ;;  %v17799_v31 = vld [vmem:[#allocation102_spill] sm:$0xff] }
 0x8d3   :  { %6012 = vmatmul.mubr.f32.gmra.mrb[34].mxu0 %v17793_v32 }
 0x8d4   :  { %10230 = vmatpush1.bf16.msra.mxu0 %v17794_v6  ;;  %6018 = vmatprep.mubr.f32.mxu0 %v17795_v39 }
 0x8d5   :  { %10231 = vmatprep.subr.bf16.mxu0 %v16855_v53  ;;  %9558 = vmatmul.mubr.f32.gmra.mrb[142].mxu1 %v17644_v51  ;;  %v17803_v51 = vld [vmem:[#allocation31_spill] sm:$0xff] }
 0x8d6   :  { %9560 = vmatprep.mubr.f32.mxu1 %v17645_v27  ;;  %v17802_v27 = vld [vmem:[#allocation134_spill] sm:$0xff] }
 0x8d7   :  { %6021 = vmatmul.mubr.f32.gmra.mrb[36].mxu0 %v17796_v5 }
 0x8d8   :  { %10233 = vmatpush1.bf16.msra.mxu0 %v17797_v38  ;;  %6027 = vmatprep.mubr.f32.mxu0 %v17798_v35  ;;  %v17856_v35 = vand.u32 4294901760, %v17804_v62 }
 0x8d9   :  { %10234 = vmatprep.subr.bf16.mxu0 %v16855_v53  ;;  %9561 = vmatmul.mubr.f32.gmra.mrb[144].mxu1 %v17646_v58  ;;  %v17806_v58 = vld [vmem:[#allocation73_spill] sm:$0xff] }
 0x8da   :  { %9563 = vmatprep.mubr.f32.mxu1 %v17648_v16  ;;  %v17805_v16 = vld [vmem:[#allocation158_spill] sm:$0xff] }
 0x8db   :  { %6030 = vmatmul.mubr.f32.gmra.mrb[38].mxu0 %v17799_v31 }
 0x8dc   :  { %10236 = vmatpush1.bf16.msra.mxu0 %v17800_v24  ;;  %6036 = vmatprep.mubr.f32.mxu0 %v17801_v57 }
 0x8dd   :  { %10237 = vmatprep.subr.bf16.mxu0 %v16855_v53  ;;  %9564 = vmatmul.mubr.f32.gmra.mrb[146].mxu1 %v17654_v22  ;;  %v17809_v22 = vld [vmem:[#allocation90_spill] sm:$0xff] }
 0x8de   :  { %9566 = vmatprep.mubr.f32.mxu1 %v17656_v19  ;;  %v17808_v19 = vld [vmem:[#allocation167_spill] sm:$0xff] }
 0x8df   :  { %6039 = vmatmul.mubr.f32.gmra.mrb[40].mxu0 %v17802_v27 }
 0x8e0   :  { %10239 = vmatpush1.bf16.msra.mxu0 %v17803_v51  ;;  %6045 = vmatprep.mubr.f32.mxu0 %v17804_v62  ;;  %v17862_v62 = vand.u32 4294901760, %v17810_v45 }
 0x8e1   :  { %10240 = vmatprep.subr.bf16.mxu0 %v16855_v53  ;;  %9567 = vmatmul.mubr.f32.gmra.mrb[148].mxu1 %v17661_v18  ;;  %v17812_v18 = vld [vmem:[#allocation108_spill] sm:$0xff] }
 0x8e2   :  { %9569 = vmatprep.mubr.f32.mxu1 %v14666_v48  ;;  %v17811_v48 = vld [vmem:[#allocation128_spill] sm:$0xff] }
 0x8e3   :  { %6048 = vmatmul.mubr.f32.gmra.mrb[42].mxu0 %v17805_v16 }
 0x8e4   :  { %10242 = vmatpush1.bf16.msra.mxu0 %v17806_v58  ;;  %6054 = vmatprep.mubr.f32.mxu0 %v17807_v49 }
 0x8e5   :  { %10243 = vmatprep.subr.bf16.mxu0 %v16855_v53  ;;  %9570 = vmatmul.mubr.f32.gmra.mrb[150].mxu1 %v14676_v2  ;;  %v17815_v2 = vld [vmem:[#allocation122_spill] sm:$0xff] }
 0x8e6   :  { %9572 = vmatprep.mubr.f32.mxu1 %v14800_v34  ;;  %v17814_v34 = vld [vmem:[#allocation141_spill] sm:$0xff] }
 0x8e7   :  { %6057 = vmatmul.mubr.f32.gmra.mrb[44].mxu0 %v17808_v19 }
 0x8e8   :  { %10245 = vmatpush1.bf16.msra.mxu0 %v17809_v22  ;;  %6063 = vmatprep.mubr.f32.mxu0 %v17810_v45  ;;  %v17868_v45 = vand.u32 4294901760, %v14996_v26 }
 0x8e9   :  { %10246 = vmatprep.subr.bf16.mxu0 %v16855_v53  ;;  %9573 = vmatmul.mubr.f32.gmra.mrb[152].mxu1 %v14838_v28  ;;  %v17817_v28 = vld [vmem:[#allocation173_spill] sm:$0xff] }
 0x8ea   :  { %9575 = vmatprep.mubr.f32.mxu1 %v14854_v9  ;;  %v17816_v9 = vld [vmem:[#allocation124_spill] sm:$0xff] }
 0x8eb   :  { %6066 = vmatmul.mubr.f32.gmra.mrb[46].mxu0 %v17811_v48 }
 0x8ec   :  { %10248 = vmatpush1.bf16.msra.mxu0 %v17812_v18  ;;  %6072 = vmatprep.mubr.f32.mxu0 %v17813_v17  ;;  %v17826_v18 = vand.u32 4294901760, %v17767_v37  ;;  %v17838_v37 = vand.u32 4294901760, %v17786_v12  ;;  %v17846_v12 = vld [vmem:[#allocation62_spill] sm:$0xff] }
 0x8ed   :  { %10249 = vmatprep.subr.bf16.mxu0 %v16855_v53  ;;  %9576 = vmatmul.mubr.f32.gmra.mrb[154].mxu1 %v14900_v54  ;;  %v17819_v54 = vld [vmem:[#allocation176_spill] sm:$0xff] }
 0x8ef   :  { %6075 = vmatmul.mubr.f32.gmra.mrb[48].mxu0 %v17814_v34 }
 0x8f0   :  { %10251 = vmatpush1.bf16.msra.mxu0 %v17815_v2  ;;  %6081 = vmatprep.mubr.f32.mxu0 %v14996_v26  ;;  %v17823_v2 = vand.u32 4294901760, %v17762_v47  ;;  %v17836_v47 = vand.u32 4294901760, %v17784_v0  ;;  %v17845_v0 = vand.u32 4294901760, %v17793_v32  ;;  %v17851_v32 = vand.u32 4294901760, %v17799_v31 }
 0x8f1   :  { %10252 = vmatprep.subr.bf16.mxu0 %v16855_v53  ;;  %v17857_v31 = vand.u32 4294901760, %v17805_v16  ;;  %v17863_v16 = vand.u32 4294901760, %v17811_v48  ;;  %v17869_v48 = vand.u32 4294901760, %v15015_v29  ;;  %v17874_v26 = vand.u32 4294901760, %v17818_v7 }
 0x8f3   :  { %6084 = vmatmul.mubr.f32.gmra.mrb[50].mxu0 %v15015_v29  ;;  %v17876_v29 = vld [vmem:[#allocation77_spill] sm:$0xff] }
 0x8f4   :  { %6090 = vmatprep.mubr.f32.mxu0 %v15028_v63 }
 0x8f7   :  { %6093 = vmatmul.mubr.f32.gmra.mrb[52].mxu0 %v15053_v36 }
 0x8f8   :  { %6099 = vmatprep.mubr.f32.mxu0 %v17816_v9 }
 0x8fb   :  { %6102 = vmatmul.mubr.f32.gmra.mrb[54].mxu0 %v17817_v28 }
 0x8fc   :  { %6108 = vmatprep.mubr.f32.mxu0 %v17818_v7  ;;  %v17882_v7 = vld [vmem:[#allocation105_spill] sm:$0xff] }
 0x8ff   :  { %6111 = vmatmul.mubr.f32.gmra.mrb[56].mxu0 %v17819_v54 }
 0x900   :  { %6215 = vmatprep.mubr.f32.mxu0 %v17820_v46  ;;  %v17827_v46 = vand.u32 4294901760, %v17770_v21  ;;  %v17839_v21 = vand.u32 4294901760, %v17787_v15  ;;  %v17847_v15 = vand.u32 4294901760, %v17795_v39  ;;  %v17853_v39 = vand.u32 4294901760, %v17801_v57 }
 0x901   :  { %v17859_v57 = vand.u32 4294901760, %v17807_v49  ;;  %v17865_v49 = vand.u32 4294901760, %v17813_v17  ;;  %v17871_v17 = vand.u32 4294901760, %v15053_v36  ;;  %v17883_v36 = vld [vmem:[#allocation109_spill] sm:$0xff] }
 0x903   :  { %6219 = vmatmul.mubr.f32.vlgmr.msra.gmra.mrb[18].mxu0 %v17821_v4  ;;  %v17828_v4 = vld [vmem:[#allocation49_spill] sm:$0xff] }
 0x904   :  { %10254 = vmatpush1.bf16.msra.mxu0 %v17822_v40  ;;  %6226 = vmatprep.mubr.f32.mxu0 %v17823_v2  ;;  %v17829_v40 = vand.u32 4294901760, %v17772_v20  ;;  %v17830_v2 = vand.u32 4294901760, %v17775_v50  ;;  %v17840_v20 = vld [vmem:[#allocation76_spill] sm:$0xff]  ;;  %v17841_v50 = vand.u32 4294901760, %v17789_v23  ;;  %v17848_v23 = vand.u32 4294901760, %v17796_v5 }
 0x905   :  { %10255 = vmatprep.subr.bf16.mxu0 %v16855_v53  ;;  %v17854_v5 = vand.u32 4294901760, %v17802_v27  ;;  %v17860_v27 = vand.u32 4294901760, %v17808_v19  ;;  %v17866_v19 = vand.u32 4294901760, %v17814_v34  ;;  %v17873_v34 = vand.u32 4294901760, %v17817_v28  ;;  %v17880_v28 = vld [vmem:[#allocation94_spill] sm:$0xff] }
 0x907   :  { %6230 = vmatmul.mubr.f32.gmra.mrb[20].mxu0 %v17824_v60  ;;  %v17831_v60 = vld [vmem:[#allocation57_spill] sm:$0xff] }
 0x908   :  { %10257 = vmatpush1.bf16.msra.mxu0 %v17825_v52  ;;  %6237 = vmatprep.mubr.f32.mxu0 %v17826_v18  ;;  %v17832_v52 = vand.u32 4294901760, %v17777_v30  ;;  %v17833_v18 = vand.u32 4294901760, %v17780_v10  ;;  %v17842_v30 = vand.u32 4294901760, %v17790_v59  ;;  %v17843_v10 = vld [vmem:[#allocation24_spill] sm:$0xff]  ;;  %v17849_v59 = vld [vmem:[#allocation35_spill] sm:$0xff] }
 0x909   :  { %10258 = vmatprep.subr.bf16.mxu0 %v16855_v53 }
 0x90b   :  { %6241 = vmatmul.mubr.f32.gmra.mrb[22].mxu0 %v17827_v46  ;;  %v17852_v46 = vld [vmem:[#allocation72_spill] sm:$0xff] }
 0x90c   :  { %10260 = vmatpush1.bf16.msra.mxu0 %v17828_v4  ;;  %6248 = vmatprep.mubr.f32.mxu0 %v17829_v40  ;;  %v17855_v4 = vld [vmem:[#allocation82_spill] sm:$0xff] }
 0x90d   :  { %10261 = vmatprep.subr.bf16.mxu0 %v16855_v53  ;;  %v17858_v40 = vld [vmem:[#allocation98_spill] sm:$0xff] }
 0x90f   :  { %6252 = vmatmul.mubr.f32.gmra.mrb[24].mxu0 %v17830_v2  ;;  %v17861_v2 = vld [vmem:[#allocation113_spill] sm:$0xff] }
 0x910   :  { %10263 = vmatpush1.bf16.msra.mxu0 %v17831_v60  ;;  %6259 = vmatprep.mubr.f32.mxu0 %v17832_v52  ;;  %v17864_v60 = vld [vmem:[#allocation130_spill] sm:$0xff]  ;;  %v17867_v52 = vld [vmem:[#allocation140_spill] sm:$0xff] }
 0x911   :  { %10264 = vmatprep.subr.bf16.mxu0 %v16855_v53 }
 0x913   :  { %6263 = vmatmul.mubr.f32.gmra.mrb[26].mxu0 %v17833_v18  ;;  %v17870_v18 = vand.u32 4294901760, %v15028_v63  ;;  %v17878_v63 = vld [vmem:[#allocation87_spill] sm:$0xff] }
 0x914   :  { %10266 = vmatpush1.bf16.msra.mxu0 %v17834_v33  ;;  %6270 = vmatprep.mubr.f32.mxu0 %v17835_v1  ;;  %v17872_v33 = vand.u32 4294901760, %v17816_v9  ;;  %v17875_v1 = vand.u32 4294901760, %v17819_v54  ;;  %v17879_v9 = vld [vmem:[#allocation91_spill] sm:$0xff]  ;;  %v17881_v54 = vld [vmem:[#allocation97_spill] sm:$0xff] }
 0x915   :  { %10267 = vmatprep.subr.bf16.mxu0 %v16855_v53 }
 0x917   :  { %6274 = vmatmul.mubr.f32.gmra.mrb[28].mxu0 %v17836_v47  ;;  %v17877_v47 = vld [vmem:[#allocation85_spill] sm:$0xff] }
 0x918   :  { %10269 = vmatpush1.bf16.msra.mxu0 %v17837_v11  ;;  %6281 = vmatprep.mubr.f32.mxu0 %v17838_v37  ;;  %v17886_v11 = vld [vmem:[#allocation116_spill] sm:$0xff]  ;;  %v17888_v37 = vld [vmem:[#allocation43_spill] sm:$0xff] }
 0x919   :  { %10270 = vmatprep.subr.bf16.mxu0 %v16855_v53 }
 0x91b   :  { %6285 = vmatmul.mubr.f32.gmra.mrb[30].mxu0 %v17839_v21  ;;  %v17890_v21 = vld [vmem:[#allocation127_spill] sm:$0xff] }
 0x91c   :  { %10272 = vmatpush1.bf16.msra.mxu0 %v17840_v20  ;;  %6292 = vmatprep.mubr.f32.mxu0 %v17841_v50  ;;  %v17892_v20 = vld [vmem:[#allocation14_spill] sm:$0xff] }
 0x91d   :  { %10273 = vmatprep.subr.bf16.mxu0 %v16855_v53  ;;  %v17894_v50 = vld [vmem:[#allocation30_spill] sm:$0xff] }
 0x91f   :  { %6296 = vmatmul.mubr.f32.gmra.mrb[32].mxu0 %v17842_v30  ;;  %v17896_v30 = vld [vmem:[#allocation78_spill] sm:$0xff] }
 0x920   :  { %10275 = vmatpush1.bf16.msra.mxu0 %v17843_v10  ;;  %6303 = vmatprep.mubr.f32.mxu0 %v17844_v56  ;;  %v17898_v10 = vld [vmem:[#allocation106_spill] sm:$0xff] }
 0x921   :  { %10276 = vmatprep.subr.bf16.mxu0 %v16855_v53  ;;  %v17900_v56 = vld [vmem:[#allocation150_spill] sm:$0xff] }
 0x923   :  { %6307 = vmatmul.mubr.f32.gmra.mrb[34].mxu0 %v17845_v0  ;;  %v17904_v0 = vld [vmem:[#allocation108_spill] sm:$0xff] }
 0x924   :  { %10278 = vmatpush1.bf16.msra.mxu0 %v17846_v12  ;;  %6314 = vmatprep.mubr.f32.mxu0 %v17847_v15  ;;  %v17905_v12 = vld [vmem:[#allocation169_spill] sm:$0xff]  ;;  %v17907_v15 = vld [vmem:[#allocation122_spill] sm:$0xff] }
 0x925   :  { %10279 = vmatprep.subr.bf16.mxu0 %v16855_v53 }
 0x927   :  { %6318 = vmatmul.mubr.f32.gmra.mrb[36].mxu0 %v17848_v23  ;;  %v17908_v23 = vld [vmem:[#allocation142_spill] sm:$0xff] }
 0x928   :  { %10281 = vmatpush1.bf16.msra.mxu0 %v17849_v59  ;;  %6325 = vmatprep.mubr.f32.mxu0 %v17850_v61  ;;  %v17909_v59 = vld [vmem:[#allocation137_spill] sm:$0xff]  ;;  %v17911_v61 = vld [vmem:[#allocation171_spill] sm:$0xff] }
 0x929   :  { %10282 = vmatprep.subr.bf16.mxu0 %v16855_v53 }
 0x92b   :  { %6329 = vmatmul.mubr.f32.gmra.mrb[38].mxu0 %v17851_v32  ;;  %v17912_v32 = vld [vmem:[#allocation100_spill] sm:$0xff] }
 0x92c   :  { %10284 = vmatpush1.bf16.msra.mxu0 %v17852_v46  ;;  %6336 = vmatprep.mubr.f32.mxu0 %v17853_v39  ;;  %v15594_v46 = vpop.f32.mrb[56].mxu1  ;;  %v17913_v39 = vld [vmem:[#allocation110_spill] sm:$0xff] }
 0x92d   :  { %10285 = vmatprep.subr.bf16.mxu0 %v16855_v53 }
 0x92f   :  { %6340 = vmatmul.mubr.f32.gmra.mrb[40].mxu0 %v17854_v5  ;;  %v15597_v5 = vpop.f32.mrb[57].mxu1 }
 0x930   :  { %10287 = vmatpush1.bf16.msra.mxu0 %v17855_v4  ;;  %6347 = vmatprep.mubr.f32.mxu0 %v17856_v35  ;;  %v17914_v35 = vld [vmem:[#allocation118_spill] sm:$0xff] }
 0x931   :  { %10288 = vmatprep.subr.bf16.mxu0 %v16855_v53 }
 0x933   :  { %6351 = vmatmul.mubr.f32.gmra.mrb[42].mxu0 %v17857_v31 }
 0x934   :  { %10290 = vmatpush1.bf16.msra.mxu0 %v17858_v40  ;;  %6358 = vmatprep.mubr.f32.mxu0 %v17859_v57  ;;  %v17915_v40 = vld [vmem:[#allocation172_spill] sm:$0xff] }
 0x935   :  { %10291 = vmatprep.subr.bf16.mxu0 %v16855_v53 }
 0x937   :  { %6362 = vmatmul.mubr.f32.gmra.mrb[44].mxu0 %v17860_v27 }
 0x938   :  { %10293 = vmatpush1.bf16.msra.mxu0 %v17861_v2  ;;  %6369 = vmatprep.mubr.f32.mxu0 %v17862_v62  ;;  %v17916_v62 = vld [vmem:[#allocation174_spill] sm:$0xff] }
 0x939   :  { %10294 = vmatprep.subr.bf16.mxu0 %v16855_v53 }
 0x93b   :  { %6373 = vmatmul.mubr.f32.gmra.mrb[46].mxu0 %v17863_v16 }
 0x93c   :  { %10296 = vmatpush1.bf16.msra.mxu0 %v17864_v60  ;;  %6380 = vmatprep.mubr.f32.mxu0 %v17865_v49 }
 0x93d   :  { %10297 = vmatprep.subr.bf16.mxu0 %v16855_v53 }
 0x93f   :  { %6384 = vmatmul.mubr.f32.gmra.mrb[48].mxu0 %v17866_v19 }
 0x940   :  { %10299 = vmatpush1.bf16.msra.mxu0 %v17867_v52  ;;  %6391 = vmatprep.mubr.f32.mxu0 %v17868_v45 }
 0x941   :  { %10300 = vmatprep.subr.bf16.mxu0 %v16855_v53 }
 0x943   :  { %6395 = vmatmul.mubr.f32.gmra.mrb[50].mxu0 %v17869_v48  ;;  %v17921_v48 = vld [vmem:[#allocation143_spill] sm:$0xff] }
 0x944   :  { %6402 = vmatprep.mubr.f32.mxu0 %v17870_v18 }
 0x947   :  { %6406 = vmatmul.mubr.f32.gmra.mrb[52].mxu0 %v17871_v17 }
 0x948   :  { %6413 = vmatprep.mubr.f32.mxu0 %v17872_v33 }
 0x94b   :  { %6417 = vmatmul.mubr.f32.gmra.mrb[54].mxu0 %v17873_v34 }
 0x94c   :  { %6424 = vmatprep.mubr.f32.mxu0 %v17874_v26  ;;  %v17926_v26 = vld [vmem:[#allocation148_spill] sm:$0xff] }
 0x94f   :  { %6428 = vmatmul.mubr.f32.gmra.mrb[56].mxu0 %v17875_v1 }
 0x950   :  { %6594 = vmatprep.mubr.f32.mxu0 %v17876_v29 }
 0x953   :  { %6596 = vmatmul.mubr.f32.vlgmr.msra.gmra.mrb[18].mxu0 %v17877_v47 }
 0x954   :  { %10302 = vmatpush1.bf16.msra.mxu0 %v17761_v41  ;;  %6601 = vmatprep.mubr.f32.mxu0 %v17878_v63  ;;  %v17884_v41 = vld [vmem:[#allocation111_spill] sm:$0xff] }
 0x955   :  { %10303 = vmatprep.subr.bf16.mxu0 %v16855_v53 }
 0x957   :  { %6603 = vmatmul.mubr.f32.gmra.mrb[20].mxu0 %v17879_v9 }
 0x958   :  { %10305 = vmatpush1.bf16.msra.mxu0 %v17766_v3  ;;  %6608 = vmatprep.mubr.f32.mxu0 %v17880_v28  ;;  %v17885_v3 = vld [vmem:[#allocation114_spill] sm:$0xff] }
 0x959   :  { %10306 = vmatprep.subr.bf16.mxu0 %v16855_v53 }
 0x95b   :  { %6610 = vmatmul.mubr.f32.gmra.mrb[22].mxu0 %v17881_v54 }
 0x95c   :  { %10308 = vmatpush1.bf16.msra.mxu0 %v17771_v14  ;;  %6615 = vmatprep.mubr.f32.mxu0 %v17882_v7  ;;  %v17887_v14 = vld [vmem:[#allocation117_spill] sm:$0xff] }
 0x95d   :  { %10309 = vmatprep.subr.bf16.mxu0 %v16855_v53 }
 0x95f   :  { %6617 = vmatmul.mubr.f32.gmra.mrb[24].mxu0 %v17883_v36 }
 0x960   :  { %10311 = vmatpush1.bf16.msra.mxu0 %v17776_v25  ;;  %6622 = vmatprep.mubr.f32.mxu0 %v17884_v41  ;;  %v17889_v25 = vld [vmem:[#allocation45_spill] sm:$0xff] }
 0x961   :  { %10312 = vmatprep.subr.bf16.mxu0 %v16855_v53 }
 0x963   :  { %6624 = vmatmul.mubr.f32.gmra.mrb[26].mxu0 %v17885_v3 }
 0x964   :  { %10314 = vmatpush1.bf16.msra.mxu0 %v17781_v42  ;;  %6629 = vmatprep.mubr.f32.mxu0 %v17886_v11  ;;  %v17891_v42 = vld [vmem:[#allocation135_spill] sm:$0xff] }
 0x965   :  { %10315 = vmatprep.subr.bf16.mxu0 %v16855_v53 }
 0x967   :  { %6631 = vmatmul.mubr.f32.gmra.mrb[28].mxu0 %v17887_v14 }
 0x968   :  { %10317 = vmatpush1.bf16.msra.mxu0 %v17785_v43  ;;  %6636 = vmatprep.mubr.f32.mxu0 %v17888_v37  ;;  %v17893_v43 = vld [vmem:[#allocation3_spill] sm:$0xff] }
 0x969   :  { %10318 = vmatprep.subr.bf16.mxu0 %v16855_v53 }
 0x96b   :  { %6638 = vmatmul.mubr.f32.gmra.mrb[30].mxu0 %v17889_v25 }
 0x96c   :  { %10320 = vmatpush1.bf16.msra.mxu0 %v17788_v8  ;;  %6643 = vmatprep.mubr.f32.mxu0 %v17890_v21  ;;  %v17895_v8 = vld [vmem:[#allocation9_spill] sm:$0xff] }
 0x96d   :  { %10321 = vmatprep.subr.bf16.mxu0 %v16855_v53 }
 0x96f   :  { %6645 = vmatmul.mubr.f32.gmra.mrb[32].mxu0 %v17891_v42 }
 0x970   :  { %10323 = vmatpush1.bf16.msra.mxu0 %v17791_v44  ;;  %6650 = vmatprep.mubr.f32.mxu0 %v17892_v20  ;;  %v17897_v44 = vld [vmem:[#allocation88_spill] sm:$0xff] }
 0x971   :  { %10324 = vmatprep.subr.bf16.mxu0 %v16855_v53 }
 0x973   :  { %6652 = vmatmul.mubr.f32.gmra.mrb[34].mxu0 %v17893_v43 }
 0x974   :  { %10326 = vmatpush1.bf16.msra.mxu0 %v17794_v6  ;;  %6657 = vmatprep.mubr.f32.mxu0 %v17894_v50  ;;  %v17899_v6 = vld [vmem:[#allocation115_spill] sm:$0xff] }
 0x975   :  { %10327 = vmatprep.subr.bf16.mxu0 %v16855_v53 }
 0x977   :  { %6659 = vmatmul.mubr.f32.gmra.mrb[36].mxu0 %v17895_v8 }
 0x978   :  { %10329 = vmatpush1.bf16.msra.mxu0 %v17797_v38  ;;  %6664 = vmatprep.mubr.f32.mxu0 %v17896_v30  ;;  %v17901_v38 = vld [vmem:[#allocation152_spill] sm:$0xff] }
 0x979   :  { %10330 = vmatprep.subr.bf16.mxu0 %v16855_v53 }
 0x97b   :  { %6666 = vmatmul.mubr.f32.gmra.mrb[38].mxu0 %v17897_v44 }
 0x97c   :  { %10332 = vmatpush1.bf16.msra.mxu0 %v17800_v24  ;;  %6671 = vmatprep.mubr.f32.mxu0 %v17898_v10  ;;  %v17902_v24 = vld [vmem:[#allocation163_spill] sm:$0xff] }
 0x97d   :  { %10333 = vmatprep.subr.bf16.mxu0 %v16855_v53 }
 0x97f   :  { %6673 = vmatmul.mubr.f32.gmra.mrb[40].mxu0 %v17899_v6 }
 0x980   :  { %10335 = vmatpush1.bf16.msra.mxu0 %v17803_v51  ;;  %6678 = vmatprep.mubr.f32.mxu0 %v17900_v56  ;;  %v17903_v51 = vld [vmem:[#allocation28_spill] sm:$0xff] }
 0x981   :  { %10336 = vmatprep.subr.bf16.mxu0 %v16855_v53 }
 0x983   :  { %6680 = vmatmul.mubr.f32.gmra.mrb[42].mxu0 %v17901_v38 }
 0x984   :  { %10338 = vmatpush1.bf16.msra.mxu0 %v17806_v58  ;;  %6685 = vmatprep.mubr.f32.mxu0 %v17728_v13  ;;  %v17906_v58 = vld [vmem:[#allocation170_spill] sm:$0xff] }
 0x985   :  { %10339 = vmatprep.subr.bf16.mxu0 %v16855_v53 }
 0x987   :  { %6687 = vmatmul.mubr.f32.gmra.mrb[44].mxu0 %v17902_v24 }
 0x988   :  { %10341 = vmatpush1.bf16.msra.mxu0 %v17809_v22  ;;  %6692 = vmatprep.mubr.f32.mxu0 %v17735_v55  ;;  %v17910_v22 = vld [vmem:[#allocation144_spill] sm:$0xff] }
 0x989   :  { %10342 = vmatprep.subr.bf16.mxu0 %v16855_v53 }
 0x98b   :  { %6694 = vmatmul.mubr.f32.gmra.mrb[46].mxu0 %v17903_v51 }
 0x98c   :  { %10344 = vmatpush1.bf16.msra.mxu0 %v17904_v0  ;;  %6699 = vmatprep.mubr.f32.mxu0 %v17905_v12 }
 0x98d   :  { %10345 = vmatprep.subr.bf16.mxu0 %v16855_v53  ;;  %v15599_v53 = vpop.f32.mrb[58].mxu1 }
 0x98e   :  { %v15601_v4 = vpop.f32.mrb[59].mxu1 }
 0x98f   :  { %6701 = vmatmul.mubr.f32.gmra.mrb[48].mxu0 %v17906_v58  ;;  %v15604_v31 = vpop.f32.mrb[60].mxu1 }
 0x990   :  { %10347 = vmatpush1.bf16.msra.mxu0 %v17907_v15  ;;  %6706 = vmatprep.mubr.f32.mxu0 %v17908_v23  ;;  %v15607_v57 = vpop.f32.mrb[61].mxu1 }
 0x991   :  { %10449 = vmatprep.subr.bf16.mxu0 %v17909_v59  ;;  %v15609_v27 = vpop.f32.mrb[62].mxu1 }
 0x992   :  { %v15611_v2 = vpop.f32.mrb[63].mxu1 }
 0x993   :  { %6708 = vmatmul.mubr.f32.gmra.mrb[50].mxu0 %v17910_v22  ;;  %v15614_v16 = vpop.f32.mrb[64].mxu1 }
 0x994   :  { %6713 = vmatprep.mubr.f32.mxu0 %v17911_v61  ;;  %v15617_v60 = vpop.f32.mrb[65].mxu1 }
 0x995   :  { %v15619_v49 = vpop.f32.mrb[66].mxu1 }
 0x996   :  { %17917 = vst [vmem:[#allocation8_spill] sm:$0xff] %v15619_v49  ;;  %v15621_v19 = vpop.f32.mrb[67].mxu1 }
 0x997   :  { %6715 = vmatmul.mubr.f32.gmra.mrb[52].mxu0 %v17912_v32  ;;  %17918 = vst [vmem:[#allocation34_spill] sm:$0xff] %v15621_v19  ;;  %v15624_v52 = vpop.f32.mrb[68].mxu1 }
 0x998   :  { %6720 = vmatprep.mubr.f32.mxu0 %v17913_v39  ;;  %17919 = vst [vmem:[#allocation6_spill] sm:$0xff] %v15624_v52  ;;  %v15628_v45 = vpop.f32.mrb[69].mxu1 }
 0x999   :  { %17920 = vst [vmem:[#allocation17_spill] sm:$0xff] %v15628_v45  ;;  %v15631_v18 = vpop.f32.mrb[70].mxu1 }
 0x99a   :  { %17922 = vst [vmem:[#allocation22_spill] sm:$0xff] %v15631_v18  ;;  %v15633_v17 = vpop.f32.mrb[71].mxu1 }
 0x99b   :  { %6722 = vmatmul.mubr.f32.gmra.mrb[54].mxu0 %v17914_v35  ;;  %17923 = vst [vmem:[#allocation25_spill] sm:$0xff] %v15633_v17  ;;  %v15636_v33 = vpop.f32.mrb[72].mxu1 }
 0x99c   :  { %6727 = vmatprep.mubr.f32.mxu0 %v17915_v40  ;;  %17924 = vst [vmem:[#allocation32_spill] sm:$0xff] %v15636_v33  ;;  %v15640_v34 = vpop.f32.mrb[73].mxu1 }
 0x99d   :  { %17925 = vst [vmem:[#allocation39_spill] sm:$0xff] %v15640_v34  ;;  %v15643_v1 = vpop.f32.mrb[74].mxu1 }
 0x99e   :  { %17927 = vst [vmem:[#allocation51_spill] sm:$0xff] %v15643_v1 }
 0x99f   :  { %6729 = vmatmul.mubr.f32.gmra.mrb[56].mxu0 %v17916_v62 }
 0x9a0   :  { %6831 = vmatprep.mubr.f32.mxu0 %v17876_v29  ;;  %v15645_v29 = vpop.f32.mrb[75].mxu1 }
 0x9a1   :  { %17928 = vst [vmem:[#allocation54_spill] sm:$0xff] %v15645_v29 }
 0x9a3   :  { %6833 = vmatmul.mubr.f32.vlgmr.msra.gmra.mrb[18].mxu0 %v17877_v47  ;;  %v15648_v47 = vpop.f32.mrb[76].mxu1 }
 0x9a4   :  { %10451 = vmatpush3.bf16.msra.mxu0 %v17909_v59  ;;  %6838 = vmatprep.mubr.f32.mxu0 %v17878_v63  ;;  %v15652_v63 = vpop.f32.mrb[77].mxu1  ;;  %v17930_v59 = vld [vmem:[#allocation157_spill] sm:$0xff] }
 0x9a5   :  { %10453 = vmatprep.subr.bf16.mxu0 %v17921_v48 }
 0x9a7   :  { %6840 = vmatmul.mubr.f32.gmra.mrb[20].mxu0 %v17879_v9  ;;  %v17929_v9 = vld [vmem:[#allocation153_spill] sm:$0xff] }
 0x9a8   :  { %10455 = vmatpush3.bf16.msra.mxu0 %v17921_v48  ;;  %6845 = vmatprep.mubr.f32.mxu0 %v17880_v28  ;;  %v15655_v28 = vpop.f32.mrb[78].mxu1 }
 0x9a9   :  { %10457 = vmatprep.subr.bf16.mxu0 %v17926_v26  ;;  %v15657_v0 = vpop.f32.mrb[79].mxu1 }
 0x9aa   :  { %v15660_v15 = vpop.f32.mrb[80].mxu1 }
 0x9ab   :  { %6847 = vmatmul.mubr.f32.gmra.mrb[22].mxu0 %v17881_v54  ;;  %v15664_v54 = vpop.f32.mrb[81].mxu1 }
 0x9ac   :  { %10459 = vmatpush3.bf16.msra.mxu0 %v17926_v26  ;;  %6852 = vmatprep.mubr.f32.mxu0 %v17882_v7  ;;  %v15667_v7 = vpop.f32.mrb[82].mxu1 }
 0x9ad   :  { %10461 = vmatprep.subr.bf16.mxu0 %v17929_v9  ;;  %v15669_v48 = vpop.f32.mrb[83].mxu1 }
 0x9ae   :  { %v15672_v26 = vpop.f32.mrb[84].mxu1 }
 0x9af   :  { %6854 = vmatmul.mubr.f32.gmra.mrb[24].mxu0 %v17883_v36  ;;  %17931 = vst [vmem:[#allocation83_spill] sm:$0xff] %v15672_v26  ;;  %v15676_v36 = vpop.f32.mrb[85].mxu1 }
 0x9b0   :  { %10463 = vmatpush3.bf16.msra.mxu0 %v17929_v9  ;;  %6859 = vmatprep.mubr.f32.mxu0 %v17884_v41  ;;  %v15678_v9 = vpop.f32.mrb[86].mxu1 }
 0x9b1   :  { %10465 = vmatprep.subr.bf16.mxu0 %v17930_v59  ;;  %17932 = vst [vmem:[#allocation59_spill] sm:$0xff] %v15678_v9  ;;  %v15680_v41 = vpop.f32.mrb[87].mxu1 }
 0x9b2   :  { %17933 = vst [vmem:[#allocation61_spill] sm:$0xff] %v15680_v41  ;;  %v15683_v1 = vpop.f32.mrb[88].mxu1 }
 0x9b3   :  { %6861 = vmatmul.mubr.f32.gmra.mrb[26].mxu0 %v17885_v3  ;;  %17934 = vst [vmem:[#allocation121_spill] sm:$0xff] %v15683_v1  ;;  %v15686_v29 = vpop.f32.mrb[89].mxu1 }
 0x9b4   :  { %10467 = vmatpush3.bf16.msra.mxu0 %v17930_v59  ;;  %6866 = vmatprep.mubr.f32.mxu0 %v17886_v11  ;;  %17935 = vst [vmem:[#allocation131_spill] sm:$0xff] %v15686_v29  ;;  %v15688_v3 = vpop.f32.mrb[90].mxu1 }
 0x9b5   :  { %17936 = vst [vmem:[#allocation67_spill] sm:$0xff] %v15688_v3  ;;  %v15690_v33 = vpop.f32.mrb[91].mxu1 }
 0x9b6   :  { %17937 = vst [vmem:[#allocation69_spill] sm:$0xff] %v15690_v33  ;;  %v15693_v11 = vpop.f32.mrb[92].mxu1 }
 0x9b7   :  { %6868 = vmatmul.mubr.f32.gmra.mrb[28].mxu0 %v17887_v14  ;;  %17938 = vst [vmem:[#allocation133_spill] sm:$0xff] %v15693_v11  ;;  %v15696_v59 = vpop.f32.mrb[93].mxu1 }
 0x9b8   :  { %6873 = vmatprep.mubr.f32.mxu0 %v17888_v37  ;;  %17939 = vst [vmem:[#allocation15_spill] sm:$0xff] %v15696_v59  ;;  %v15698_v34 = vpop.f32.mrb[94].mxu1 }
 0x9b9   :  { %17940 = vst [vmem:[#allocation16_spill] sm:$0xff] %v15698_v34  ;;  %v15700_v14 = vpop.f32.mrb[95].mxu1 }
 0x9ba   :  { %17941 = vst [vmem:[#allocation33_spill] sm:$0xff] %v15700_v14  ;;  %v15703_v37 = vpop.f32.mrb[96].mxu1 }
 0x9bb   :  { %6875 = vmatmul.mubr.f32.gmra.mrb[30].mxu0 %v17889_v25  ;;  %v15706_v3 = vpop.f32.mrb[97].mxu1 }
 0x9bc   :  { %6880 = vmatprep.mubr.f32.mxu0 %v17890_v21  ;;  %v15708_v18 = vpop.f32.mrb[98].mxu1 }
 0x9bd   :  { %v15710_v25 = vpop.f32.mrb[99].mxu1 }
 0x9be   :  { %v15713_v21 = vpop.f32.mrb[100].mxu1 }
 0x9bf   :  { %6882 = vmatmul.mubr.f32.gmra.mrb[32].mxu0 %v17891_v42  ;;  %v15716_v34 = vpop.f32.mrb[101].mxu1 }
 0x9c0   :  { %6887 = vmatprep.mubr.f32.mxu0 %v17892_v20  ;;  %v15718_v14 = vpop.f32.mrb[102].mxu1 }
 0x9c1   :  { %v15720_v42 = vpop.f32.mrb[103].mxu1 }
 0x9c2   :  { %v15723_v20 = vpop.f32.mrb[104].mxu1 }
 0x9c3   :  { %6889 = vmatmul.mubr.f32.gmra.mrb[34].mxu0 %v17893_v43  ;;  %17942 = vst [vmem:[#allocation41_spill] sm:$0xff] %v15723_v20  ;;  %v15726_v11 = vpop.f32.mrb[105].mxu1 }
 0x9c4   :  { %6894 = vmatprep.mubr.f32.mxu0 %v17894_v50  ;;  %v15728_v59 = vpop.f32.mrb[106].mxu1 }
 0x9c5   :  { %17943 = vst [vmem:[#allocation80_spill] sm:$0xff] %v15728_v59  ;;  %v15730_v43 = vpop.f32.mrb[107].mxu1 }
 0x9c6   :  { %17944 = vst [vmem:[#allocation86_spill] sm:$0xff] %v15730_v43  ;;  %v15733_v50 = vpop.f32.mrb[108].mxu1  ;;  %v4887_v43 = vpop.permute.xlu1 %4886 }
 0x9c7   :  { %6896 = vmatmul.mubr.f32.gmra.mrb[36].mxu0 %v17895_v8  ;;  %17945 = vst [vmem:[#allocation145_spill] sm:$0xff] %v15733_v50  ;;  %v15736_v33 = vpop.f32.mrb[109].mxu1 }
 0x9c8   :  { %6901 = vmatprep.mubr.f32.mxu0 %v17896_v30  ;;  %17946 = vst [vmem:[#allocation112_spill] sm:$0xff] %v15736_v33  ;;  %v15738_v17 = vpop.f32.mrb[110].mxu1 }
 0x9c9   :  { %17947 = vst [vmem:[#allocation120_spill] sm:$0xff] %v15738_v17  ;;  %v15740_v8 = vpop.f32.mrb[111].mxu1 }
 0x9ca   :  { %17948 = vst [vmem:[#allocation64_spill] sm:$0xff] %v15740_v8  ;;  %v15743_v30 = vpop.f32.mrb[112].mxu1 }
 0x9cb   :  { %6903 = vmatmul.mubr.f32.gmra.mrb[38].mxu0 %v17897_v44  ;;  %17949 = vst [vmem:[#allocation151_spill] sm:$0xff] %v15743_v30  ;;  %v15746_v1 = vpop.f32.mrb[113].mxu1 }
 0x9cc   :  { %6908 = vmatprep.mubr.f32.mxu0 %v17898_v10  ;;  %17950 = vst [vmem:[#allocation162_spill] sm:$0xff] %v15746_v1  ;;  %v15748_v52 = vpop.f32.mrb[114].mxu1 }
 0x9cd   :  { %17951 = vst [vmem:[#allocation70_spill] sm:$0xff] %v15748_v52  ;;  %v15750_v44 = vpop.f32.mrb[115].mxu1 }
 0x9ce   :  { %17952 = vst [vmem:[#allocation75_spill] sm:$0xff] %v15750_v44  ;;  %v15753_v10 = vpop.f32.mrb[116].mxu1 }
 0x9cf   :  { %6910 = vmatmul.mubr.f32.gmra.mrb[40].mxu0 %v17899_v6  ;;  %v15756_v17 = vpop.f32.mrb[117].mxu1 }
 0x9d0   :  { %6915 = vmatprep.mubr.f32.mxu0 %v17900_v56  ;;  %v15758_v8 = vpop.f32.mrb[118].mxu1 }
 0x9d1   :  { %v15760_v6 = vpop.f32.mrb[119].mxu1 }
 0x9d2   :  { %v15763_v56 = vpop.f32.mrb[120].mxu1 }
 0x9d3   :  { %6917 = vmatmul.mubr.f32.gmra.mrb[42].mxu0 %v17901_v38  ;;  %v15766_v52 = vpop.f32.mrb[121].mxu1 }
 0x9d4   :  { %6922 = vmatprep.mubr.f32.mxu0 %v17728_v13  ;;  %v15768_v44 = vpop.f32.mrb[122].mxu1 }
 0x9d5   :  { %v15770_v38 = vpop.f32.mrb[123].mxu1 }
 0x9d6   :  { %v15773_v13 = vpop.f32.mrb[124].mxu1 }
 0x9d7   :  { %6924 = vmatmul.mubr.f32.gmra.mrb[44].mxu0 %v17902_v24  ;;  %17953 = vst [vmem:[#allocation165_spill] sm:$0xff] %v15773_v13  ;;  %v15776_v30 = vpop.f32.mrb[125].mxu1  ;;  %v17957_v24 = vld [vmem:[#allocation12_spill] sm:$0xff] }
 0x9d8   :  { %6929 = vmatprep.mubr.f32.mxu0 %v17735_v55  ;;  %17954 = vst [vmem:[#allocation161_spill] sm:$0xff] %v15776_v30  ;;  %v15778_v1 = vpop.f32.mrb[126].mxu1  ;;  %v17956_v55 = vld [vmem:[#allocation81_spill] sm:$0xff] }
 0x9d9   :  { %17955 = vst [vmem:[#allocation42_spill] sm:$0xff] %v15778_v1 }
 0x9db   :  { %6931 = vmatmul.mubr.f32.gmra.mrb[46].mxu0 %v17903_v51  ;;  %v17958_v51 = vld [vmem:[#allocation107_spill] sm:$0xff] }
 0x9dc   :  { %6936 = vmatprep.mubr.f32.mxu0 %v17905_v12  ;;  %v17959_v12 = vld [vmem:[#allocation119_spill] sm:$0xff] }
 0x9df   :  { %6938 = vmatmul.mubr.f32.gmra.mrb[48].mxu0 %v17906_v58  ;;  %v17960_v58 = vld [vmem:[#allocation13_spill] sm:$0xff] }
 0x9e0   :  { %6943 = vmatprep.mubr.f32.mxu0 %v17908_v23  ;;  %v17961_v23 = vld [vmem:[#allocation2_spill] sm:$0xff] }
 0x9e3   :  { %6945 = vmatmul.mubr.f32.gmra.mrb[50].mxu0 %v17910_v22  ;;  %v15795_v22 = vpop.f32.mrb[127].mxu1 }
 0x9e4   :  { %6950 = vmatprep.mubr.f32.mxu0 %v17911_v61  ;;  %17962 = vst [vmem:[#allocation84_spill] sm:$0xff] %v15795_v22  ;;  %v17963_v61 = vld [vmem:[#allocation4_spill] sm:$0xff] }
 0x9e7   :  { %6952 = vmatmul.mubr.f32.gmra.mrb[52].mxu0 %v17912_v32  ;;  %v15798_v32 = vpop.f32.mrb[128].mxu1 }
 0x9e8   :  { %6957 = vmatprep.mubr.f32.mxu0 %v17913_v39  ;;  %17964 = vst [vmem:[#allocation92_spill] sm:$0xff] %v15798_v32  ;;  %v15800_v39 = vpop.f32.mrb[129].mxu1 }
 0x9e9   :  { %17965 = vst [vmem:[#allocation60_spill] sm:$0xff] %v15800_v39  ;;  %v17983_v39 = vld [vmem:[#allocation58_spill] sm:$0xff] }
 0x9eb   :  { %6959 = vmatmul.mubr.f32.gmra.mrb[54].mxu0 %v17914_v35  ;;  %v15802_v35 = vpop.f32.mrb[130].mxu1 }
 0x9ec   :  { %6964 = vmatprep.mubr.f32.mxu0 %v17915_v40  ;;  %17966 = vst [vmem:[#allocation53_spill] sm:$0xff] %v15802_v35  ;;  %v17967_v40 = vld [vmem:[#allocation7_spill] sm:$0xff] }
 0x9ef   :  { %6966 = vmatmul.mubr.f32.gmra.mrb[56].mxu0 %v17916_v62  ;;  %v15805_v62 = vpop.f32.mrb[131].mxu1 }
 0x9f0   :  { %9598 = vmatprep.mubr.f32.mxu0 %v17956_v55  ;;  %17968 = vst [vmem:[#allocation138_spill] sm:$0xff] %v15805_v62  ;;  %v17969_v55 = vld [vmem:[#allocation66_spill] sm:$0xff] }
 0x9f1   :  { %v17977_v62 = vld [vmem:[#allocation146_spill] sm:$0xff] }
 0x9f3   :  { %9599 = vmatmul.mubr.f32.vlgmr.msra.gmra.mrb[58].mxu0 %v17957_v24  ;;  %v15808_v24 = vpop.f32.mrb[132].mxu1 }
 0x9f4   :  { %9601 = vmatprep.mubr.f32.mxu0 %v17958_v51  ;;  %17970 = vst [vmem:[#allocation149_spill] sm:$0xff] %v15808_v24  ;;  %v15810_v51 = vpop.f32.mrb[133].mxu1 }
 0x9f5   :  { %17971 = vst [vmem:[#allocation154_spill] sm:$0xff] %v15810_v51  ;;  %v17979_v51 = vld [vmem:[#allocation156_spill] sm:$0xff] }
 0x9f7   :  { %9602 = vmatmul.mubr.f32.gmra.mrb[60].mxu0 %v17959_v12  ;;  %v15812_v12 = vpop.f32.mrb[134].mxu1 }
 0x9f8   :  { %9604 = vmatprep.mubr.f32.mxu0 %v17960_v58  ;;  %17972 = vst [vmem:[#allocation160_spill] sm:$0xff] %v15812_v12  ;;  %v17973_v58 = vld [vmem:[#allocation38_spill] sm:$0xff] }
 0x9fb   :  { %9605 = vmatmul.mubr.f32.gmra.mrb[62].mxu0 %v17961_v23  ;;  %v15815_v23 = vpop.f32.mrb[135].mxu1 }
 0x9fc   :  { %9607 = vmatprep.mubr.f32.mxu0 %v17963_v61  ;;  %17974 = vst [vmem:[#allocation164_spill] sm:$0xff] %v15815_v23  ;;  %v17975_v61 = vld [vmem:[#allocation95_spill] sm:$0xff]  ;;  %v15818_v32 = vpop.f32.mrb[136].mxu1  ;;  %v17981_v23 = vld [vmem:[#allocation168_spill] sm:$0xff] }
 0x9fd   :  { %v8038_v35 = vpop.f32.mrb[137].mxu1 }
 0x9fe   :  { %v15823_v24 = vpop.f32.mrb[138].mxu1 }
 0x9ff   :  { %9608 = vmatmul.mubr.f32.gmra.mrb[64].mxu0 %v17967_v40  ;;  %v17976_v40 = vld [vmem:[#allocation104_spill] sm:$0xff]  ;;  %v15826_v12 = vpop.f32.mrb[139].mxu1 }
 0xa00   :  { %9610 = vmatprep.mubr.f32.mxu0 %v17969_v55  ;;  %v17978_v55 = vld [vmem:[#allocation147_spill] sm:$0xff]  ;;  %v15831_v50 = vpop.f32.mrb[140].mxu1 }
 0xa03   :  { %9611 = vmatmul.mubr.f32.gmra.mrb[66].mxu0 %v17973_v58  ;;  %v17980_v58 = vld [vmem:[#allocation159_spill] sm:$0xff] }
 0xa04   :  { %9613 = vmatprep.mubr.f32.mxu0 %v17975_v61  ;;  %v17982_v61 = vld [vmem:[#allocation52_spill] sm:$0xff] }
 0xa07   :  { %9614 = vmatmul.mubr.f32.gmra.mrb[68].mxu0 %v17976_v40  ;;  %v15834_v40 = vpop.f32.mrb[141].mxu1 }
 0xa08   :  { %9616 = vmatprep.mubr.f32.mxu0 %v17977_v62  ;;  %v17984_v62 = vld [vmem:[#allocation132_spill] sm:$0xff] }
 0xa0b   :  { %9617 = vmatmul.mubr.f32.gmra.mrb[70].mxu0 %v17978_v55  ;;  %v15837_v55 = vpop.f32.mrb[142].mxu1 }
 0xa0c   :  { %9619 = vmatprep.mubr.f32.mxu0 %v17979_v51  ;;  %v15839_v33 = vpop.f32.mrb[143].mxu1 }
 0xa0d   :  { %v15841_v51 = vpop.f32.mrb[144].mxu1 }
 0xa0e   :  { %17985 = vst [vmem:[#allocation79_spill] sm:$0xff] %v15841_v51  ;;  %v15843_v1 = vpop.f32.mrb[145].mxu1 }
 0xa0f   :  { %9620 = vmatmul.mubr.f32.gmra.mrb[72].mxu0 %v17980_v58  ;;  %17986 = vst [vmem:[#allocation89_spill] sm:$0xff] %v15843_v1  ;;  %v15845_v58 = vpop.f32.mrb[146].mxu1 }
 0xa10   :  { %9622 = vmatprep.mubr.f32.mxu0 %v17981_v23  ;;  %17987 = vst [vmem:[#allocation36_spill] sm:$0xff] %v15845_v58  ;;  %v15847_v23 = vpop.f32.mrb[147].mxu1  ;;  %v4912_v58 = vpop.permute.xlu1 %4911 }
 0xa11   :  { %17988 = vst [vmem:[#allocation96_spill] sm:$0xff] %v15847_v23 }
 0xa13   :  { %9623 = vmatmul.mubr.f32.gmra.mrb[74].mxu0 %v17982_v61  ;;  %v15849_v61 = vpop.f32.mrb[148].mxu1 }
 0xa14   :  { %9625 = vmatprep.mubr.f32.mxu0 %v17983_v39  ;;  %17989 = vst [vmem:[#allocation99_spill] sm:$0xff] %v15849_v61  ;;  %v15851_v29 = vpop.f32.mrb[149].mxu1  ;;  %v15865_v49 = vpop.permute.xlu1 %4936 }
 0xa15   :  { %17990 = vst [vmem:[#allocation18_spill] sm:$0xff] %v15851_v29  ;;  %v15853_v39 = vpop.f32.mrb[150].mxu1  ;;  %17997 = vst [vmem:[#allocation44_spill] sm:$0xff] %v15865_v49  ;;  %v4892_v61 = vpop.permute.xlu0 %4891 }
 0xa16   :  { %17991 = vst [vmem:[#allocation101_spill] sm:$0xff] %v15853_v39  ;;  %v15855_v59 = vpop.f32.mrb[151].mxu1 }
 0xa17   :  { %9626 = vmatmul.mubr.f32.gmra.mrb[76].mxu0 %v17984_v62  ;;  %17992 = vst [vmem:[#allocation103_spill] sm:$0xff] %v15855_v59  ;;  %v15857_v62 = vpop.f32.mrb[152].mxu1 }
 0xa18   :  { %17993 = vst [vmem:[#allocation26_spill] sm:$0xff] %v15857_v62  ;;  %v15859_v45 = vpop.f32.mrb[153].mxu1  ;;  %v15867_v23 = vpop.permute.xlu1 %4961 }
 0xa19   :  { %17994 = vst [vmem:[#allocation129_spill] sm:$0xff] %v15859_v45  ;;  %v15861_v22 = vpop.f32.mrb[154].mxu1  ;;  %17998 = vst [vmem:[#allocation46_spill] sm:$0xff] %v15867_v23  ;;  %v4917_v51 = vpop.permute.xlu0 %4916 }
 0xa1a   :  { %17995 = vst [vmem:[#allocation11_spill] sm:$0xff] %v15861_v22  ;;  %v15863_v9 = vpop.f32.mrb[155].mxu1 }
 0xa1b   :  { %17996 = vst [vmem:[#allocation40_spill] sm:$0xff] %v15863_v9 }
 0xa1c   :  { %v4897_v29 = vpop.permute.xlu1 %4896 }
 0xa1d   :  { %v15871_v59 = vpop.permute.xlu0 %4941 }
 0xa1e   :  { %18000 = vst [vmem:[#allocation47_spill] sm:$0xff] %v15871_v59 }
 0xa20   :  { %v15869_v39 = vpop.permute.xlu1 %4946 }
 0xa21   :  { %17999 = vst [vmem:[#allocation55_spill] sm:$0xff] %v15869_v39  ;;  %v15875_v30 = vpop.permute.xlu0 %4966 }
 0xa24   :  { %v4902_v41 = vpop.permute.xlu1 %4901 }
 0xa76   :  { %v6834_v62 = vpop.f32.mrb[18].mxu0 }
 0xa77   :  { %v10500_v13 = vadd.f32 %v6834_v62, %v4887_v43  ;;  %v6836_v45 = vpop.f32.mrb[19].mxu0 }
 0xa79   :  { %v7053_v22 = vadd.f32 %v10500_v13, %v15597_v5  ;;  %v15881_v5 = vpop.permute.xlu1 %4951 }
 0xa7a   :  { %v6841_v9 = vpop.f32.mrb[20].mxu0 }
 0xa7b   :  { %v7364_v1 = vadd.f32 %v15652_v63, %v7053_v22  ;;  %v10501_v20 = vadd.f32 %v6841_v9, %v4892_v61  ;;  %v6843_v19 = vpop.f32.mrb[21].mxu0  ;;  %v4922_v9 = vpop.permute.xlu0 %4921 }
 0xa7d   :  { %v7063_v23 = vadd.f32 %v10501_v20, %v15594_v46  ;;  %v7570_v49 = vadd.f32 %v15706_v3, %v7364_v1 }
 0xa7e   :  { %v6848_v39 = vpop.f32.mrb[22].mxu0 }
 0xa7f   :  { %v7370_v59 = vadd.f32 %v15648_v47, %v7063_v23  ;;  %v10502_v26 = vadd.f32 %v6848_v39, %v4897_v29  ;;  %v6850_v43 = vpop.f32.mrb[23].mxu0  ;;  %v7786_v45 = vadd.f32 %v15756_v17, %v7570_v49 }
 0xa81   :  { %v7073_v13 = vadd.f32 %v10502_v26, %v15601_v4  ;;  %v7577_v63 = vadd.f32 %v15703_v37, %v7370_v59  ;;  %v15885_v19 = vadd.f32 %v8038_v35, %v7786_v45  ;;  %v4907_v4 = vpop.permute.xlu1 %4906 }
 0xa82   :  { %v6855_v22 = vpop.f32.mrb[24].mxu0 }
 0xa83   :  { %v7376_v46 = vadd.f32 %v15657_v0, %v7073_v13  ;;  %v7794_v1 = vadd.f32 %v15753_v10, %v7577_v63  ;;  %v10503_v3 = vadd.f32 %v6855_v22, %v4902_v41  ;;  %v6857_v47 = vpop.f32.mrb[25].mxu0  ;;  %v15896_v0 = vpop.permute.xlu0 %4971 }
 0xa85   :  { %v15890_v29 = vadd.f32 %v15818_v32, %v7794_v1  ;;  %v7083_v49 = vadd.f32 %v10503_v3, %v15599_v53  ;;  %v7584_v17 = vadd.f32 %v15710_v25, %v7376_v46 }
 0xa86   :  { %v6862_v26 = vpop.f32.mrb[26].mxu0 }
 0xa87   :  { %v7382_v59 = vadd.f32 %v15655_v28, %v7083_v49  ;;  %v10504_v37 = vadd.f32 %v6862_v26, %v4907_v4  ;;  %v6864_v20 = vpop.f32.mrb[27].mxu0  ;;  %v7802_v35 = vadd.f32 %v15760_v6, %v7584_v17 }
 0xa88   :  { %v18003_v20 = vld [vmem:[#allocation161_spill] sm:$0xff] }
 0xa89   :  { %v7093_v41 = vadd.f32 %v10504_v37, %v15607_v57  ;;  %v7591_v10 = vadd.f32 %v15708_v18, %v7382_v59  ;;  %v15901_v32 = vadd.f32 %v15826_v12, %v7802_v35  ;;  %v4927_v57 = vpop.permute.xlu0 %4926 }
 0xa8a   :  { %v6869_v53 = vpop.f32.mrb[28].mxu0 }
 0xa8b   :  { %v7388_v25 = vadd.f32 %v15664_v54, %v7093_v41  ;;  %v7810_v23 = vadd.f32 %v15758_v8, %v7591_v10  ;;  %v10505_v61 = vadd.f32 %v6869_v53, %v4912_v58  ;;  %v6871_v28 = vpop.f32.mrb[29].mxu0  ;;  %v18006_v53 = vld [vmem:[#allocation89_spill] sm:$0xff] }
 0xa8c   :  { %v18009_v28 = vld [vmem:[#allocation47_spill] sm:$0xff] }
 0xa8d   :  { %v15906_v39 = vadd.f32 %v15823_v24, %v7810_v23  ;;  %v7103_v6 = vadd.f32 %v10505_v61, %v15604_v31  ;;  %v7598_v62 = vadd.f32 %v15716_v34, %v7388_v25  ;;  %v15919_v46 = vpop.permute.xlu0 %4976  ;;  %v18007_v23 = vld [vmem:[#allocation61_spill] sm:$0xff] }
 0xa8e   :  { %v6876_v43 = vpop.f32.mrb[30].mxu0  ;;  %v18008_v61 = vld [vmem:[#allocation165_spill] sm:$0xff] }
 0xa8f   :  { %v7394_v18 = vadd.f32 %v15660_v15, %v7103_v6  ;;  %v10506_v12 = vadd.f32 %v6876_v43, %v4917_v51  ;;  %v6878_v45 = vpop.f32.mrb[31].mxu0  ;;  %v7818_v13 = vadd.f32 %v15766_v52, %v7598_v62 }
 0xa90   :  { %v18012_v45 = vld [vmem:[#allocation86_spill] sm:$0xff] }
 0xa91   :  { %v7113_v54 = vadd.f32 %v10506_v12, %v15611_v2  ;;  %v7605_v8 = vadd.f32 %v15713_v21, %v7394_v18  ;;  %v15915_v58 = vadd.f32 %v15834_v40, %v7818_v13  ;;  %v18011_v18 = vld [vmem:[#allocation8_spill] sm:$0xff] }
 0xa92   :  { %v6883_v24 = vpop.f32.mrb[32].mxu0 }
 0xa93   :  { %v7400_v31 = vadd.f32 %v15669_v48, %v7113_v54  ;;  %v7826_v34 = vadd.f32 %v15763_v56, %v7605_v8  ;;  %v10507_v63 = vadd.f32 %v6883_v24, %v4922_v9  ;;  %v6885_v22 = vpop.f32.mrb[33].mxu0  ;;  %v18013_v8 = vld [vmem:[#allocation59_spill] sm:$0xff] }
 0xa94   :  { %v18015_v22 = vld [vmem:[#allocation84_spill] sm:$0xff] }
 0xa95   :  { %v15922_v15 = vadd.f32 %v15831_v50, %v7826_v34  ;;  %v7123_v52 = vadd.f32 %v10507_v63, %v15609_v27  ;;  %v7612_v2 = vadd.f32 %v15720_v42, %v7400_v31  ;;  %v4932_v50 = vpop.permute.xlu0 %4931  ;;  %v18014_v31 = vld [vmem:[#allocation55_spill] sm:$0xff] }
 0xa96   :  { %v6890_v21 = vpop.f32.mrb[34].mxu0 }
 0xa97   :  { %v7406_v40 = vadd.f32 %v15667_v7, %v7123_v52  ;;  %v10508_v51 = vadd.f32 %v6890_v21, %v4927_v57  ;;  %v6892_v1 = vpop.f32.mrb[35].mxu0  ;;  %v7834_v48 = vadd.f32 %v15770_v38, %v7612_v2  ;;  %v18010_v57 = vld [vmem:[#allocation79_spill] sm:$0xff]  ;;  %v18016_v2 = vld [vmem:[#allocation17_spill] sm:$0xff] }
 0xa98   :  { %v18018_v1 = vld [vmem:[#allocation96_spill] sm:$0xff] }
 0xa99   :  { %v7133_v56 = vadd.f32 %v10508_v51, %v15617_v60  ;;  %v7619_v9 = vadd.f32 %v15718_v14, %v7406_v40  ;;  %v15931_v3 = vadd.f32 %v15839_v33, %v7834_v48  ;;  %v18001_v14 = vld [vmem:[#allocation83_spill] sm:$0xff]  ;;  %v18002_v33 = vld [vmem:[#allocation44_spill] sm:$0xff] }
 0xa9a   :  { %v6897_v47 = vpop.f32.mrb[36].mxu0  ;;  %v18017_v40 = vld [vmem:[#allocation80_spill] sm:$0xff] }
 0xa9b   :  { %v7412_v27 = vadd.f32 %v15676_v36, %v7133_v56  ;;  %v7842_v42 = vadd.f32 %v15768_v44, %v7619_v9  ;;  %v10509_v49 = vadd.f32 %v6897_v47, %v4932_v50  ;;  %v6899_v17 = vpop.f32.mrb[37].mxu0  ;;  %v18004_v36 = vld [vmem:[#allocation34_spill] sm:$0xff]  ;;  %v18005_v44 = vld [vmem:[#allocation41_spill] sm:$0xff]  ;;  %v18019_v9 = vld [vmem:[#allocation131_spill] sm:$0xff] }
 0xa9c   :  { %v18020_v47 = vld [vmem:[#allocation42_spill] sm:$0xff]  ;;  %v18021_v17 = vld [vmem:[#allocation36_spill] sm:$0xff] }
 0xa9d   :  { %v15936_v7 = vadd.f32 %v15837_v55, %v7842_v42  ;;  %v7143_v38 = vadd.f32 %v10509_v49, %v15614_v16  ;;  %v7626_v60 = vadd.f32 %v15726_v11, %v7412_v27 }
 0xa9e   :  { %v6904_v4 = vpop.f32.mrb[38].mxu0 }
 0xa9f   :  { %v7418_v26 = vadd.f32 %v18001_v14, %v7143_v38  ;;  %v10510_v59 = vadd.f32 %v6904_v4, %v18002_v33  ;;  %v6906_v37 = vpop.f32.mrb[39].mxu0  ;;  %v7850_v35 = vadd.f32 %v18003_v20, %v7626_v60  ;;  %v18022_v60 = vld [vmem:[#allocation6_spill] sm:$0xff]  ;;  %v18023_v14 = vld [vmem:[#allocation112_spill] sm:$0xff]  ;;  %v4957_v33 = vpop.permute.xlu1 %4956 }
 0xaa0   :  { %v18024_v37 = vld [vmem:[#allocation121_spill] sm:$0xff] }
 0xaa1   :  { %v7153_v41 = vadd.f32 %v10510_v59, %v18004_v36  ;;  %v7633_v10 = vadd.f32 %v18005_v44, %v7418_v26  ;;  %v15946_v25 = vadd.f32 %v18006_v53, %v7850_v35 }
 0xaa2   :  { %v6911_v55 = vpop.f32.mrb[40].mxu0 }
 0xaa3   :  { %v7424_v16 = vadd.f32 %v18007_v23, %v7153_v41  ;;  %v7858_v11 = vadd.f32 %v18008_v61, %v7633_v10  ;;  %v10511_v6 = vadd.f32 %v6911_v55, %v18009_v28  ;;  %v6913_v62 = vpop.f32.mrb[41].mxu0  ;;  %v18025_v41 = vld [vmem:[#allocation60_spill] sm:$0xff]  ;;  %v18026_v10 = vld [vmem:[#allocation25_spill] sm:$0xff]  ;;  %v18028_v23 = vld [vmem:[#allocation18_spill] sm:$0xff] }
 0xaa4   :  { %v18027_v55 = vld [vmem:[#allocation145_spill] sm:$0xff] }
 0xaa5   :  { %v15952_v43 = vadd.f32 %v18010_v57, %v7858_v11  ;;  %v7163_v12 = vadd.f32 %v10511_v6, %v18011_v18  ;;  %v7640_v13 = vadd.f32 %v18012_v45, %v7424_v16  ;;  %v18029_v11 = vld [vmem:[#allocation69_spill] sm:$0xff]  ;;  %v18030_v6 = vld [vmem:[#allocation92_spill] sm:$0xff]  ;;  %v18031_v57 = vld [vmem:[#allocation46_spill] sm:$0xff] }
 0xaa6   :  { %v6918_v54 = vpop.f32.mrb[42].mxu0  ;;  %v18032_v45 = vld [vmem:[#allocation99_spill] sm:$0xff] }
 0xaa7   :  { %v7430_v24 = vadd.f32 %v18013_v8, %v7163_v12  ;;  %v10512_v34 = vadd.f32 %v6918_v54, %v18014_v31  ;;  %v6920_v63 = vpop.f32.mrb[43].mxu0  ;;  %v7866_v52 = vadd.f32 %v18015_v22, %v7640_v13  ;;  %v18033_v54 = vld [vmem:[#allocation22_spill] sm:$0xff] }
 0xaa8   :  { %v18035_v63 = vld [vmem:[#allocation67_spill] sm:$0xff] }
 0xaa9   :  { %v7173_v21 = vadd.f32 %v10512_v34, %v18016_v2  ;;  %v7647_v51 = vadd.f32 %v18017_v40, %v7430_v24  ;;  %v15962_v48 = vadd.f32 %v18018_v1, %v7866_v52  ;;  %v18034_v24 = vld [vmem:[#allocation64_spill] sm:$0xff] }
 0xaaa   :  { %v6925_v56 = vpop.f32.mrb[44].mxu0 }
 0xaab   :  { %v7436_v50 = vadd.f32 %v18019_v9, %v7173_v21  ;;  %v7874_v27 = vadd.f32 %v18020_v47, %v7647_v51  ;;  %v10513_v42 = vadd.f32 %v6925_v56, %v15881_v5  ;;  %v6927_v49 = vpop.f32.mrb[45].mxu0  ;;  %v18036_v21 = vld [vmem:[#allocation138_spill] sm:$0xff]  ;;  %v18037_v51 = vld [vmem:[#allocation39_spill] sm:$0xff]  ;;  %v18038_v56 = vld [vmem:[#allocation120_spill] sm:$0xff] }
 0xaad   :  { %v15968_v38 = vadd.f32 %v18021_v17, %v7874_v27  ;;  %v7183_v4 = vadd.f32 %v10513_v42, %v18022_v60  ;;  %v7654_v26 = vadd.f32 %v18023_v14, %v7436_v50  ;;  %v18039_v50 = vld [vmem:[#allocation103_spill] sm:$0xff]  ;;  %v18041_v17 = vld [vmem:[#allocation53_spill] sm:$0xff] }
 0xaae   :  { %v6932_v59 = vpop.f32.mrb[46].mxu0  ;;  %v18040_v42 = vld [vmem:[#allocation15_spill] sm:$0xff] }
 0xaaf   :  { %v7442_v20 = vadd.f32 %v18024_v37, %v7183_v4  ;;  %v10514_v35 = vadd.f32 %v6932_v59, %v4957_v33  ;;  %v6934_v36 = vpop.f32.mrb[47].mxu0  ;;  %v7882_v44 = vadd.f32 %v18025_v41, %v7654_v26  ;;  %v18042_v26 = vld [vmem:[#allocation101_spill] sm:$0xff]  ;;  %v18043_v33 = vld [vmem:[#allocation32_spill] sm:$0xff]  ;;  %v18044_v37 = vld [vmem:[#allocation162_spill] sm:$0xff] }
 0xab0   :  { %v18045_v36 = vld [vmem:[#allocation133_spill] sm:$0xff] }
 0xab1   :  { %v7193_v53 = vadd.f32 %v10514_v35, %v18026_v10  ;;  %v7661_v5 = vadd.f32 %v18027_v55, %v7442_v20  ;;  %v15977_v16 = vadd.f32 %v18028_v23, %v7882_v44 }
 0xab2   :  { %v6939_v61 = vpop.f32.mrb[48].mxu0 }
 0xab3   :  { %v7448_v28 = vadd.f32 %v18029_v11, %v7193_v53  ;;  %v7890_v62 = vadd.f32 %v18030_v6, %v7661_v5  ;;  %v10515_v18 = vadd.f32 %v6939_v61, %v18031_v57  ;;  %v6941_v12 = vpop.f32.mrb[49].mxu0  ;;  %v18046_v53 = vld [vmem:[#allocation154_spill] sm:$0xff]  ;;  %v18048_v61 = vld [vmem:[#allocation151_spill] sm:$0xff]  ;;  %v18049_v11 = vld [vmem:[#allocation129_spill] sm:$0xff]  ;;  %v4982_v6 = vpop.permute.xlu0 %4981 }
 0xab4   :  { %v18047_v5 = vld [vmem:[#allocation54_spill] sm:$0xff]  ;;  %v18050_v57 = vld [vmem:[#allocation33_spill] sm:$0xff] }
 0xab5   :  { %v15983_v13 = vadd.f32 %v18032_v45, %v7890_v62  ;;  %v7203_v8 = vadd.f32 %v10515_v18, %v18033_v54  ;;  %v7668_v31 = vadd.f32 %v18034_v24, %v7448_v28  ;;  %v18051_v12 = vld [vmem:[#allocation149_spill] sm:$0xff]  ;;  %v18052_v24 = vld [vmem:[#allocation26_spill] sm:$0xff] }
 0xab6   :  { %v6946_v34 = vpop.f32.mrb[50].mxu0 }
 0xab7   :  { %v7454_v22 = vadd.f32 %v18035_v63, %v7203_v8  ;;  %v10516_v52 = vadd.f32 %v6946_v34, %v15875_v30  ;;  %v6948_v2 = vpop.f32.mrb[51].mxu0  ;;  %v7898_v40 = vadd.f32 %v18036_v21, %v7668_v31  ;;  %v18053_v31 = vld [vmem:[#allocation51_spill] sm:$0xff] }
 0xab8   :  { %v18054_v63 = vld [vmem:[#allocation75_spill] sm:$0xff]  ;;  %v18055_v2 = vld [vmem:[#allocation16_spill] sm:$0xff] }
 0xab9   :  { %v7213_v1 = vadd.f32 %v10516_v52, %v18037_v51  ;;  %v7675_v9 = vadd.f32 %v18038_v56, %v7454_v22  ;;  %v15993_v47 = vadd.f32 %v18039_v50, %v7898_v40  ;;  %v18057_v50 = vld [vmem:[#allocation70_spill] sm:$0xff] }
 0xaba   :  { %v6953_v27 = vpop.f32.mrb[52].mxu0 }
 0xabb   :  { %v7460_v49 = vadd.f32 %v18040_v42, %v7213_v1  ;;  %v7906_v60 = vadd.f32 %v18041_v17, %v7675_v9  ;;  %v10517_v4 = vadd.f32 %v6953_v27, %v15896_v0  ;;  %v6955_v14 = vpop.f32.mrb[53].mxu0  ;;  %v18056_v1 = vld [vmem:[#allocation164_spill] sm:$0xff] }
 0xabc   :  { %v18058_v42 = vld [vmem:[#allocation40_spill] sm:$0xff] }
 0xabd   :  { %v15999_v30 = vadd.f32 %v18042_v26, %v7906_v60  ;;  %v7223_v59 = vadd.f32 %v10517_v4, %v18043_v33  ;;  %v7682_v20 = vadd.f32 %v18044_v37, %v7460_v49  ;;  %v18059_v60 = vld [vmem:[#allocation160_spill] sm:$0xff] }
 0xabe   :  { %v6960_v35 = vpop.f32.mrb[54].mxu0 }
 0xabf   :  { %v7466_v41 = vadd.f32 %v18045_v36, %v7223_v59  ;;  %v10518_v44 = vadd.f32 %v6960_v35, %v15919_v46  ;;  %v6962_v10 = vpop.f32.mrb[55].mxu0  ;;  %v7914_v55 = vadd.f32 %v18046_v53, %v7682_v20  ;;  %v18060_v59 = vld [vmem:[#allocation11_spill] sm:$0xff] }
 0xac1   :  { %v7233_v23 = vadd.f32 %v10518_v44, %v18047_v5  ;;  %v7689_v0 = vadd.f32 %v18048_v61, %v7466_v41  ;;  %v16009_v28 = vadd.f32 %v18049_v11, %v7914_v55 }
 0xac2   :  { %v6967_v62 = vpop.f32.mrb[56].mxu0 }
 0xac3   :  { %v7472_v18 = vadd.f32 %v18050_v57, %v7233_v23  ;;  %v7922_v45 = vadd.f32 %v18051_v12, %v7689_v0  ;;  %v10519_v54 = vadd.f32 %v6967_v62, %v4982_v6  ;;  %v6969_v8 = vpop.f32.mrb[57].mxu0 }
 0xac5   :  { %v16014_v46 = vadd.f32 %v18052_v24, %v7922_v45  ;;  %v7243_v34 = vadd.f32 %v10519_v54, %v18053_v31  ;;  %v7696_v22 = vadd.f32 %v18054_v63, %v7472_v18 }
 0xac6   :  { %v9600_v52 = vpop.f32.mrb[58].mxu0 }
 0xac7   :  { %v7478_v21 = vadd.f32 %v18055_v2, %v7243_v34  ;;  %v8240_v40 = vadd.f32 %v9600_v52, %v15890_v29  ;;  %v8233_v51 = vpop.f32.mrb[59].mxu0  ;;  %v7930_v56 = vadd.f32 %v18056_v1, %v7696_v22 }
 0xac8   :  { %v8234_v9 = vadd.f32 %v8233_v51, %v15885_v19 }
 0xac9   :  { %v7703_v27 = vadd.f32 %v18057_v50, %v7478_v21  ;;  %v16024_v49 = vadd.f32 %v18058_v42, %v7930_v56  ;;  %v8372_v5 = vmul.f32 0.2, %v8240_v40  ;;  %vm8352_vm0 = vcmp.gt.f32.partialorder %v8240_v40, 0.0 }
 0xaca   :  { %v9603_v17 = vpop.f32.mrb[60].mxu0  ;;  %vm8351_vm1 = vcmp.gt.f32.partialorder %v8234_v9, 0.0 }
 0xacb   :  { %v7938_v4 = vadd.f32 %v18059_v60, %v7703_v27  ;;  %v8252_v14 = vadd.f32 %v9603_v17, %v15906_v39  ;;  %v8245_v26 = vpop.f32.mrb[61].mxu0 }
 0xacc   :  { %v8246_v33 = vadd.f32 %v8245_v26, %v15901_v32 }
 0xacd   :  { %v16030_v29 = vadd.f32 %v18060_v59, %v7938_v4  ;;  %vm8354_vm2 = vcmp.gt.f32.partialorder %v8252_v14, 0.0 }
 0xace   :  { %v9606_v37 = vpop.f32.mrb[62].mxu0  ;;  %vm8353_vm5 = vcmp.gt.f32.partialorder %v8246_v33, 0.0 }
 0xacf   :  { %v8264_v20 = vadd.f32 %v9606_v37, %v15922_v15  ;;  %v8257_v19 = vpop.f32.mrb[63].mxu0 }
 0xad0   :  { %v16034_v35 = vadd.f32 %v8257_v19, %v15915_v58 }
 0xad1   :  { %v8376_v34 = vmul.f32 0.2, %v8264_v20  ;;  %vm8356_vm8 = vcmp.gt.f32.partialorder %v8264_v20, 0.0 }
 0xad2   :  { %v9609_v36 = vpop.f32.mrb[64].mxu0  ;;  %vm8355_vm9 = vcmp.gt.f32.partialorder %v16034_v35, 0.0  ;;  %v8375_v2 = vmul.f32 0.2, %v16034_v35 }
 0xad3   :  { %v16037_v41 = vadd.f32 %v9609_v36, %v15936_v7  ;;  %v8269_v44 = vpop.f32.mrb[65].mxu0  ;;  %v8371_v7 = vmul.f32 0.2, %v8234_v9  ;;  %v8396_v50 = vsel %vm8356_vm8, %v8264_v20, %v8376_v34 }
 0xad4   :  { %v16040_v39 = vadd.f32 %v8269_v44, %v15931_v3  ;;  %v8374_v3 = vmul.f32 0.2, %v8252_v14  ;;  %v8395_v4 = vsel %vm8355_vm9, %v16034_v35, %v8375_v2 }
 0xad5   :  { %v8391_v18 = vsel %vm8351_vm1, %v8234_v9, %v8371_v7  ;;  %v8378_v1 = vmul.f32 0.2, %v16037_v41  ;;  %vm8358_vm12 = vcmp.gt.f32.partialorder %v16037_v41, 0.0 }
 0xad6   :  { %v9612_v10 = vpop.f32.mrb[66].mxu0  ;;  %v8394_v54 = vsel %vm8354_vm2, %v8252_v14, %v8374_v3  ;;  %vm8357_vm13 = vcmp.gt.f32.partialorder %v16040_v39, 0.0 }
 0xad7   :  { %v16043_v32 = vadd.f32 %v9612_v10, %v15952_v43  ;;  %v8281_v53 = vpop.f32.mrb[67].mxu0  ;;  %v8373_v43 = vmul.f32 0.2, %v8246_v33  ;;  %v8398_v20 = vsel %vm8358_vm12, %v16037_v41, %v8378_v1 }
 0xad8   :  { %v16046_v55 = vadd.f32 %v8281_v53, %v15946_v25  ;;  %v8392_v25 = vsel %vm8352_vm0, %v8240_v40, %v8372_v5 }
 0xad9   :  { %v8393_v31 = vsel %vm8353_vm5, %v8246_v33, %v8373_v43  ;;  %vm8360_vm0 = vcmp.gt.f32.partialorder %v16043_v32, 0.0  ;;  %v8380_v35 = vmul.f32 0.2, %v16043_v32 }
 0xada   :  { %v9615_v15 = vpop.f32.mrb[68].mxu0  ;;  %vm8359_vm1 = vcmp.gt.f32.partialorder %v16046_v55, 0.0 }
 0xadb   :  { %v8300_v58 = vadd.f32 %v9615_v15, %v15968_v38  ;;  %v8293_v23 = vpop.f32.mrb[69].mxu0 }
 0xadc   :  { %v8294_v61 = vadd.f32 %v8293_v23, %v15962_v48 }
 0xadd   :  { %vm8362_vm3 = vcmp.gt.f32.partialorder %v8300_v58, 0.0  ;;  %v8382_v0 = vmul.f32 0.2, %v8300_v58 }
 0xade   :  { %vm8361_vm4 = vcmp.gt.f32.partialorder %v8294_v61, 0.0  ;;  %v8381_v11 = vmul.f32 0.2, %v8294_v61  ;;  %v9618_v6 = vpop.f32.mrb[70].mxu0 }
 0xadf   :  { %v8402_v62 = vsel %vm8362_vm3, %v8300_v58, %v8382_v0  ;;  %v8312_v57 = vadd.f32 %v9618_v6, %v15983_v13  ;;  %v8305_v38 = vpop.f32.mrb[71].mxu0 }
 0xae0   :  { %v16052_v12 = vmax.f32 %v8392_v25, %v8402_v62  ;;  %v8401_v45 = vsel %vm8361_vm4, %v8294_v61, %v8381_v11  ;;  %v8306_v48 = vadd.f32 %v8305_v38, %v15977_v16  ;;  %v8471_v11 = vld [vmem:[%s16172_s9] sm:$0xff]  ;;  %vm8491_vm4 = vcmask 31744   ;;  %v8473_v38 = vld [vmem:[%s16172_s9 + $0x10] sm:$0xff] }
 0xae1   :  { %v16056_v8 = vmax.f32 %v8391_v18, %v8401_v45  ;;  %vm8364_vm6 = vcmp.gt.f32.partialorder %v8312_v57, 0.0  ;;  %v8384_v24 = vmul.f32 0.2, %v8312_v57 }
 0xae2   :  { %vm8363_vm7 = vcmp.gt.f32.partialorder %v8306_v48, 0.0  ;;  %v8383_v63 = vmul.f32 0.2, %v8306_v48  ;;  %v9621_v22 = vpop.f32.mrb[72].mxu0  ;;  %8433 = vrot.lane.b32.xlu0 %v16052_v12, %s11096_s21 }
 0xae3   :  { %v8404_v13 = vsel %vm8364_vm6, %v8312_v57, %v8384_v24  ;;  %v8324_v16 = vadd.f32 %v9621_v22, %v15999_v30  ;;  %v8317_v52 = vpop.f32.mrb[73].mxu0  ;;  %8431 = vrot.lane.b32.xlu1 %v16056_v8, %s11096_s21  ;;  %v8377_v30 = vmul.f32 0.2, %v16040_v39  ;;  %v8478_v22 = vld [vmem:[%s16172_s9 + $0x38] sm:$0xff]  ;;  %vm8548_vm6 = vcmask 1024  }
 0xae4   :  { %v16065_v21 = vmax.f32 %v8394_v54, %v8404_v13  ;;  %v8403_v40 = vsel %vm8363_vm7, %v8306_v48, %v8383_v63  ;;  %v8318_v51 = vadd.f32 %v8317_v52, %v15993_v47  ;;  %v8474_v52 = vld [vmem:[%s16172_s9 + $0x18] sm:$0xff] }
 0xae5   :  { %v16069_v56 = vmax.f32 %v8393_v31, %v8403_v40  ;;  %vm8366_vm10 = vcmp.gt.f32.partialorder %v8324_v16, 0.0  ;;  %v8386_v9 = vmul.f32 0.2, %v8324_v16 }
 0xae6   :  { %vm8365_vm11 = vcmp.gt.f32.partialorder %v8318_v51, 0.0  ;;  %v8385_v27 = vmul.f32 0.2, %v8318_v51  ;;  %v9624_v42 = vpop.f32.mrb[74].mxu0 }
 0xae7   :  { %v8406_v17 = vsel %vm8366_vm10, %v8324_v16, %v8386_v9  ;;  %v8336_v60 = vadd.f32 %v9624_v42, %v16014_v46  ;;  %v8329_v47 = vpop.f32.mrb[75].mxu0  ;;  %8435 = vrot.lane.b32.xlu1 %v16069_v56, %s11096_s21  ;;  %v8397_v46 = vsel %vm8357_vm13, %v16040_v39, %v8377_v30  ;;  %v8477_v9 = vld [vmem:[%s16172_s9 + $0x30] sm:$0xff] }
 0xae8   :  { %v16080_v14 = vmax.f32 %v8396_v50, %v8406_v17  ;;  %v8405_v26 = vsel %vm8365_vm11, %v8318_v51, %v8385_v27  ;;  %v8330_v33 = vadd.f32 %v8329_v47, %v16009_v28  ;;  %v8379_v28 = vmul.f32 0.2, %v16046_v55  ;;  %v8475_v27 = vld [vmem:[%s16172_s9 + $0x20] sm:$0xff] }
 0xae9   :  { %v16083_v59 = vmax.f32 %v8395_v4, %v8405_v26  ;;  %vm8368_vm14 = vcmp.gt.f32.partialorder %v8336_v60, 0.0  ;;  %v8388_v37 = vmul.f32 0.2, %v8336_v60 }
 0xaea   :  { %vm8367_vm15 = vcmp.gt.f32.partialorder %v8330_v33, 0.0  ;;  %v8387_v19 = vmul.f32 0.2, %v8330_v33  ;;  %v9627_v36 = vpop.f32.mrb[76].mxu0  ;;  %v8399_v61 = vsel %vm8359_vm1, %v16046_v55, %v8379_v28 }
 0xaeb   :  { %v8408_v44 = vsel %vm8368_vm14, %v8336_v60, %v8388_v37  ;;  %v8348_v10 = vadd.f32 %v9627_v36, %v16030_v29  ;;  %v8341_v53 = vpop.f32.mrb[77].mxu0  ;;  %8441 = vrot.lane.b32.xlu1 %v16080_v14, %s11096_s21  ;;  %v8400_v29 = vsel %vm8360_vm0, %v16043_v32, %v8380_v35  ;;  %v8472_v32 = vld [vmem:[%s16172_s9 + $0x8] sm:$0xff] }
 0xaec   :  { %v8418_v15 = vmax.f32 %v8398_v20, %v8408_v44  ;;  %v8407_v41 = vsel %vm8367_vm15, %v8330_v33, %v8387_v19  ;;  %v8342_v39 = vadd.f32 %v8341_v53, %v16024_v49 }
 0xaed   :  { %v8417_v5 = vmax.f32 %v8397_v46, %v8407_v41  ;;  %vm8370_vm2 = vcmp.gt.f32.partialorder %v8348_v10, 0.0  ;;  %v8390_v58 = vmul.f32 0.2, %v8348_v10 }
 0xaee   :  { %vm8369_vm3 = vcmp.gt.f32.partialorder %v8342_v39, 0.0  ;;  %v8389_v23 = vmul.f32 0.2, %v8342_v39  ;;  %8445 = vrot.lane.b32.xlu0 %v8418_v15, %s11096_s21 }
 0xaef   :  { %v8410_v7 = vsel %vm8370_vm2, %v8348_v10, %v8390_v58  ;;  %8437 = vrot.lane.b32.xlu1 %v16065_v21, %s11096_s21 }
 0xaf0   :  { %v16102_v49 = vmax.f32 %v8400_v29, %v8410_v7  ;;  %v8409_v3 = vsel %vm8369_vm3, %v8342_v39, %v8389_v23 }
 0xaf1   :  { %v8419_v0 = vmax.f32 %v8399_v61, %v8409_v3 }
 0xaf2   :  { %8443 = vrot.lane.b32.xlu0 %v8417_v5, %s11096_s21 }
 0xaf3   :  { %8439 = vrot.lane.b32.xlu1 %v16083_v59, %s11096_s21 }
 0xaf6   :  { %8447 = vrot.lane.b32.xlu0 %v8419_v0, %s11096_s21 }
 0xafa   :  { %8449 = vrot.lane.b32.xlu0 %v16102_v49, %s11096_s21 }
 0xb54   :  { %v8434_v43 = vpop.permute.xlu0 %8433 }
 0xb55   :  { %v8462_v55 = vmax.f32 %v16052_v12, %v8434_v43  ;;  %v8432_v6 = vpop.permute.xlu1 %8431 }
 0xb56   :  { %v8461_v25 = vmax.f32 %v16056_v8, %v8432_v6  ;;  %v8476_v8 = vld [vmem:[%s16172_s9 + $0x28] sm:$0xff] }
 0xb57   :  { %v8482_v62 = vmul.f32 %v8472_v32, %v8462_v55 }
 0xb58   :  { %v8481_v57 = vmul.f32 %v8471_v11, %v8461_v25 }
 0xb59   :  { %v8436_v18 = vpop.permute.xlu1 %8435  ;;  %v8495_v45 = vsel %vm8491_vm4, %v8482_v62, 0.0 }
 0xb5a   :  { %v8463_v48 = vmax.f32 %v16069_v56, %v8436_v18  ;;  %8496 = vadd.xlane.f32.xlu0 %v8495_v45  ;;  %v8492_v12 = vsel %vm8491_vm4, %v8481_v57, 0.0 }
 0xb5b   :  { %8493 = vadd.xlane.f32.xlu1 %v8492_v12 }
 0xb5c   :  { %v8483_v54 = vmul.f32 %v8473_v38, %v8463_v48  ;;  %v8542_v38 = vlaneseq }
 0xb5d   :  { %v8442_v24 = vpop.permute.xlu1 %8441 }
 0xb5e   :  { %v8466_v31 = vmax.f32 %v16080_v14, %v8442_v24  ;;  %v8498_v34 = vsel %vm8491_vm4, %v8483_v54, 0.0  ;;  %v8479_v14 = vld [vmem:[%s16172_s9 + $0x40] sm:$0xff]  ;;  %v8543_v12 = vshrl.u32 %v8542_v38, 7 }
 0xb5f   :  { %8499 = vadd.xlane.f32.xlu0 %v8498_v34  ;;  %v8546_v34 = vld [vmem:[%s16173_s10] sm:$0x3] }
 0xb60   :  { %v8486_v63 = vmul.f32 %v8476_v8, %v8466_v31  ;;  %v8446_v13 = vpop.permute.xlu0 %8445  ;;  %vm8544_vm5 = vcmp.eq.s32.totalorder %v8543_v12, 0 }
 0xb61   :  { %v8468_v16 = vmax.f32 %v8418_v15, %v8446_v13  ;;  %v8438_v2 = vpop.permute.xlu1 %8437 }
 0xb62   :  { %v8464_v40 = vmax.f32 %v16065_v21, %v8438_v2  ;;  %v8507_v51 = vsel %vm8491_vm4, %v8486_v63, 0.0 }
 0xb63   :  { %v8488_v1 = vmul.f32 %v8478_v22, %v8468_v16  ;;  %8508 = vadd.xlane.f32.xlu0 %v8507_v51 }
 0xb64   :  { %v8484_v56 = vmul.f32 %v8474_v52, %v8464_v40  ;;  %v8444_v50 = vpop.permute.xlu0 %8443 }
 0xb65   :  { %v8467_v30 = vmax.f32 %v8417_v5, %v8444_v50  ;;  %v8440_v42 = vpop.permute.xlu1 %8439  ;;  %v8513_v17 = vsel %vm8491_vm4, %v8488_v1, 0.0 }
 0xb66   :  { %v8465_v21 = vmax.f32 %v16083_v59, %v8440_v42  ;;  %8514 = vadd.xlane.f32.xlu1 %v8513_v17  ;;  %v8501_v60 = vsel %vm8491_vm4, %v8484_v56, 0.0  ;;  %v8480_v59 = vld [vmem:[%s16172_s9 + $0x48] sm:$0xff] }
 0xb67   :  { %v8487_v47 = vmul.f32 %v8477_v9, %v8467_v30  ;;  %8502 = vadd.xlane.f32.xlu0 %v8501_v60 }
 0xb68   :  { %v8485_v4 = vmul.f32 %v8475_v27, %v8465_v21  ;;  %v8448_v26 = vpop.permute.xlu0 %8447 }
 0xb69   :  { %v8469_v33 = vmax.f32 %v8419_v0, %v8448_v26  ;;  %v8510_v37 = vsel %vm8491_vm4, %v8487_v47, 0.0 }
 0xb6a   :  { %8511 = vadd.xlane.f32.xlu1 %v8510_v37  ;;  %v8504_v20 = vsel %vm8491_vm4, %v8485_v4, 0.0 }
 0xb6b   :  { %v8489_v46 = vmul.f32 %v8479_v14, %v8469_v33  ;;  %8505 = vadd.xlane.f32.xlu0 %v8504_v20 }
 0xb6c   :  { %v8450_v19 = vpop.permute.xlu0 %8449 }
 0xb6d   :  { %v8470_v36 = vmax.f32 %v16102_v49, %v8450_v19  ;;  %v8516_v35 = vsel %vm8491_vm4, %v8489_v46, 0.0 }
 0xb6e   :  { %8517 = vadd.xlane.f32.xlu1 %v8516_v35 }
 0xb6f   :  { %v8490_v44 = vmul.f32 %v8480_v59, %v8470_v36 }
 0xb71   :  { %v8519_v10 = vsel %vm8491_vm4, %v8490_v44, 0.0 }
 0xb72   :  { %8520 = vadd.xlane.f32.xlu1 %v8519_v10 }
 0xbe7   :  { %v8497_v53 = vpop.xlane.xlu0 %8496 }
 0xbe8   :  { %v8494_v15 = vpop.xlane.xlu1 %8493 }
 0xbe9   :  { %v8522_v39 = vadd.f32 %v8497_v53, %v8494_v15 }
 0xbec   :  { %v8500_v28 = vpop.xlane.xlu0 %8499 }
 0xbed   :  { %v8523_v23 = vadd.f32 %v8522_v39, %v8500_v28 }
 0xbf0   :  { %v8509_v41 = vpop.xlane.xlu0 %8508 }
 0xbf3   :  { %v8515_v5 = vpop.xlane.xlu1 %8514 }
 0xbf4   :  { %v8503_v58 = vpop.xlane.xlu0 %8502 }
 0xbf5   :  { %v8524_v29 = vadd.f32 %v8523_v23, %v8503_v58 }
 0xbf7   :  { %v8512_v7 = vpop.xlane.xlu1 %8511 }
 0xbf8   :  { %v8532_v61 = vadd.f32 %v8512_v7, %v8509_v41  ;;  %v8506_v3 = vpop.xlane.xlu0 %8505 }
 0xbf9   :  { %v8525_v49 = vadd.f32 %v8524_v29, %v8506_v3 }
 0xbfa   :  { %v8533_v0 = vadd.f32 %v8532_v61, %v8515_v5 }
 0xbfb   :  { %v8526_v32 = vrot.slane %v8525_v49, 4  ;;  %v8518_v43 = vpop.xlane.xlu1 %8517 }
 0xbfc   :  { %v8534_v11 = vadd.f32 %v8533_v0, %v8518_v43 }
 0xbfd   :  { %v8527_v55 = vadd.f32 %v8526_v32, %v8525_v49 }
 0xbff   :  { %v8521_v6 = vpop.xlane.xlu1 %8520  ;;  %v8528_v25 = vrot.slane %v8527_v55, 2 }
 0xc00   :  { %v8535_v62 = vadd.f32 %v8534_v11, %v8521_v6 }
 0xc01   :  { %v8529_v18 = vadd.f32 %v8528_v25, %v8527_v55 }
 0xc02   :  { %v8536_v57 = vrot.slane %v8535_v62, 4 }
 0xc03   :  { %v8530_v54 = vrot.slane %v8529_v18, 1 }
 0xc04   :  { %v8537_v45 = vadd.f32 %v8536_v57, %v8535_v62 }
 0xc05   :  { %v8531_v31 = vadd.f32 %v8530_v54, %v8529_v18 }
 0xc06   :  { %v8538_v48 = vrot.slane %v8537_v45, 2 }
 0xc08   :  { %v8539_v8 = vadd.f32 %v8538_v48, %v8537_v45 }
 0xc0a   :  { %v8540_v24 = vrot.slane %v8539_v8, 1 }
 0xc0c   :  { %v8541_v63 = vadd.f32 %v8540_v24, %v8539_v8 }
 0xc0e   :  { %v8545_v22 = vsel %vm8544_vm5, %v8531_v31, %v8541_v63 }
 0xc0f   :  { %v8547_v13 = vadd.f32 %v8546_v34, %v8545_v22 }
 0xc11   :  { %8549 = vst.msk [vmem:[%s16174_s11] sm:$0x3] %vm8548_vm6, %v8547_v13 }

</bundles_post_ra>
